<compile_context>
chip_gen: v7x
topology: tpu7x:2x2x1
jax: 0.10.0
libtpu: 0.0.40
codegen_flags: <defaults>
</compile_context>

<pallas_src>
import jax
import jax.numpy as jnp
from jax import lax
from jax.experimental import pallas as pl
from jax.experimental.pallas import tpu as pltpu

EPS = 1e-5      # PyTorch BatchNorm3d default
LANE = 128      # channel padding target (lane width)

_CPARAMS = pltpu.CompilerParams(
    dimension_semantics=("parallel", "parallel"),
    vmem_limit_bytes=48 * 1024 * 1024,   # stays inside v7x's 64 MiB physical VMEM
)


def _round_up(x, m):
    return (x + m - 1) // m * m


# ----------------------------- Pallas kernels ------------------------------

def _conv3x3_taps(x_refs, w_ref, h, w, cpo):
    """Accumulate the 27 shifted-tap matmuls of a 3x3x3 conv for one depth slice.

    x_refs: 3 refs (kd = 0,1,2), each (h+2, w+2, cpi) bf16 (padded plane).
    w_ref : (27, cpi, cpo) bf16, tap-major (kd, kh, kw).
    Returns an f32 accumulator of shape (h*w, cpo).
    """
    acc = jnp.zeros((h * w, cpo), jnp.float32)
    for kd in range(3):
        xr = x_refs[kd]
        for kh in range(3):
            for kw in range(3):
                patch = xr[kh:kh + h, kw:kw + w, :].reshape(h * w, -1)
                acc = acc + jnp.dot(patch, w_ref[kd * 9 + kh * 3 + kw],
                                    preferred_element_type=jnp.float32)
    return acc


def _stats(acc):
    # per-channel partial (sum, sum_sq) of this tile -> (2, cpo) f32
    s = jnp.sum(acc, axis=0, keepdims=True)
    q = jnp.sum(acc * acc, axis=0, keepdims=True)
    return jnp.concatenate([s, q], axis=0)


def _conv3x3_kernel(x0_ref, x1_ref, x2_ref, w_ref, z_ref, st_ref):
    h, w, cpo = z_ref.shape
    acc = _conv3x3_taps((x0_ref, x1_ref, x2_ref), w_ref, h, w, cpo)
    z_ref[...] = acc.reshape(h, w, cpo).astype(z_ref.dtype)
    st_ref[...] = _stats(acc)


def _conv3x3_ds_kernel(x0_ref, x1_ref, x2_ref, w_ref, wd_ref,
                       z_ref, zd_ref, st_ref, std_ref):
    h, w, cpo = z_ref.shape
    acc = _conv3x3_taps((x0_ref, x1_ref, x2_ref), w_ref, h, w, cpo)
    z_ref[...] = acc.reshape(h, w, cpo).astype(z_ref.dtype)
    st_ref[...] = _stats(acc)
    # 1x1-conv downsample reuses the already-resident center tap (kd=kh=kw=1).
    center = x1_ref[1:1 + h, 1:1 + w, :].reshape(h * w, -1)
    r = jnp.dot(center, wd_ref[...], preferred_element_type=jnp.float32)
    zd_ref[...] = r.reshape(h, w, cpo).astype(zd_ref.dtype)
    std_ref[...] = _stats(r)


def _bn_relu_kernel(z_ref, ss_ref, o_ref):
    # y = relu(z * scale + shift)  with folded BN (scale, shift) per channel.
    z = z_ref[...].astype(jnp.float32)
    scale = ss_ref[0:1, :].reshape(1, 1, -1)
    shift = ss_ref[1:2, :].reshape(1, 1, -1)
    o_ref[...] = jnp.maximum(z * scale + shift, 0.0).astype(o_ref.dtype)


def _bn_add_relu_kernel(z_ref, r_ref, ss_ref, ssr_ref, o_ref):
    # y = relu((z*scale2 + shift2) + (res*scale_r + shift_r))
    z = z_ref[...].astype(jnp.float32)
    r = r_ref[...].astype(jnp.float32)
    s2 = ss_ref[0:1, :].reshape(1, 1, -1)
    t2 = ss_ref[1:2, :].reshape(1, 1, -1)
    sr = ssr_ref[0:1, :].reshape(1, 1, -1)
    tr = ssr_ref[1:2, :].reshape(1, 1, -1)
    o_ref[...] = jnp.maximum(z * s2 + t2 + (r * sr + tr), 0.0).astype(o_ref.dtype)


# --------------------------- pallas_call builders ---------------------------

def _shifted_x_spec(hp2, wp2, cpi, off):
    def imap(ni, di):
        return (ni, di + off, 0, 0, 0)
    return pl.BlockSpec((None, None, hp2, wp2, cpi), imap)


def _slab_spec(h, w, c):
    return pl.BlockSpec((None, None, h, w, c), lambda ni, di: (ni, di, 0, 0, 0))


def _conv3x3(x_pad, w_taps, wd=None):
    """3x3x3 'same' conv via in-kernel tap accumulation + BN partial stats."""
    n, dp2, hp2, wp2, cpi = x_pad.shape
    d, h, w = dp2 - 2, hp2 - 2, wp2 - 2
    cpo = w_taps.shape[-1]

    in_specs = [_shifted_x_spec(hp2, wp2, cpi, 0),
                _shifted_x_spec(hp2, wp2, cpi, 1),
                _shifted_x_spec(hp2, wp2, cpi, 2),
                pl.BlockSpec((27, cpi, cpo), lambda ni, di: (0, 0, 0))]
    z_spec = _slab_spec(h, w, cpo)
    st_spec = pl.BlockSpec((None, None, 2, cpo), lambda ni, di: (ni, di, 0, 0))
    z_shape = jax.ShapeDtypeStruct((n, d, h, w, cpo), jnp.float32)
    st_shape = jax.ShapeDtypeStruct((n, d, 2, cpo), jnp.float32)

    if wd is None:
        return pl.pallas_call(
            _conv3x3_kernel,
            out_shape=(z_shape, st_shape),
            grid=(n, d),
            in_specs=in_specs,
            out_specs=(z_spec, st_spec),
            compiler_params=_CPARAMS,
        )(x_pad, x_pad, x_pad, w_taps)

    in_specs = in_specs + [pl.BlockSpec((cpi, cpo), lambda ni, di: (0, 0))]
    return pl.pallas_call(
        _conv3x3_ds_kernel,
        out_shape=(z_shape, z_shape, st_shape, st_shape),
        grid=(n, d),
        in_specs=in_specs,
        out_specs=(z_spec, z_spec, st_spec, st_spec),
        compiler_params=_CPARAMS,
    )(x_pad, x_pad, x_pad, w_taps, wd)


def _bn_relu(z, ss):
    n, d, h, w, cpo = z.shape
    return pl.pallas_call(
        _bn_relu_kernel,
        out_shape=jax.ShapeDtypeStruct((n, d, h, w, cpo), jnp.bfloat16),
        grid=(n, d),
        in_specs=[_slab_spec(h, w, cpo),
                  pl.BlockSpec((2, cpo), lambda ni, di: (0, 0))],
        out_specs=_slab_spec(h, w, cpo),
        compiler_params=_CPARAMS,
    )(z, ss)


def _bn_add_relu(z, res, ss, ssr):
    n, d, h, w, cpo = z.shape
    return pl.pallas_call(
        _bn_add_relu_kernel,
        out_shape=jax.ShapeDtypeStruct((n, d, h, w, cpo), jnp.float32),
        grid=(n, d),
        in_specs=[_slab_spec(h, w, cpo),
                  _slab_spec(h, w, cpo),
                  pl.BlockSpec((2, cpo), lambda ni, di: (0, 0)),
                  pl.BlockSpec((2, cpo), lambda ni, di: (0, 0))],
        out_specs=_slab_spec(h, w, cpo),
        compiler_params=_CPARAMS,
    )(z, res, ss, ssr)


# --------------------------- JAX glue / wrapper -----------------------------

def _pack_w3(w_oidhw, cpi, cpo):
    co, ci = w_oidhw.shape[0], w_oidhw.shape[1]
    wt = jnp.transpose(w_oidhw, (2, 3, 4, 1, 0)).reshape(27, ci, co)
    wt = jnp.pad(wt, ((0, 0), (0, cpi - ci), (0, cpo - co)))
    return wt.astype(jnp.bfloat16)


def _pack_w1(w_oi111, cpi, cpo):
    co, ci = w_oi111.shape[0], w_oi111.shape[1]
    wt = jnp.pad(w_oi111.reshape(co, ci).T, ((0, cpi - ci), (0, cpo - co)))
    return wt.astype(jnp.bfloat16)


def _fold_bn(partial_stats, gamma, beta, m, cpo):
    """(sum, sum_sq) per-tile partials -> folded per-channel (scale, shift), (2, cpo)."""
    tot = jnp.sum(partial_stats, axis=(0, 1))                 # (2, cpo)
    mean = tot[0] / m
    var = jnp.maximum(tot[1] / m - mean * mean, 0.0)          # biased var (train BN)
    g = jnp.pad(gamma.astype(jnp.float32), (0, cpo - gamma.shape[0]))
    b = jnp.pad(beta.astype(jnp.float32), (0, cpo - beta.shape[0]))
    scale = g * lax.rsqrt(var + EPS)
    shift = b - scale * mean
    return jnp.stack([scale, shift], axis=0)


def _pad_spatial(x):
    return jnp.pad(x, ((0, 0), (1, 1), (1, 1), (1, 1), (0, 0)))


@jax.jit
def resblock3d_forward(x_ncdhw, params):
    """Pallas ResBlock3D forward.  x: (N, Cin, D, H, W) -> (N, Cout, D, H, W)."""
    n, cin, d, h, w = x_ncdhw.shape
    cout = params["w1"].shape[0]
    cpi = _round_up(cin, LANE)
    cpo = _round_up(cout, LANE)
    m = n * d * h * w
    has_ds = "wd" in params

    x = jnp.transpose(x_ncdhw, (0, 2, 3, 4, 1)).astype(jnp.float32)     # NDHWC
    x_c = jnp.pad(x, ((0, 0), (0, 0), (0, 0), (0, 0), (0, cpi - cin)))   # lane-pad C
    x_pad = _pad_spatial(x_c).astype(jnp.bfloat16)

    w1 = _pack_w3(params["w1"], cpi, cpo)
    w2 = _pack_w3(params["w2"], cpo, cpo)

    # conv1 (+ fused 1x1 downsample conv) with in-kernel BN partial stats.
    # (conv biases deliberately omitted: they cancel exactly under train-mode BN)
    if has_ds:
        wd = _pack_w1(params["wd"], cpi, cpo)
        z1, zds, st1, std = _conv3x3(x_pad, w1, wd)
    else:
        z1, st1 = _conv3x3(x_pad, w1)

    ss1 = _fold_bn(st1, params["g1"], params["be1"], m, cpo)
    h1 = _bn_relu(z1, ss1)                                              # bf16

    # conv2 (+ stats).  The halo re-pad of h1 is a cheap wrapper-side jnp.pad.
    # TODO(synk): write h1 straight into a pre-padded buffer to drop this pad/copy.
    z2, st2 = _conv3x3(_pad_spatial(h1), w2)
    ss2 = _fold_bn(st2, params["g2"], params["be2"], m, cpo)

    if has_ds:
        ssr = _fold_bn(std, params["gd"], params["bed"], m, cpo)
        res = zds
    else:
        ssr = jnp.stack([jnp.ones((cpo,), jnp.float32),
                         jnp.zeros((cpo,), jnp.float32)], axis=0)
        res = x_c

    out = _bn_add_relu(z2, res, ss2, ssr)                               # (n,d,h,w,cpo)
    return jnp.transpose(out[..., :cout], (0, 4, 1, 2, 3))


# --------------------------- pure-JAX reference -----------------------------

def _conv3d_ref(x, wgt, b, pad):
    out = lax.conv_general_dilated(
        x, wgt, window_strides=(1, 1, 1), padding=((pad, pad),) * 3,
        dimension_numbers=("NCDHW", "OIDHW", "NCDHW"),
        precision=lax.Precision.HIGHEST)
    return out + b[None, :, None, None, None]


def _bn_ref(x, g, b):
    mean = jnp.mean(x, axis=(0, 2, 3, 4), keepdims=True)
    var = jnp.mean((x - mean) ** 2, axis=(0, 2, 3, 4), keepdims=True)
    return (g[None, :, None, None, None] * (x - mean) * lax.rsqrt(var + EPS)
            + b[None, :, None, None, None])


def resblock3d_ref(x, p):
    out = jnp.maximum(_bn_ref(_conv3d_ref(x, p["w1"], p["b1"], 1), p["g1"], p["be1"]), 0.0)
    out = _bn_ref(_conv3d_ref(out, p["w2"], p["b2"], 1), p["g2"], p["be2"])
    if "wd" in p:
        res = _bn_ref(_conv3d_ref(x, p["wd"], p["bd"], 0), p["gd"], p["bed"])
    else:
        res = x
    return jnp.maximum(out + res, 0.0)


# --------------------------------- main -------------------------------------

if __name__ == "__main__":
    key = jax.random.PRNGKey(0)

    def nrm(k, shape, scale=0.1):
        return scale * jax.random.normal(k, shape, dtype=jnp.float32)

    def make_params(k, cin, cout, with_ds):
        ks = jax.random.split(k, 12)
        p = {
            "w1": nrm(ks[0], (cout, cin, 3, 3, 3)),
            "b1": nrm(ks[1], (cout,)),
            "g1": 1.0 + nrm(ks[2], (cout,)),
            "be1": nrm(ks[3], (cout,)),
            "w2": nrm(ks[4], (cout, cout, 3, 3, 3)),
            "b2": nrm(ks[5], (cout,)),
            "g2": 1.0 + nrm(ks[6], (cout,)),
            "be2": nrm(ks[7], (cout,)),
        }
        if with_ds:
            p.update({
                "wd": nrm(ks[8], (cout, cin, 1, 1, 1)),
                "bd": nrm(ks[9], (cout,)),
                "gd": 1.0 + nrm(ks[10], (cout,)),
                "bed": nrm(ks[11], (cout,)),
            })
        return p

    N, D, H, W = 2, 8, 8, 8
    k1, k2, k3, k4 = jax.random.split(key, 4)

    # Case 1: in_channels != out_channels -> downsample (1x1 conv + BN) residual.
    p_ds = make_params(k1, 4, 8, with_ds=True)
    x_ds = jax.random.normal(k2, (N, 4, D, H, W), dtype=jnp.float32)
    out = jax.block_until_ready(resblock3d_forward(x_ds, p_ds))
    ref = jax.block_until_ready(resblock3d_ref(x_ds, p_ds))
    assert out.shape == (N, 8, D, H, W), out.shape
    err = float(jnp.max(jnp.abs(out - ref)))
    assert err < 5e-2, f"downsample path: max abs error too large: {err}"

    # Case 2: in_channels == out_channels -> identity residual.
    p_id = make_params(k3, 8, 8, with_ds=False)
    x_id = jax.random.normal(k4, (N, 8, D, H, W), dtype=jnp.float32)
    out2 = jax.block_until_ready(resblock3d_forward(x_id, p_id))
    ref2 = jax.block_until_ready(resblock3d_ref(x_id, p_id))
    assert out2.shape == (N, 8, D, H, W), out2.shape
    err2 = float(jnp.max(jnp.abs(out2 - ref2)))
    assert err2 < 5e-2, f"identity path: max abs error too large: {err2}"

    print("KERNEL_OK")
</pallas_src>

<mosaic_0001>
module attributes {stable_mosaic.version = 11 : i64} {
  func.func @_conv3x3_ds_kernel(%arg0: i32, %arg1: i32, %arg2: memref<1x1x10x10x128xbf16, #tpu.memory_space<vmem>>, %arg3: memref<1x1x10x10x128xbf16, #tpu.memory_space<vmem>>, %arg4: memref<1x1x10x10x128xbf16, #tpu.memory_space<vmem>>, %arg5: memref<27x128x128xbf16, #tpu.memory_space<vmem>>, %arg6: memref<128x128xbf16, #tpu.memory_space<vmem>>, %arg7: memref<1x1x8x8x128xf32, #tpu.memory_space<vmem>>, %arg8: memref<1x1x8x8x128xf32, #tpu.memory_space<vmem>>, %arg9: memref<1x1x2x128xf32, #tpu.memory_space<vmem>>, %arg10: memref<1x1x2x128xf32, #tpu.memory_space<vmem>>) attributes {dimension_semantics = [#tpu.dimension_semantics<parallel>, #tpu.dimension_semantics<parallel>], iteration_bounds = array<i64: 2, 8>, scalar_prefetch = 0 : i64, scratch_operands = 0 : i64, tpu.core_type = #tpu.core_type<tc>, window_params = [{transform_indices = @transform_0, window_bounds = array<i64: 1, 1, 10, 10, 128>}, {transform_indices = @transform_1, window_bounds = array<i64: 1, 1, 10, 10, 128>}, {transform_indices = @transform_2, window_bounds = array<i64: 1, 1, 10, 10, 128>}, {pipeline_mode = #tpu.pipeline_mode<synchronous>, transform_indices = @transform_3, window_bounds = array<i64: 27, 128, 128>}, {pipeline_mode = #tpu.pipeline_mode<synchronous>, transform_indices = @transform_4, window_bounds = array<i64: 128, 128>}, {transform_indices = @transform_5, window_bounds = array<i64: 1, 1, 8, 8, 128>}, {transform_indices = @transform_6, window_bounds = array<i64: 1, 1, 8, 8, 128>}, {transform_indices = @transform_7, window_bounds = array<i64: 1, 1, 2, 128>}, {transform_indices = @transform_8, window_bounds = array<i64: 1, 1, 2, 128>}]} {
    %cst = arith.constant 0.000000e+00 : f32
    %0 = vector.broadcast %cst : f32 to vector<64x128xf32>
    %c0 = arith.constant 0 : index
    %c0_0 = arith.constant 0 : index
    %c0_1 = arith.constant 0 : index
    %c0_2 = arith.constant 0 : index
    %c0_3 = arith.constant 0 : index
    %1 = vector.load %arg2[%c0, %c0_0, %c0_1, %c0_2, %c0_3] : memref<1x1x10x10x128xbf16, #tpu.memory_space<vmem>>, vector<1x1x8x8x128xbf16>
    %2 = vector.shape_cast %1 : vector<1x1x8x8x128xbf16> to vector<8x8x128xbf16>
    %3 = vector.shape_cast %2 : vector<8x8x128xbf16> to vector<64x128xbf16>
    %c0_4 = arith.constant 0 : index
    %c0_5 = arith.constant 0 : index
    %c0_6 = arith.constant 0 : index
    %4 = vector.load %arg5[%c0_4, %c0_5, %c0_6] : memref<27x128x128xbf16, #tpu.memory_space<vmem>>, vector<1x128x128xbf16>
    %5 = vector.shape_cast %4 : vector<1x128x128xbf16> to vector<128x128xbf16>
    %cst_7 = arith.constant dense<0.000000e+00> : vector<64x128xf32>
    %6 = tpu.matmul %3, %5, %cst_7 {dimension_numbers = #tpu.dot_dimension_numbers<[1], [0], [0], [1], [0, 0, 1, 1], [], []>} : vector<64x128xbf16>, vector<128x128xbf16>, vector<64x128xf32> -> vector<64x128xf32>
    %7 = arith.addf %0, %6 : vector<64x128xf32>
    %c0_8 = arith.constant 0 : index
    %c0_9 = arith.constant 0 : index
    %c0_10 = arith.constant 0 : index
    %c1 = arith.constant 1 : index
    %c0_11 = arith.constant 0 : index
    %8 = vector.load %arg2[%c0_8, %c0_9, %c0_10, %c1, %c0_11] : memref<1x1x10x10x128xbf16, #tpu.memory_space<vmem>>, vector<1x1x8x8x128xbf16>
    %9 = vector.shape_cast %8 : vector<1x1x8x8x128xbf16> to vector<8x8x128xbf16>
    %10 = vector.shape_cast %9 : vector<8x8x128xbf16> to vector<64x128xbf16>
    %c1_12 = arith.constant 1 : index
    %c0_13 = arith.constant 0 : index
    %c0_14 = arith.constant 0 : index
    %11 = vector.load %arg5[%c1_12, %c0_13, %c0_14] : memref<27x128x128xbf16, #tpu.memory_space<vmem>>, vector<1x128x128xbf16>
    %12 = vector.shape_cast %11 : vector<1x128x128xbf16> to vector<128x128xbf16>
    %cst_15 = arith.constant dense<0.000000e+00> : vector<64x128xf32>
    %13 = tpu.matmul %10, %12, %cst_15 {dimension_numbers = #tpu.dot_dimension_numbers<[1], [0], [0], [1], [0, 0, 1, 1], [], []>} : vector<64x128xbf16>, vector<128x128xbf16>, vector<64x128xf32> -> vector<64x128xf32>
    %14 = arith.addf %7, %13 : vector<64x128xf32>
    %c0_16 = arith.constant 0 : index
    %c0_17 = arith.constant 0 : index
    %c0_18 = arith.constant 0 : index
    %c2 = arith.constant 2 : index
    %c0_19 = arith.constant 0 : index
    %15 = vector.load %arg2[%c0_16, %c0_17, %c0_18, %c2, %c0_19] : memref<1x1x10x10x128xbf16, #tpu.memory_space<vmem>>, vector<1x1x8x8x128xbf16>
    %16 = vector.shape_cast %15 : vector<1x1x8x8x128xbf16> to vector<8x8x128xbf16>
    %17 = vector.shape_cast %16 : vector<8x8x128xbf16> to vector<64x128xbf16>
    %c2_20 = arith.constant 2 : index
    %c0_21 = arith.constant 0 : index
    %c0_22 = arith.constant 0 : index
    %18 = vector.load %arg5[%c2_20, %c0_21, %c0_22] : memref<27x128x128xbf16, #tpu.memory_space<vmem>>, vector<1x128x128xbf16>
    %19 = vector.shape_cast %18 : vector<1x128x128xbf16> to vector<128x128xbf16>
    %cst_23 = arith.constant dense<0.000000e+00> : vector<64x128xf32>
    %20 = tpu.matmul %17, %19, %cst_23 {dimension_numbers = #tpu.dot_dimension_numbers<[1], [0], [0], [1], [0, 0, 1, 1], [], []>} : vector<64x128xbf16>, vector<128x128xbf16>, vector<64x128xf32> -> vector<64x128xf32>
    %21 = arith.addf %14, %20 : vector<64x128xf32>
    %c0_24 = arith.constant 0 : index
    %c0_25 = arith.constant 0 : index
    %c1_26 = arith.constant 1 : index
    %c0_27 = arith.constant 0 : index
    %c0_28 = arith.constant 0 : index
    %22 = vector.load %arg2[%c0_24, %c0_25, %c1_26, %c0_27, %c0_28] : memref<1x1x10x10x128xbf16, #tpu.memory_space<vmem>>, vector<1x1x8x8x128xbf16>
    %23 = vector.shape_cast %22 : vector<1x1x8x8x128xbf16> to vector<8x8x128xbf16>
    %24 = vector.shape_cast %23 : vector<8x8x128xbf16> to vector<64x128xbf16>
    %c3 = arith.constant 3 : index
    %c0_29 = arith.constant 0 : index
    %c0_30 = arith.constant 0 : index
    %25 = vector.load %arg5[%c3, %c0_29, %c0_30] : memref<27x128x128xbf16, #tpu.memory_space<vmem>>, vector<1x128x128xbf16>
    %26 = vector.shape_cast %25 : vector<1x128x128xbf16> to vector<128x128xbf16>
    %cst_31 = arith.constant dense<0.000000e+00> : vector<64x128xf32>
    %27 = tpu.matmul %24, %26, %cst_31 {dimension_numbers = #tpu.dot_dimension_numbers<[1], [0], [0], [1], [0, 0, 1, 1], [], []>} : vector<64x128xbf16>, vector<128x128xbf16>, vector<64x128xf32> -> vector<64x128xf32>
    %28 = arith.addf %21, %27 : vector<64x128xf32>
    %c0_32 = arith.constant 0 : index
    %c0_33 = arith.constant 0 : index
    %c1_34 = arith.constant 1 : index
    %c1_35 = arith.constant 1 : index
    %c0_36 = arith.constant 0 : index
    %29 = vector.load %arg2[%c0_32, %c0_33, %c1_34, %c1_35, %c0_36] : memref<1x1x10x10x128xbf16, #tpu.memory_space<vmem>>, vector<1x1x8x8x128xbf16>
    %30 = vector.shape_cast %29 : vector<1x1x8x8x128xbf16> to vector<8x8x128xbf16>
    %31 = vector.shape_cast %30 : vector<8x8x128xbf16> to vector<64x128xbf16>
    %c4 = arith.constant 4 : index
    %c0_37 = arith.constant 0 : index
    %c0_38 = arith.constant 0 : index
    %32 = vector.load %arg5[%c4, %c0_37, %c0_38] : memref<27x128x128xbf16, #tpu.memory_space<vmem>>, vector<1x128x128xbf16>
    %33 = vector.shape_cast %32 : vector<1x128x128xbf16> to vector<128x128xbf16>
    %cst_39 = arith.constant dense<0.000000e+00> : vector<64x128xf32>
    %34 = tpu.matmul %31, %33, %cst_39 {dimension_numbers = #tpu.dot_dimension_numbers<[1], [0], [0], [1], [0, 0, 1, 1], [], []>} : vector<64x128xbf16>, vector<128x128xbf16>, vector<64x128xf32> -> vector<64x128xf32>
    %35 = arith.addf %28, %34 : vector<64x128xf32>
    %c0_40 = arith.constant 0 : index
    %c0_41 = arith.constant 0 : index
    %c1_42 = arith.constant 1 : index
    %c2_43 = arith.constant 2 : index
    %c0_44 = arith.constant 0 : index
    %36 = vector.load %arg2[%c0_40, %c0_41, %c1_42, %c2_43, %c0_44] : memref<1x1x10x10x128xbf16, #tpu.memory_space<vmem>>, vector<1x1x8x8x128xbf16>
    %37 = vector.shape_cast %36 : vector<1x1x8x8x128xbf16> to vector<8x8x128xbf16>
    %38 = vector.shape_cast %37 : vector<8x8x128xbf16> to vector<64x128xbf16>
    %c5 = arith.constant 5 : index
    %c0_45 = arith.constant 0 : index
    %c0_46 = arith.constant 0 : index
    %39 = vector.load %arg5[%c5, %c0_45, %c0_46] : memref<27x128x128xbf16, #tpu.memory_space<vmem>>, vector<1x128x128xbf16>
    %40 = vector.shape_cast %39 : vector<1x128x128xbf16> to vector<128x128xbf16>
    %cst_47 = arith.constant dense<0.000000e+00> : vector<64x128xf32>
    %41 = tpu.matmul %38, %40, %cst_47 {dimension_numbers = #tpu.dot_dimension_numbers<[1], [0], [0], [1], [0, 0, 1, 1], [], []>} : vector<64x128xbf16>, vector<128x128xbf16>, vector<64x128xf32> -> vector<64x128xf32>
    %42 = arith.addf %35, %41 : vector<64x128xf32>
    %c0_48 = arith.constant 0 : index
    %c0_49 = arith.constant 0 : index
    %c2_50 = arith.constant 2 : index
    %c0_51 = arith.constant 0 : index
    %c0_52 = arith.constant 0 : index
    %43 = vector.load %arg2[%c0_48, %c0_49, %c2_50, %c0_51, %c0_52] : memref<1x1x10x10x128xbf16, #tpu.memory_space<vmem>>, vector<1x1x8x8x128xbf16>
    %44 = vector.shape_cast %43 : vector<1x1x8x8x128xbf16> to vector<8x8x128xbf16>
    %45 = vector.shape_cast %44 : vector<8x8x128xbf16> to vector<64x128xbf16>
    %c6 = arith.constant 6 : index
    %c0_53 = arith.constant 0 : index
    %c0_54 = arith.constant 0 : index
    %46 = vector.load %arg5[%c6, %c0_53, %c0_54] : memref<27x128x128xbf16, #tpu.memory_space<vmem>>, vector<1x128x128xbf16>
    %47 = vector.shape_cast %46 : vector<1x128x128xbf16> to vector<128x128xbf16>
    %cst_55 = arith.constant dense<0.000000e+00> : vector<64x128xf32>
    %48 = tpu.matmul %45, %47, %cst_55 {dimension_numbers = #tpu.dot_dimension_numbers<[1], [0], [0], [1], [0, 0, 1, 1], [], []>} : vector<64x128xbf16>, vector<128x128xbf16>, vector<64x128xf32> -> vector<64x128xf32>
    %49 = arith.addf %42, %48 : vector<64x128xf32>
    %c0_56 = arith.constant 0 : index
    %c0_57 = arith.constant 0 : index
    %c2_58 = arith.constant 2 : index
    %c1_59 = arith.constant 1 : index
    %c0_60 = arith.constant 0 : index
    %50 = vector.load %arg2[%c0_56, %c0_57, %c2_58, %c1_59, %c0_60] : memref<1x1x10x10x128xbf16, #tpu.memory_space<vmem>>, vector<1x1x8x8x128xbf16>
    %51 = vector.shape_cast %50 : vector<1x1x8x8x128xbf16> to vector<8x8x128xbf16>
    %52 = vector.shape_cast %51 : vector<8x8x128xbf16> to vector<64x128xbf16>
    %c7 = arith.constant 7 : index
    %c0_61 = arith.constant 0 : index
    %c0_62 = arith.constant 0 : index
    %53 = vector.load %arg5[%c7, %c0_61, %c0_62] : memref<27x128x128xbf16, #tpu.memory_space<vmem>>, vector<1x128x128xbf16>
    %54 = vector.shape_cast %53 : vector<1x128x128xbf16> to vector<128x128xbf16>
    %cst_63 = arith.constant dense<0.000000e+00> : vector<64x128xf32>
    %55 = tpu.matmul %52, %54, %cst_63 {dimension_numbers = #tpu.dot_dimension_numbers<[1], [0], [0], [1], [0, 0, 1, 1], [], []>} : vector<64x128xbf16>, vector<128x128xbf16>, vector<64x128xf32> -> vector<64x128xf32>
    %56 = arith.addf %49, %55 : vector<64x128xf32>
    %c0_64 = arith.constant 0 : index
    %c0_65 = arith.constant 0 : index
    %c2_66 = arith.constant 2 : index
    %c2_67 = arith.constant 2 : index
    %c0_68 = arith.constant 0 : index
    %57 = vector.load %arg2[%c0_64, %c0_65, %c2_66, %c2_67, %c0_68] : memref<1x1x10x10x128xbf16, #tpu.memory_space<vmem>>, vector<1x1x8x8x128xbf16>
    %58 = vector.shape_cast %57 : vector<1x1x8x8x128xbf16> to vector<8x8x128xbf16>
    %59 = vector.shape_cast %58 : vector<8x8x128xbf16> to vector<64x128xbf16>
    %c8 = arith.constant 8 : index
    %c0_69 = arith.constant 0 : index
    %c0_70 = arith.constant 0 : index
    %60 = vector.load %arg5[%c8, %c0_69, %c0_70] : memref<27x128x128xbf16, #tpu.memory_space<vmem>>, vector<1x128x128xbf16>
    %61 = vector.shape_cast %60 : vector<1x128x128xbf16> to vector<128x128xbf16>
    %cst_71 = arith.constant dense<0.000000e+00> : vector<64x128xf32>
    %62 = tpu.matmul %59, %61, %cst_71 {dimension_numbers = #tpu.dot_dimension_numbers<[1], [0], [0], [1], [0, 0, 1, 1], [], []>} : vector<64x128xbf16>, vector<128x128xbf16>, vector<64x128xf32> -> vector<64x128xf32>
    %63 = arith.addf %56, %62 : vector<64x128xf32>
    %c0_72 = arith.constant 0 : index
    %c0_73 = arith.constant 0 : index
    %c0_74 = arith.constant 0 : index
    %c0_75 = arith.constant 0 : index
    %c0_76 = arith.constant 0 : index
    %64 = vector.load %arg3[%c0_72, %c0_73, %c0_74, %c0_75, %c0_76] : memref<1x1x10x10x128xbf16, #tpu.memory_space<vmem>>, vector<1x1x8x8x128xbf16>
    %65 = vector.shape_cast %64 : vector<1x1x8x8x128xbf16> to vector<8x8x128xbf16>
    %66 = vector.shape_cast %65 : vector<8x8x128xbf16> to vector<64x128xbf16>
    %c9 = arith.constant 9 : index
    %c0_77 = arith.constant 0 : index
    %c0_78 = arith.constant 0 : index
    %67 = vector.load %arg5[%c9, %c0_77, %c0_78] : memref<27x128x128xbf16, #tpu.memory_space<vmem>>, vector<1x128x128xbf16>
    %68 = vector.shape_cast %67 : vector<1x128x128xbf16> to vector<128x128xbf16>
    %cst_79 = arith.constant dense<0.000000e+00> : vector<64x128xf32>
    %69 = tpu.matmul %66, %68, %cst_79 {dimension_numbers = #tpu.dot_dimension_numbers<[1], [0], [0], [1], [0, 0, 1, 1], [], []>} : vector<64x128xbf16>, vector<128x128xbf16>, vector<64x128xf32> -> vector<64x128xf32>
    %70 = arith.addf %63, %69 : vector<64x128xf32>
    %c0_80 = arith.constant 0 : index
    %c0_81 = arith.constant 0 : index
    %c0_82 = arith.constant 0 : index
    %c1_83 = arith.constant 1 : index
    %c0_84 = arith.constant 0 : index
    %71 = vector.load %arg3[%c0_80, %c0_81, %c0_82, %c1_83, %c0_84] : memref<1x1x10x10x128xbf16, #tpu.memory_space<vmem>>, vector<1x1x8x8x128xbf16>
    %72 = vector.shape_cast %71 : vector<1x1x8x8x128xbf16> to vector<8x8x128xbf16>
    %73 = vector.shape_cast %72 : vector<8x8x128xbf16> to vector<64x128xbf16>
    %c10 = arith.constant 10 : index
    %c0_85 = arith.constant 0 : index
    %c0_86 = arith.constant 0 : index
    %74 = vector.load %arg5[%c10, %c0_85, %c0_86] : memref<27x128x128xbf16, #tpu.memory_space<vmem>>, vector<1x128x128xbf16>
    %75 = vector.shape_cast %74 : vector<1x128x128xbf16> to vector<128x128xbf16>
    %cst_87 = arith.constant dense<0.000000e+00> : vector<64x128xf32>
    %76 = tpu.matmul %73, %75, %cst_87 {dimension_numbers = #tpu.dot_dimension_numbers<[1], [0], [0], [1], [0, 0, 1, 1], [], []>} : vector<64x128xbf16>, vector<128x128xbf16>, vector<64x128xf32> -> vector<64x128xf32>
    %77 = arith.addf %70, %76 : vector<64x128xf32>
    %c0_88 = arith.constant 0 : index
    %c0_89 = arith.constant 0 : index
    %c0_90 = arith.constant 0 : index
    %c2_91 = arith.constant 2 : index
    %c0_92 = arith.constant 0 : index
    %78 = vector.load %arg3[%c0_88, %c0_89, %c0_90, %c2_91, %c0_92] : memref<1x1x10x10x128xbf16, #tpu.memory_space<vmem>>, vector<1x1x8x8x128xbf16>
    %79 = vector.shape_cast %78 : vector<1x1x8x8x128xbf16> to vector<8x8x128xbf16>
    %80 = vector.shape_cast %79 : vector<8x8x128xbf16> to vector<64x128xbf16>
    %c11 = arith.constant 11 : index
    %c0_93 = arith.constant 0 : index
    %c0_94 = arith.constant 0 : index
    %81 = vector.load %arg5[%c11, %c0_93, %c0_94] : memref<27x128x128xbf16, #tpu.memory_space<vmem>>, vector<1x128x128xbf16>
    %82 = vector.shape_cast %81 : vector<1x128x128xbf16> to vector<128x128xbf16>
    %cst_95 = arith.constant dense<0.000000e+00> : vector<64x128xf32>
    %83 = tpu.matmul %80, %82, %cst_95 {dimension_numbers = #tpu.dot_dimension_numbers<[1], [0], [0], [1], [0, 0, 1, 1], [], []>} : vector<64x128xbf16>, vector<128x128xbf16>, vector<64x128xf32> -> vector<64x128xf32>
    %84 = arith.addf %77, %83 : vector<64x128xf32>
    %c0_96 = arith.constant 0 : index
    %c0_97 = arith.constant 0 : index
    %c1_98 = arith.constant 1 : index
    %c0_99 = arith.constant 0 : index
    %c0_100 = arith.constant 0 : index
    %85 = vector.load %arg3[%c0_96, %c0_97, %c1_98, %c0_99, %c0_100] : memref<1x1x10x10x128xbf16, #tpu.memory_space<vmem>>, vector<1x1x8x8x128xbf16>
    %86 = vector.shape_cast %85 : vector<1x1x8x8x128xbf16> to vector<8x8x128xbf16>
    %87 = vector.shape_cast %86 : vector<8x8x128xbf16> to vector<64x128xbf16>
    %c12 = arith.constant 12 : index
    %c0_101 = arith.constant 0 : index
    %c0_102 = arith.constant 0 : index
    %88 = vector.load %arg5[%c12, %c0_101, %c0_102] : memref<27x128x128xbf16, #tpu.memory_space<vmem>>, vector<1x128x128xbf16>
    %89 = vector.shape_cast %88 : vector<1x128x128xbf16> to vector<128x128xbf16>
    %cst_103 = arith.constant dense<0.000000e+00> : vector<64x128xf32>
    %90 = tpu.matmul %87, %89, %cst_103 {dimension_numbers = #tpu.dot_dimension_numbers<[1], [0], [0], [1], [0, 0, 1, 1], [], []>} : vector<64x128xbf16>, vector<128x128xbf16>, vector<64x128xf32> -> vector<64x128xf32>
    %91 = arith.addf %84, %90 : vector<64x128xf32>
    %c0_104 = arith.constant 0 : index
    %c0_105 = arith.constant 0 : index
    %c1_106 = arith.constant 1 : index
    %c1_107 = arith.constant 1 : index
    %c0_108 = arith.constant 0 : index
    %92 = vector.load %arg3[%c0_104, %c0_105, %c1_106, %c1_107, %c0_108] : memref<1x1x10x10x128xbf16, #tpu.memory_space<vmem>>, vector<1x1x8x8x128xbf16>
    %93 = vector.shape_cast %92 : vector<1x1x8x8x128xbf16> to vector<8x8x128xbf16>
    %94 = vector.shape_cast %93 : vector<8x8x128xbf16> to vector<64x128xbf16>
    %c13 = arith.constant 13 : index
    %c0_109 = arith.constant 0 : index
    %c0_110 = arith.constant 0 : index
    %95 = vector.load %arg5[%c13, %c0_109, %c0_110] : memref<27x128x128xbf16, #tpu.memory_space<vmem>>, vector<1x128x128xbf16>
    %96 = vector.shape_cast %95 : vector<1x128x128xbf16> to vector<128x128xbf16>
    %cst_111 = arith.constant dense<0.000000e+00> : vector<64x128xf32>
    %97 = tpu.matmul %94, %96, %cst_111 {dimension_numbers = #tpu.dot_dimension_numbers<[1], [0], [0], [1], [0, 0, 1, 1], [], []>} : vector<64x128xbf16>, vector<128x128xbf16>, vector<64x128xf32> -> vector<64x128xf32>
    %98 = arith.addf %91, %97 : vector<64x128xf32>
    %c0_112 = arith.constant 0 : index
    %c0_113 = arith.constant 0 : index
    %c1_114 = arith.constant 1 : index
    %c2_115 = arith.constant 2 : index
    %c0_116 = arith.constant 0 : index
    %99 = vector.load %arg3[%c0_112, %c0_113, %c1_114, %c2_115, %c0_116] : memref<1x1x10x10x128xbf16, #tpu.memory_space<vmem>>, vector<1x1x8x8x128xbf16>
    %100 = vector.shape_cast %99 : vector<1x1x8x8x128xbf16> to vector<8x8x128xbf16>
    %101 = vector.shape_cast %100 : vector<8x8x128xbf16> to vector<64x128xbf16>
    %c14 = arith.constant 14 : index
    %c0_117 = arith.constant 0 : index
    %c0_118 = arith.constant 0 : index
    %102 = vector.load %arg5[%c14, %c0_117, %c0_118] : memref<27x128x128xbf16, #tpu.memory_space<vmem>>, vector<1x128x128xbf16>
    %103 = vector.shape_cast %102 : vector<1x128x128xbf16> to vector<128x128xbf16>
    %cst_119 = arith.constant dense<0.000000e+00> : vector<64x128xf32>
    %104 = tpu.matmul %101, %103, %cst_119 {dimension_numbers = #tpu.dot_dimension_numbers<[1], [0], [0], [1], [0, 0, 1, 1], [], []>} : vector<64x128xbf16>, vector<128x128xbf16>, vector<64x128xf32> -> vector<64x128xf32>
    %105 = arith.addf %98, %104 : vector<64x128xf32>
    %c0_120 = arith.constant 0 : index
    %c0_121 = arith.constant 0 : index
    %c2_122 = arith.constant 2 : index
    %c0_123 = arith.constant 0 : index
    %c0_124 = arith.constant 0 : index
    %106 = vector.load %arg3[%c0_120, %c0_121, %c2_122, %c0_123, %c0_124] : memref<1x1x10x10x128xbf16, #tpu.memory_space<vmem>>, vector<1x1x8x8x128xbf16>
    %107 = vector.shape_cast %106 : vector<1x1x8x8x128xbf16> to vector<8x8x128xbf16>
    %108 = vector.shape_cast %107 : vector<8x8x128xbf16> to vector<64x128xbf16>
    %c15 = arith.constant 15 : index
    %c0_125 = arith.constant 0 : index
    %c0_126 = arith.constant 0 : index
    %109 = vector.load %arg5[%c15, %c0_125, %c0_126] : memref<27x128x128xbf16, #tpu.memory_space<vmem>>, vector<1x128x128xbf16>
    %110 = vector.shape_cast %109 : vector<1x128x128xbf16> to vector<128x128xbf16>
    %cst_127 = arith.constant dense<0.000000e+00> : vector<64x128xf32>
    %111 = tpu.matmul %108, %110, %cst_127 {dimension_numbers = #tpu.dot_dimension_numbers<[1], [0], [0], [1], [0, 0, 1, 1], [], []>} : vector<64x128xbf16>, vector<128x128xbf16>, vector<64x128xf32> -> vector<64x128xf32>
    %112 = arith.addf %105, %111 : vector<64x128xf32>
    %c0_128 = arith.constant 0 : index
    %c0_129 = arith.constant 0 : index
    %c2_130 = arith.constant 2 : index
    %c1_131 = arith.constant 1 : index
    %c0_132 = arith.constant 0 : index
    %113 = vector.load %arg3[%c0_128, %c0_129, %c2_130, %c1_131, %c0_132] : memref<1x1x10x10x128xbf16, #tpu.memory_space<vmem>>, vector<1x1x8x8x128xbf16>
    %114 = vector.shape_cast %113 : vector<1x1x8x8x128xbf16> to vector<8x8x128xbf16>
    %115 = vector.shape_cast %114 : vector<8x8x128xbf16> to vector<64x128xbf16>
    %c16 = arith.constant 16 : index
    %c0_133 = arith.constant 0 : index
    %c0_134 = arith.constant 0 : index
    %116 = vector.load %arg5[%c16, %c0_133, %c0_134] : memref<27x128x128xbf16, #tpu.memory_space<vmem>>, vector<1x128x128xbf16>
    %117 = vector.shape_cast %116 : vector<1x128x128xbf16> to vector<128x128xbf16>
    %cst_135 = arith.constant dense<0.000000e+00> : vector<64x128xf32>
    %118 = tpu.matmul %115, %117, %cst_135 {dimension_numbers = #tpu.dot_dimension_numbers<[1], [0], [0], [1], [0, 0, 1, 1], [], []>} : vector<64x128xbf16>, vector<128x128xbf16>, vector<64x128xf32> -> vector<64x128xf32>
    %119 = arith.addf %112, %118 : vector<64x128xf32>
    %c0_136 = arith.constant 0 : index
    %c0_137 = arith.constant 0 : index
    %c2_138 = arith.constant 2 : index
    %c2_139 = arith.constant 2 : index
    %c0_140 = arith.constant 0 : index
    %120 = vector.load %arg3[%c0_136, %c0_137, %c2_138, %c2_139, %c0_140] : memref<1x1x10x10x128xbf16, #tpu.memory_space<vmem>>, vector<1x1x8x8x128xbf16>
    %121 = vector.shape_cast %120 : vector<1x1x8x8x128xbf16> to vector<8x8x128xbf16>
    %122 = vector.shape_cast %121 : vector<8x8x128xbf16> to vector<64x128xbf16>
    %c17 = arith.constant 17 : index
    %c0_141 = arith.constant 0 : index
    %c0_142 = arith.constant 0 : index
    %123 = vector.load %arg5[%c17, %c0_141, %c0_142] : memref<27x128x128xbf16, #tpu.memory_space<vmem>>, vector<1x128x128xbf16>
    %124 = vector.shape_cast %123 : vector<1x128x128xbf16> to vector<128x128xbf16>
    %cst_143 = arith.constant dense<0.000000e+00> : vector<64x128xf32>
    %125 = tpu.matmul %122, %124, %cst_143 {dimension_numbers = #tpu.dot_dimension_numbers<[1], [0], [0], [1], [0, 0, 1, 1], [], []>} : vector<64x128xbf16>, vector<128x128xbf16>, vector<64x128xf32> -> vector<64x128xf32>
    %126 = arith.addf %119, %125 : vector<64x128xf32>
    %c0_144 = arith.constant 0 : index
    %c0_145 = arith.constant 0 : index
    %c0_146 = arith.constant 0 : index
    %c0_147 = arith.constant 0 : index
    %c0_148 = arith.constant 0 : index
    %127 = vector.load %arg4[%c0_144, %c0_145, %c0_146, %c0_147, %c0_148] : memref<1x1x10x10x128xbf16, #tpu.memory_space<vmem>>, vector<1x1x8x8x128xbf16>
    %128 = vector.shape_cast %127 : vector<1x1x8x8x128xbf16> to vector<8x8x128xbf16>
    %129 = vector.shape_cast %128 : vector<8x8x128xbf16> to vector<64x128xbf16>
    %c18 = arith.constant 18 : index
    %c0_149 = arith.constant 0 : index
    %c0_150 = arith.constant 0 : index
    %130 = vector.load %arg5[%c18, %c0_149, %c0_150] : memref<27x128x128xbf16, #tpu.memory_space<vmem>>, vector<1x128x128xbf16>
    %131 = vector.shape_cast %130 : vector<1x128x128xbf16> to vector<128x128xbf16>
    %cst_151 = arith.constant dense<0.000000e+00> : vector<64x128xf32>
    %132 = tpu.matmul %129, %131, %cst_151 {dimension_numbers = #tpu.dot_dimension_numbers<[1], [0], [0], [1], [0, 0, 1, 1], [], []>} : vector<64x128xbf16>, vector<128x128xbf16>, vector<64x128xf32> -> vector<64x128xf32>
    %133 = arith.addf %126, %132 : vector<64x128xf32>
    %c0_152 = arith.constant 0 : index
    %c0_153 = arith.constant 0 : index
    %c0_154 = arith.constant 0 : index
    %c1_155 = arith.constant 1 : index
    %c0_156 = arith.constant 0 : index
    %134 = vector.load %arg4[%c0_152, %c0_153, %c0_154, %c1_155, %c0_156] : memref<1x1x10x10x128xbf16, #tpu.memory_space<vmem>>, vector<1x1x8x8x128xbf16>
    %135 = vector.shape_cast %134 : vector<1x1x8x8x128xbf16> to vector<8x8x128xbf16>
    %136 = vector.shape_cast %135 : vector<8x8x128xbf16> to vector<64x128xbf16>
    %c19 = arith.constant 19 : index
    %c0_157 = arith.constant 0 : index
    %c0_158 = arith.constant 0 : index
    %137 = vector.load %arg5[%c19, %c0_157, %c0_158] : memref<27x128x128xbf16, #tpu.memory_space<vmem>>, vector<1x128x128xbf16>
    %138 = vector.shape_cast %137 : vector<1x128x128xbf16> to vector<128x128xbf16>
    %cst_159 = arith.constant dense<0.000000e+00> : vector<64x128xf32>
    %139 = tpu.matmul %136, %138, %cst_159 {dimension_numbers = #tpu.dot_dimension_numbers<[1], [0], [0], [1], [0, 0, 1, 1], [], []>} : vector<64x128xbf16>, vector<128x128xbf16>, vector<64x128xf32> -> vector<64x128xf32>
    %140 = arith.addf %133, %139 : vector<64x128xf32>
    %c0_160 = arith.constant 0 : index
    %c0_161 = arith.constant 0 : index
    %c0_162 = arith.constant 0 : index
    %c2_163 = arith.constant 2 : index
    %c0_164 = arith.constant 0 : index
    %141 = vector.load %arg4[%c0_160, %c0_161, %c0_162, %c2_163, %c0_164] : memref<1x1x10x10x128xbf16, #tpu.memory_space<vmem>>, vector<1x1x8x8x128xbf16>
    %142 = vector.shape_cast %141 : vector<1x1x8x8x128xbf16> to vector<8x8x128xbf16>
    %143 = vector.shape_cast %142 : vector<8x8x128xbf16> to vector<64x128xbf16>
    %c20 = arith.constant 20 : index
    %c0_165 = arith.constant 0 : index
    %c0_166 = arith.constant 0 : index
    %144 = vector.load %arg5[%c20, %c0_165, %c0_166] : memref<27x128x128xbf16, #tpu.memory_space<vmem>>, vector<1x128x128xbf16>
    %145 = vector.shape_cast %144 : vector<1x128x128xbf16> to vector<128x128xbf16>
    %cst_167 = arith.constant dense<0.000000e+00> : vector<64x128xf32>
    %146 = tpu.matmul %143, %145, %cst_167 {dimension_numbers = #tpu.dot_dimension_numbers<[1], [0], [0], [1], [0, 0, 1, 1], [], []>} : vector<64x128xbf16>, vector<128x128xbf16>, vector<64x128xf32> -> vector<64x128xf32>
    %147 = arith.addf %140, %146 : vector<64x128xf32>
    %c0_168 = arith.constant 0 : index
    %c0_169 = arith.constant 0 : index
    %c1_170 = arith.constant 1 : index
    %c0_171 = arith.constant 0 : index
    %c0_172 = arith.constant 0 : index
    %148 = vector.load %arg4[%c0_168, %c0_169, %c1_170, %c0_171, %c0_172] : memref<1x1x10x10x128xbf16, #tpu.memory_space<vmem>>, vector<1x1x8x8x128xbf16>
    %149 = vector.shape_cast %148 : vector<1x1x8x8x128xbf16> to vector<8x8x128xbf16>
    %150 = vector.shape_cast %149 : vector<8x8x128xbf16> to vector<64x128xbf16>
    %c21 = arith.constant 21 : index
    %c0_173 = arith.constant 0 : index
    %c0_174 = arith.constant 0 : index
    %151 = vector.load %arg5[%c21, %c0_173, %c0_174] : memref<27x128x128xbf16, #tpu.memory_space<vmem>>, vector<1x128x128xbf16>
    %152 = vector.shape_cast %151 : vector<1x128x128xbf16> to vector<128x128xbf16>
    %cst_175 = arith.constant dense<0.000000e+00> : vector<64x128xf32>
    %153 = tpu.matmul %150, %152, %cst_175 {dimension_numbers = #tpu.dot_dimension_numbers<[1], [0], [0], [1], [0, 0, 1, 1], [], []>} : vector<64x128xbf16>, vector<128x128xbf16>, vector<64x128xf32> -> vector<64x128xf32>
    %154 = arith.addf %147, %153 : vector<64x128xf32>
    %c0_176 = arith.constant 0 : index
    %c0_177 = arith.constant 0 : index
    %c1_178 = arith.constant 1 : index
    %c1_179 = arith.constant 1 : index
    %c0_180 = arith.constant 0 : index
    %155 = vector.load %arg4[%c0_176, %c0_177, %c1_178, %c1_179, %c0_180] : memref<1x1x10x10x128xbf16, #tpu.memory_space<vmem>>, vector<1x1x8x8x128xbf16>
    %156 = vector.shape_cast %155 : vector<1x1x8x8x128xbf16> to vector<8x8x128xbf16>
    %157 = vector.shape_cast %156 : vector<8x8x128xbf16> to vector<64x128xbf16>
    %c22 = arith.constant 22 : index
    %c0_181 = arith.constant 0 : index
    %c0_182 = arith.constant 0 : index
    %158 = vector.load %arg5[%c22, %c0_181, %c0_182] : memref<27x128x128xbf16, #tpu.memory_space<vmem>>, vector<1x128x128xbf16>
    %159 = vector.shape_cast %158 : vector<1x128x128xbf16> to vector<128x128xbf16>
    %cst_183 = arith.constant dense<0.000000e+00> : vector<64x128xf32>
    %160 = tpu.matmul %157, %159, %cst_183 {dimension_numbers = #tpu.dot_dimension_numbers<[1], [0], [0], [1], [0, 0, 1, 1], [], []>} : vector<64x128xbf16>, vector<128x128xbf16>, vector<64x128xf32> -> vector<64x128xf32>
    %161 = arith.addf %154, %160 : vector<64x128xf32>
    %c0_184 = arith.constant 0 : index
    %c0_185 = arith.constant 0 : index
    %c1_186 = arith.constant 1 : index
    %c2_187 = arith.constant 2 : index
    %c0_188 = arith.constant 0 : index
    %162 = vector.load %arg4[%c0_184, %c0_185, %c1_186, %c2_187, %c0_188] : memref<1x1x10x10x128xbf16, #tpu.memory_space<vmem>>, vector<1x1x8x8x128xbf16>
    %163 = vector.shape_cast %162 : vector<1x1x8x8x128xbf16> to vector<8x8x128xbf16>
    %164 = vector.shape_cast %163 : vector<8x8x128xbf16> to vector<64x128xbf16>
    %c23 = arith.constant 23 : index
    %c0_189 = arith.constant 0 : index
    %c0_190 = arith.constant 0 : index
    %165 = vector.load %arg5[%c23, %c0_189, %c0_190] : memref<27x128x128xbf16, #tpu.memory_space<vmem>>, vector<1x128x128xbf16>
    %166 = vector.shape_cast %165 : vector<1x128x128xbf16> to vector<128x128xbf16>
    %cst_191 = arith.constant dense<0.000000e+00> : vector<64x128xf32>
    %167 = tpu.matmul %164, %166, %cst_191 {dimension_numbers = #tpu.dot_dimension_numbers<[1], [0], [0], [1], [0, 0, 1, 1], [], []>} : vector<64x128xbf16>, vector<128x128xbf16>, vector<64x128xf32> -> vector<64x128xf32>
    %168 = arith.addf %161, %167 : vector<64x128xf32>
    %c0_192 = arith.constant 0 : index
    %c0_193 = arith.constant 0 : index
    %c2_194 = arith.constant 2 : index
    %c0_195 = arith.constant 0 : index
    %c0_196 = arith.constant 0 : index
    %169 = vector.load %arg4[%c0_192, %c0_193, %c2_194, %c0_195, %c0_196] : memref<1x1x10x10x128xbf16, #tpu.memory_space<vmem>>, vector<1x1x8x8x128xbf16>
    %170 = vector.shape_cast %169 : vector<1x1x8x8x128xbf16> to vector<8x8x128xbf16>
    %171 = vector.shape_cast %170 : vector<8x8x128xbf16> to vector<64x128xbf16>
    %c24 = arith.constant 24 : index
    %c0_197 = arith.constant 0 : index
    %c0_198 = arith.constant 0 : index
    %172 = vector.load %arg5[%c24, %c0_197, %c0_198] : memref<27x128x128xbf16, #tpu.memory_space<vmem>>, vector<1x128x128xbf16>
    %173 = vector.shape_cast %172 : vector<1x128x128xbf16> to vector<128x128xbf16>
    %cst_199 = arith.constant dense<0.000000e+00> : vector<64x128xf32>
    %174 = tpu.matmul %171, %173, %cst_199 {dimension_numbers = #tpu.dot_dimension_numbers<[1], [0], [0], [1], [0, 0, 1, 1], [], []>} : vector<64x128xbf16>, vector<128x128xbf16>, vector<64x128xf32> -> vector<64x128xf32>
    %175 = arith.addf %168, %174 : vector<64x128xf32>
    %c0_200 = arith.constant 0 : index
    %c0_201 = arith.constant 0 : index
    %c2_202 = arith.constant 2 : index
    %c1_203 = arith.constant 1 : index
    %c0_204 = arith.constant 0 : index
    %176 = vector.load %arg4[%c0_200, %c0_201, %c2_202, %c1_203, %c0_204] : memref<1x1x10x10x128xbf16, #tpu.memory_space<vmem>>, vector<1x1x8x8x128xbf16>
    %177 = vector.shape_cast %176 : vector<1x1x8x8x128xbf16> to vector<8x8x128xbf16>
    %178 = vector.shape_cast %177 : vector<8x8x128xbf16> to vector<64x128xbf16>
    %c25 = arith.constant 25 : index
    %c0_205 = arith.constant 0 : index
    %c0_206 = arith.constant 0 : index
    %179 = vector.load %arg5[%c25, %c0_205, %c0_206] : memref<27x128x128xbf16, #tpu.memory_space<vmem>>, vector<1x128x128xbf16>
    %180 = vector.shape_cast %179 : vector<1x128x128xbf16> to vector<128x128xbf16>
    %cst_207 = arith.constant dense<0.000000e+00> : vector<64x128xf32>
    %181 = tpu.matmul %178, %180, %cst_207 {dimension_numbers = #tpu.dot_dimension_numbers<[1], [0], [0], [1], [0, 0, 1, 1], [], []>} : vector<64x128xbf16>, vector<128x128xbf16>, vector<64x128xf32> -> vector<64x128xf32>
    %182 = arith.addf %175, %181 : vector<64x128xf32>
    %c0_208 = arith.constant 0 : index
    %c0_209 = arith.constant 0 : index
    %c2_210 = arith.constant 2 : index
    %c2_211 = arith.constant 2 : index
    %c0_212 = arith.constant 0 : index
    %183 = vector.load %arg4[%c0_208, %c0_209, %c2_210, %c2_211, %c0_212] : memref<1x1x10x10x128xbf16, #tpu.memory_space<vmem>>, vector<1x1x8x8x128xbf16>
    %184 = vector.shape_cast %183 : vector<1x1x8x8x128xbf16> to vector<8x8x128xbf16>
    %185 = vector.shape_cast %184 : vector<8x8x128xbf16> to vector<64x128xbf16>
    %c26 = arith.constant 26 : index
    %c0_213 = arith.constant 0 : index
    %c0_214 = arith.constant 0 : index
    %186 = vector.load %arg5[%c26, %c0_213, %c0_214] : memref<27x128x128xbf16, #tpu.memory_space<vmem>>, vector<1x128x128xbf16>
    %187 = vector.shape_cast %186 : vector<1x128x128xbf16> to vector<128x128xbf16>
    %cst_215 = arith.constant dense<0.000000e+00> : vector<64x128xf32>
    %188 = tpu.matmul %185, %187, %cst_215 {dimension_numbers = #tpu.dot_dimension_numbers<[1], [0], [0], [1], [0, 0, 1, 1], [], []>} : vector<64x128xbf16>, vector<128x128xbf16>, vector<64x128xf32> -> vector<64x128xf32>
    %189 = arith.addf %182, %188 : vector<64x128xf32>
    %190 = vector.shape_cast %189 : vector<64x128xf32> to vector<8x8x128xf32>
    %c0_216 = arith.constant 0 : index
    %c0_217 = arith.constant 0 : index
    %c0_218 = arith.constant 0 : index
    %c0_219 = arith.constant 0 : index
    %c0_220 = arith.constant 0 : index
    %191 = vector.load %arg7[%c0_216, %c0_217, %c0_218, %c0_219, %c0_220] : memref<1x1x8x8x128xf32, #tpu.memory_space<vmem>>, vector<1x1x8x8x128xf32>
    %192 = vector.shape_cast %191 : vector<1x1x8x8x128xf32> to vector<8x8x128xf32>
    %193 = vector.shape_cast %190 : vector<8x8x128xf32> to vector<1x1x8x8x128xf32>
    tpu.vector_store %arg7[%c0_216, %c0_217, %c0_218, %c0_219, %c0_220], %193 {strides = array<i32>} : memref<1x1x8x8x128xf32, #tpu.memory_space<vmem>>, vector<1x1x8x8x128xf32>,
    %cst_221 = arith.constant dense<0.000000e+00> : vector<128xf32>
    %194 = vector.multi_reduction <add>, %189, %cst_221 [0] : vector<64x128xf32> to vector<128xf32>
    %195 = vector.shape_cast %194 : vector<128xf32> to vector<1x128xf32>
    %196 = arith.mulf %189, %189 : vector<64x128xf32>
    %cst_222 = arith.constant dense<0.000000e+00> : vector<128xf32>
    %197 = vector.multi_reduction <add>, %196, %cst_222 [0] : vector<64x128xf32> to vector<128xf32>
    %198 = vector.shape_cast %197 : vector<128xf32> to vector<1x128xf32>
    %199 = tpu.concatenate %195, %198 in 0 : vector<1x128xf32>, vector<1x128xf32> -> vector<2x128xf32>
    %c0_223 = arith.constant 0 : index
    %c0_224 = arith.constant 0 : index
    %c0_225 = arith.constant 0 : index
    %c0_226 = arith.constant 0 : index
    %200 = vector.load %arg9[%c0_223, %c0_224, %c0_225, %c0_226] : memref<1x1x2x128xf32, #tpu.memory_space<vmem>>, vector<1x1x2x128xf32>
    %201 = vector.shape_cast %200 : vector<1x1x2x128xf32> to vector<2x128xf32>
    %202 = vector.shape_cast %199 : vector<2x128xf32> to vector<1x1x2x128xf32>
    tpu.vector_store %arg9[%c0_223, %c0_224, %c0_225, %c0_226], %202 {strides = array<i32>} : memref<1x1x2x128xf32, #tpu.memory_space<vmem>>, vector<1x1x2x128xf32>,
    %c0_227 = arith.constant 0 : index
    %c0_228 = arith.constant 0 : index
    %c1_229 = arith.constant 1 : index
    %c1_230 = arith.constant 1 : index
    %c0_231 = arith.constant 0 : index
    %203 = vector.load %arg3[%c0_227, %c0_228, %c1_229, %c1_230, %c0_231] : memref<1x1x10x10x128xbf16, #tpu.memory_space<vmem>>, vector<1x1x8x8x128xbf16>
    %204 = vector.shape_cast %203 : vector<1x1x8x8x128xbf16> to vector<8x8x128xbf16>
    %205 = vector.shape_cast %204 : vector<8x8x128xbf16> to vector<64x128xbf16>
    %c0_232 = arith.constant 0 : index
    %c0_233 = arith.constant 0 : index
    %206 = vector.load %arg6[%c0_232, %c0_233] : memref<128x128xbf16, #tpu.memory_space<vmem>>, vector<128x128xbf16>
    %cst_234 = arith.constant dense<0.000000e+00> : vector<64x128xf32>
    %207 = tpu.matmul %205, %206, %cst_234 {dimension_numbers = #tpu.dot_dimension_numbers<[1], [0], [0], [1], [0, 0, 1, 1], [], []>} : vector<64x128xbf16>, vector<128x128xbf16>, vector<64x128xf32> -> vector<64x128xf32>
    %208 = vector.shape_cast %207 : vector<64x128xf32> to vector<8x8x128xf32>
    %c0_235 = arith.constant 0 : index
    %c0_236 = arith.constant 0 : index
    %c0_237 = arith.constant 0 : index
    %c0_238 = arith.constant 0 : index
    %c0_239 = arith.constant 0 : index
    %209 = vector.load %arg8[%c0_235, %c0_236, %c0_237, %c0_238, %c0_239] : memref<1x1x8x8x128xf32, #tpu.memory_space<vmem>>, vector<1x1x8x8x128xf32>
    %210 = vector.shape_cast %209 : vector<1x1x8x8x128xf32> to vector<8x8x128xf32>
    %211 = vector.shape_cast %208 : vector<8x8x128xf32> to vector<1x1x8x8x128xf32>
    tpu.vector_store %arg8[%c0_235, %c0_236, %c0_237, %c0_238, %c0_239], %211 {strides = array<i32>} : memref<1x1x8x8x128xf32, #tpu.memory_space<vmem>>, vector<1x1x8x8x128xf32>,
    %cst_240 = arith.constant dense<0.000000e+00> : vector<128xf32>
    %212 = vector.multi_reduction <add>, %207, %cst_240 [0] : vector<64x128xf32> to vector<128xf32>
    %213 = vector.shape_cast %212 : vector<128xf32> to vector<1x128xf32>
    %214 = arith.mulf %207, %207 : vector<64x128xf32>
    %cst_241 = arith.constant dense<0.000000e+00> : vector<128xf32>
    %215 = vector.multi_reduction <add>, %214, %cst_241 [0] : vector<64x128xf32> to vector<128xf32>
    %216 = vector.shape_cast %215 : vector<128xf32> to vector<1x128xf32>
    %217 = tpu.concatenate %213, %216 in 0 : vector<1x128xf32>, vector<1x128xf32> -> vector<2x128xf32>
    %c0_242 = arith.constant 0 : index
    %c0_243 = arith.constant 0 : index
    %c0_244 = arith.constant 0 : index
    %c0_245 = arith.constant 0 : index
    %218 = vector.load %arg10[%c0_242, %c0_243, %c0_244, %c0_245] : memref<1x1x2x128xf32, #tpu.memory_space<vmem>>, vector<1x1x2x128xf32>
    %219 = vector.shape_cast %218 : vector<1x1x2x128xf32> to vector<2x128xf32>
    %220 = vector.shape_cast %217 : vector<2x128xf32> to vector<1x1x2x128xf32>
    tpu.vector_store %arg10[%c0_242, %c0_243, %c0_244, %c0_245], %220 {strides = array<i32>} : memref<1x1x2x128xf32, #tpu.memory_space<vmem>>, vector<1x1x2x128xf32>,
    return
  }
  func.func @transform_0(%arg0: i32, %arg1: i32) -> (i32, i32, i32, i32, i32) {
    %c0_i32 = arith.constant 0 : i32
    %0 = arith.addi %arg1, %c0_i32 : i32
    %c0_i32_0 = arith.constant 0 : i32
    %c0_i32_1 = arith.constant 0 : i32
    %c0_i32_2 = arith.constant 0 : i32
    %c0_i32_3 = arith.constant 0 : i32
    return %arg0, %0, %c0_i32_0, %c0_i32_1, %c0_i32_2 : i32, i32, i32, i32, i32
  }
  func.func @transform_1(%arg0: i32, %arg1: i32) -> (i32, i32, i32, i32, i32) {
    %c1_i32 = arith.constant 1 : i32
    %0 = arith.addi %arg1, %c1_i32 : i32
    %c0_i32 = arith.constant 0 : i32
    %c0_i32_0 = arith.constant 0 : i32
    %c0_i32_1 = arith.constant 0 : i32
    %c0_i32_2 = arith.constant 0 : i32
    return %arg0, %0, %c0_i32, %c0_i32_0, %c0_i32_1 : i32, i32, i32, i32, i32
  }
  func.func @transform_2(%arg0: i32, %arg1: i32) -> (i32, i32, i32, i32, i32) {
    %c2_i32 = arith.constant 2 : i32
    %0 = arith.addi %arg1, %c2_i32 : i32
    %c0_i32 = arith.constant 0 : i32
    %c0_i32_0 = arith.constant 0 : i32
    %c0_i32_1 = arith.constant 0 : i32
    %c0_i32_2 = arith.constant 0 : i32
    return %arg0, %0, %c0_i32, %c0_i32_0, %c0_i32_1 : i32, i32, i32, i32, i32
  }
  func.func @transform_3(%arg0: i32, %arg1: i32) -> (i32, i32, i32) {
    %c0_i32 = arith.constant 0 : i32
    %c0_i32_0 = arith.constant 0 : i32
    %c0_i32_1 = arith.constant 0 : i32
    %c0_i32_2 = arith.constant 0 : i32
    return %c0_i32, %c0_i32_0, %c0_i32_1 : i32, i32, i32
  }
  func.func @transform_4(%arg0: i32, %arg1: i32) -> (i32, i32) {
    %c0_i32 = arith.constant 0 : i32
    %c0_i32_0 = arith.constant 0 : i32
    %c0_i32_1 = arith.constant 0 : i32
    return %c0_i32, %c0_i32_0 : i32, i32
  }
  func.func @transform_5(%arg0: i32, %arg1: i32) -> (i32, i32, i32, i32, i32) {
    %c0_i32 = arith.constant 0 : i32
    %c0_i32_0 = arith.constant 0 : i32
    %c0_i32_1 = arith.constant 0 : i32
    %c0_i32_2 = arith.constant 0 : i32
    return %arg0, %arg1, %c0_i32, %c0_i32_0, %c0_i32_1 : i32, i32, i32, i32, i32
  }
  func.func @transform_6(%arg0: i32, %arg1: i32) -> (i32, i32, i32, i32, i32) {
    %c0_i32 = arith.constant 0 : i32
    %c0_i32_0 = arith.constant 0 : i32
    %c0_i32_1 = arith.constant 0 : i32
    %c0_i32_2 = arith.constant 0 : i32
    return %arg0, %arg1, %c0_i32, %c0_i32_0, %c0_i32_1 : i32, i32, i32, i32, i32
  }
  func.func @transform_7(%arg0: i32, %arg1: i32) -> (i32, i32, i32, i32) {
    %c0_i32 = arith.constant 0 : i32
    %c0_i32_0 = arith.constant 0 : i32
    %c0_i32_1 = arith.constant 0 : i32
    return %arg0, %arg1, %c0_i32, %c0_i32_0 : i32, i32, i32, i32
  }
  func.func @transform_8(%arg0: i32, %arg1: i32) -> (i32, i32, i32, i32) {
    %c0_i32 = arith.constant 0 : i32
    %c0_i32_0 = arith.constant 0 : i32
    %c0_i32_1 = arith.constant 0 : i32
    return %arg0, %arg1, %c0_i32, %c0_i32_0 : i32, i32, i32, i32
  }
}

module attributes {stable_mosaic.version = 11 : i64} {
  func.func @_bn_relu_kernel(%arg0: i32, %arg1: i32, %arg2: memref<1x1x8x8x128xf32, #tpu.memory_space<vmem>>, %arg3: memref<2x128xf32, #tpu.memory_space<vmem>>, %arg4: memref<1x1x8x8x128xbf16, #tpu.memory_space<vmem>>) attributes {dimension_semantics = [#tpu.dimension_semantics<parallel>, #tpu.dimension_semantics<parallel>], iteration_bounds = array<i64: 2, 8>, scalar_prefetch = 0 : i64, scratch_operands = 0 : i64, tpu.core_type = #tpu.core_type<tc>, window_params = [{transform_indices = @transform_0, window_bounds = array<i64: 1, 1, 8, 8, 128>}, {pipeline_mode = #tpu.pipeline_mode<synchronous>, transform_indices = @transform_1, window_bounds = array<i64: 2, 128>}, {transform_indices = @transform_2, window_bounds = array<i64: 1, 1, 8, 8, 128>}]} {
    %c0 = arith.constant 0 : index
    %c0_0 = arith.constant 0 : index
    %c0_1 = arith.constant 0 : index
    %c0_2 = arith.constant 0 : index
    %c0_3 = arith.constant 0 : index
    %0 = vector.load %arg2[%c0, %c0_0, %c0_1, %c0_2, %c0_3] : memref<1x1x8x8x128xf32, #tpu.memory_space<vmem>>, vector<1x1x8x8x128xf32>
    %1 = vector.shape_cast %0 : vector<1x1x8x8x128xf32> to vector<8x8x128xf32>
    %c0_4 = arith.constant 0 : index
    %c0_5 = arith.constant 0 : index
    %2 = vector.load %arg3[%c0_4, %c0_5] : memref<2x128xf32, #tpu.memory_space<vmem>>, vector<1x128xf32>
    %3 = vector.shape_cast %2 : vector<1x128xf32> to vector<1x1x128xf32>
    %c1 = arith.constant 1 : index
    %c0_6 = arith.constant 0 : index
    %4 = vector.load %arg3[%c1, %c0_6] : memref<2x128xf32, #tpu.memory_space<vmem>>, vector<1x128xf32>
    %5 = vector.shape_cast %4 : vector<1x128xf32> to vector<1x1x128xf32>
    %6 = vector.broadcast %3 : vector<1x1x128xf32> to vector<8x8x128xf32>
    %7 = arith.mulf %1, %6 : vector<8x8x128xf32>
    %8 = vector.broadcast %5 : vector<1x1x128xf32> to vector<8x8x128xf32>
    %9 = arith.addf %7, %8 : vector<8x8x128xf32>
    %cst = arith.constant 0.000000e+00 : f32
    %10 = vector.broadcast %cst : f32 to vector<8x8x128xf32>
    %11 = arith.maximumf %9, %10 : vector<8x8x128xf32>
    %12 = arith.truncf %11 : vector<8x8x128xf32> to vector<8x8x128xbf16>
    %c0_7 = arith.constant 0 : index
    %c0_8 = arith.constant 0 : index
    %c0_9 = arith.constant 0 : index
    %c0_10 = arith.constant 0 : index
    %c0_11 = arith.constant 0 : index
    %13 = vector.load %arg4[%c0_7, %c0_8, %c0_9, %c0_10, %c0_11] : memref<1x1x8x8x128xbf16, #tpu.memory_space<vmem>>, vector<1x1x8x8x128xbf16>
    %14 = vector.shape_cast %13 : vector<1x1x8x8x128xbf16> to vector<8x8x128xbf16>
    %15 = vector.shape_cast %12 : vector<8x8x128xbf16> to vector<1x1x8x8x128xbf16>
    tpu.vector_store %arg4[%c0_7, %c0_8, %c0_9, %c0_10, %c0_11], %15 {strides = array<i32>} : memref<1x1x8x8x128xbf16, #tpu.memory_space<vmem>>, vector<1x1x8x8x128xbf16>,
    return
  }
  func.func @transform_0(%arg0: i32, %arg1: i32) -> (i32, i32, i32, i32, i32) {
    %c0_i32 = arith.constant 0 : i32
    %c0_i32_0 = arith.constant 0 : i32
    %c0_i32_1 = arith.constant 0 : i32
    %c0_i32_2 = arith.constant 0 : i32
    return %arg0, %arg1, %c0_i32, %c0_i32_0, %c0_i32_1 : i32, i32, i32, i32, i32
  }
  func.func @transform_1(%arg0: i32, %arg1: i32) -> (i32, i32) {
    %c0_i32 = arith.constant 0 : i32
    %c0_i32_0 = arith.constant 0 : i32
    %c0_i32_1 = arith.constant 0 : i32
    return %c0_i32, %c0_i32_0 : i32, i32
  }
  func.func @transform_2(%arg0: i32, %arg1: i32) -> (i32, i32, i32, i32, i32) {
    %c0_i32 = arith.constant 0 : i32
    %c0_i32_0 = arith.constant 0 : i32
    %c0_i32_1 = arith.constant 0 : i32
    %c0_i32_2 = arith.constant 0 : i32
    return %arg0, %arg1, %c0_i32, %c0_i32_0, %c0_i32_1 : i32, i32, i32, i32, i32
  }
}

module attributes {stable_mosaic.version = 11 : i64} {
  func.func @_conv3x3_kernel(%arg0: i32, %arg1: i32, %arg2: memref<1x1x10x10x128xbf16, #tpu.memory_space<vmem>>, %arg3: memref<1x1x10x10x128xbf16, #tpu.memory_space<vmem>>, %arg4: memref<1x1x10x10x128xbf16, #tpu.memory_space<vmem>>, %arg5: memref<27x128x128xbf16, #tpu.memory_space<vmem>>, %arg6: memref<1x1x8x8x128xf32, #tpu.memory_space<vmem>>, %arg7: memref<1x1x2x128xf32, #tpu.memory_space<vmem>>) attributes {dimension_semantics = [#tpu.dimension_semantics<parallel>, #tpu.dimension_semantics<parallel>], iteration_bounds = array<i64: 2, 8>, scalar_prefetch = 0 : i64, scratch_operands = 0 : i64, tpu.core_type = #tpu.core_type<tc>, window_params = [{transform_indices = @transform_0, window_bounds = array<i64: 1, 1, 10, 10, 128>}, {transform_indices = @transform_1, window_bounds = array<i64: 1, 1, 10, 10, 128>}, {transform_indices = @transform_2, window_bounds = array<i64: 1, 1, 10, 10, 128>}, {pipeline_mode = #tpu.pipeline_mode<synchronous>, transform_indices = @transform_3, window_bounds = array<i64: 27, 128, 128>}, {transform_indices = @transform_4, window_bounds = array<i64: 1, 1, 8, 8, 128>}, {transform_indices = @transform_5, window_bounds = array<i64: 1, 1, 2, 128>}]} {
    %cst = arith.constant 0.000000e+00 : f32
    %0 = vector.broadcast %cst : f32 to vector<64x128xf32>
    %c0 = arith.constant 0 : index
    %c0_0 = arith.constant 0 : index
    %c0_1 = arith.constant 0 : index
    %c0_2 = arith.constant 0 : index
    %c0_3 = arith.constant 0 : index
    %1 = vector.load %arg2[%c0, %c0_0, %c0_1, %c0_2, %c0_3] : memref<1x1x10x10x128xbf16, #tpu.memory_space<vmem>>, vector<1x1x8x8x128xbf16>
    %2 = vector.shape_cast %1 : vector<1x1x8x8x128xbf16> to vector<8x8x128xbf16>
    %3 = vector.shape_cast %2 : vector<8x8x128xbf16> to vector<64x128xbf16>
    %c0_4 = arith.constant 0 : index
    %c0_5 = arith.constant 0 : index
    %c0_6 = arith.constant 0 : index
    %4 = vector.load %arg5[%c0_4, %c0_5, %c0_6] : memref<27x128x128xbf16, #tpu.memory_space<vmem>>, vector<1x128x128xbf16>
    %5 = vector.shape_cast %4 : vector<1x128x128xbf16> to vector<128x128xbf16>
    %cst_7 = arith.constant dense<0.000000e+00> : vector<64x128xf32>
    %6 = tpu.matmul %3, %5, %cst_7 {dimension_numbers = #tpu.dot_dimension_numbers<[1], [0], [0], [1], [0, 0, 1, 1], [], []>} : vector<64x128xbf16>, vector<128x128xbf16>, vector<64x128xf32> -> vector<64x128xf32>
    %7 = arith.addf %0, %6 : vector<64x128xf32>
    %c0_8 = arith.constant 0 : index
    %c0_9 = arith.constant 0 : index
    %c0_10 = arith.constant 0 : index
    %c1 = arith.constant 1 : index
    %c0_11 = arith.constant 0 : index
    %8 = vector.load %arg2[%c0_8, %c0_9, %c0_10, %c1, %c0_11] : memref<1x1x10x10x128xbf16, #tpu.memory_space<vmem>>, vector<1x1x8x8x128xbf16>
    %9 = vector.shape_cast %8 : vector<1x1x8x8x128xbf16> to vector<8x8x128xbf16>
    %10 = vector.shape_cast %9 : vector<8x8x128xbf16> to vector<64x128xbf16>
    %c1_12 = arith.constant 1 : index
    %c0_13 = arith.constant 0 : index
    %c0_14 = arith.constant 0 : index
    %11 = vector.load %arg5[%c1_12, %c0_13, %c0_14] : memref<27x128x128xbf16, #tpu.memory_space<vmem>>, vector<1x128x128xbf16>
    %12 = vector.shape_cast %11 : vector<1x128x128xbf16> to vector<128x128xbf16>
    %cst_15 = arith.constant dense<0.000000e+00> : vector<64x128xf32>
    %13 = tpu.matmul %10, %12, %cst_15 {dimension_numbers = #tpu.dot_dimension_numbers<[1], [0], [0], [1], [0, 0, 1, 1], [], []>} : vector<64x128xbf16>, vector<128x128xbf16>, vector<64x128xf32> -> vector<64x128xf32>
    %14 = arith.addf %7, %13 : vector<64x128xf32>
    %c0_16 = arith.constant 0 : index
    %c0_17 = arith.constant 0 : index
    %c0_18 = arith.constant 0 : index
    %c2 = arith.constant 2 : index
    %c0_19 = arith.constant 0 : index
    %15 = vector.load %arg2[%c0_16, %c0_17, %c0_18, %c2, %c0_19] : memref<1x1x10x10x128xbf16, #tpu.memory_space<vmem>>, vector<1x1x8x8x128xbf16>
    %16 = vector.shape_cast %15 : vector<1x1x8x8x128xbf16> to vector<8x8x128xbf16>
    %17 = vector.shape_cast %16 : vector<8x8x128xbf16> to vector<64x128xbf16>
    %c2_20 = arith.constant 2 : index
    %c0_21 = arith.constant 0 : index
    %c0_22 = arith.constant 0 : index
    %18 = vector.load %arg5[%c2_20, %c0_21, %c0_22] : memref<27x128x128xbf16, #tpu.memory_space<vmem>>, vector<1x128x128xbf16>
    %19 = vector.shape_cast %18 : vector<1x128x128xbf16> to vector<128x128xbf16>
    %cst_23 = arith.constant dense<0.000000e+00> : vector<64x128xf32>
    %20 = tpu.matmul %17, %19, %cst_23 {dimension_numbers = #tpu.dot_dimension_numbers<[1], [0], [0], [1], [0, 0, 1, 1], [], []>} : vector<64x128xbf16>, vector<128x128xbf16>, vector<64x128xf32> -> vector<64x128xf32>
    %21 = arith.addf %14, %20 : vector<64x128xf32>
    %c0_24 = arith.constant 0 : index
    %c0_25 = arith.constant 0 : index
    %c1_26 = arith.constant 1 : index
    %c0_27 = arith.constant 0 : index
    %c0_28 = arith.constant 0 : index
    %22 = vector.load %arg2[%c0_24, %c0_25, %c1_26, %c0_27, %c0_28] : memref<1x1x10x10x128xbf16, #tpu.memory_space<vmem>>, vector<1x1x8x8x128xbf16>
    %23 = vector.shape_cast %22 : vector<1x1x8x8x128xbf16> to vector<8x8x128xbf16>
    %24 = vector.shape_cast %23 : vector<8x8x128xbf16> to vector<64x128xbf16>
    %c3 = arith.constant 3 : index
    %c0_29 = arith.constant 0 : index
    %c0_30 = arith.constant 0 : index
    %25 = vector.load %arg5[%c3, %c0_29, %c0_30] : memref<27x128x128xbf16, #tpu.memory_space<vmem>>, vector<1x128x128xbf16>
    %26 = vector.shape_cast %25 : vector<1x128x128xbf16> to vector<128x128xbf16>
    %cst_31 = arith.constant dense<0.000000e+00> : vector<64x128xf32>
    %27 = tpu.matmul %24, %26, %cst_31 {dimension_numbers = #tpu.dot_dimension_numbers<[1], [0], [0], [1], [0, 0, 1, 1], [], []>} : vector<64x128xbf16>, vector<128x128xbf16>, vector<64x128xf32> -> vector<64x128xf32>
    %28 = arith.addf %21, %27 : vector<64x128xf32>
    %c0_32 = arith.constant 0 : index
    %c0_33 = arith.constant 0 : index
    %c1_34 = arith.constant 1 : index
    %c1_35 = arith.constant 1 : index
    %c0_36 = arith.constant 0 : index
    %29 = vector.load %arg2[%c0_32, %c0_33, %c1_34, %c1_35, %c0_36] : memref<1x1x10x10x128xbf16, #tpu.memory_space<vmem>>, vector<1x1x8x8x128xbf16>
    %30 = vector.shape_cast %29 : vector<1x1x8x8x128xbf16> to vector<8x8x128xbf16>
    %31 = vector.shape_cast %30 : vector<8x8x128xbf16> to vector<64x128xbf16>
    %c4 = arith.constant 4 : index
    %c0_37 = arith.constant 0 : index
    %c0_38 = arith.constant 0 : index
    %32 = vector.load %arg5[%c4, %c0_37, %c0_38] : memref<27x128x128xbf16, #tpu.memory_space<vmem>>, vector<1x128x128xbf16>
    %33 = vector.shape_cast %32 : vector<1x128x128xbf16> to vector<128x128xbf16>
    %cst_39 = arith.constant dense<0.000000e+00> : vector<64x128xf32>
    %34 = tpu.matmul %31, %33, %cst_39 {dimension_numbers = #tpu.dot_dimension_numbers<[1], [0], [0], [1], [0, 0, 1, 1], [], []>} : vector<64x128xbf16>, vector<128x128xbf16>, vector<64x128xf32> -> vector<64x128xf32>
    %35 = arith.addf %28, %34 : vector<64x128xf32>
    %c0_40 = arith.constant 0 : index
    %c0_41 = arith.constant 0 : index
    %c1_42 = arith.constant 1 : index
    %c2_43 = arith.constant 2 : index
    %c0_44 = arith.constant 0 : index
    %36 = vector.load %arg2[%c0_40, %c0_41, %c1_42, %c2_43, %c0_44] : memref<1x1x10x10x128xbf16, #tpu.memory_space<vmem>>, vector<1x1x8x8x128xbf16>
    %37 = vector.shape_cast %36 : vector<1x1x8x8x128xbf16> to vector<8x8x128xbf16>
    %38 = vector.shape_cast %37 : vector<8x8x128xbf16> to vector<64x128xbf16>
    %c5 = arith.constant 5 : index
    %c0_45 = arith.constant 0 : index
    %c0_46 = arith.constant 0 : index
    %39 = vector.load %arg5[%c5, %c0_45, %c0_46] : memref<27x128x128xbf16, #tpu.memory_space<vmem>>, vector<1x128x128xbf16>
    %40 = vector.shape_cast %39 : vector<1x128x128xbf16> to vector<128x128xbf16>
    %cst_47 = arith.constant dense<0.000000e+00> : vector<64x128xf32>
    %41 = tpu.matmul %38, %40, %cst_47 {dimension_numbers = #tpu.dot_dimension_numbers<[1], [0], [0], [1], [0, 0, 1, 1], [], []>} : vector<64x128xbf16>, vector<128x128xbf16>, vector<64x128xf32> -> vector<64x128xf32>
    %42 = arith.addf %35, %41 : vector<64x128xf32>
    %c0_48 = arith.constant 0 : index
    %c0_49 = arith.constant 0 : index
    %c2_50 = arith.constant 2 : index
    %c0_51 = arith.constant 0 : index
    %c0_52 = arith.constant 0 : index
    %43 = vector.load %arg2[%c0_48, %c0_49, %c2_50, %c0_51, %c0_52] : memref<1x1x10x10x128xbf16, #tpu.memory_space<vmem>>, vector<1x1x8x8x128xbf16>
    %44 = vector.shape_cast %43 : vector<1x1x8x8x128xbf16> to vector<8x8x128xbf16>
    %45 = vector.shape_cast %44 : vector<8x8x128xbf16> to vector<64x128xbf16>
    %c6 = arith.constant 6 : index
    %c0_53 = arith.constant 0 : index
    %c0_54 = arith.constant 0 : index
    %46 = vector.load %arg5[%c6, %c0_53, %c0_54] : memref<27x128x128xbf16, #tpu.memory_space<vmem>>, vector<1x128x128xbf16>
    %47 = vector.shape_cast %46 : vector<1x128x128xbf16> to vector<128x128xbf16>
    %cst_55 = arith.constant dense<0.000000e+00> : vector<64x128xf32>
    %48 = tpu.matmul %45, %47, %cst_55 {dimension_numbers = #tpu.dot_dimension_numbers<[1], [0], [0], [1], [0, 0, 1, 1], [], []>} : vector<64x128xbf16>, vector<128x128xbf16>, vector<64x128xf32> -> vector<64x128xf32>
    %49 = arith.addf %42, %48 : vector<64x128xf32>
    %c0_56 = arith.constant 0 : index
    %c0_57 = arith.constant 0 : index
    %c2_58 = arith.constant 2 : index
    %c1_59 = arith.constant 1 : index
    %c0_60 = arith.constant 0 : index
    %50 = vector.load %arg2[%c0_56, %c0_57, %c2_58, %c1_59, %c0_60] : memref<1x1x10x10x128xbf16, #tpu.memory_space<vmem>>, vector<1x1x8x8x128xbf16>
    %51 = vector.shape_cast %50 : vector<1x1x8x8x128xbf16> to vector<8x8x128xbf16>
    %52 = vector.shape_cast %51 : vector<8x8x128xbf16> to vector<64x128xbf16>
    %c7 = arith.constant 7 : index
    %c0_61 = arith.constant 0 : index
    %c0_62 = arith.constant 0 : index
    %53 = vector.load %arg5[%c7, %c0_61, %c0_62] : memref<27x128x128xbf16, #tpu.memory_space<vmem>>, vector<1x128x128xbf16>
    %54 = vector.shape_cast %53 : vector<1x128x128xbf16> to vector<128x128xbf16>
    %cst_63 = arith.constant dense<0.000000e+00> : vector<64x128xf32>
    %55 = tpu.matmul %52, %54, %cst_63 {dimension_numbers = #tpu.dot_dimension_numbers<[1], [0], [0], [1], [0, 0, 1, 1], [], []>} : vector<64x128xbf16>, vector<128x128xbf16>, vector<64x128xf32> -> vector<64x128xf32>
    %56 = arith.addf %49, %55 : vector<64x128xf32>
    %c0_64 = arith.constant 0 : index
    %c0_65 = arith.constant 0 : index
    %c2_66 = arith.constant 2 : index
    %c2_67 = arith.constant 2 : index
    %c0_68 = arith.constant 0 : index
    %57 = vector.load %arg2[%c0_64, %c0_65, %c2_66, %c2_67, %c0_68] : memref<1x1x10x10x128xbf16, #tpu.memory_space<vmem>>, vector<1x1x8x8x128xbf16>
    %58 = vector.shape_cast %57 : vector<1x1x8x8x128xbf16> to vector<8x8x128xbf16>
    %59 = vector.shape_cast %58 : vector<8x8x128xbf16> to vector<64x128xbf16>
    %c8 = arith.constant 8 : index
    %c0_69 = arith.constant 0 : index
    %c0_70 = arith.constant 0 : index
    %60 = vector.load %arg5[%c8, %c0_69, %c0_70] : memref<27x128x128xbf16, #tpu.memory_space<vmem>>, vector<1x128x128xbf16>
    %61 = vector.shape_cast %60 : vector<1x128x128xbf16> to vector<128x128xbf16>
    %cst_71 = arith.constant dense<0.000000e+00> : vector<64x128xf32>
    %62 = tpu.matmul %59, %61, %cst_71 {dimension_numbers = #tpu.dot_dimension_numbers<[1], [0], [0], [1], [0, 0, 1, 1], [], []>} : vector<64x128xbf16>, vector<128x128xbf16>, vector<64x128xf32> -> vector<64x128xf32>
    %63 = arith.addf %56, %62 : vector<64x128xf32>
    %c0_72 = arith.constant 0 : index
    %c0_73 = arith.constant 0 : index
    %c0_74 = arith.constant 0 : index
    %c0_75 = arith.constant 0 : index
    %c0_76 = arith.constant 0 : index
    %64 = vector.load %arg3[%c0_72, %c0_73, %c0_74, %c0_75, %c0_76] : memref<1x1x10x10x128xbf16, #tpu.memory_space<vmem>>, vector<1x1x8x8x128xbf16>
    %65 = vector.shape_cast %64 : vector<1x1x8x8x128xbf16> to vector<8x8x128xbf16>
    %66 = vector.shape_cast %65 : vector<8x8x128xbf16> to vector<64x128xbf16>
    %c9 = arith.constant 9 : index
    %c0_77 = arith.constant 0 : index
    %c0_78 = arith.constant 0 : index
    %67 = vector.load %arg5[%c9, %c0_77, %c0_78] : memref<27x128x128xbf16, #tpu.memory_space<vmem>>, vector<1x128x128xbf16>
    %68 = vector.shape_cast %67 : vector<1x128x128xbf16> to vector<128x128xbf16>
    %cst_79 = arith.constant dense<0.000000e+00> : vector<64x128xf32>
    %69 = tpu.matmul %66, %68, %cst_79 {dimension_numbers = #tpu.dot_dimension_numbers<[1], [0], [0], [1], [0, 0, 1, 1], [], []>} : vector<64x128xbf16>, vector<128x128xbf16>, vector<64x128xf32> -> vector<64x128xf32>
    %70 = arith.addf %63, %69 : vector<64x128xf32>
    %c0_80 = arith.constant 0 : index
    %c0_81 = arith.constant 0 : index
    %c0_82 = arith.constant 0 : index
    %c1_83 = arith.constant 1 : index
    %c0_84 = arith.constant 0 : index
    %71 = vector.load %arg3[%c0_80, %c0_81, %c0_82, %c1_83, %c0_84] : memref<1x1x10x10x128xbf16, #tpu.memory_space<vmem>>, vector<1x1x8x8x128xbf16>
    %72 = vector.shape_cast %71 : vector<1x1x8x8x128xbf16> to vector<8x8x128xbf16>
    %73 = vector.shape_cast %72 : vector<8x8x128xbf16> to vector<64x128xbf16>
    %c10 = arith.constant 10 : index
    %c0_85 = arith.constant 0 : index
    %c0_86 = arith.constant 0 : index
    %74 = vector.load %arg5[%c10, %c0_85, %c0_86] : memref<27x128x128xbf16, #tpu.memory_space<vmem>>, vector<1x128x128xbf16>
    %75 = vector.shape_cast %74 : vector<1x128x128xbf16> to vector<128x128xbf16>
    %cst_87 = arith.constant dense<0.000000e+00> : vector<64x128xf32>
    %76 = tpu.matmul %73, %75, %cst_87 {dimension_numbers = #tpu.dot_dimension_numbers<[1], [0], [0], [1], [0, 0, 1, 1], [], []>} : vector<64x128xbf16>, vector<128x128xbf16>, vector<64x128xf32> -> vector<64x128xf32>
    %77 = arith.addf %70, %76 : vector<64x128xf32>
    %c0_88 = arith.constant 0 : index
    %c0_89 = arith.constant 0 : index
    %c0_90 = arith.constant 0 : index
    %c2_91 = arith.constant 2 : index
    %c0_92 = arith.constant 0 : index
    %78 = vector.load %arg3[%c0_88, %c0_89, %c0_90, %c2_91, %c0_92] : memref<1x1x10x10x128xbf16, #tpu.memory_space<vmem>>, vector<1x1x8x8x128xbf16>
    %79 = vector.shape_cast %78 : vector<1x1x8x8x128xbf16> to vector<8x8x128xbf16>
    %80 = vector.shape_cast %79 : vector<8x8x128xbf16> to vector<64x128xbf16>
    %c11 = arith.constant 11 : index
    %c0_93 = arith.constant 0 : index
    %c0_94 = arith.constant 0 : index
    %81 = vector.load %arg5[%c11, %c0_93, %c0_94] : memref<27x128x128xbf16, #tpu.memory_space<vmem>>, vector<1x128x128xbf16>
    %82 = vector.shape_cast %81 : vector<1x128x128xbf16> to vector<128x128xbf16>
    %cst_95 = arith.constant dense<0.000000e+00> : vector<64x128xf32>
    %83 = tpu.matmul %80, %82, %cst_95 {dimension_numbers = #tpu.dot_dimension_numbers<[1], [0], [0], [1], [0, 0, 1, 1], [], []>} : vector<64x128xbf16>, vector<128x128xbf16>, vector<64x128xf32> -> vector<64x128xf32>
    %84 = arith.addf %77, %83 : vector<64x128xf32>
    %c0_96 = arith.constant 0 : index
    %c0_97 = arith.constant 0 : index
    %c1_98 = arith.constant 1 : index
    %c0_99 = arith.constant 0 : index
    %c0_100 = arith.constant 0 : index
    %85 = vector.load %arg3[%c0_96, %c0_97, %c1_98, %c0_99, %c0_100] : memref<1x1x10x10x128xbf16, #tpu.memory_space<vmem>>, vector<1x1x8x8x128xbf16>
    %86 = vector.shape_cast %85 : vector<1x1x8x8x128xbf16> to vector<8x8x128xbf16>
    %87 = vector.shape_cast %86 : vector<8x8x128xbf16> to vector<64x128xbf16>
    %c12 = arith.constant 12 : index
    %c0_101 = arith.constant 0 : index
    %c0_102 = arith.constant 0 : index
    %88 = vector.load %arg5[%c12, %c0_101, %c0_102] : memref<27x128x128xbf16, #tpu.memory_space<vmem>>, vector<1x128x128xbf16>
    %89 = vector.shape_cast %88 : vector<1x128x128xbf16> to vector<128x128xbf16>
    %cst_103 = arith.constant dense<0.000000e+00> : vector<64x128xf32>
    %90 = tpu.matmul %87, %89, %cst_103 {dimension_numbers = #tpu.dot_dimension_numbers<[1], [0], [0], [1], [0, 0, 1, 1], [], []>} : vector<64x128xbf16>, vector<128x128xbf16>, vector<64x128xf32> -> vector<64x128xf32>
    %91 = arith.addf %84, %90 : vector<64x128xf32>
    %c0_104 = arith.constant 0 : index
    %c0_105 = arith.constant 0 : index
    %c1_106 = arith.constant 1 : index
    %c1_107 = arith.constant 1 : index
    %c0_108 = arith.constant 0 : index
    %92 = vector.load %arg3[%c0_104, %c0_105, %c1_106, %c1_107, %c0_108] : memref<1x1x10x10x128xbf16, #tpu.memory_space<vmem>>, vector<1x1x8x8x128xbf16>
    %93 = vector.shape_cast %92 : vector<1x1x8x8x128xbf16> to vector<8x8x128xbf16>
    %94 = vector.shape_cast %93 : vector<8x8x128xbf16> to vector<64x128xbf16>
    %c13 = arith.constant 13 : index
    %c0_109 = arith.constant 0 : index
    %c0_110 = arith.constant 0 : index
    %95 = vector.load %arg5[%c13, %c0_109, %c0_110] : memref<27x128x128xbf16, #tpu.memory_space<vmem>>, vector<1x128x128xbf16>
    %96 = vector.shape_cast %95 : vector<1x128x128xbf16> to vector<128x128xbf16>
    %cst_111 = arith.constant dense<0.000000e+00> : vector<64x128xf32>
    %97 = tpu.matmul %94, %96, %cst_111 {dimension_numbers = #tpu.dot_dimension_numbers<[1], [0], [0], [1], [0, 0, 1, 1], [], []>} : vector<64x128xbf16>, vector<128x128xbf16>, vector<64x128xf32> -> vector<64x128xf32>
    %98 = arith.addf %91, %97 : vector<64x128xf32>
    %c0_112 = arith.constant 0 : index
    %c0_113 = arith.constant 0 : index
    %c1_114 = arith.constant 1 : index
    %c2_115 = arith.constant 2 : index
    %c0_116 = arith.constant 0 : index
    %99 = vector.load %arg3[%c0_112, %c0_113, %c1_114, %c2_115, %c0_116] : memref<1x1x10x10x128xbf16, #tpu.memory_space<vmem>>, vector<1x1x8x8x128xbf16>
    %100 = vector.shape_cast %99 : vector<1x1x8x8x128xbf16> to vector<8x8x128xbf16>
    %101 = vector.shape_cast %100 : vector<8x8x128xbf16> to vector<64x128xbf16>
    %c14 = arith.constant 14 : index
    %c0_117 = arith.constant 0 : index
    %c0_118 = arith.constant 0 : index
    %102 = vector.load %arg5[%c14, %c0_117, %c0_118] : memref<27x128x128xbf16, #tpu.memory_space<vmem>>, vector<1x128x128xbf16>
    %103 = vector.shape_cast %102 : vector<1x128x128xbf16> to vector<128x128xbf16>
    %cst_119 = arith.constant dense<0.000000e+00> : vector<64x128xf32>
    %104 = tpu.matmul %101, %103, %cst_119 {dimension_numbers = #tpu.dot_dimension_numbers<[1], [0], [0], [1], [0, 0, 1, 1], [], []>} : vector<64x128xbf16>, vector<128x128xbf16>, vector<64x128xf32> -> vector<64x128xf32>
    %105 = arith.addf %98, %104 : vector<64x128xf32>
    %c0_120 = arith.constant 0 : index
    %c0_121 = arith.constant 0 : index
    %c2_122 = arith.constant 2 : index
    %c0_123 = arith.constant 0 : index
    %c0_124 = arith.constant 0 : index
    %106 = vector.load %arg3[%c0_120, %c0_121, %c2_122, %c0_123, %c0_124] : memref<1x1x10x10x128xbf16, #tpu.memory_space<vmem>>, vector<1x1x8x8x128xbf16>
    %107 = vector.shape_cast %106 : vector<1x1x8x8x128xbf16> to vector<8x8x128xbf16>
    %108 = vector.shape_cast %107 : vector<8x8x128xbf16> to vector<64x128xbf16>
    %c15 = arith.constant 15 : index
    %c0_125 = arith.constant 0 : index
    %c0_126 = arith.constant 0 : index
    %109 = vector.load %arg5[%c15, %c0_125, %c0_126] : memref<27x128x128xbf16, #tpu.memory_space<vmem>>, vector<1x128x128xbf16>
    %110 = vector.shape_cast %109 : vector<1x128x128xbf16> to vector<128x128xbf16>
    %cst_127 = arith.constant dense<0.000000e+00> : vector<64x128xf32>
    %111 = tpu.matmul %108, %110, %cst_127 {dimension_numbers = #tpu.dot_dimension_numbers<[1], [0], [0], [1], [0, 0, 1, 1], [], []>} : vector<64x128xbf16>, vector<128x128xbf16>, vector<64x128xf32> -> vector<64x128xf32>
    %112 = arith.addf %105, %111 : vector<64x128xf32>
    %c0_128 = arith.constant 0 : index
    %c0_129 = arith.constant 0 : index
    %c2_130 = arith.constant 2 : index
    %c1_131 = arith.constant 1 : index
    %c0_132 = arith.constant 0 : index
    %113 = vector.load %arg3[%c0_128, %c0_129, %c2_130, %c1_131, %c0_132] : memref<1x1x10x10x128xbf16, #tpu.memory_space<vmem>>, vector<1x1x8x8x128xbf16>
    %114 = vector.shape_cast %113 : vector<1x1x8x8x128xbf16> to vector<8x8x128xbf16>
    %115 = vector.shape_cast %114 : vector<8x8x128xbf16> to vector<64x128xbf16>
    %c16 = arith.constant 16 : index
    %c0_133 = arith.constant 0 : index
    %c0_134 = arith.constant 0 : index
    %116 = vector.load %arg5[%c16, %c0_133, %c0_134] : memref<27x128x128xbf16, #tpu.memory_space<vmem>>, vector<1x128x128xbf16>
    %117 = vector.shape_cast %116 : vector<1x128x128xbf16> to vector<128x128xbf16>
    %cst_135 = arith.constant dense<0.000000e+00> : vector<64x128xf32>
    %118 = tpu.matmul %115, %117, %cst_135 {dimension_numbers = #tpu.dot_dimension_numbers<[1], [0], [0], [1], [0, 0, 1, 1], [], []>} : vector<64x128xbf16>, vector<128x128xbf16>, vector<64x128xf32> -> vector<64x128xf32>
    %119 = arith.addf %112, %118 : vector<64x128xf32>
    %c0_136 = arith.constant 0 : index
    %c0_137 = arith.constant 0 : index
    %c2_138 = arith.constant 2 : index
    %c2_139 = arith.constant 2 : index
    %c0_140 = arith.constant 0 : index
    %120 = vector.load %arg3[%c0_136, %c0_137, %c2_138, %c2_139, %c0_140] : memref<1x1x10x10x128xbf16, #tpu.memory_space<vmem>>, vector<1x1x8x8x128xbf16>
    %121 = vector.shape_cast %120 : vector<1x1x8x8x128xbf16> to vector<8x8x128xbf16>
    %122 = vector.shape_cast %121 : vector<8x8x128xbf16> to vector<64x128xbf16>
    %c17 = arith.constant 17 : index
    %c0_141 = arith.constant 0 : index
    %c0_142 = arith.constant 0 : index
    %123 = vector.load %arg5[%c17, %c0_141, %c0_142] : memref<27x128x128xbf16, #tpu.memory_space<vmem>>, vector<1x128x128xbf16>
    %124 = vector.shape_cast %123 : vector<1x128x128xbf16> to vector<128x128xbf16>
    %cst_143 = arith.constant dense<0.000000e+00> : vector<64x128xf32>
    %125 = tpu.matmul %122, %124, %cst_143 {dimension_numbers = #tpu.dot_dimension_numbers<[1], [0], [0], [1], [0, 0, 1, 1], [], []>} : vector<64x128xbf16>, vector<128x128xbf16>, vector<64x128xf32> -> vector<64x128xf32>
    %126 = arith.addf %119, %125 : vector<64x128xf32>
    %c0_144 = arith.constant 0 : index
    %c0_145 = arith.constant 0 : index
    %c0_146 = arith.constant 0 : index
    %c0_147 = arith.constant 0 : index
    %c0_148 = arith.constant 0 : index
    %127 = vector.load %arg4[%c0_144, %c0_145, %c0_146, %c0_147, %c0_148] : memref<1x1x10x10x128xbf16, #tpu.memory_space<vmem>>, vector<1x1x8x8x128xbf16>
    %128 = vector.shape_cast %127 : vector<1x1x8x8x128xbf16> to vector<8x8x128xbf16>
    %129 = vector.shape_cast %128 : vector<8x8x128xbf16> to vector<64x128xbf16>
    %c18 = arith.constant 18 : index
    %c0_149 = arith.constant 0 : index
    %c0_150 = arith.constant 0 : index
    %130 = vector.load %arg5[%c18, %c0_149, %c0_150] : memref<27x128x128xbf16, #tpu.memory_space<vmem>>, vector<1x128x128xbf16>
    %131 = vector.shape_cast %130 : vector<1x128x128xbf16> to vector<128x128xbf16>
    %cst_151 = arith.constant dense<0.000000e+00> : vector<64x128xf32>
    %132 = tpu.matmul %129, %131, %cst_151 {dimension_numbers = #tpu.dot_dimension_numbers<[1], [0], [0], [1], [0, 0, 1, 1], [], []>} : vector<64x128xbf16>, vector<128x128xbf16>, vector<64x128xf32> -> vector<64x128xf32>
    %133 = arith.addf %126, %132 : vector<64x128xf32>
    %c0_152 = arith.constant 0 : index
    %c0_153 = arith.constant 0 : index
    %c0_154 = arith.constant 0 : index
    %c1_155 = arith.constant 1 : index
    %c0_156 = arith.constant 0 : index
    %134 = vector.load %arg4[%c0_152, %c0_153, %c0_154, %c1_155, %c0_156] : memref<1x1x10x10x128xbf16, #tpu.memory_space<vmem>>, vector<1x1x8x8x128xbf16>
    %135 = vector.shape_cast %134 : vector<1x1x8x8x128xbf16> to vector<8x8x128xbf16>
    %136 = vector.shape_cast %135 : vector<8x8x128xbf16> to vector<64x128xbf16>
    %c19 = arith.constant 19 : index
    %c0_157 = arith.constant 0 : index
    %c0_158 = arith.constant 0 : index
    %137 = vector.load %arg5[%c19, %c0_157, %c0_158] : memref<27x128x128xbf16, #tpu.memory_space<vmem>>, vector<1x128x128xbf16>
    %138 = vector.shape_cast %137 : vector<1x128x128xbf16> to vector<128x128xbf16>
    %cst_159 = arith.constant dense<0.000000e+00> : vector<64x128xf32>
    %139 = tpu.matmul %136, %138, %cst_159 {dimension_numbers = #tpu.dot_dimension_numbers<[1], [0], [0], [1], [0, 0, 1, 1], [], []>} : vector<64x128xbf16>, vector<128x128xbf16>, vector<64x128xf32> -> vector<64x128xf32>
    %140 = arith.addf %133, %139 : vector<64x128xf32>
    %c0_160 = arith.constant 0 : index
    %c0_161 = arith.constant 0 : index
    %c0_162 = arith.constant 0 : index
    %c2_163 = arith.constant 2 : index
    %c0_164 = arith.constant 0 : index
    %141 = vector.load %arg4[%c0_160, %c0_161, %c0_162, %c2_163, %c0_164] : memref<1x1x10x10x128xbf16, #tpu.memory_space<vmem>>, vector<1x1x8x8x128xbf16>
    %142 = vector.shape_cast %141 : vector<1x1x8x8x128xbf16> to vector<8x8x128xbf16>
    %143 = vector.shape_cast %142 : vector<8x8x128xbf16> to vector<64x128xbf16>
    %c20 = arith.constant 20 : index
    %c0_165 = arith.constant 0 : index
    %c0_166 = arith.constant 0 : index
    %144 = vector.load %arg5[%c20, %c0_165, %c0_166] : memref<27x128x128xbf16, #tpu.memory_space<vmem>>, vector<1x128x128xbf16>
    %145 = vector.shape_cast %144 : vector<1x128x128xbf16> to vector<128x128xbf16>
    %cst_167 = arith.constant dense<0.000000e+00> : vector<64x128xf32>
    %146 = tpu.matmul %143, %145, %cst_167 {dimension_numbers = #tpu.dot_dimension_numbers<[1], [0], [0], [1], [0, 0, 1, 1], [], []>} : vector<64x128xbf16>, vector<128x128xbf16>, vector<64x128xf32> -> vector<64x128xf32>
    %147 = arith.addf %140, %146 : vector<64x128xf32>
    %c0_168 = arith.constant 0 : index
    %c0_169 = arith.constant 0 : index
    %c1_170 = arith.constant 1 : index
    %c0_171 = arith.constant 0 : index
    %c0_172 = arith.constant 0 : index
    %148 = vector.load %arg4[%c0_168, %c0_169, %c1_170, %c0_171, %c0_172] : memref<1x1x10x10x128xbf16, #tpu.memory_space<vmem>>, vector<1x1x8x8x128xbf16>
    %149 = vector.shape_cast %148 : vector<1x1x8x8x128xbf16> to vector<8x8x128xbf16>
    %150 = vector.shape_cast %149 : vector<8x8x128xbf16> to vector<64x128xbf16>
    %c21 = arith.constant 21 : index
    %c0_173 = arith.constant 0 : index
    %c0_174 = arith.constant 0 : index
    %151 = vector.load %arg5[%c21, %c0_173, %c0_174] : memref<27x128x128xbf16, #tpu.memory_space<vmem>>, vector<1x128x128xbf16>
    %152 = vector.shape_cast %151 : vector<1x128x128xbf16> to vector<128x128xbf16>
    %cst_175 = arith.constant dense<0.000000e+00> : vector<64x128xf32>
    %153 = tpu.matmul %150, %152, %cst_175 {dimension_numbers = #tpu.dot_dimension_numbers<[1], [0], [0], [1], [0, 0, 1, 1], [], []>} : vector<64x128xbf16>, vector<128x128xbf16>, vector<64x128xf32> -> vector<64x128xf32>
    %154 = arith.addf %147, %153 : vector<64x128xf32>
    %c0_176 = arith.constant 0 : index
    %c0_177 = arith.constant 0 : index
    %c1_178 = arith.constant 1 : index
    %c1_179 = arith.constant 1 : index
    %c0_180 = arith.constant 0 : index
    %155 = vector.load %arg4[%c0_176, %c0_177, %c1_178, %c1_179, %c0_180] : memref<1x1x10x10x128xbf16, #tpu.memory_space<vmem>>, vector<1x1x8x8x128xbf16>
    %156 = vector.shape_cast %155 : vector<1x1x8x8x128xbf16> to vector<8x8x128xbf16>
    %157 = vector.shape_cast %156 : vector<8x8x128xbf16> to vector<64x128xbf16>
    %c22 = arith.constant 22 : index
    %c0_181 = arith.constant 0 : index
    %c0_182 = arith.constant 0 : index
    %158 = vector.load %arg5[%c22, %c0_181, %c0_182] : memref<27x128x128xbf16, #tpu.memory_space<vmem>>, vector<1x128x128xbf16>
    %159 = vector.shape_cast %158 : vector<1x128x128xbf16> to vector<128x128xbf16>
    %cst_183 = arith.constant dense<0.000000e+00> : vector<64x128xf32>
    %160 = tpu.matmul %157, %159, %cst_183 {dimension_numbers = #tpu.dot_dimension_numbers<[1], [0], [0], [1], [0, 0, 1, 1], [], []>} : vector<64x128xbf16>, vector<128x128xbf16>, vector<64x128xf32> -> vector<64x128xf32>
    %161 = arith.addf %154, %160 : vector<64x128xf32>
    %c0_184 = arith.constant 0 : index
    %c0_185 = arith.constant 0 : index
    %c1_186 = arith.constant 1 : index
    %c2_187 = arith.constant 2 : index
    %c0_188 = arith.constant 0 : index
    %162 = vector.load %arg4[%c0_184, %c0_185, %c1_186, %c2_187, %c0_188] : memref<1x1x10x10x128xbf16, #tpu.memory_space<vmem>>, vector<1x1x8x8x128xbf16>
    %163 = vector.shape_cast %162 : vector<1x1x8x8x128xbf16> to vector<8x8x128xbf16>
    %164 = vector.shape_cast %163 : vector<8x8x128xbf16> to vector<64x128xbf16>
    %c23 = arith.constant 23 : index
    %c0_189 = arith.constant 0 : index
    %c0_190 = arith.constant 0 : index
    %165 = vector.load %arg5[%c23, %c0_189, %c0_190] : memref<27x128x128xbf16, #tpu.memory_space<vmem>>, vector<1x128x128xbf16>
    %166 = vector.shape_cast %165 : vector<1x128x128xbf16> to vector<128x128xbf16>
    %cst_191 = arith.constant dense<0.000000e+00> : vector<64x128xf32>
    %167 = tpu.matmul %164, %166, %cst_191 {dimension_numbers = #tpu.dot_dimension_numbers<[1], [0], [0], [1], [0, 0, 1, 1], [], []>} : vector<64x128xbf16>, vector<128x128xbf16>, vector<64x128xf32> -> vector<64x128xf32>
    %168 = arith.addf %161, %167 : vector<64x128xf32>
    %c0_192 = arith.constant 0 : index
    %c0_193 = arith.constant 0 : index
    %c2_194 = arith.constant 2 : index
    %c0_195 = arith.constant 0 : index
    %c0_196 = arith.constant 0 : index
    %169 = vector.load %arg4[%c0_192, %c0_193, %c2_194, %c0_195, %c0_196] : memref<1x1x10x10x128xbf16, #tpu.memory_space<vmem>>, vector<1x1x8x8x128xbf16>
    %170 = vector.shape_cast %169 : vector<1x1x8x8x128xbf16> to vector<8x8x128xbf16>
    %171 = vector.shape_cast %170 : vector<8x8x128xbf16> to vector<64x128xbf16>
    %c24 = arith.constant 24 : index
    %c0_197 = arith.constant 0 : index
    %c0_198 = arith.constant 0 : index
    %172 = vector.load %arg5[%c24, %c0_197, %c0_198] : memref<27x128x128xbf16, #tpu.memory_space<vmem>>, vector<1x128x128xbf16>
    %173 = vector.shape_cast %172 : vector<1x128x128xbf16> to vector<128x128xbf16>
    %cst_199 = arith.constant dense<0.000000e+00> : vector<64x128xf32>
    %174 = tpu.matmul %171, %173, %cst_199 {dimension_numbers = #tpu.dot_dimension_numbers<[1], [0], [0], [1], [0, 0, 1, 1], [], []>} : vector<64x128xbf16>, vector<128x128xbf16>, vector<64x128xf32> -> vector<64x128xf32>
    %175 = arith.addf %168, %174 : vector<64x128xf32>
    %c0_200 = arith.constant 0 : index
    %c0_201 = arith.constant 0 : index
    %c2_202 = arith.constant 2 : index
    %c1_203 = arith.constant 1 : index
    %c0_204 = arith.constant 0 : index
    %176 = vector.load %arg4[%c0_200, %c0_201, %c2_202, %c1_203, %c0_204] : memref<1x1x10x10x128xbf16, #tpu.memory_space<vmem>>, vector<1x1x8x8x128xbf16>
    %177 = vector.shape_cast %176 : vector<1x1x8x8x128xbf16> to vector<8x8x128xbf16>
    %178 = vector.shape_cast %177 : vector<8x8x128xbf16> to vector<64x128xbf16>
    %c25 = arith.constant 25 : index
    %c0_205 = arith.constant 0 : index
    %c0_206 = arith.constant 0 : index
    %179 = vector.load %arg5[%c25, %c0_205, %c0_206] : memref<27x128x128xbf16, #tpu.memory_space<vmem>>, vector<1x128x128xbf16>
    %180 = vector.shape_cast %179 : vector<1x128x128xbf16> to vector<128x128xbf16>
    %cst_207 = arith.constant dense<0.000000e+00> : vector<64x128xf32>
    %181 = tpu.matmul %178, %180, %cst_207 {dimension_numbers = #tpu.dot_dimension_numbers<[1], [0], [0], [1], [0, 0, 1, 1], [], []>} : vector<64x128xbf16>, vector<128x128xbf16>, vector<64x128xf32> -> vector<64x128xf32>
    %182 = arith.addf %175, %181 : vector<64x128xf32>
    %c0_208 = arith.constant 0 : index
    %c0_209 = arith.constant 0 : index
    %c2_210 = arith.constant 2 : index
    %c2_211 = arith.constant 2 : index
    %c0_212 = arith.constant 0 : index
    %183 = vector.load %arg4[%c0_208, %c0_209, %c2_210, %c2_211, %c0_212] : memref<1x1x10x10x128xbf16, #tpu.memory_space<vmem>>, vector<1x1x8x8x128xbf16>
    %184 = vector.shape_cast %183 : vector<1x1x8x8x128xbf16> to vector<8x8x128xbf16>
    %185 = vector.shape_cast %184 : vector<8x8x128xbf16> to vector<64x128xbf16>
    %c26 = arith.constant 26 : index
    %c0_213 = arith.constant 0 : index
    %c0_214 = arith.constant 0 : index
    %186 = vector.load %arg5[%c26, %c0_213, %c0_214] : memref<27x128x128xbf16, #tpu.memory_space<vmem>>, vector<1x128x128xbf16>
    %187 = vector.shape_cast %186 : vector<1x128x128xbf16> to vector<128x128xbf16>
    %cst_215 = arith.constant dense<0.000000e+00> : vector<64x128xf32>
    %188 = tpu.matmul %185, %187, %cst_215 {dimension_numbers = #tpu.dot_dimension_numbers<[1], [0], [0], [1], [0, 0, 1, 1], [], []>} : vector<64x128xbf16>, vector<128x128xbf16>, vector<64x128xf32> -> vector<64x128xf32>
    %189 = arith.addf %182, %188 : vector<64x128xf32>
    %190 = vector.shape_cast %189 : vector<64x128xf32> to vector<8x8x128xf32>
    %c0_216 = arith.constant 0 : index
    %c0_217 = arith.constant 0 : index
    %c0_218 = arith.constant 0 : index
    %c0_219 = arith.constant 0 : index
    %c0_220 = arith.constant 0 : index
    %191 = vector.load %arg6[%c0_216, %c0_217, %c0_218, %c0_219, %c0_220] : memref<1x1x8x8x128xf32, #tpu.memory_space<vmem>>, vector<1x1x8x8x128xf32>
    %192 = vector.shape_cast %191 : vector<1x1x8x8x128xf32> to vector<8x8x128xf32>
    %193 = vector.shape_cast %190 : vector<8x8x128xf32> to vector<1x1x8x8x128xf32>
    tpu.vector_store %arg6[%c0_216, %c0_217, %c0_218, %c0_219, %c0_220], %193 {strides = array<i32>} : memref<1x1x8x8x128xf32, #tpu.memory_space<vmem>>, vector<1x1x8x8x128xf32>,
    %cst_221 = arith.constant dense<0.000000e+00> : vector<128xf32>
    %194 = vector.multi_reduction <add>, %189, %cst_221 [0] : vector<64x128xf32> to vector<128xf32>
    %195 = vector.shape_cast %194 : vector<128xf32> to vector<1x128xf32>
    %196 = arith.mulf %189, %189 : vector<64x128xf32>
    %cst_222 = arith.constant dense<0.000000e+00> : vector<128xf32>
    %197 = vector.multi_reduction <add>, %196, %cst_222 [0] : vector<64x128xf32> to vector<128xf32>
    %198 = vector.shape_cast %197 : vector<128xf32> to vector<1x128xf32>
    %199 = tpu.concatenate %195, %198 in 0 : vector<1x128xf32>, vector<1x128xf32> -> vector<2x128xf32>
    %c0_223 = arith.constant 0 : index
    %c0_224 = arith.constant 0 : index
    %c0_225 = arith.constant 0 : index
    %c0_226 = arith.constant 0 : index
    %200 = vector.load %arg7[%c0_223, %c0_224, %c0_225, %c0_226] : memref<1x1x2x128xf32, #tpu.memory_space<vmem>>, vector<1x1x2x128xf32>
    %201 = vector.shape_cast %200 : vector<1x1x2x128xf32> to vector<2x128xf32>
    %202 = vector.shape_cast %199 : vector<2x128xf32> to vector<1x1x2x128xf32>
    tpu.vector_store %arg7[%c0_223, %c0_224, %c0_225, %c0_226], %202 {strides = array<i32>} : memref<1x1x2x128xf32, #tpu.memory_space<vmem>>, vector<1x1x2x128xf32>,
    return
  }
  func.func @transform_0(%arg0: i32, %arg1: i32) -> (i32, i32, i32, i32, i32) {
    %c0_i32 = arith.constant 0 : i32
    %0 = arith.addi %arg1, %c0_i32 : i32
    %c0_i32_0 = arith.constant 0 : i32
    %c0_i32_1 = arith.constant 0 : i32
    %c0_i32_2 = arith.constant 0 : i32
    %c0_i32_3 = arith.constant 0 : i32
    return %arg0, %0, %c0_i32_0, %c0_i32_1, %c0_i32_2 : i32, i32, i32, i32, i32
  }
  func.func @transform_1(%arg0: i32, %arg1: i32) -> (i32, i32, i32, i32, i32) {
    %c1_i32 = arith.constant 1 : i32
    %0 = arith.addi %arg1, %c1_i32 : i32
    %c0_i32 = arith.constant 0 : i32
    %c0_i32_0 = arith.constant 0 : i32
    %c0_i32_1 = arith.constant 0 : i32
    %c0_i32_2 = arith.constant 0 : i32
    return %arg0, %0, %c0_i32, %c0_i32_0, %c0_i32_1 : i32, i32, i32, i32, i32
  }
  func.func @transform_2(%arg0: i32, %arg1: i32) -> (i32, i32, i32, i32, i32) {
    %c2_i32 = arith.constant 2 : i32
    %0 = arith.addi %arg1, %c2_i32 : i32
    %c0_i32 = arith.constant 0 : i32
    %c0_i32_0 = arith.constant 0 : i32
    %c0_i32_1 = arith.constant 0 : i32
    %c0_i32_2 = arith.constant 0 : i32
    return %arg0, %0, %c0_i32, %c0_i32_0, %c0_i32_1 : i32, i32, i32, i32, i32
  }
  func.func @transform_3(%arg0: i32, %arg1: i32) -> (i32, i32, i32) {
    %c0_i32 = arith.constant 0 : i32
    %c0_i32_0 = arith.constant 0 : i32
    %c0_i32_1 = arith.constant 0 : i32
    %c0_i32_2 = arith.constant 0 : i32
    return %c0_i32, %c0_i32_0, %c0_i32_1 : i32, i32, i32
  }
  func.func @transform_4(%arg0: i32, %arg1: i32) -> (i32, i32, i32, i32, i32) {
    %c0_i32 = arith.constant 0 : i32
    %c0_i32_0 = arith.constant 0 : i32
    %c0_i32_1 = arith.constant 0 : i32
    %c0_i32_2 = arith.constant 0 : i32
    return %arg0, %arg1, %c0_i32, %c0_i32_0, %c0_i32_1 : i32, i32, i32, i32, i32
  }
  func.func @transform_5(%arg0: i32, %arg1: i32) -> (i32, i32, i32, i32) {
    %c0_i32 = arith.constant 0 : i32
    %c0_i32_0 = arith.constant 0 : i32
    %c0_i32_1 = arith.constant 0 : i32
    return %arg0, %arg1, %c0_i32, %c0_i32_0 : i32, i32, i32, i32
  }
}

module attributes {stable_mosaic.version = 11 : i64} {
  func.func @_bn_add_relu_kernel(%arg0: i32, %arg1: i32, %arg2: memref<1x1x8x8x128xf32, #tpu.memory_space<vmem>>, %arg3: memref<1x1x8x8x128xf32, #tpu.memory_space<vmem>>, %arg4: memref<2x128xf32, #tpu.memory_space<vmem>>, %arg5: memref<2x128xf32, #tpu.memory_space<vmem>>, %arg6: memref<1x1x8x8x128xf32, #tpu.memory_space<vmem>>) attributes {dimension_semantics = [#tpu.dimension_semantics<parallel>, #tpu.dimension_semantics<parallel>], iteration_bounds = array<i64: 2, 8>, scalar_prefetch = 0 : i64, scratch_operands = 0 : i64, tpu.core_type = #tpu.core_type<tc>, window_params = [{transform_indices = @transform_0, window_bounds = array<i64: 1, 1, 8, 8, 128>}, {transform_indices = @transform_1, window_bounds = array<i64: 1, 1, 8, 8, 128>}, {pipeline_mode = #tpu.pipeline_mode<synchronous>, transform_indices = @transform_2, window_bounds = array<i64: 2, 128>}, {pipeline_mode = #tpu.pipeline_mode<synchronous>, transform_indices = @transform_3, window_bounds = array<i64: 2, 128>}, {transform_indices = @transform_4, window_bounds = array<i64: 1, 1, 8, 8, 128>}]} {
    %c0 = arith.constant 0 : index
    %c0_0 = arith.constant 0 : index
    %c0_1 = arith.constant 0 : index
    %c0_2 = arith.constant 0 : index
    %c0_3 = arith.constant 0 : index
    %0 = vector.load %arg2[%c0, %c0_0, %c0_1, %c0_2, %c0_3] : memref<1x1x8x8x128xf32, #tpu.memory_space<vmem>>, vector<1x1x8x8x128xf32>
    %1 = vector.shape_cast %0 : vector<1x1x8x8x128xf32> to vector<8x8x128xf32>
    %c0_4 = arith.constant 0 : index
    %c0_5 = arith.constant 0 : index
    %c0_6 = arith.constant 0 : index
    %c0_7 = arith.constant 0 : index
    %c0_8 = arith.constant 0 : index
    %2 = vector.load %arg3[%c0_4, %c0_5, %c0_6, %c0_7, %c0_8] : memref<1x1x8x8x128xf32, #tpu.memory_space<vmem>>, vector<1x1x8x8x128xf32>
    %3 = vector.shape_cast %2 : vector<1x1x8x8x128xf32> to vector<8x8x128xf32>
    %c0_9 = arith.constant 0 : index
    %c0_10 = arith.constant 0 : index
    %4 = vector.load %arg4[%c0_9, %c0_10] : memref<2x128xf32, #tpu.memory_space<vmem>>, vector<1x128xf32>
    %5 = vector.shape_cast %4 : vector<1x128xf32> to vector<1x1x128xf32>
    %c1 = arith.constant 1 : index
    %c0_11 = arith.constant 0 : index
    %6 = vector.load %arg4[%c1, %c0_11] : memref<2x128xf32, #tpu.memory_space<vmem>>, vector<1x128xf32>
    %7 = vector.shape_cast %6 : vector<1x128xf32> to vector<1x1x128xf32>
    %c0_12 = arith.constant 0 : index
    %c0_13 = arith.constant 0 : index
    %8 = vector.load %arg5[%c0_12, %c0_13] : memref<2x128xf32, #tpu.memory_space<vmem>>, vector<1x128xf32>
    %9 = vector.shape_cast %8 : vector<1x128xf32> to vector<1x1x128xf32>
    %c1_14 = arith.constant 1 : index
    %c0_15 = arith.constant 0 : index
    %10 = vector.load %arg5[%c1_14, %c0_15] : memref<2x128xf32, #tpu.memory_space<vmem>>, vector<1x128xf32>
    %11 = vector.shape_cast %10 : vector<1x128xf32> to vector<1x1x128xf32>
    %12 = vector.broadcast %5 : vector<1x1x128xf32> to vector<8x8x128xf32>
    %13 = arith.mulf %1, %12 : vector<8x8x128xf32>
    %14 = vector.broadcast %7 : vector<1x1x128xf32> to vector<8x8x128xf32>
    %15 = arith.addf %13, %14 : vector<8x8x128xf32>
    %16 = vector.broadcast %9 : vector<1x1x128xf32> to vector<8x8x128xf32>
    %17 = arith.mulf %3, %16 : vector<8x8x128xf32>
    %18 = vector.broadcast %11 : vector<1x1x128xf32> to vector<8x8x128xf32>
    %19 = arith.addf %17, %18 : vector<8x8x128xf32>
    %20 = arith.addf %15, %19 : vector<8x8x128xf32>
    %cst = arith.constant 0.000000e+00 : f32
    %21 = vector.broadcast %cst : f32 to vector<8x8x128xf32>
    %22 = arith.maximumf %20, %21 : vector<8x8x128xf32>
    %c0_16 = arith.constant 0 : index
    %c0_17 = arith.constant 0 : index
    %c0_18 = arith.constant 0 : index
    %c0_19 = arith.constant 0 : index
    %c0_20 = arith.constant 0 : index
    %23 = vector.load %arg6[%c0_16, %c0_17, %c0_18, %c0_19, %c0_20] : memref<1x1x8x8x128xf32, #tpu.memory_space<vmem>>, vector<1x1x8x8x128xf32>
    %24 = vector.shape_cast %23 : vector<1x1x8x8x128xf32> to vector<8x8x128xf32>
    %25 = vector.shape_cast %22 : vector<8x8x128xf32> to vector<1x1x8x8x128xf32>
    tpu.vector_store %arg6[%c0_16, %c0_17, %c0_18, %c0_19, %c0_20], %25 {strides = array<i32>} : memref<1x1x8x8x128xf32, #tpu.memory_space<vmem>>, vector<1x1x8x8x128xf32>,
    return
  }
  func.func @transform_0(%arg0: i32, %arg1: i32) -> (i32, i32, i32, i32, i32) {
    %c0_i32 = arith.constant 0 : i32
    %c0_i32_0 = arith.constant 0 : i32
    %c0_i32_1 = arith.constant 0 : i32
    %c0_i32_2 = arith.constant 0 : i32
    return %arg0, %arg1, %c0_i32, %c0_i32_0, %c0_i32_1 : i32, i32, i32, i32, i32
  }
  func.func @transform_1(%arg0: i32, %arg1: i32) -> (i32, i32, i32, i32, i32) {
    %c0_i32 = arith.constant 0 : i32
    %c0_i32_0 = arith.constant 0 : i32
    %c0_i32_1 = arith.constant 0 : i32
    %c0_i32_2 = arith.constant 0 : i32
    return %arg0, %arg1, %c0_i32, %c0_i32_0, %c0_i32_1 : i32, i32, i32, i32, i32
  }
  func.func @transform_2(%arg0: i32, %arg1: i32) -> (i32, i32) {
    %c0_i32 = arith.constant 0 : i32
    %c0_i32_0 = arith.constant 0 : i32
    %c0_i32_1 = arith.constant 0 : i32
    return %c0_i32, %c0_i32_0 : i32, i32
  }
  func.func @transform_3(%arg0: i32, %arg1: i32) -> (i32, i32) {
    %c0_i32 = arith.constant 0 : i32
    %c0_i32_0 = arith.constant 0 : i32
    %c0_i32_1 = arith.constant 0 : i32
    return %c0_i32, %c0_i32_0 : i32, i32
  }
  func.func @transform_4(%arg0: i32, %arg1: i32) -> (i32, i32, i32, i32, i32) {
    %c0_i32 = arith.constant 0 : i32
    %c0_i32_0 = arith.constant 0 : i32
    %c0_i32_1 = arith.constant 0 : i32
    %c0_i32_2 = arith.constant 0 : i32
    return %arg0, %arg1, %c0_i32, %c0_i32_0, %c0_i32_1 : i32, i32, i32, i32, i32
  }
}

</mosaic_0001>

<bundles_post_ra>
// kernel: resblock3d_forward.5
= control target key start
LH: loop header
LB: loop body
LE: loop exit
PB: predicated region body
PF: predicated region fallthrough
CT: control target
= control target key end

     0   :  { %s466_s9 = smov 0   ;;  %s468_s10 = smov 0   ;;  %s527_s0 = inlined_call_operand.vmem [shape: f32[2,8,8,8,128], index: 0, kind: input, shape index: {}]   ;;  %s528_s1 = inlined_call_operand.vmem [shape: f32[2,128], index: 1, kind: input, shape index: {}]   ;;  %s529_s2 = inlined_call_operand.vmem [shape: bf16[2,8,8,8,128], index: 2, kind: output, shape index: {}]  }
   0x1   :  { %s470_s11 = smov 0   ;;  %s472_s12 = smov 0  }
   0x2   :  { %s474_s13 = smov 0  }
   0x3 LB: > { %s21_s14 = sadd.s32 1, %s441_s11  ;;  %s24_s15 = sadd.s32 1, %s445_s12  ;;  %s449_s13 = sphi %s474_s13, %s12_s13   ;;  %s445_s12 = sphi %s472_s12, %s533_s12   ;;  %s441_s11 = sphi %s470_s11, %s532_s11   ;;  %s437_s10 = sphi %s468_s10, %s531_s10   ;;  %s433_s9 = sphi %s466_s9, %s530_s9  }
   0x4   : > { %p22_p0 = scmp.ge.s32.totalorder %s21_s14, 8  ;;  %p337_p1 = scmp.ge.s32.totalorder %s449_s13, 1 }
   0x5   : > { %p132_p2 = scmp.lt.s32.totalorder %s449_s13, 17 }
   0x6   : > { %s535_s14 = smov (%p22_p0, %s21_s14), 0  ;;  %s537_s15 = smov (!%p22_p0, %s24_s15), %s445_s12 }
   0x7   : > { %p133_p3 = pnand %p337_p1, %p132_p2  ;;  %p26_p4 = scmp.ge.s32.totalorder %s537_s15, 2 }
   0x8   : > { %p162_p5 = scmp.lt.s32.totalorder (!%p133_p3), %s437_s10, 1  ;;  %p164_p6 = scmp.lt.s32.totalorder (!%p133_p3), %s433_s9, 7  ;;  %v344_v0 = vld [vmem:[%s528_s1] ss:$0 sm:$0xff] (!%p133_p3)  ;;  %v345_v1 = vld [vmem:[%s528_s1 + $0x1] ss:$0 sm:$0xff] (!%p133_p3) }
   0x9   : > { %s539_s15 = smov (%p26_p4, %s537_s15), 0  ;;  %136 = sbr.rel (%p133_p3) target bundleno = 34 (0x22), region = 28 }
  0x10   : > { %s541_s10 = smov (!%p162_p5, %s437_s10), 1  ;;  %s543_s9 = smov (!%p164_p6, %s433_s9), 7 }
  0x11   : > { %s339_s16 = sshll.u32 %s541_s10, 6  ;;  %s338_s17 = sshll.u32 %s543_s9, 3 }
  0x12   : > { %s496_s18 = sadd.s32 %s339_s16, %s338_s17 }
  0x13   : > { %s340_s19 = sshll.u32 %s496_s18, 3  ;;  %s343_s27 = sshll.u32 %s496_s18, 2 }
  0x14   : > { %s170_s24 = scalar_lea.vmem %s527_s0, %s340_s19  ;;  %s179_s30 = scalar_lea.vmem %s529_s2, %s343_s27 }
  0x15   : > { %v180_v2 = vld [vmem:[%s170_s24] sm:$0xff]  ;;  %v181_v3 = vld [vmem:[%s170_s24 + $0x8] sm:$0xff]  ;;  %v182_v4 = vld [vmem:[%s170_s24 + $0x10] sm:$0xff] }
  0x16   : > { %v194_v5 = vmul.f32 %v344_v0, %v180_v2  ;;  %v195_v6 = vmul.f32 %v344_v0, %v181_v3  ;;  %v183_v7 = vld [vmem:[%s170_s24 + $0x18] sm:$0xff]  ;;  %v196_v8 = vmul.f32 %v344_v0, %v182_v4  ;;  %v184_v9 = vld [vmem:[%s170_s24 + $0x20] sm:$0xff]  ;;  %v185_v10 = vld [vmem:[%s170_s24 + $0x28] sm:$0xff] }
  0x17   : > { %v197_v11 = vmul.f32 %v344_v0, %v183_v7  ;;  %v198_v12 = vmul.f32 %v344_v0, %v184_v9  ;;  %v199_v13 = vmul.f32 %v344_v0, %v185_v10  ;;  %v186_v14 = vld [vmem:[%s170_s24 + $0x30] sm:$0xff]  ;;  %v187_v15 = vld [vmem:[%s170_s24 + $0x38] sm:$0xff] }
  0x18   : > { %v206_v16 = vadd.f32 %v345_v1, %v194_v5  ;;  %v207_v17 = vadd.f32 %v345_v1, %v195_v6  ;;  %v208_v18 = vadd.f32 %v345_v1, %v196_v8  ;;  %v200_v19 = vmul.f32 %v344_v0, %v186_v14 }
  0x19   : > { %v209_v20 = vadd.f32 %v345_v1, %v197_v11  ;;  %v210_v21 = vadd.f32 %v345_v1, %v198_v12  ;;  %v211_v22 = vadd.f32 %v345_v1, %v199_v13  ;;  %v201_v23 = vmul.f32 %v344_v0, %v187_v15 }
  0x1a   : > { %v214_v24 = vmax.f32 %v206_v16, 0.0  ;;  %v215_v25 = vmax.f32 %v207_v17, 0.0  ;;  %v216_v26 = vmax.f32 %v208_v18, 0.0  ;;  %v212_v27 = vadd.f32 %v345_v1, %v200_v19 }
  0x1b   : > { %v217_v28 = vmax.f32 %v209_v20, 0.0  ;;  %v218_v29 = vmax.f32 %v210_v21, 0.0  ;;  %v219_v30 = vmax.f32 %v211_v22, 0.0  ;;  %v213_v31 = vadd.f32 %v345_v1, %v201_v23 }
  0x1c   : > { %v351_v32 = vpack.c.bf16 %v215_v25, %v214_v24  ;;  %v220_v33 = vmax.f32 %v212_v27, 0.0 }
  0x1d   : > { %v356_v34 = vpack.c.bf16 %v217_v28, %v216_v26  ;;  %v361_v35 = vpack.c.bf16 %v219_v30, %v218_v29  ;;  %v221_v36 = vmax.f32 %v213_v31, 0.0 }
  0x1e   : > { %352 = vst [vmem:[%s179_s30] sm:$0xff] %v351_v32  }
  0x1f   : > { %368 = vst [vmem:[%s179_s30 + $0x8] sm:$0xff] %v356_v34   ;;  %369 = vst [vmem:[%s179_s30 + $0x10] sm:$0xff] %v361_v35   ;;  %v366_v37 = vpack.c.bf16 %v221_v36, %v220_v33 }
  0x21   : > { %370 = vst [vmem:[%s179_s30 + $0x18] sm:$0xff] %v366_v37  }
  0x22 PF: > { %s12_s13 = sadd.s32 1, %s449_s13   ;;  %s530_s9 = smov %s441_s11 }
  0x23   : > { %p9_p7 = scmp.ge.s32.totalorder %s12_s13, 18   ;;  %s531_s10 = smov %s445_s12 }
  0x24   : > { %s532_s11 = smov %s535_s14  ;;  %s533_s12 = smov %s539_s15 }
  0x25   :  { %11 = sbr.rel (!%p9_p7) target bundleno = 3 (0x3), region = 58 }

// kernel: resblock3d_forward.7
= control target key start
LH: loop header
LB: loop body
LE: loop exit
PB: predicated region body
PF: predicated region fallthrough
CT: control target
= control target key end

     0   :  { %s601_s15 = smov 0   ;;  %s603_s16 = smov 0   ;;  %s722_s0 = inlined_call_operand.vmem [shape: f32[2,8,8,8,128], index: 0, kind: input, shape index: {}]   ;;  %s723_s1 = inlined_call_operand.vmem [shape: f32[2,8,8,8,128], index: 1, kind: input, shape index: {}]   ;;  %s724_s2 = inlined_call_operand.vmem [shape: f32[2,128], index: 2, kind: input, shape index: {}]   ;;  %s725_s3 = inlined_call_operand.vmem [shape: f32[2,128], index: 3, kind: input, shape index: {}]   ;;  %s726_s4 = inlined_call_operand.vmem [shape: f32[2,8,8,8,128], index: 4, kind: output, shape index: {}]  }
   0x1   :  { %s605_s17 = smov 0   ;;  %s607_s18 = smov 0  }
   0x2   :  { %s609_s19 = smov 0  }
   0x3 LB: > { %s23_s20 = sadd.s32 1, %s566_s17  ;;  %s26_s21 = sadd.s32 1, %s570_s18  ;;  %s574_s19 = sphi %s609_s19, %s14_s19   ;;  %s570_s18 = sphi %s607_s18, %s730_s18   ;;  %s566_s17 = sphi %s605_s17, %s729_s17   ;;  %s562_s16 = sphi %s603_s16, %s728_s16   ;;  %s558_s15 = sphi %s601_s15, %s727_s15  }
   0x4   : > { %p24_p0 = scmp.ge.s32.totalorder %s23_s20, 8  ;;  %p480_p1 = scmp.ge.s32.totalorder %s574_s19, 1 }
   0x5   : > { %p198_p2 = scmp.lt.s32.totalorder %s574_s19, 17 }
   0x6   : > { %s732_s20 = smov (%p24_p0, %s23_s20), 0  ;;  %s734_s21 = smov (!%p24_p0, %s26_s21), %s570_s18 }
   0x7   : > { %p199_p3 = pnand %p480_p1, %p198_p2  ;;  %p28_p4 = scmp.ge.s32.totalorder %s734_s21, 2 }
   0x8   : > { %p241_p5 = scmp.lt.s32.totalorder (!%p199_p3), %s562_s16, 1  ;;  %p243_p6 = scmp.lt.s32.totalorder (!%p199_p3), %s558_s15, 7  ;;  %v490_v0 = vld [vmem:[%s724_s2] ss:$0 sm:$0xff] (!%p199_p3)  ;;  %v654_v2 = vld [vmem:[%s724_s2 + $0x1] ss:$0 sm:$0xff] (!%p199_p3) }
   0x9   : > { %s736_s21 = smov (%p28_p4, %s734_s21), 0  ;;  %202 = sbr.rel (%p199_p3) target bundleno = 40 (0x28), region = 36 }
   0xa   : > { %v492_v1 = vld [vmem:[%s725_s3] ss:$0 sm:$0xff] (!%p199_p3)  ;;  %v659_v3 = vld [vmem:[%s725_s3 + $0x1] ss:$0 sm:$0xff] (!%p199_p3) }
  0x10   : > { %s738_s16 = smov (!%p241_p5, %s562_s16), 1  ;;  %s740_s15 = smov (!%p243_p6, %s558_s15), 7 }
  0x11   : > { %s482_s22 = sshll.u32 %s738_s16, 6  ;;  %s481_s23 = sshll.u32 %s740_s15, 3 }
  0x12   : > { %s247_s24 = sadd.s32 %s482_s22, %s481_s23 }
  0x13   : > { %s631_s25 = sshll.u32 %s247_s24, 3 }
  0x14   : > { %s643_s6 = scalar_lea.vmem %s722_s0, %s631_s25  ;;  %s649_s9 = scalar_lea.vmem %s723_s1, %s631_s25 }
  0x15   : > { %v268_v4 = vld [vmem:[%s643_s6] sm:$0xff]  ;;  %v269_v6 = vld [vmem:[%s643_s6 + $0x8] sm:$0xff]  ;;  %v270_v11 = vld [vmem:[%s643_s6 + $0x10] sm:$0xff]  ;;  %s684_s16 = scalar_lea.vmem %s726_s4, %s631_s25 }
  0x16   : > { %v276_v5 = vld [vmem:[%s649_s9] sm:$0xff]  ;;  %v292_v7 = vmul.f32 %v490_v0, %v268_v4  ;;  %v277_v9 = vld [vmem:[%s649_s9 + $0x8] sm:$0xff]  ;;  %v293_v10 = vmul.f32 %v490_v0, %v269_v6  ;;  %v278_v12 = vld [vmem:[%s649_s9 + $0x10] sm:$0xff]  ;;  %v294_v14 = vmul.f32 %v490_v0, %v270_v11 }
  0x17   : > { %v316_v8 = vmul.f32 %v492_v1, %v276_v5  ;;  %v317_v13 = vmul.f32 %v492_v1, %v277_v9  ;;  %v318_v15 = vmul.f32 %v492_v1, %v278_v12  ;;  %v271_v16 = vld [vmem:[%s643_s6 + $0x18] sm:$0xff]  ;;  %v272_v18 = vld [vmem:[%s643_s6 + $0x20] sm:$0xff]  ;;  %v273_v24 = vld [vmem:[%s643_s6 + $0x28] sm:$0xff] }
  0x18   : > { %v279_v17 = vld [vmem:[%s649_s9 + $0x18] sm:$0xff]  ;;  %v304_v19 = vadd.f32 %v654_v2, %v292_v7  ;;  %v305_v21 = vadd.f32 %v654_v2, %v293_v10  ;;  %v295_v22 = vmul.f32 %v490_v0, %v271_v16  ;;  %v280_v23 = vld [vmem:[%s649_s9 + $0x20] sm:$0xff]  ;;  %v306_v26 = vadd.f32 %v654_v2, %v294_v14  ;;  %v281_v29 = vld [vmem:[%s649_s9 + $0x28] sm:$0xff] }
  0x19   : > { %v328_v20 = vadd.f32 %v659_v3, %v316_v8  ;;  %v329_v25 = vadd.f32 %v659_v3, %v317_v13  ;;  %v330_v27 = vadd.f32 %v659_v3, %v318_v15  ;;  %v319_v28 = vmul.f32 %v492_v1, %v279_v17  ;;  %v274_v38 = vld [vmem:[%s643_s6 + $0x30] sm:$0xff]  ;;  %v275_v44 = vld [vmem:[%s643_s6 + $0x38] sm:$0xff] }
  0x1a   : > { %v307_v31 = vadd.f32 %v654_v2, %v295_v22  ;;  %v296_v32 = vmul.f32 %v490_v0, %v272_v18  ;;  %v320_v33 = vmul.f32 %v492_v1, %v280_v23  ;;  %v297_v37 = vmul.f32 %v490_v0, %v273_v24  ;;  %v282_v39 = vld [vmem:[%s649_s9 + $0x30] sm:$0xff]  ;;  %v283_v45 = vld [vmem:[%s649_s9 + $0x38] sm:$0xff] }
  0x1b   : > { %v336_v30 = vadd.f32 %v328_v20, %v304_v19  ;;  %v337_v34 = vadd.f32 %v329_v25, %v305_v21  ;;  %v338_v35 = vadd.f32 %v330_v27, %v306_v26  ;;  %v331_v36 = vadd.f32 %v659_v3, %v319_v28 }
  0x1c   : > { %v308_v41 = vadd.f32 %v654_v2, %v296_v32  ;;  %v332_v42 = vadd.f32 %v659_v3, %v320_v33  ;;  %v321_v43 = vmul.f32 %v492_v1, %v281_v29  ;;  %v309_v49 = vadd.f32 %v654_v2, %v297_v37 }
  0x1d   : > { %v344_v40 = vmax.f32 %v336_v30, 0.0  ;;  %v345_v46 = vmax.f32 %v337_v34, 0.0  ;;  %v346_v47 = vmax.f32 %v338_v35, 0.0  ;;  %v339_v48 = vadd.f32 %v331_v36, %v307_v31 }
  0x1e   : > { %v340_v50 = vadd.f32 %v332_v42, %v308_v41  ;;  %v333_v51 = vadd.f32 %v659_v3, %v321_v43  ;;  %v298_v52 = vmul.f32 %v490_v0, %v274_v38  ;;  %v322_v53 = vmul.f32 %v492_v1, %v282_v39 }
  0x1f   : > { %352 = vst [vmem:[%s684_s16] sm:$0xff] %v344_v40  ;;  %353 = vst [vmem:[%s684_s16 + $0x8] sm:$0xff] %v345_v46  ;;  %v347_v54 = vmax.f32 %v339_v48, 0.0  ;;  %v299_v55 = vmul.f32 %v490_v0, %v275_v44  ;;  %v323_v56 = vmul.f32 %v492_v1, %v283_v45 }
  0x20   : > { %354 = vst [vmem:[%s684_s16 + $0x10] sm:$0xff] %v346_v47  ;;  %v348_v57 = vmax.f32 %v340_v50, 0.0  ;;  %v341_v58 = vadd.f32 %v333_v51, %v309_v49  ;;  %v310_v59 = vadd.f32 %v654_v2, %v298_v52  ;;  %v334_v60 = vadd.f32 %v659_v3, %v322_v53 }
  0x21   : > { %355 = vst [vmem:[%s684_s16 + $0x18] sm:$0xff] %v347_v54  ;;  %v311_v61 = vadd.f32 %v654_v2, %v299_v55  ;;  %v335_v62 = vadd.f32 %v659_v3, %v323_v56 }
  0x22   : > { %356 = vst [vmem:[%s684_s16 + $0x20] sm:$0xff] %v348_v57  ;;  %v349_v63 = vmax.f32 %v341_v58, 0.0  ;;  %v342_v4 = vadd.f32 %v334_v60, %v310_v59 }
  0x23   : > { %v343_v5 = vadd.f32 %v335_v62, %v311_v61 }
  0x24   : > { %357 = vst [vmem:[%s684_s16 + $0x28] sm:$0xff] %v349_v63  ;;  %v350_v0 = vmax.f32 %v342_v4, 0.0 }
  0x25   : > { %v351_v6 = vmax.f32 %v343_v5, 0.0 }
  0x26   : > { %358 = vst [vmem:[%s684_s16 + $0x30] sm:$0xff] %v350_v0 }
  0x27   : > { %359 = vst [vmem:[%s684_s16 + $0x38] sm:$0xff] %v351_v6 }
  0x28 PF: > { %s14_s19 = sadd.s32 1, %s574_s19   ;;  %s727_s15 = smov %s566_s17 }
  0x29   : > { %p11_p7 = scmp.ge.s32.totalorder %s14_s19, 18   ;;  %s728_s16 = smov %s570_s18 }
  0x2a   : > { %s729_s17 = smov %s732_s20  ;;  %s730_s18 = smov %s736_s21 }
  0x2b   :  { %13 = sbr.rel (!%p11_p7) target bundleno = 3 (0x3), region = 69 }

// kernel: resblock3d_forward.4
= control target key start
LH: loop header
LB: loop body
LE: loop exit
PB: predicated region body
PF: predicated region fallthrough
CT: control target
= control target key end

     0   :  { %s9736_s27 = smov 0   ;;  %s9738_s28 = smov 0   ;;  %s11553_s0 = inlined_call_operand.vmem [shape: bf16[2,10,10,10,128], index: 0, kind: input, shape index: {}, may-alias: {0,1,2}]   ;;  %s11554_s1 = inlined_call_operand.vmem [shape: bf16[2,10,10,10,128], index: 1, kind: input, shape index: {}, may-alias: {0,1,2}]   ;;  %s11555_s2 = inlined_call_operand.vmem [shape: bf16[2,10,10,10,128], index: 2, kind: input, shape index: {}, may-alias: {0,1,2}]   ;;  %s11556_s3 = inlined_call_operand.vmem [shape: bf16[27,128,128], index: 3, kind: input, shape index: {}]   ;;  %s11557_s4 = inlined_call_operand.vmem [shape: bf16[128,128], index: 4, kind: input, shape index: {}]   ;;  %s11558_s5 = inlined_call_operand.vmem [shape: f32[2,8,8,8,128], index: 5, kind: output, shape index: {0}]   ;;  %s11559_s6 = inlined_call_operand.vmem [shape: f32[2,8,8,8,128], index: 6, kind: output, shape index: {1}]   ;;  %s11560_s7 = inlined_call_operand.vmem [shape: f32[2,8,2,128], index: 7, kind: output, shape index: {2}]   ;;  %s11561_s8 = inlined_call_operand.vmem [shape: f32[2,8,2,128], index: 8, kind: output, shape index: {3}]  }
   0x1   :  { %s9740_s29 = smov 0   ;;  %s9742_s30 = smov 0  }
   0x2   :  { %s9744_s9 = smov 0  }
   0x3 LB: > { %s28_s10 = sadd.s32 1, %s9681_s29  ;;  %s31_s11 = sadd.s32 1, %s9685_s30  ;;  %s9689_s9 = sphi %s9744_s9, %s19_s9   ;;  %s9685_s30 = sphi %s9742_s30, %s11570_s30   ;;  %s9681_s29 = sphi %s9740_s29, %s11569_s29   ;;  %s9677_s28 = sphi %s9738_s28, %s11568_s28   ;;  %s9673_s27 = sphi %s9736_s27, %s11567_s27  }
   0x4   : > { %p29_p0 = scmp.ge.s32.totalorder %s28_s10, 8  ;;  %p7083_p1 = scmp.ge.s32.totalorder %s9689_s9, 1 }
   0x5   : > { %p335_p2 = scmp.lt.s32.totalorder %s9689_s9, 17 }
   0x6   : > { %s11572_s10 = smov (%p29_p0, %s28_s10), 0  ;;  %s11574_s11 = smov (!%p29_p0, %s31_s11), %s9685_s30 }
   0x7   : > { %p336_p3 = pnand %p7083_p1, %p335_p2  ;;  %p33_p4 = scmp.ge.s32.totalorder %s11574_s11, 2 }
   0x8   : > { %v9391_v0 = vld [vmem:[%s11556_s3 + $0x40] sm:$0xff] (!%p336_p3)   ;;  %p422_p5 = scmp.lt.s32.totalorder (!%p336_p3), %s9677_s28, 1  ;;  %p424_p6 = scmp.lt.s32.totalorder (!%p336_p3), %s9673_s27, 9  ;;  %v9393_v2 = vld [vmem:[%s11556_s3 + $0x48] sm:$0xff] (!%p336_p3)   ;;  %v9395_v4 = vld [vmem:[%s11556_s3 + $0x50] sm:$0xff] (!%p336_p3)   ;;  %vm942_vm3 = vcmask (!%p336_p3), 1042432  }
   0x9   : > { %s11576_s11 = smov (%p33_p4, %s11574_s11), 0  ;;  %339 = sbr.rel (%p336_p3) target bundleno = 715 (0x2cb), region = 40 }
   0xa   : > { %v9392_v1 = vld [vmem:[%s11556_s3 + $0x340] sm:$0xff] (!%p336_p3)   ;;  %8467 = vmatprep.subr.bf16.mxu1 (!%p336_p3), %v9391_v0  ;;  %v9394_v3 = vld [vmem:[%s11556_s3 + $0x348] sm:$0xff] (!%p336_p3)   ;;  %v9396_v5 = vld [vmem:[%s11556_s3 + $0x350] sm:$0xff] (!%p336_p3)   ;;  %s431_s12 = sadd.s32 (!%p336_p3), 1, %s9673_s27  ;;  %vm520_vm0 = vsmask.f32 (!%p336_p3), 3328 }
   0xb   : > { %8779 = vmatprep.subr.bf16.mxu0 (!%p336_p3), %v9392_v1  ;;  %8468 = vmatpush3.bf16.msra.mxu1 (!%p336_p3), %v9391_v0  ;;  %p434_p7 = scmp.lt.s32.totalorder (!%p336_p3), %s431_s12, 9  ;;  %v9397_v6 = vld [vmem:[%s11556_s3 + $0x58] sm:$0xff] (!%p336_p3)   ;;  %v9399_v8 = vld [vmem:[%s11556_s3 + $0x60] sm:$0xff] (!%p336_p3)   ;;  %v9401_v10 = vld [vmem:[%s11556_s3 + $0x68] sm:$0xff] (!%p336_p3)   ;;  %vm521_vm1 = vsmask.f32 (!%p336_p3), 7440 }
   0xc   : > { %8780 = vmatpush3.bf16.msra.mxu0 (!%p336_p3), %v9392_v1  ;;  %8469 = vmatprep.subr.bf16.mxu1 (!%p336_p3), %v9393_v2  ;;  %v9398_v7 = vld [vmem:[%s11556_s3 + $0x358] sm:$0xff] (!%p336_p3)   ;;  %v9400_v9 = vld [vmem:[%s11556_s3 + $0x360] sm:$0xff] (!%p336_p3)   ;;  %v9402_v13 = vld [vmem:[%s11556_s3 + $0x368] sm:$0xff] (!%p336_p3)   ;;  %vm943_vm4 = vcmask (!%p336_p3), 1046532   ;;  %s442_s19 = sadd.s32 (!%p336_p3), 2, %s9673_s27  ;;  %p455_p9 = scmp.lt.s32.totalorder (!%p336_p3), %s9673_s27, 7 }
   0xd   : > { %8781 = vmatprep.subr.bf16.mxu0 (!%p336_p3), %v9394_v3  ;;  %v9403_v16 = vld [vmem:[%s11556_s3 + $0x70] sm:$0xff] (!%p336_p3)   ;;  %v9405_v34 = vld [vmem:[%s11556_s3 + $0x78] sm:$0xff] (!%p336_p3)   ;;  %vm9857_vm2 = vmor (!%p336_p3), %vm520_vm0, %vm521_vm1  ;;  %p10253_p8 = scmp.lt.s32.totalorder (!%p336_p3), %s442_s19, 9  ;;  %vm6475_vm6 = vcmask (!%p336_p3), 1040384  }
   0xe   : > { %v9404_v20 = vld [vmem:[%s11556_s3 + $0x370] sm:$0xff] (!%p336_p3)   ;;  %v9406_v45 = vld [vmem:[%s11556_s3 + $0x378] sm:$0xff] (!%p336_p3)   ;;  %v9407_v60 = vld [vmem:[%s11556_s3] sm:$0xff] (!%p336_p3)  }
   0xf   : > { %8470 = vmatpush3.bf16.msra.mxu1 (!%p336_p3), %v9393_v2  ;;  %v9888_v62 = vld [vmem:[%s11556_s3 + $0x380] sm:$0xff] (!%p336_p3)   ;;  %vm10031_vm5 = vmor (!%p336_p3), %vm942_vm3, %vm943_vm4 }
  0x10   : > { %s11578_s28 = smov (!%p422_p5, %s9677_s28), 1  ;;  %8782 = vmatpush3.bf16.msra.mxu0 %v9394_v3  ;;  %8471 = vmatprep.subr.bf16.mxu1 %v9395_v4  ;;  %s11580_s12 = smov (!%p434_p7, %s431_s12), 9 }
  0x11   : > { %s425_s20 = scalar_select %p424_p6, %s9673_s27, 9  ;;  %8783 = vmatprep.subr.bf16.mxu0 %v9396_v5 }
  0x12   : > { %s9788_s23 = smul.u32 200, %s11578_s28  ;;  %s11582_s19 = smov (!%p10253_p8, %s442_s19), 9 }
  0x13   : > { %s9347_s26 = smul.u32 20, %s425_s20  ;;  %8472 = vmatpush3.bf16.msra.mxu1 %v9395_v4  ;;  %s11584_s27 = smov (!%p455_p9, %s9673_s27), 7 }
  0x14   : > { %8784 = vmatpush3.bf16.msra.mxu0 %v9396_v5  ;;  %8473 = vmatprep.subr.bf16.mxu1 %v9397_v6  ;;  %s9349_s21 = smul.u32 20, %s11580_s12 }
  0x15   : > { %s428_s13 = sadd.s32 %s9788_s23, %s9347_s26  ;;  %8785 = vmatprep.subr.bf16.mxu0 %v9398_v7  ;;  %s9350_s15 = smul.u32 20, %s11582_s19 }
  0x16   : > { %s7084_s18 = sshll.u32 %s428_s13, 2  ;;  %s438_s13 = sadd.s32 %s9349_s21, %s9788_s23 }
  0x17   : > { %s9810_s14 = scalar_lea.vmem %s11553_s0, %s7084_s18  ;;  %8474 = vmatpush3.bf16.msra.mxu1 %v9397_v6  ;;  %s7085_s16 = sshll.u32 %s438_s13, 2 }
  0x18   : > { %8786 = vmatpush3.bf16.msra.mxu0 %v9398_v7  ;;  %8475 = vmatprep.subr.bf16.mxu1 %v9399_v8  ;;  %v9817_v11 = vld [vmem:[%s9810_s14] sm:$0xf]  ;;  %v9820_v12 = vld [vmem:[%s9810_s14 + $0x8] sm:$0xf]  ;;  %v9826_v14 = vld [vmem:[%s9810_s14 + $0x4] sm:$0x1]  ;;  %s9843_s26 = scalar_lea.vmem %s11554_s1, %s7085_s16  ;;  %s10417_s20 = sadd.s32 %s9350_s15, %s9788_s23 }
  0x19   : > { %8787 = vmatprep.subr.bf16.mxu0 %v9400_v9  ;;  %v9829_v15 = vld [vmem:[%s9810_s14 + $0xc] sm:$0x1]  ;;  %v524_v17 = vshrl.u32 %v9817_v11, 16  ;;  %v527_v18 = vshll.u32 %v9817_v11, 16  ;;  %v533_v19 = vshll.u32 %v9826_v14, 16  ;;  %v538_v21 = vshrl.u32 %v9820_v12, 16 }
  0x1a   : > { %v541_v22 = vshll.u32 %v9820_v12, 16  ;;  %v547_v23 = vshll.u32 %v9829_v15, 16  ;;  %v7549_v31 = vld [vmem:[%s9843_s26 + $0x8] sm:$0xf]  ;;  %v9850_v32 = vld [vmem:[%s9843_s26 + $0xc] sm:$0x1] }
  0x1b   : > { %8476 = vmatpush3.bf16.msra.mxu1 %v9399_v8  ;;  %v526_v24 = vrot.slane %v524_v17, 4  ;;  %v529_v25 = vrot.slane %v527_v18, 5  ;;  %v535_v26 = vrot.slane %v533_v19, 5  ;;  %v540_v27 = vrot.slane %v538_v21, 4  ;;  %v7551_v33 = vld [vmem:[%s9843_s26 + $0x10] sm:$0xf] }
  0x1c   : > { %8788 = vmatpush3.bf16.msra.mxu0 %v9400_v9  ;;  %8477 = vmatprep.subr.bf16.mxu1 %v9401_v10  ;;  %v543_v28 = vrot.slane %v541_v22, 5  ;;  %v549_v29 = vrot.slane %v547_v23, 5  ;;  %v9862_v37 = vld [vmem:[%s9843_s26 + $0x14] sm:$0x1]  ;;  %v3307_v38 = vshrl.u32 %v7549_v31, 16  ;;  %v3310_v39 = vshll.u32 %v7549_v31, 16 }
  0x1d   : > { %8789 = vmatprep.subr.bf16.mxu0 %v9402_v13  ;;  %v530_v30 = vor.u32 %v529_v25, %v526_v24  ;;  %v3316_v40 = vshll.u32 %v9850_v32, 16  ;;  %v3321_v42 = vshrl.u32 %v7551_v33, 16  ;;  %v3324_v43 = vshll.u32 %v7551_v33, 16  ;;  %v9872_v52 = vld [vmem:[%s9810_s14 + $0x10] sm:$0xf]  ;;  %s7086_s22 = sshll.u32 %s10417_s20, 2 }
  0x1e   : > { %v544_v36 = vor.u32 %v543_v28, %v540_v27  ;;  %v3330_v44 = vshll.u32 %v9862_v37, 16  ;;  %v3309_v47 = vrot.slane %v3307_v38, 4  ;;  %v3312_v48 = vrot.slane %v3310_v39, 5  ;;  %v9877_v57 = vld [vmem:[%s9810_s14 + $0x18] sm:$0xf]  ;;  %s10465_s19 = scalar_lea.vmem %s11555_s2, %s7086_s22  ;;  %s7088_s22 = sshll.u32 %s11578_s28, 6 }
  0x1f   : > { %8478 = vmatpush3.bf16.msra.mxu1 %v9401_v10  ;;  %v531_v41 = vrot.slane %v530_v30, 4  ;;  %v3323_v50 = vrot.slane %v3321_v42, 4  ;;  %v3326_v51 = vrot.slane %v3324_v43, 5  ;;  %v3318_v55 = vrot.slane %v3316_v40, 5  ;;  %v9880_v58 = vld [vmem:[%s9810_s14 + $0x14] sm:$0x1] }
  0x20   : > { %8790 = vmatpush3.bf16.msra.mxu0 %v9402_v13  ;;  %8479 = vmatprep.subr.bf16.mxu1 %v9403_v16  ;;  %v545_v46 = vrot.slane %v544_v36, 4  ;;  %v3313_v54 = vor.u32 %v3312_v48, %v3309_v47  ;;  %v3332_v56 = vrot.slane %v3330_v44, 5  ;;  %v9891_v63 = vld [vmem:[%s9810_s14 + $0x1c] sm:$0x1]  ;;  %v552_v0 = vshrl.u32 %v9872_v52, 16  ;;  %v9409_v44 = vld [vmem:[%s11556_s3 + $0x8] sm:$0xff]  }
  0x21   : > { %8791 = vmatprep.subr.bf16.mxu0 %v9404_v20  ;;  %v536_v49 = vsel %vm9857_vm2, %v531_v41, %v535_v26  ;;  %v3327_v61 = vor.u32 %v3326_v51, %v3323_v50  ;;  %v555_v1 = vshll.u32 %v9872_v52, 16  ;;  %v561_v3 = vshll.u32 %v9880_v58, 16  ;;  %v7553_v6 = vld [vmem:[%s9843_s26 + $0x18] sm:$0xf]  ;;  %v9901_v13 = vld [vmem:[%s9843_s26 + $0x1c] sm:$0x1] }
  0x22   : > { %v550_v53 = vsel %vm9857_vm2, %v545_v46, %v549_v29  ;;  %v3314_v2 = vrot.slane %v3313_v54, 4  ;;  %v566_v4 = vshrl.u32 %v9877_v57, 16  ;;  %v569_v5 = vshll.u32 %v9877_v57, 16  ;;  %v9909_v23 = vld [vmem:[%s9843_s26 + $0x24] sm:$0x1]  ;;  %s7093_s18 = sshll.u32 %s11578_s28, 3 }
  0x23   : > { %8480 = vmatpush3.bf16.msra.mxu1 %v9403_v16  ;;  %v7113_v59 = vcombine.low %v536_v49, %v550_v53  ;;  %v3328_v7 = vrot.slane %v3327_v61, 4  ;;  %v554_v8 = vrot.slane %v552_v0, 4  ;;  %v557_v9 = vrot.slane %v555_v1, 5  ;;  %v9411_v53 = vld [vmem:[%s11556_s3 + $0x10] sm:$0xff]   ;;  %v9931_v61 = vld [vmem:[%s9810_s14 + $0x20] sm:$0xf]  ;;  %s476_s20 = sadd.s32 %s7093_s18, %s11584_s27 }
  0x24   : > { %8792 = vmatpush3.bf16.msra.mxu0 %v9404_v20  ;;  %8481 = vmatprep.subr.bf16.mxu1 %v9405_v34  ;;  %v575_v10 = vshll.u32 %v9891_v63, 16  ;;  %v3319_v16 = vsel %vm9857_vm2, %v3314_v2, %v3318_v55  ;;  %v563_v17 = vrot.slane %v561_v3, 5  ;;  %v568_v18 = vrot.slane %v566_v4, 4  ;;  %v7555_v20 = vld [vmem:[%s9843_s26 + $0x20] sm:$0xf]  ;;  %v9410_v3 = vld [vmem:[%s11556_s3 + $0x388] sm:$0xff]  }
  0x25   : > { %8793 = vmatprep.subr.bf16.mxu0 %v9406_v45  ;;  %8483 = vmatprep.mubr.bf16.mxu1 %v7113_v59  ;;  %v571_v19 = vrot.slane %v569_v5, 5  ;;  %v3333_v21 = vsel %vm9857_vm2, %v3328_v7, %v3332_v56  ;;  %v558_v22 = vor.u32 %v557_v9, %v554_v8  ;;  %v3335_v27 = vshrl.u32 %v7553_v6, 16  ;;  %v9934_v0 = vld [vmem:[%s9810_s14 + $0x28] sm:$0xf]  ;;  %v9937_v1 = vld [vmem:[%s9810_s14 + $0x24] sm:$0x1] }
  0x26   : > { %v7581_v24 = vcombine.low %v3319_v16, %v3333_v21  ;;  %v577_v26 = vrot.slane %v575_v10, 5  ;;  %v3338_v29 = vshll.u32 %v7553_v6, 16  ;;  %v3344_v30 = vshll.u32 %v9901_v13, 16  ;;  %v9413_v7 = vld [vmem:[%s11556_s3 + $0x18] sm:$0xff]   ;;  %s7094_s23 = sshll.u32 %s476_s20, 1 }
  0x27   : > { %8482 = vmatpush3.bf16.msra.mxu1 %v9405_v34  ;;  %v572_v25 = vor.u32 %v571_v19, %v568_v18  ;;  %v559_v28 = vrot.slane %v558_v22, 4  ;;  %v3349_v31 = vshrl.u32 %v7555_v20, 16  ;;  %v3337_v34 = vrot.slane %v3335_v27, 4  ;;  %v9412_v18 = vld [vmem:[%s11556_s3 + $0x390] sm:$0xff]   ;;  %s486_s21 = scalar_lea.vmem %s11561_s8, %s7094_s23 }
  0x28   : > { %8794 = vmatpush3.bf16.msra.mxu0 %v9406_v45  ;;  %8491 = vmatprep.subr.bf16.mxu1 %v9407_v60  ;;  %v3352_v36 = vshll.u32 %v7555_v20, 16  ;;  %v3358_v38 = vshll.u32 %v9909_v23, 16  ;;  %v3340_v40 = vrot.slane %v3338_v29, 5  ;;  %v3346_v47 = vrot.slane %v3344_v30, 5  ;;  %v7559_v29 = vld [vmem:[%s9843_s26 + $0x30] sm:$0xf] }
  0x29   : > { %8803 = vmatprep.subr.bf16.mxu0 %v9888_v62  ;;  %8795 = vmatprep.mubr.bf16.mxu0 %v7581_v24  ;;  %v573_v33 = vrot.slane %v572_v25, 4  ;;  %v564_v39 = vsel %vm9857_vm2, %v559_v28, %v563_v17  ;;  %v3351_v41 = vrot.slane %v3349_v31, 4  ;;  %v3598_v50 = vrot.slane %v9850_v32, 5  ;;  %v9962_v28 = vld [vmem:[%s9843_s26 + $0x2c] sm:$0x1]  ;;  %v9415_v31 = vld [vmem:[%s11556_s3 + $0x20] sm:$0xff]  }
  0x2a   : > { %v3354_v43 = vrot.slane %v3352_v36, 5  ;;  %v3341_v46 = vor.u32 %v3340_v40, %v3337_v34  ;;  %v3360_v48 = vrot.slane %v3358_v38, 5  ;;  %v3602_v54 = vrot.slane %v9862_v37, 5  ;;  %v9966_v30 = vld [vmem:[%s9843_s26 + $0x34] sm:$0x1]  ;;  %v9414_v38 = vld [vmem:[%s11556_s3 + $0x398] sm:$0xff]  }
  0x2b   : > { %v578_v42 = vsel %vm9857_vm2, %v573_v33, %v577_v26  ;;  %v580_v4 = vshrl.u32 %v9931_v61, 16  ;;  %v583_v5 = vshll.u32 %v9931_v61, 16  ;;  %v589_v6 = vshll.u32 %v9937_v1, 16  ;;  %v7557_v26 = vld [vmem:[%s9843_s26 + $0x28] sm:$0xf]  ;;  %v9422_v37 = vld [vmem:[%s11556_s3 + $0x3b8] sm:$0xff]  }
  0x2c   : > { %v7114_v45 = vcombine.low %v564_v39, %v578_v42  ;;  %v3355_v49 = vor.u32 %v3354_v43, %v3351_v41  ;;  %v3342_v51 = vrot.slane %v3341_v46, 4  ;;  %v594_v8 = vshrl.u32 %v9934_v0, 16 }
  0x2d   : > { %v597_v9 = vshll.u32 %v9934_v0, 16  ;;  %v3606_v16 = vrot.slane %v9901_v13, 5  ;;  %v3610_v17 = vrot.slane %v9909_v23, 5  ;;  %v582_v19 = vrot.slane %v580_v4, 4  ;;  %v9993_v4 = vld [vmem:[%s9810_s14 + $0x3c] sm:$0x1] }
  0x2e   : > { %8484 = vmatmul.mubr.bf16.vlgmr.msra.gmra.mrb[0].mxu1 %v7114_v45  ;;  %v3356_v55 = vrot.slane %v3355_v49, 4  ;;  %v3347_v56 = vsel %vm9857_vm2, %v3342_v51, %v3346_v47  ;;  %v585_v20 = vrot.slane %v583_v5, 5  ;;  %v591_v21 = vrot.slane %v589_v6, 5  ;;  %v9977_v47 = vld [vmem:[%s9810_s14 + $0x30] sm:$0xf]  ;;  %v9425_v13 = vld [vmem:[%s11556_s3 + $0x3c0] sm:$0xff]  }
  0x2f   : > { %8492 = vmatpush3.bf16.msra.mxu1 %v9407_v60  ;;  %v9943_v60 = vld [vmem:[%s9810_s14 + $0x2c] sm:$0x1]  ;;  %v596_v22 = vrot.slane %v594_v8, 4  ;;  %v599_v24 = vrot.slane %v597_v9, 5  ;;  %v3366_v34 = vshll.u32 %v7557_v26, 16  ;;  %v3372_v36 = vshll.u32 %v9962_v28, 16 }
  0x30   : > { %8493 = vmatprep.subr.bf16.mxu1 %v9409_v44  ;;  %v3361_v59 = vsel %vm9857_vm2, %v3356_v55, %v3360_v48  ;;  %v603_v10 = vshll.u32 %v9943_v60, 16  ;;  %v586_v27 = vor.u32 %v585_v20, %v582_v19  ;;  %v3377_v40 = vshrl.u32 %v7559_v29, 16  ;;  %v9417_v48 = vld [vmem:[%s11556_s3 + $0x28] sm:$0xff]   ;;  %v9416_v8 = vld [vmem:[%s11556_s3 + $0x3a0] sm:$0xff]   ;;  %v7561_v20 = vld [vmem:[%s9843_s26 + $0x38] sm:$0xf] }
  0x31   : > { %v7582_v2 = vcombine.low %v3347_v56, %v3361_v59  ;;  %v600_v33 = vor.u32 %v599_v24, %v596_v22  ;;  %v3380_v41 = vshll.u32 %v7559_v29, 16  ;;  %v3386_v42 = vshll.u32 %v9966_v30, 16  ;;  %v9985_v56 = vld [vmem:[%s9810_s14 + $0x38] sm:$0xf] }
  0x32   : > { %v605_v25 = vrot.slane %v603_v10, 5  ;;  %v587_v39 = vrot.slane %v586_v27, 4  ;;  %v3368_v45 = vrot.slane %v3366_v34, 5  ;;  %v3374_v46 = vrot.slane %v3372_v36, 5  ;;  %v7563_v27 = vld [vmem:[%s9843_s26 + $0x40] sm:$0xf] }
  0x33   : > { %8494 = vmatpush3.bf16.msra.mxu1 %v9409_v44  ;;  %8796 = vmatmul.mubr.bf16.vlgmr.msra.gmra.mrb[0].mxu0 %v7582_v2  ;;  %v601_v43 = vrot.slane %v600_v33, 4  ;;  %v3379_v51 = vrot.slane %v3377_v40, 4  ;;  %v3388_v55 = vrot.slane %v3386_v42, 5  ;;  %v608_v5 = vshrl.u32 %v9977_v47, 16  ;;  %v10010_v36 = vld [vmem:[%s9843_s26 + $0x44] sm:$0x1] }
  0x34   : > { %8495 = vmatprep.subr.bf16.mxu1 %v9411_v53  ;;  %8804 = vmatpush3.bf16.msra.mxu0 %v9888_v62  ;;  %v3363_v62 = vshrl.u32 %v7557_v26, 16  ;;  %v592_v49 = vsel %vm9857_vm2, %v587_v39, %v591_v21  ;;  %v611_v6 = vshll.u32 %v9977_v47, 16  ;;  %v622_v19 = vshrl.u32 %v9985_v56, 16  ;;  %v10004_v21 = vld [vmem:[%s9843_s26 + $0x3c] sm:$0x1]  ;;  %v9418_v42 = vld [vmem:[%s11556_s3 + $0x3a8] sm:$0xff]  }
  0x35   : > { %8805 = vmatprep.subr.bf16.mxu0 %v9410_v3  ;;  %v606_v59 = vsel %vm9857_vm2, %v601_v43, %v605_v25  ;;  %v610_v24 = vrot.slane %v608_v5, 4  ;;  %v625_v26 = vshll.u32 %v9985_v56, 16  ;;  %v631_v34 = vshll.u32 %v9993_v4, 16  ;;  %v9419_v43 = vld [vmem:[%s11556_s3 + $0x30] sm:$0xff]  }
  0x36   : > { %v3365_v44 = vrot.slane %v3363_v62, 4  ;;  %v7115_v9 = vcombine.low %v592_v49, %v606_v59  ;;  %v613_v25 = vrot.slane %v611_v6, 5  ;;  %v624_v62 = vrot.slane %v622_v19, 4 }
  0x37   : > { %8496 = vmatpush3.bf16.msra.mxu1 %v9411_v53  ;;  %v3382_v53 = vrot.slane %v3380_v41, 5  ;;  %v627_v40 = vrot.slane %v625_v26, 5  ;;  %v3391_v41 = vshrl.u32 %v7561_v20, 16  ;;  %v3400_v49 = vshll.u32 %v10004_v21, 16 }
  0x38   : > { %8497 = vmatprep.subr.bf16.mxu1 %v9413_v7  ;;  %8806 = vmatpush3.bf16.msra.mxu0 %v9410_v3  ;;  %v3369_v2 = vor.u32 %v3368_v45, %v3365_v44  ;;  %v9990_v3 = vld [vmem:[%s9810_s14 + $0x34] sm:$0x1]  ;;  %v633_v45 = vrot.slane %v631_v34, 5  ;;  %v3405_v6 = vshrl.u32 %v7563_v27, 16  ;;  %v3614_v23 = vrot.slane %v9962_v28, 5 }
  0x39   : > { %8807 = vmatprep.subr.bf16.mxu0 %v9412_v18  ;;  %v617_v10 = vshll.u32 %v9990_v3, 16  ;;  %8487 = vmatprep.mubr.bf16.mxu1 %v7115_v9  ;;  %v3393_v59 = vrot.slane %v3391_v41, 4  ;;  %v3402_v5 = vrot.slane %v3400_v49, 5  ;;  %v3408_v9 = vshll.u32 %v7563_v27, 16  ;;  %v9420_v27 = vld [vmem:[%s11556_s3 + $0x3b0] sm:$0xff]  }
  0x3a   : > { %v3370_v22 = vrot.slane %v3369_v2, 4  ;;  %v7595_v41 = vld [vmem:[%s9843_s26 + $0x18] sm:$0xe]  ;;  %v3622_v28 = vrot.slane %v10004_v21, 5  ;;  %v955_v21 = vrot.slane %v9880_v58, 5 }
  0x3b   : > { %8498 = vmatpush3.bf16.msra.mxu1 %v9413_v7  ;;  %v3383_v7 = vor.u32 %v3382_v53, %v3379_v51  ;;  %v619_v33 = vrot.slane %v617_v10, 5  ;;  %v628_v53 = vor.u32 %v627_v40, %v624_v62  ;;  %v3414_v10 = vshll.u32 %v10010_v36, 16 }
  0x3c   : > { %8499 = vmatprep.subr.bf16.mxu1 %v9415_v31  ;;  %8808 = vmatpush3.bf16.msra.mxu0 %v9412_v18  ;;  %v3375_v39 = vsel %vm9857_vm2, %v3370_v22, %v3374_v46  ;;  %v614_v18 = vor.u32 %v613_v25, %v610_v24  ;;  %v3410_v22 = vrot.slane %v3408_v9, 5  ;;  %v9421_v24 = vld [vmem:[%s11556_s3 + $0x38] sm:$0xff]   ;;  %v7594_v25 = vld [vmem:[%s9843_s26 + $0x10] sm:$0xe] }
  0x3d   : > { %8809 = vmatprep.subr.bf16.mxu0 %v9414_v38  ;;  %v3384_v29 = vrot.slane %v3383_v7, 4  ;;  %v629_v7 = vrot.slane %v628_v53, 4  ;;  %v7602_v62 = vrot.slane %v7594_v25, 9  ;;  %v3416_v40 = vrot.slane %v3414_v10, 5  ;;  %v7599_v9 = vld [vmem:[%s9843_s26 + $0x38] sm:$0xe] }
  0x3e   : > { %v615_v51 = vrot.slane %v614_v18, 4  ;;  %v9430_v25 = vld [vmem:[%s11556_s3 + $0x3d0] sm:$0xff]  }
  0x3f   : > { %8500 = vmatpush3.bf16.msra.mxu1 %v9415_v31  ;;  %v3389_v44 = vsel %vm9857_vm2, %v3384_v29, %v3388_v55  ;;  %v3394_v31 = vshll.u32 %v7561_v20, 16  ;;  %v3407_v20 = vrot.slane %v3405_v6, 4  ;;  %v634_v29 = vsel %vm9857_vm2, %v629_v7, %v633_v45 }
  0x40   : > { %8501 = vmatprep.subr.bf16.mxu1 %v9417_v48  ;;  %8810 = vmatpush3.bf16.msra.mxu0 %v9414_v38  ;;  %v7583_v46 = vcombine.low %v3375_v39, %v3389_v44  ;;  %v620_v55 = vsel %vm9857_vm2, %v615_v51, %v619_v33  ;;  %v7593_v38 = vld [vmem:[%s9843_s26 + $0x8] sm:$0xe]  ;;  %v7125_v33 = vcombine.low %v9817_v11, %v9820_v12  ;;  %v7596_v44 = vld [vmem:[%s9843_s26 + $0x20] sm:$0xe]  ;;  %v7603_v12 = vrot.slane %v7595_v41, 9 }
  0x41   : > { %8811 = vmatprep.subr.bf16.mxu0 %v9416_v8  ;;  %v3396_v2 = vrot.slane %v3394_v31, 5  ;;  %v7601_v26 = vrot.slane %v7593_v38, 9  ;;  %v7116_v34 = vcombine.low %v620_v55, %v634_v29  ;;  %v3411_v18 = vor.u32 %v3410_v22, %v3407_v20  ;;  %v7600_v55 = vld [vmem:[%s9843_s26 + $0x40] sm:$0xe] }
  0x42   : > { %8799 = vmatprep.mubr.bf16.mxu0 %v7583_v46  ;;  %v3603_v11 = vsel %vm10031_vm5, %v7602_v62, %v3602_v54  ;;  %v7604_v49 = vrot.slane %v7596_v44, 9  ;;  %v7126_v54 = vcombine.low %v9872_v52, %v9877_v57  ;;  %v3607_v51 = vsel %vm10031_vm5, %v7603_v12, %v3606_v16  ;;  %v9427_v52 = vld [vmem:[%s11556_s3 + $0x88] sm:$0xff]   ;;  %v918_v22 = vld [vmem:[%s9810_s14] sm:$0xe]  ;;  %v9432_v62 = vld [vmem:[%s11556_s3 + $0x3d8] sm:$0xff]  }
  0x43   : > { %8502 = vmatpush3.bf16.msra.mxu1 %v9417_v48  ;;  %v3397_v19 = vor.u32 %v3396_v2, %v3393_v59  ;;  %v3599_v45 = vsel %vm10031_vm5, %v7601_v26, %v3598_v50  ;;  %v947_v57 = vrot.slane %v9826_v14, 5  ;;  %v9428_v14 = vld [vmem:[%s11556_s3 + $0x3c8] sm:$0xff]   ;;  %v7598_v59 = vld [vmem:[%s9843_s26 + $0x30] sm:$0xe]  ;;  %v3626_v6 = vrot.slane %v10010_v36, 5  ;;  %v9433_v29 = vld [vmem:[%s11556_s3 + $0xa0] sm:$0xff]  }
  0x44   : > { %8503 = vmatprep.subr.bf16.mxu1 %v9419_v43  ;;  %8812 = vmatpush3.bf16.msra.mxu0 %v9416_v8  ;;  %v9424_v8 = vld [vmem:[%s11556_s3 + $0x80] sm:$0xff]   ;;  %v7625_v50 = vcombine.low %v3599_v45, %v3603_v11  ;;  %v3611_v53 = vsel %vm10031_vm5, %v7604_v49, %v3610_v17  ;;  %v7597_v17 = vld [vmem:[%s9843_s26 + $0x28] sm:$0xe]  ;;  %v7607_v38 = vrot.slane %v7599_v9, 9  ;;  %v951_v20 = vrot.slane %v9829_v15, 5  ;;  %v9438_v49 = vld [vmem:[%s11556_s3 + $0xb0] sm:$0xff]  }
  0x45   : > { %8813 = vmatprep.subr.bf16.mxu0 %v9418_v42  ;;  %v3398_v39 = vrot.slane %v3397_v19, 4  ;;  %8488 = vmatmul.mubr.bf16.gmra.mrb[4].mxu1 %v7116_v34  ;;  %v7626_v16 = vcombine.low %v3607_v51, %v3611_v53  ;;  %v7605_v2 = vrot.slane %v7597_v17, 9  ;;  %v7608_v19 = vrot.slane %v7600_v55, 9  ;;  %v919_v15 = vld [vmem:[%s9810_s14 + $0x8] sm:$0xe] }
  0x46   : > { %8507 = vmatprep.mubr.bf16.mxu1 %v7125_v33  ;;  %v7137_v58 = vrot.slane %v918_v22, 9  ;;  %v7138_v26 = vrot.slane %v919_v15, 9  ;;  %v7675_v9 = vld [vmem:[%s9843_s26 + $0x18] sm:$0xf]  ;;  %v10187_v55 = vld [vmem:[%s9843_s26 + $0x1c] sm:$0x1] }
  0x47   : > { %8504 = vmatpush3.bf16.msra.mxu1 %v9419_v43  ;;  %v3403_v31 = vsel %vm9857_vm2, %v3398_v39, %v3402_v5  ;;  %v3412_v43 = vrot.slane %v3411_v18, 4  ;;  %v7606_v5 = vrot.slane %v7598_v59, 9  ;;  %v3615_v7 = vsel %vm10031_vm5, %v7605_v2, %v3614_v23  ;;  %v920_v18 = vld [vmem:[%s9810_s14 + $0x10] sm:$0xe]  ;;  %v9445_v59 = vld [vmem:[%s11556_s3 + $0x400] sm:$0xff]  }
  0x48   : > { %8505 = vmatprep.subr.bf16.mxu1 %v9421_v24  ;;  %8814 = vmatpush3.bf16.msra.mxu0 %v9418_v42  ;;  %v7127_v42 = vcombine.low %v9931_v61, %v9934_v0  ;;  %v9429_v61 = vld [vmem:[%s11556_s3 + $0x90] sm:$0xff]   ;;  %v3618_v0 = vrot.slane %v9966_v30, 5  ;;  %v7128_v30 = vcombine.low %v9977_v47, %v9985_v56  ;;  %v9431_v47 = vld [vmem:[%s11556_s3 + $0x98] sm:$0xff]   ;;  %v3623_v56 = vsel %vm10031_vm5, %v7607_v38, %v3622_v28 }
  0x49   : > { %8815 = vmatprep.subr.bf16.mxu0 %v9420_v27  ;;  %v3417_v32 = vsel %vm9857_vm2, %v3412_v43, %v3416_v40  ;;  %v948_v33 = vsel %vm10031_vm5, %v7137_v58, %v947_v57  ;;  %v952_v39 = vsel %vm10031_vm5, %v7138_v26, %v951_v20  ;;  %v7139_v41 = vrot.slane %v920_v18, 9  ;;  %v9434_v43 = vld [vmem:[%s11556_s3 + $0x3e0] sm:$0xff]   ;;  %v924_v57 = vld [vmem:[%s9810_s14 + $0x30] sm:$0xe] }
  0x4a   : > { %v7584_v46 = vcombine.low %v3403_v31, %v3417_v32  ;;  %v3619_v10 = vsel %vm10031_vm5, %v7606_v5, %v3618_v0  ;;  %v7161_v40 = vcombine.low %v948_v33, %v952_v39  ;;  %v9435_v31 = vld [vmem:[%s11556_s3 + $0xa8] sm:$0xff]   ;;  %v971_v0 = vrot.slane %v9990_v3, 5  ;;  %v7673_v28 = vld [vmem:[%s9843_s26 + $0x10] sm:$0xf]  ;;  %v9451_v39 = vld [vmem:[%s11556_s3 + $0xd8] sm:$0xff]  }
  0x4b   : > { %8506 = vmatpush3.bf16.msra.mxu1 %v9421_v24  ;;  %v7627_v36 = vcombine.low %v3615_v7, %v3619_v10  ;;  %v3627_v24 = vsel %vm10031_vm5, %v7608_v19, %v3626_v6  ;;  %v956_v45 = vsel %vm10031_vm5, %v7139_v41, %v955_v21  ;;  %v9436_v32 = vld [vmem:[%s11556_s3 + $0x3e8] sm:$0xff]   ;;  %v3970_v7 = vshrl.u32 %v7673_v28, 16  ;;  %v9449_v22 = vld [vmem:[%s11556_s3 + $0xd0] sm:$0xff]  }
  0x4c   : > { %8515 = vmatprep.subr.bf16.mxu1 %v9424_v8  ;;  %8800 = vmatmul.mubr.bf16.gmra.mrb[4].mxu0 %v7584_v46  ;;  %v7628_v34 = vcombine.low %v3623_v56, %v3627_v24  ;;  %v9441_v46 = vld [vmem:[%s11556_s3 + $0xb8] sm:$0xff]   ;;  %v9447_v5 = vld [vmem:[%s11556_s3 + $0xc8] sm:$0xff]   ;;  %v3973_v10 = vshll.u32 %v7673_v28, 16  ;;  %v3984_v19 = vshrl.u32 %v7675_v9, 16  ;;  %v3987_v20 = vshll.u32 %v7675_v9, 16 }
  0x4d   : > { %8816 = vmatpush3.bf16.msra.mxu0 %v9420_v27  ;;  %8819 = vmatprep.mubr.bf16.mxu0 %v7625_v50  ;;  %v959_v27 = vrot.slane %v9891_v63, 5  ;;  %v921_v63 = vld [vmem:[%s9810_s14 + $0x18] sm:$0xe]  ;;  %v963_v50 = vrot.slane %v9937_v1, 5  ;;  %v9446_v3 = vld [vmem:[%s9843_s26 + $0x20] ss:$8 sps:$4 sm:$0xff]  }
  0x4e   : > { %8817 = vmatprep.subr.bf16.mxu0 %v9422_v37  ;;  %8508 = vmatmul.mubr.bf16.vlgmr.msra.gmra.mrb[0].mxu1 %v7126_v54  ;;  %v7140_v44 = vrot.slane %v921_v63, 9  ;;  %v923_v54 = vld [vmem:[%s9810_s14 + $0x28] sm:$0xe]  ;;  %v9442_v1 = vld [vmem:[%s11556_s3 + $0x3f8] sm:$0xff]   ;;  %v3993_v21 = vshll.u32 %v10187_v55, 16  ;;  %v3975_v56 = vrot.slane %v3973_v10, 5 }
  0x4f   : > { %8516 = vmatpush3.bf16.msra.mxu1 %v9424_v8  ;;  %8511 = vmatprep.mubr.bf16.mxu1 %v7127_v42  ;;  %v9444_v8 = vld [vmem:[%s9843_s26 + $0x10] ss:$8 sps:$4 sm:$0xff]   ;;  %v967_v42 = vrot.slane %v9943_v60, 5  ;;  %v7142_v53 = vrot.slane %v923_v54, 9  ;;  %v9443_v60 = vld [vmem:[%s11556_s3 + $0xc0] sm:$0xff]   ;;  %v3986_v15 = vrot.slane %v3984_v19, 4 }
  0x50   : > { %8517 = vmatprep.subr.bf16.mxu1 %v9427_v52  ;;  %v960_v11 = vsel %vm10031_vm5, %v7140_v44, %v959_v27  ;;  %v9458_v24 = vld [vmem:[%s9843_s26 + $0x30] ss:$8 sps:$4 sm:$0xff]   ;;  %v3989_v58 = vrot.slane %v3987_v20, 5  ;;  %v7679_v63 = vld [vmem:[%s9843_s26 + $0x28] sm:$0xf] }
  0x51   : > { %8818 = vmatpush3.bf16.msra.mxu0 %v9422_v37  ;;  %v7162_v12 = vcombine.low %v956_v45, %v960_v11  ;;  %v922_v37 = vld [vmem:[%s9810_s14 + $0x20] sm:$0xe]  ;;  %v968_v23 = vsel %vm10031_vm5, %v7142_v53, %v967_v42  ;;  %v9463_v33 = vld [vmem:[%s9810_s14 + $0x8] ss:$8 sps:$4 sm:$0xff]   ;;  %v10222_v42 = vld [vmem:[%s9843_s26 + $0x2c] sm:$0x1] }
  0x52   : > { %8827 = vmatprep.subr.bf16.mxu0 %v9425_v13  ;;  %v7141_v51 = vrot.slane %v922_v37, 9  ;;  %v9453_v45 = vld [vmem:[%s11556_s3 + $0xe0] sm:$0xff]   ;;  %v9461_v10 = vld [vmem:[%s11556_s3 + $0xf8] sm:$0xff]  }
  0x53   : > { %8518 = vmatpush3.bf16.msra.mxu1 %v9427_v52  ;;  %v9439_v52 = vld [vmem:[%s11556_s3 + $0x3f0] sm:$0xff]   ;;  %v9460_v11 = vld [vmem:[%s9843_s26 + $0x40] ss:$8 sps:$4 sm:$0xff]  }
  0x54   : > { %8820 = vmatmul.mubr.bf16.vlgmr.msra.gmra.mrb[0].mxu0 %v7626_v16  ;;  %8519 = vmatprep.subr.bf16.mxu1 %v9429_v61  ;;  %v975_v16 = vrot.slane %v9993_v4, 5  ;;  %v10179_v4 = vld [vmem:[%s9843_s26 + $0x14] sm:$0x1] }
  0x55   : > { %8828 = vmatpush3.bf16.msra.mxu0 %v9425_v13  ;;  %8823 = vmatprep.mubr.bf16.mxu0 %v7627_v36  ;;  %v925_v13 = vld [vmem:[%s9810_s14 + $0x38] sm:$0xe]  ;;  %v3979_v38 = vshll.u32 %v10179_v4, 16  ;;  %v9448_v36 = vld [vmem:[%s11556_s3 + $0x408] sm:$0xff]  }
  0x56   : > { %8829 = vmatprep.subr.bf16.mxu0 %v9428_v14  ;;  %8512 = vmatmul.mubr.bf16.gmra.mrb[4].mxu1 %v7128_v30  ;;  %v7144_v17 = vrot.slane %v925_v13, 9 }
  0x57   : > { %8520 = vmatpush3.bf16.msra.mxu1 %v9429_v61  ;;  %8531 = vmatprep.mubr.bf16.mxu1 %v7161_v40  ;;  %v964_v61 = vsel %vm10031_vm5, %v7141_v51, %v963_v50  ;;  %v3981_v27 = vrot.slane %v3979_v38, 5  ;;  %v9450_v40 = vld [vmem:[%s11556_s3 + $0x410] sm:$0xff]   ;;  %v4015_v50 = vshll.u32 %v7679_v63, 16 }
  0x58   : > { %8521 = vmatprep.subr.bf16.mxu1 %v9431_v47  ;;  %v7163_v2 = vcombine.low %v964_v61, %v968_v23  ;;  %v976_v30 = vsel %vm10031_vm5, %v7144_v17, %v975_v16  ;;  %v9456_v61 = vld [vmem:[%s11556_s3 + $0x428] sm:$0xff]  }
  0x59   : > { %8830 = vmatpush3.bf16.msra.mxu0 %v9428_v14  ;;  %v7143_v14 = vrot.slane %v924_v57, 9  ;;  %v4017_v53 = vrot.slane %v4015_v50, 5  ;;  %v9454_v57 = vld [vmem:[%s11556_s3 + $0x420] sm:$0xff]  }
  0x5a   : > { %8831 = vmatprep.subr.bf16.mxu0 %v9430_v25 }
  0x5b   : > { %8522 = vmatpush3.bf16.msra.mxu1 %v9431_v47  ;;  %v972_v6 = vsel %vm10031_vm5, %v7143_v14, %v971_v0  ;;  %v3972_v47 = vrot.slane %v3970_v7, 4  ;;  %v9457_v0 = vld [vmem:[%s11556_s3 + $0xf0] sm:$0xff]  }
  0x5c   : > { %8824 = vmatmul.mubr.bf16.gmra.mrb[4].mxu0 %v7628_v34  ;;  %8523 = vmatprep.subr.bf16.mxu1 %v9433_v29  ;;  %v3995_v34 = vrot.slane %v3993_v21, 5  ;;  %v9459_v7 = vld [vmem:[%s11556_s3 + $0x430] sm:$0xff]  }
  0x5d   : > { %8832 = vmatpush3.bf16.msra.mxu0 %v9430_v25  ;;  %8843 = vmatprep.mubr.bf16.mxu0 %v9444_v8  ;;  %v7164_v25 = vcombine.low %v972_v6, %v976_v30  ;;  %v3976_v26 = vor.u32 %v3975_v56, %v3972_v47  ;;  %v4261_v56 = vrot.slane %v10179_v4, 5 }
  0x5e   : > { %8833 = vmatprep.subr.bf16.mxu0 %v9432_v62 }
  0x5f   : > { %8524 = vmatpush3.bf16.msra.mxu1 %v9433_v29  ;;  %v7677_v29 = vld [vmem:[%s9843_s26 + $0x20] sm:$0xf]  ;;  %v3977_v18 = vrot.slane %v3976_v26, 4 }
  0x60   : > { %8525 = vmatprep.subr.bf16.mxu1 %v9435_v31  ;;  %v3998_v44 = vshrl.u32 %v7677_v29, 16  ;;  %v4001_v8 = vshll.u32 %v7677_v29, 16  ;;  %v10278_v29 = vld [vmem:[%s9843_s26 + $0x44] sm:$0x1] }
  0x61   : > { %8834 = vmatpush3.bf16.msra.mxu0 %v9432_v62  ;;  %v3990_v62 = vor.u32 %v3989_v58, %v3986_v15  ;;  %v9462_v15 = vld [vmem:[%s11556_s3 + $0x438] sm:$0xff]  }
  0x62   : > { %8835 = vmatprep.subr.bf16.mxu0 %v9434_v43  ;;  %v4000_v37 = vrot.slane %v3998_v44, 4  ;;  %v4003_v54 = vrot.slane %v4001_v8, 5  ;;  %v9477_v44 = vld [vmem:[%s9810_s14 + $0x28] ss:$8 sps:$4 sm:$0xff]  }
  0x63   : > { %8526 = vmatpush3.bf16.msra.mxu1 %v9435_v31  ;;  %v3991_v41 = vrot.slane %v3990_v62, 4  ;;  %v9452_v31 = vld [vmem:[%s11556_s3 + $0x418] sm:$0xff]   ;;  %v9464_v62 = vld [vmem:[%s11556_s3 + $0x100] sm:$0xff]  }
  0x64   : > { %8527 = vmatprep.subr.bf16.mxu1 %v9438_v49  ;;  %v4004_v13 = vor.u32 %v4003_v54, %v4000_v37  ;;  %v9465_v37 = vld [vmem:[%s11556_s3 + $0x440] sm:$0xff]  }
  0x65   : > { %8836 = vmatpush3.bf16.msra.mxu0 %v9434_v43  ;;  %v3996_v43 = vsel %vm9857_vm2, %v3991_v41, %v3995_v34  ;;  %v9466_v34 = vld [vmem:[%s9810_s14 + $0x18] ss:$8 sps:$4 sm:$0xff]   ;;  %v4063_v41 = vshll.u32 %v10278_v29, 16 }
  0x66   : > { %8837 = vmatprep.subr.bf16.mxu0 %v9436_v32  ;;  %v10241_v14 = vrot.slane %v4004_v13, 4  ;;  %v7209_v13 = vld [vmem:[%s9810_s14 + $0x8] sm:$0xf] }
  0x67   : > { %8528 = vmatpush3.bf16.msra.mxu1 %v9438_v49  ;;  %v10219_v49 = vld [vmem:[%s9843_s26 + $0x24] sm:$0x1]  ;;  %v10296_v54 = vrot.slane %v4063_v41, 5  ;;  %v7215_v41 = vld [vmem:[%s9810_s14 + $0x20] sm:$0xf] }
  0x68   : > { %8529 = vmatprep.subr.bf16.mxu1 %v9441_v46 }
  0x69   : > { %8838 = vmatpush3.bf16.msra.mxu0 %v9436_v32  ;;  %v4012_v32 = vshrl.u32 %v7679_v63, 16 }
  0x6a   : > { %8839 = vmatprep.subr.bf16.mxu0 %v9439_v52 }
  0x6b   : > { %8530 = vmatpush3.bf16.msra.mxu1 %v9441_v46  ;;  %v4014_v51 = vrot.slane %v4012_v32, 4 }
  0x6c   : > { %8539 = vmatprep.subr.bf16.mxu1 %v9443_v60 }
  0x6d   : > { %8840 = vmatpush3.bf16.msra.mxu0 %v9439_v52  ;;  %v9455_v52 = vld [vmem:[%s11556_s3 + $0xe8] sm:$0xff]   ;;  %v4018_v23 = vor.u32 %v4017_v53, %v4014_v51 }
  0x6e   : > { %8841 = vmatprep.subr.bf16.mxu0 %v9442_v1  ;;  %8532 = vmatmul.mubr.bf16.vlgmr.msra.gmra.mrb[0].mxu1 %v7162_v12  ;;  %v3982_v12 = vsel %vm9857_vm2, %v3977_v18, %v3981_v27  ;;  %v7685_v27 = vld [vmem:[%s9843_s26 + $0x40] sm:$0xf]  ;;  %v10286_v18 = vld [vmem:[%s9843_s26 + $0x4c] sm:$0x1] }
  0x6f   : > { %8540 = vmatpush3.bf16.msra.mxu1 %v9443_v60  ;;  %8535 = vmatprep.mubr.bf16.mxu1 %v7163_v2  ;;  %v7705_v46 = vcombine.low %v3982_v12, %v3996_v43  ;;  %v4021_v60 = vshll.u32 %v10222_v42, 16  ;;  %v10245_v2 = vld [vmem:[%s9843_s26 + $0x34] sm:$0x1]  ;;  %v4019_v28 = vrot.slane %v4018_v23, 4  ;;  %v4054_v63 = vshrl.u32 %v7685_v27, 16 }
  0x70   : > { %8541 = vmatprep.subr.bf16.mxu1 %v9447_v5  ;;  %v4035_v21 = vshll.u32 %v10245_v2, 16 }
  0x71   : > { %8842 = vmatpush3.bf16.msra.mxu0 %v9442_v1  ;;  %v4007_v1 = vshll.u32 %v10219_v49, 16  ;;  %v4023_v17 = vrot.slane %v4021_v60, 5  ;;  %v4056_v50 = vrot.slane %v4054_v63, 4  ;;  %v10301_v60 = vld [vmem:[%s9810_s14 + $0xc] sm:$0x1] }
  0x72   : > { %8851 = vmatprep.subr.bf16.mxu0 %v9445_v59 }
  0x73   : > { %8542 = vmatpush3.bf16.msra.mxu1 %v9447_v5  ;;  %v10239_v16 = vrot.slane %v4007_v1, 5  ;;  %v7683_v5 = vld [vmem:[%s9843_s26 + $0x38] sm:$0xf] }
  0x74   : > { %8844 = vmatmul.mubr.bf16.vlgmr.msra.gmra.mrb[0].mxu0 %v9446_v3  ;;  %8543 = vmatprep.subr.bf16.mxu1 %v9449_v22  ;;  %v10249_v3 = vld [vmem:[%s9843_s26 + $0x3c] sm:$0x1]  ;;  %v4040_v9 = vshrl.u32 %v7683_v5, 16  ;;  %v4043_v38 = vshll.u32 %v7683_v5, 16 }
  0x75   : > { %8852 = vmatpush3.bf16.msra.mxu0 %v9445_v59  ;;  %8847 = vmatprep.mubr.bf16.mxu0 %v9458_v24  ;;  %v7681_v59 = vld [vmem:[%s9843_s26 + $0x30] sm:$0xf]  ;;  %v4049_v47 = vshll.u32 %v10249_v3, 16  ;;  %v4265_v24 = vrot.slane %v10187_v55, 5  ;;  %v4010_v58 = vsel %vm9857_vm2, %v10241_v14, %v10239_v16  ;;  %v10307_v16 = vld [vmem:[%s9810_s14 + $0x14] sm:$0x1] }
  0x76   : > { %8853 = vmatprep.subr.bf16.mxu0 %v9448_v36  ;;  %8536 = vmatmul.mubr.bf16.gmra.mrb[4].mxu1 %v7164_v25  ;;  %v4026_v6 = vshrl.u32 %v7681_v59, 16  ;;  %v4029_v30 = vshll.u32 %v7681_v59, 16  ;;  %v4024_v25 = vsel %vm9857_vm2, %v4019_v28, %v4023_v17  ;;  %v1319_v14 = vshrl.u32 %v7209_v13, 16  ;;  %v9469_v59 = vld [vmem:[%s11556_s3 + $0x110] sm:$0xff]  }
  0x77   : > { %8544 = vmatpush3.bf16.msra.mxu1 %v9449_v22  ;;  %8555 = vmatprep.mubr.bf16.mxu1 %v9463_v33  ;;  %v4045_v22 = vrot.slane %v4043_v38, 5  ;;  %v7687_v33 = vld [vmem:[%s9843_s26 + $0x48] sm:$0xf]  ;;  %v4051_v32 = vrot.slane %v4049_v47, 5  ;;  %v7706_v1 = vcombine.low %v4010_v58, %v4024_v25  ;;  %v1322_v17 = vshll.u32 %v7209_v13, 16 }
  0x78   : > { %8545 = vmatprep.subr.bf16.mxu1 %v9451_v39  ;;  %v4028_v19 = vrot.slane %v4026_v6, 4  ;;  %v4031_v20 = vrot.slane %v4029_v30, 5  ;;  %v4071_v12 = vshll.u32 %v7687_v33, 16  ;;  %v1328_v28 = vshll.u32 %v10301_v60, 16  ;;  %v7717_v58 = vld [vmem:[%s9843_s26 + $0x10] sm:$0xe] }
  0x79   : > { %8854 = vmatpush3.bf16.msra.mxu0 %v9448_v36  ;;  %v4042_v36 = vrot.slane %v4040_v9, 4  ;;  %v9468_v9 = vld [vmem:[%s11556_s3 + $0x448] sm:$0xff]   ;;  %v1324_v38 = vrot.slane %v1322_v17, 5  ;;  %v10360_v13 = vld [vmem:[%s9810_s14 + $0x24] sm:$0x1]  ;;  %v4269_v17 = vrot.slane %v10219_v49, 5 }
  0x7a   : > { %8855 = vmatprep.subr.bf16.mxu0 %v9450_v40  ;;  %v4032_v26 = vor.u32 %v4031_v20, %v4028_v19  ;;  %v4073_v53 = vrot.slane %v4071_v12, 5  ;;  %v1342_v19 = vshll.u32 %v10307_v16, 16  ;;  %v9480_v20 = vld [vmem:[%s9810_s14 + $0x38] ss:$8 sps:$4 sm:$0xff]  }
  0x7b   : > { %8546 = vmatpush3.bf16.msra.mxu1 %v9451_v39  ;;  %v4046_v39 = vor.u32 %v4045_v22, %v4042_v36 }
  0x7c   : > { %8848 = vmatmul.mubr.bf16.gmra.mrb[4].mxu0 %v9460_v11  ;;  %8547 = vmatprep.subr.bf16.mxu1 %v9453_v45  ;;  %v4033_v8 = vrot.slane %v4032_v26, 4  ;;  %v4068_v11 = vshrl.u32 %v7687_v33, 16  ;;  %v7718_v33 = vld [vmem:[%s9843_s26 + $0x18] sm:$0xe] }
  0x7d   : > { %8856 = vmatpush3.bf16.msra.mxu0 %v9450_v40  ;;  %8867 = vmatprep.mubr.bf16.mxu0 %v7705_v46  ;;  %v4057_v40 = vshll.u32 %v7685_v27, 16  ;;  %v4047_v43 = vrot.slane %v4046_v39, 4  ;;  %v1330_v27 = vrot.slane %v1328_v28, 5  ;;  %v1344_v39 = vrot.slane %v1342_v19, 5  ;;  %v9474_v28 = vld [vmem:[%s11556_s3 + $0x460] sm:$0xff]  }
  0x7e   : > { %8857 = vmatprep.subr.bf16.mxu0 %v9452_v31  ;;  %v4070_v51 = vrot.slane %v4068_v11, 4  ;;  %v7726_v63 = vrot.slane %v7718_v33, 9  ;;  %v4273_v19 = vrot.slane %v10222_v42, 5  ;;  %v10394_v33 = vld [vmem:[%s9810_s14 + $0x34] sm:$0x1] }
  0x7f   : > { %8548 = vmatpush3.bf16.msra.mxu1 %v9453_v45  ;;  %v4037_v45 = vrot.slane %v4035_v21, 5  ;;  %v4059_v46 = vrot.slane %v4057_v40, 5  ;;  %v4052_v5 = vsel %vm9857_vm2, %v4047_v43, %v4051_v32  ;;  %v7213_v40 = vld [vmem:[%s9810_s14 + $0x18] sm:$0xf]  ;;  %v9470_v43 = vld [vmem:[%s11556_s3 + $0x450] sm:$0xff]  }
  0x80   : > { %8549 = vmatprep.subr.bf16.mxu1 %v9455_v52  ;;  %v4074_v23 = vor.u32 %v4073_v53, %v4070_v51  ;;  %v4266_v4 = vsel %vm10031_vm5, %v7726_v63, %v4265_v24 }
  0x81   : > { %8858 = vmatpush3.bf16.msra.mxu0 %v9452_v31  ;;  %v9467_v31 = vld [vmem:[%s11556_s3 + $0x108] sm:$0xff]  }
  0x82   : > { %8859 = vmatprep.subr.bf16.mxu0 %v9454_v57  ;;  %v4075_v36 = vrot.slane %v4074_v23, 4 }
  0x83   : > { %8550 = vmatpush3.bf16.msra.mxu1 %v9455_v52  ;;  %v4077_v52 = vshll.u32 %v10286_v18, 16 }
  0x84   : > { %8551 = vmatprep.subr.bf16.mxu1 %v9457_v0 }
  0x85   : > { %8860 = vmatpush3.bf16.msra.mxu0 %v9454_v57  ;;  %v4060_v57 = vor.u32 %v4059_v46, %v4056_v50  ;;  %v10342_v46 = vld [vmem:[%s9810_s14 + $0x1c] sm:$0x1] }
  0x86   : > { %8861 = vmatprep.subr.bf16.mxu0 %v9456_v61  ;;  %v1356_v23 = vshll.u32 %v10342_v46, 16 }
  0x87   : > { %8552 = vmatpush3.bf16.msra.mxu1 %v9457_v0  ;;  %v7211_v0 = vld [vmem:[%s9810_s14 + $0x10] sm:$0xf]  ;;  %v4061_v21 = vrot.slane %v4060_v57, 4 }
  0x88   : > { %8553 = vmatprep.subr.bf16.mxu1 %v9461_v10  ;;  %v1333_v6 = vshrl.u32 %v7211_v0, 16  ;;  %v1336_v30 = vshll.u32 %v7211_v0, 16  ;;  %v9472_v0 = vld [vmem:[%s11556_s3 + $0x458] sm:$0xff]  }
  0x89   : > { %8862 = vmatpush3.bf16.msra.mxu0 %v9456_v61  ;;  %v4038_v61 = vsel %vm9857_vm2, %v4033_v8, %v4037_v45  ;;  %v9471_v8 = vld [vmem:[%s11556_s3 + $0x118] sm:$0xff]   ;;  %v4066_v45 = vsel %vm9857_vm2, %v4061_v21, %v10296_v54  ;;  %v1361_v54 = vshrl.u32 %v7215_v41, 16 }
  0x8a   : > { %8863 = vmatprep.subr.bf16.mxu0 %v9459_v7  ;;  %v1335_v22 = vrot.slane %v1333_v6, 4  ;;  %v1338_v47 = vrot.slane %v1336_v30, 5  ;;  %v7707_v25 = vcombine.low %v4038_v61, %v4052_v5  ;;  %v1370_v5 = vshll.u32 %v10360_v13, 16  ;;  %v7719_v30 = vld [vmem:[%s9843_s26 + $0x20] sm:$0xe] }
  0x8b   : > { %8554 = vmatpush3.bf16.msra.mxu1 %v9461_v10  ;;  %v1321_v10 = vrot.slane %v1319_v14, 4  ;;  %v1363_v61 = vrot.slane %v1361_v54, 4 }
  0x8c   : > { %8563 = vmatprep.subr.bf16.mxu1 %v9464_v62 }
  0x8d   : > { %8864 = vmatpush3.bf16.msra.mxu0 %v9459_v7  ;;  %v4079_v7 = vrot.slane %v4077_v52, 5  ;;  %v1325_v26 = vor.u32 %v1324_v38, %v1321_v10  ;;  %v1364_v52 = vshll.u32 %v7215_v41, 16  ;;  %v1358_v10 = vrot.slane %v1356_v23, 5  ;;  %v9478_v38 = vld [vmem:[%s11556_s3 + $0x130] sm:$0xff]  }
  0x8e   : > { %8865 = vmatprep.subr.bf16.mxu0 %v9462_v15  ;;  %8556 = vmatmul.mubr.bf16.vlgmr.msra.gmra.mrb[0].mxu1 %v9466_v34  ;;  %v1339_v34 = vor.u32 %v1338_v47, %v1335_v22  ;;  %v7727_v22 = vrot.slane %v7719_v30, 9  ;;  %v7723_v30 = vld [vmem:[%s9843_s26 + $0x40] sm:$0xe] }
  0x8f   : > { %8564 = vmatpush3.bf16.msra.mxu1 %v9464_v62  ;;  %8559 = vmatprep.mubr.bf16.mxu1 %v9477_v44  ;;  %v7725_v62 = vrot.slane %v7717_v58, 9  ;;  %v1347_v44 = vshrl.u32 %v7213_v40, 16  ;;  %v4080_v11 = vsel %vm9857_vm2, %v4075_v36, %v4079_v7  ;;  %v1366_v24 = vrot.slane %v1364_v52, 5  ;;  %v7217_v58 = vld [vmem:[%s9810_s14 + $0x28] sm:$0xf] }
  0x90   : > { %8565 = vmatprep.subr.bf16.mxu1 %v9467_v31  ;;  %v1340_v12 = vrot.slane %v1339_v34, 4  ;;  %v1372_v36 = vrot.slane %v1370_v5, 5  ;;  %v1378_v34 = vshll.u32 %v7217_v58, 16  ;;  %v7722_v52 = vld [vmem:[%s9843_s26 + $0x38] sm:$0xe] }
  0x91   : > { %8866 = vmatpush3.bf16.msra.mxu0 %v9462_v15  ;;  %v1326_v15 = vrot.slane %v1325_v26, 4  ;;  %v4262_v50 = vsel %vm10031_vm5, %v7725_v62, %v4261_v56  ;;  %v9473_v56 = vld [vmem:[%s11556_s3 + $0x120] sm:$0xff]   ;;  %v1367_v6 = vor.u32 %v1366_v24, %v1363_v61  ;;  %v1375_v62 = vshrl.u32 %v7217_v58, 16  ;;  %v10426_v61 = vld [vmem:[%s9810_s14 + $0x3c] sm:$0x1] }
  0x92   : > { %8875 = vmatprep.subr.bf16.mxu0 %v9465_v37  ;;  %v1345_v51 = vsel %vm9857_vm2, %v1340_v12, %v1344_v39  ;;  %v7749_v14 = vcombine.low %v4262_v50, %v4266_v4  ;;  %v9481_v12 = vld [vmem:[%s11556_s3 + $0x138] sm:$0xff]   ;;  %v9483_v4 = vld [vmem:[%s11556_s3 + $0x140] sm:$0xff]   ;;  %v1412_v49 = vshll.u32 %v10426_v61, 16 }
  0x93   : > { %8566 = vmatpush3.bf16.msra.mxu1 %v9467_v31  ;;  %v1350_v31 = vshll.u32 %v7213_v40, 16  ;;  %v1331_v32 = vsel %vm9857_vm2, %v1326_v15, %v1330_v27  ;;  %v1368_v21 = vrot.slane %v1367_v6, 4  ;;  %v7219_v27 = vld [vmem:[%s9810_s14 + $0x30] sm:$0xf]  ;;  %v1398_v15 = vshll.u32 %v10394_v33, 16 }
  0x94   : > { %8868 = vmatmul.mubr.bf16.vlgmr.msra.gmra.mrb[0].mxu0 %v7706_v1  ;;  %8567 = vmatprep.subr.bf16.mxu1 %v9469_v59  ;;  %v7708_v1 = vcombine.low %v4066_v45, %v4080_v11  ;;  %v7241_v57 = vcombine.low %v1331_v32, %v1345_v51  ;;  %v1389_v63 = vshrl.u32 %v7219_v27, 16  ;;  %v1392_v40 = vshll.u32 %v7219_v27, 16  ;;  %v9479_v11 = vld [vmem:[%s11556_s3 + $0x470] sm:$0xff]  }
  0x95   : > { %8876 = vmatpush3.bf16.msra.mxu0 %v9465_v37  ;;  %8871 = vmatprep.mubr.bf16.mxu0 %v7707_v25  ;;  %v1349_v37 = vrot.slane %v1347_v44, 4  ;;  %v1352_v53 = vrot.slane %v1350_v31, 5  ;;  %v10388_v25 = vld [vmem:[%s9810_s14 + $0x2c] sm:$0x1]  ;;  %v1373_v41 = vsel %vm9857_vm2, %v1368_v21, %v1372_v36  ;;  %v1377_v44 = vrot.slane %v1375_v62, 4  ;;  %v9484_v36 = vld [vmem:[%s11556_s3 + $0x480] sm:$0xff]  }
  0x96   : > { %8877 = vmatprep.subr.bf16.mxu0 %v9468_v9  ;;  %8560 = vmatmul.mubr.bf16.gmra.mrb[4].mxu1 %v9480_v20  ;;  %v9476_v20 = vld [vmem:[%s11556_s3 + $0x468] sm:$0xff]   ;;  %v1384_v39 = vshll.u32 %v10388_v25, 16  ;;  %v4277_v45 = vrot.slane %v10245_v2, 5  ;;  %v1391_v31 = vrot.slane %v1389_v63, 4  ;;  %v4281_v32 = vrot.slane %v10249_v3, 5 }
  0x97   : > { %8568 = vmatpush3.bf16.msra.mxu1 %v9469_v59  ;;  %v1353_v55 = vor.u32 %v1352_v53, %v1349_v37  ;;  %8579 = vmatprep.mubr.bf16.mxu1 %v7241_v57  ;;  %v9475_v59 = vld [vmem:[%s11556_s3 + $0x128] sm:$0xff]   ;;  %v4285_v2 = vrot.slane %v10278_v29, 5  ;;  %v1400_v54 = vrot.slane %v1398_v15, 5  ;;  %v7721_v51 = vld [vmem:[%s9843_s26 + $0x30] sm:$0xe] }
  0x98   : > { %8569 = vmatprep.subr.bf16.mxu1 %v9471_v8  ;;  %v1386_v37 = vrot.slane %v1384_v39, 5  ;;  %v7724_v62 = vld [vmem:[%s9843_s26 + $0x48] sm:$0xe] }
  0x99   : > { %8878 = vmatpush3.bf16.msra.mxu0 %v9468_v9  ;;  %v10376_v9 = vld [vmem:[%s9843_s26 + $0x28] sm:$0xe]  ;;  %v1354_v7 = vrot.slane %v1353_v55, 4  ;;  %v7223_v55 = vld [vmem:[%s9810_s14 + $0x40] sm:$0xf] }
  0x9a   : > { %8879 = vmatprep.subr.bf16.mxu0 %v9470_v43  ;;  %v7728_v47 = vrot.slane %v10376_v9, 9  ;;  %v1417_v6 = vshrl.u32 %v7223_v55, 16  ;;  %v1420_v21 = vshll.u32 %v7223_v55, 16  ;;  %v9490_v55 = vld [vmem:[%s11556_s3 + $0x498] sm:$0xff]  }
  0x9b   : > { %8570 = vmatpush3.bf16.msra.mxu1 %v9471_v8  ;;  %v1359_v26 = vsel %vm9857_vm2, %v1354_v7, %v1358_v10  ;;  %v1380_v8 = vrot.slane %v1378_v34, 5  ;;  %v4289_v7 = vrot.slane %v10286_v18, 5  ;;  %v1414_v18 = vrot.slane %v1412_v49, 5  ;;  %v9495_v49 = vld [vmem:[%s11556_s3 + $0x170] sm:$0xff]  }
  0x9c   : > { %8872 = vmatmul.mubr.bf16.gmra.mrb[4].mxu0 %v7708_v1  ;;  %8571 = vmatprep.subr.bf16.mxu1 %v9473_v56  ;;  %v7242_v3 = vcombine.low %v1359_v26, %v1373_v41  ;;  %v10423_v1 = vsel %vm10031_vm5, %v7727_v22, %v4269_v17  ;;  %v9482_v17 = vld [vmem:[%s11556_s3 + $0x478] sm:$0xff]   ;;  %v9485_v22 = vld [vmem:[%s11556_s3 + $0x148] sm:$0xff]   ;;  %v1419_v26 = vrot.slane %v1417_v6, 4  ;;  %v4274_v34 = vsel %vm10031_vm5, %v7728_v47, %v4273_v19 }
  0x9d   : > { %8880 = vmatpush3.bf16.msra.mxu0 %v9470_v43  ;;  %8891 = vmatprep.mubr.bf16.mxu0 %v7749_v14  ;;  %v1394_v43 = vrot.slane %v1392_v40, 5  ;;  %v1381_v50 = vor.u32 %v1380_v8, %v1377_v44  ;;  %v10430_v14 = vld [vmem:[%s9810_s14 + $0x44] sm:$0x1]  ;;  %v1422_v63 = vrot.slane %v1420_v21, 5  ;;  %v7731_v40 = vrot.slane %v7723_v30, 9  ;;  %v9494_v6 = vld [vmem:[%s11556_s3 + $0x4a8] sm:$0xff]  }
  0x9e   : > { %8881 = vmatprep.subr.bf16.mxu0 %v9472_v0  ;;  %v1426_v27 = vshll.u32 %v10430_v14, 16  ;;  %v7253_v44 = vld [vmem:[%s9810_s14 + $0x8] sm:$0xe]  ;;  %v7254_v8 = vld [vmem:[%s9810_s14 + $0x10] sm:$0xe]  ;;  %v1630_v21 = vrot.slane %v10394_v33, 5 }
  0x9f   : > { %8572 = vmatpush3.bf16.msra.mxu1 %v9473_v56  ;;  %v1395_v53 = vor.u32 %v1394_v43, %v1391_v31  ;;  %v7221_v56 = vld [vmem:[%s9810_s14 + $0x38] sm:$0xf]  ;;  %v1382_v57 = vrot.slane %v1381_v50, 4  ;;  %v1423_v19 = vor.u32 %v1422_v63, %v1419_v26  ;;  %v7261_v47 = vrot.slane %v7253_v44, 9  ;;  %v4615_v63 = vld [vmem:[%s10465_s19] sm:$0xf] }
  0xa0   : > { %8573 = vmatprep.subr.bf16.mxu1 %v9475_v59  ;;  %v1403_v23 = vshrl.u32 %v7221_v56, 16  ;;  %v1428_v41 = vrot.slane %v1426_v27, 5  ;;  %v1614_v31 = vrot.slane %v10307_v16, 5  ;;  %v7732_v50 = vrot.slane %v7724_v62, 9  ;;  %v7259_v62 = vld [vmem:[%s9810_s14 + $0x38] sm:$0xe] }
  0xa1   : > { %8882 = vmatpush3.bf16.msra.mxu0 %v9472_v0  ;;  %v1396_v24 = vrot.slane %v1395_v53, 4  ;;  %v7729_v0 = vrot.slane %v7721_v51, 9  ;;  %v1387_v5 = vsel %vm9857_vm2, %v1382_v57, %v1386_v37  ;;  %v9489_v53 = vld [vmem:[%s11556_s3 + $0x158] sm:$0xff]   ;;  %v9488_v57 = vld [vmem:[%s11556_s3 + $0x490] sm:$0xff]   ;;  %v4635_v44 = vshll.u32 %v4615_v63, 16 }
  0xa2   : > { %8883 = vmatprep.subr.bf16.mxu0 %v9474_v28 }
  0xa3   : > { %8574 = vmatpush3.bf16.msra.mxu1 %v9475_v59  ;;  %v1406_v59 = vshll.u32 %v7221_v56, 16  ;;  %v1401_v10 = vsel %vm9857_vm2, %v1396_v24, %v1400_v54  ;;  %v4278_v15 = vsel %vm10031_vm5, %v7729_v0, %v4277_v45  ;;  %v7750_v45 = vcombine.low %v10423_v1, %v4274_v34  ;;  %v9486_v54 = vld [vmem:[%s11556_s3 + $0x488] sm:$0xff]   ;;  %v9492_v0 = vld [vmem:[%s11556_s3 + $0x4a0] sm:$0xff]  }
  0xa4   : > { %8575 = vmatprep.subr.bf16.mxu1 %v9478_v38  ;;  %v7243_v58 = vcombine.low %v1387_v5, %v1401_v10  ;;  %v4290_v1 = vsel %vm10031_vm5, %v7732_v50, %v4289_v7  ;;  %v9493_v24 = vld [vmem:[%s11556_s3 + $0x168] sm:$0xff]   ;;  %v1618_v7 = vrot.slane %v10342_v46, 5  ;;  %v9496_v46 = vld [vmem:[%s11556_s3 + $0x4b0] sm:$0xff]   ;;  %v1634_v34 = vrot.slane %v10426_v61, 5 }
  0xa5   : > { %8884 = vmatpush3.bf16.msra.mxu0 %v9474_v28  ;;  %v1405_v28 = vrot.slane %v1403_v23, 4  ;;  %v9500_v23 = vld [vmem:[%s10465_s19] ss:$8 sps:$4 sm:$0xff]   ;;  %v4637_v61 = vrot.slane %v4635_v44, 5  ;;  %v9513_v44 = vld [vmem:[%s11556_s3 + $0x1b0] sm:$0xff]  }
  0xa6   : > { %8885 = vmatprep.subr.bf16.mxu0 %v9476_v20  ;;  %v7257_v5 = vld [vmem:[%s9810_s14 + $0x28] sm:$0xe] }
  0xa7   : > { %8576 = vmatpush3.bf16.msra.mxu1 %v9478_v38  ;;  %v7730_v38 = vrot.slane %v7722_v52, 9 }
  0xa8   : > { %8577 = vmatprep.subr.bf16.mxu1 %v9481_v12 }
  0xa9   : > { %8886 = vmatpush3.bf16.msra.mxu0 %v9476_v20  ;;  %v1408_v20 = vrot.slane %v1406_v59, 5  ;;  %v4282_v42 = vsel %vm10031_vm5, %v7730_v38, %v4281_v32  ;;  %v1424_v32 = vrot.slane %v1423_v19, 4  ;;  %v7255_v59 = vld [vmem:[%s9810_s14 + $0x18] sm:$0xe]  ;;  %v1622_v38 = vrot.slane %v10360_v13, 5  ;;  %v9499_v13 = vld [vmem:[%s11556_s3 + $0x180] sm:$0xff]  }
  0xaa   : > { %8887 = vmatprep.subr.bf16.mxu0 %v9479_v11  ;;  %v7751_v16 = vcombine.low %v4278_v15, %v4282_v42  ;;  %v7263_v30 = vrot.slane %v7255_v59, 9  ;;  %v4617_v15 = vld [vmem:[%s10465_s19 + $0x8] sm:$0xf]  ;;  %v4619_v59 = vld [vmem:[%s10465_s19 + $0x10] sm:$0xf] }
  0xab   : > { %8578 = vmatpush3.bf16.msra.mxu1 %v9481_v12  ;;  %v1409_v39 = vor.u32 %v1408_v20, %v1405_v28  ;;  %v7262_v12 = vrot.slane %v7254_v8, 9  ;;  %v7258_v28 = vld [vmem:[%s9810_s14 + $0x30] sm:$0xe]  ;;  %v1626_v20 = vrot.slane %v10388_v25, 5  ;;  %v10551_v8 = vld [vmem:[%s10465_s19 + $0x4] sm:$0x1] }
  0xac   : > { %8587 = vmatprep.subr.bf16.mxu1 %v9483_v4  ;;  %v1619_v25 = vsel %vm10031_vm5, %v7263_v30, %v1618_v7  ;;  %v4649_v42 = vshll.u32 %v4617_v15, 16  ;;  %v4663_v30 = vshll.u32 %v4619_v59, 16  ;;  %v9508_v7 = vld [vmem:[%s11556_s3 + $0x4d8] sm:$0xff]  }
  0xad   : > { %8888 = vmatpush3.bf16.msra.mxu0 %v9479_v11  ;;  %v1610_v11 = vrot.slane %v10301_v60, 5  ;;  %v1410_v9 = vrot.slane %v1409_v39, 4  ;;  %v9487_v60 = vld [vmem:[%s11556_s3 + $0x150] sm:$0xff]   ;;  %v1615_v51 = vsel %vm10031_vm5, %v7262_v12, %v1614_v31  ;;  %v1638_v39 = vrot.slane %v10430_v14, 5 }
  0xae   : > { %8889 = vmatprep.subr.bf16.mxu0 %v9482_v17  ;;  %8580 = vmatmul.mubr.bf16.vlgmr.msra.gmra.mrb[0].mxu1 %v7242_v3  ;;  %v4286_v3 = vsel %vm10031_vm5, %v7731_v40, %v4285_v2  ;;  %v9491_v2 = vld [vmem:[%s11556_s3 + $0x160] sm:$0xff]   ;;  %v7267_v14 = vrot.slane %v7259_v62, 9  ;;  %v4625_v62 = vld [vmem:[%s10465_s19 + $0x28] sm:$0xf] }
  0xaf   : > { %8588 = vmatpush3.bf16.msra.mxu1 %v9483_v4  ;;  %8583 = vmatprep.mubr.bf16.mxu1 %v7243_v58  ;;  %v1415_v43 = vsel %vm9857_vm2, %v1410_v9, %v1414_v18  ;;  %v1611_v37 = vsel %vm10031_vm5, %v7261_v47, %v1610_v11  ;;  %v1429_v4 = vsel %vm9857_vm2, %v1424_v32, %v1428_v41  ;;  %v9497_v58 = vld [vmem:[%s11556_s3 + $0x178] sm:$0xff]   ;;  %v7260_v40 = vld [vmem:[%s9810_s14 + $0x40] sm:$0xe]  ;;  %v4632_v41 = vshrl.u32 %v4615_v63, 16  ;;  %v10554_v47 = vld [vmem:[%s10465_s19 + $0xc] sm:$0x1] }
  0xb0   : > { %8589 = vmatprep.subr.bf16.mxu1 %v9485_v22  ;;  %v7244_v52 = vcombine.low %v1415_v43, %v1429_v4  ;;  %v7285_v56 = vcombine.low %v1611_v37, %v1615_v51  ;;  %v7752_v29 = vcombine.low %v4286_v3, %v4290_v1  ;;  %v9498_v18 = vld [vmem:[%s11556_s3 + $0x4b8] sm:$0xff]   ;;  %v4646_v11 = vshrl.u32 %v4617_v15, 16  ;;  %v9503_v43 = vld [vmem:[%s11556_s3 + $0x188] sm:$0xff]   ;;  %v9501_v32 = vld [vmem:[%s11556_s3 + $0x4c0] sm:$0xff]  }
  0xb1   : > { %8890 = vmatpush3.bf16.msra.mxu0 %v9482_v17  ;;  %v7256_v17 = vld [vmem:[%s9810_s14 + $0x20] sm:$0xe]  ;;  %v7268_v12 = vrot.slane %v7260_v40, 9  ;;  %v4641_v37 = vshll.u32 %v10551_v8, 16  ;;  %v9502_v51 = vld [vmem:[%s10465_s19 + $0x10] ss:$8 sps:$4 sm:$0xff]  }
  0xb2   : > { %8899 = vmatprep.subr.bf16.mxu0 %v9484_v36  ;;  %v7264_v10 = vrot.slane %v7256_v17, 9  ;;  %v4648_v31 = vrot.slane %v4646_v11, 4  ;;  %v9504_v4 = vld [vmem:[%s11556_s3 + $0x4c8] sm:$0xff]   ;;  %v9519_v1 = vld [vmem:[%s9810_s14 + $0x10] ss:$8 sps:$4 sm:$0xff]   ;;  %v4702_v40 = vshrl.u32 %v4625_v62, 16 }
  0xb3   : > { %8590 = vmatpush3.bf16.msra.mxu1 %v9485_v22  ;;  %v7266_v22 = vrot.slane %v7258_v28, 9  ;;  %v9514_v3 = vld [vmem:[%s10465_s19 + $0x20] ss:$8 sps:$4 sm:$0xff]   ;;  %v9516_v17 = vld [vmem:[%s10465_s19 + $0x30] ss:$8 sps:$4 sm:$0xff]   ;;  %v4705_v15 = vshll.u32 %v4625_v62, 16 }
  0xb4   : > { %8892 = vmatmul.mubr.bf16.vlgmr.msra.gmra.mrb[0].mxu0 %v7750_v45  ;;  %8591 = vmatprep.subr.bf16.mxu1 %v9487_v60  ;;  %v1623_v33 = vsel %vm10031_vm5, %v7264_v10, %v1622_v38  ;;  %v4634_v45 = vrot.slane %v4632_v41, 4  ;;  %v9512_v41 = vld [vmem:[%s11556_s3 + $0x4e8] sm:$0xff]  }
  0xb5   : > { %8900 = vmatpush3.bf16.msra.mxu0 %v9484_v36  ;;  %8895 = vmatprep.mubr.bf16.mxu0 %v7751_v16  ;;  %v7265_v36 = vrot.slane %v7257_v5, 9  ;;  %v1631_v27 = vsel %vm10031_vm5, %v7266_v22, %v1630_v21  ;;  %v7286_v9 = vcombine.low %v1619_v25, %v1623_v33  ;;  %v4655_v16 = vshll.u32 %v10554_v47, 16  ;;  %v4623_v33 = vld [vmem:[%s10465_s19 + $0x20] sm:$0xf] }
  0xb6   : > { %8901 = vmatprep.subr.bf16.mxu0 %v9486_v54  ;;  %8584 = vmatmul.mubr.bf16.gmra.mrb[4].mxu1 %v7244_v52  ;;  %v4638_v50 = vor.u32 %v4637_v61, %v4634_v45  ;;  %v1639_v52 = vsel %vm10031_vm5, %v7268_v12, %v1638_v39  ;;  %v4688_v39 = vshrl.u32 %v4623_v33, 16  ;;  %v4691_v63 = vshll.u32 %v4623_v33, 16  ;;  %v10624_v45 = vld [vmem:[%s10465_s19 + $0x2c] sm:$0x1] }
  0xb7   : > { %8592 = vmatpush3.bf16.msra.mxu1 %v9487_v60  ;;  %8603 = vmatprep.mubr.bf16.mxu1 %v7285_v56  ;;  %v1627_v26 = vsel %vm10031_vm5, %v7265_v36, %v1626_v20  ;;  %v4651_v60 = vrot.slane %v4649_v42, 5  ;;  %v9505_v56 = vld [vmem:[%s11556_s3 + $0x190] sm:$0xff]   ;;  %v9509_v20 = vld [vmem:[%s11556_s3 + $0x1a0] sm:$0xff]  }
  0xb8   : > { %8593 = vmatprep.subr.bf16.mxu1 %v9489_v53  ;;  %v7287_v19 = vcombine.low %v1627_v26, %v1631_v27  ;;  %v10597_v36 = vld [vmem:[%s10465_s19 + $0x14] sm:$0x1]  ;;  %v10607_v26 = vld [vmem:[%s10465_s19 + $0x1c] sm:$0x1]  ;;  %v4693_v12 = vrot.slane %v4691_v63, 5 }
  0xb9   : > { %8902 = vmatpush3.bf16.msra.mxu0 %v9486_v54  ;;  %v4652_v54 = vor.u32 %v4651_v60, %v4648_v31  ;;  %v4669_v27 = vshll.u32 %v10597_v36, 16  ;;  %v4627_v31 = vld [vmem:[%s10465_s19 + $0x30] sm:$0xf]  ;;  %v4629_v60 = vld [vmem:[%s10465_s19 + $0x38] sm:$0xf] }
  0xba   : > { %8903 = vmatprep.subr.bf16.mxu0 %v9488_v57 }
  0xbb   : > { %8594 = vmatpush3.bf16.msra.mxu1 %v9489_v53  ;;  %v1635_v53 = vsel %vm10031_vm5, %v7267_v14, %v1634_v34  ;;  %v10612_v34 = vld [vmem:[%s10465_s19 + $0x24] sm:$0x1]  ;;  %v4690_v14 = vrot.slane %v4688_v39, 4 }
  0xbc   : > { %8896 = vmatmul.mubr.bf16.gmra.mrb[4].mxu0 %v7752_v29  ;;  %8595 = vmatprep.subr.bf16.mxu1 %v9491_v2  ;;  %v4653_v29 = vrot.slane %v4652_v54, 4  ;;  %v4697_v61 = vshll.u32 %v10612_v34, 16 }
  0xbd   : > { %8904 = vmatpush3.bf16.msra.mxu0 %v9488_v57  ;;  %8915 = vmatprep.mubr.bf16.mxu0 %v9500_v23  ;;  %v4639_v57 = vrot.slane %v4638_v50, 4  ;;  %v9507_v23 = vld [vmem:[%s11556_s3 + $0x198] sm:$0xff]   ;;  %v4716_v50 = vshrl.u32 %v4627_v31, 16 }
  0xbe   : > { %8905 = vmatprep.subr.bf16.mxu0 %v9490_v55 }
  0xbf   : > { %8596 = vmatpush3.bf16.msra.mxu1 %v9491_v2  ;;  %v4657_v2 = vrot.slane %v4655_v16, 5 }
  0xc0   : > { %8597 = vmatprep.subr.bf16.mxu1 %v9493_v24 }
  0xc1   : > { %8906 = vmatpush3.bf16.msra.mxu0 %v9490_v55  ;;  %v4643_v55 = vrot.slane %v4641_v37, 5  ;;  %v4658_v28 = vsel %vm9857_vm2, %v4653_v29, %v4657_v2  ;;  %v4719_v37 = vshll.u32 %v4627_v31, 16  ;;  %v9520_v2 = vld [vmem:[%s11556_s3 + $0x1c0] sm:$0xff]  }
  0xc2   : > { %8907 = vmatprep.subr.bf16.mxu0 %v9492_v0 }
  0xc3   : > { %8598 = vmatpush3.bf16.msra.mxu1 %v9493_v24  ;;  %v7288_v24 = vcombine.low %v1635_v53, %v1639_v52  ;;  %v4644_v5 = vsel %vm9857_vm2, %v4639_v57, %v4643_v55  ;;  %v9515_v53 = vld [vmem:[%s11556_s3 + $0x4f0] sm:$0xff]   ;;  %v9517_v52 = vld [vmem:[%s11556_s3 + $0x1b8] sm:$0xff]   ;;  %v10644_v57 = vrot.slane %v4716_v50, 4  ;;  %v10646_v55 = vrot.slane %v4719_v37, 5 }
  0xc4   : > { %8599 = vmatprep.subr.bf16.mxu1 %v9495_v49  ;;  %v7805_v21 = vcombine.low %v4644_v5, %v4658_v28  ;;  %v9518_v5 = vld [vmem:[%s11556_s3 + $0x4f8] sm:$0xff]  }
  0xc5   : > { %8908 = vmatpush3.bf16.msra.mxu0 %v9492_v0  ;;  %v9506_v0 = vld [vmem:[%s11556_s3 + $0x4d0] sm:$0xff]  }
  0xc6   : > { %8909 = vmatprep.subr.bf16.mxu0 %v9494_v6 }
  0xc7   : > { %8600 = vmatpush3.bf16.msra.mxu1 %v9495_v49  ;;  %v4621_v49 = vld [vmem:[%s10465_s19 + $0x18] sm:$0xf] }
  0xc8   : > { %8601 = vmatprep.subr.bf16.mxu1 %v9497_v58  ;;  %v4674_v10 = vshrl.u32 %v4621_v49, 16  ;;  %v4677_v38 = vshll.u32 %v4621_v49, 16  ;;  %v7333_v49 = vld [vmem:[%s9810_s14 + $0x10] sm:$0xf] }
  0xc9   : > { %8910 = vmatpush3.bf16.msra.mxu0 %v9494_v6  ;;  %v4660_v6 = vshrl.u32 %v4619_v59, 16  ;;  %v10657_v59 = vld [vmem:[%s10465_s19 + $0x3c] sm:$0x1] }
  0xca   : > { %8911 = vmatprep.subr.bf16.mxu0 %v9496_v46  ;;  %v4679_v25 = vrot.slane %v4677_v38, 5  ;;  %v1985_v38 = vshll.u32 %v7333_v49, 16 }
  0xcb   : > { %8602 = vmatpush3.bf16.msra.mxu1 %v9497_v58  ;;  %v4662_v22 = vrot.slane %v4660_v6, 4  ;;  %v4665_v58 = vrot.slane %v4663_v30, 5  ;;  %v7335_v30 = vld [vmem:[%s9810_s14 + $0x18] sm:$0xf] }
  0xcc   : > { %8611 = vmatprep.subr.bf16.mxu1 %v9499_v13 }
  0xcd   : > { %8912 = vmatpush3.bf16.msra.mxu0 %v9496_v46  ;;  %v9510_v46 = vld [vmem:[%s11556_s3 + $0x4e0] sm:$0xff]   ;;  %v4666_v11 = vor.u32 %v4665_v58, %v4662_v22  ;;  %v1996_v22 = vshrl.u32 %v7335_v30, 16  ;;  %v1999_v58 = vshll.u32 %v7335_v30, 16 }
  0xce   : > { %8913 = vmatprep.subr.bf16.mxu0 %v9498_v18  ;;  %8604 = vmatmul.mubr.bf16.vlgmr.msra.gmra.mrb[0].mxu1 %v7286_v9  ;;  %v4683_v9 = vshll.u32 %v10607_v26, 16 }
  0xcf   : > { %8612 = vmatpush3.bf16.msra.mxu1 %v9499_v13  ;;  %8607 = vmatprep.mubr.bf16.mxu1 %v7287_v19  ;;  %v4676_v13 = vrot.slane %v4674_v10, 4  ;;  %v10621_v19 = vrot.slane %v4669_v27, 5  ;;  %v10629_v54 = vrot.slane %v4666_v11, 4  ;;  %v1982_v10 = vshrl.u32 %v7333_v49, 16 }
  0xd0   : > { %8613 = vmatprep.subr.bf16.mxu1 %v9503_v43  ;;  %v1998_v39 = vrot.slane %v1996_v22, 4  ;;  %v2001_v63 = vrot.slane %v1999_v58, 5  ;;  %v9529_v22 = vld [vmem:[%s11556_s3 + $0x1e0] sm:$0xff]  }
  0xd1   : > { %8914 = vmatpush3.bf16.msra.mxu0 %v9498_v18  ;;  %v9511_v18 = vld [vmem:[%s11556_s3 + $0x1a8] sm:$0xff]   ;;  %v4680_v42 = vor.u32 %v4679_v25, %v4676_v13  ;;  %v4672_v28 = vsel %vm9857_vm2, %v10629_v54, %v10621_v19  ;;  %v1984_v13 = vrot.slane %v1982_v10, 4  ;;  %v1987_v25 = vrot.slane %v1985_v38, 5 }
  0xd2   : > { %8923 = vmatprep.subr.bf16.mxu0 %v9501_v32  ;;  %v4927_v54 = vrot.slane %v10554_v47, 5 }
  0xd3   : > { %8614 = vmatpush3.bf16.msra.mxu1 %v9503_v43  ;;  %v4704_v43 = vrot.slane %v4702_v40, 4  ;;  %v10631_v16 = vrot.slane %v4680_v42, 4  ;;  %v9533_v40 = vld [vmem:[%s9810_s14 + $0x30] ss:$8 sps:$4 sm:$0xff]   ;;  %v1988_v11 = vor.u32 %v1987_v25, %v1984_v13  ;;  %v9523_v42 = vld [vmem:[%s11556_s3 + $0x1c8] sm:$0xff]  }
  0xd4   : > { %8916 = vmatmul.mubr.bf16.vlgmr.msra.gmra.mrb[0].mxu0 %v9502_v51  ;;  %8615 = vmatprep.subr.bf16.mxu1 %v9505_v56  ;;  %v10633_v51 = vrot.slane %v4683_v9, 5  ;;  %v9528_v13 = vld [vmem:[%s11556_s3 + $0x518] sm:$0xff]  }
  0xd5   : > { %8924 = vmatpush3.bf16.msra.mxu0 %v9501_v32  ;;  %8919 = vmatprep.mubr.bf16.mxu0 %v9514_v3  ;;  %v4707_v32 = vrot.slane %v4705_v15, 5  ;;  %v4733_v3 = vshll.u32 %v4629_v60, 16  ;;  %v4722_v15 = vor.u32 %v10646_v55, %v10644_v57  ;;  %v1989_v31 = vrot.slane %v1988_v11, 4  ;;  %v7337_v57 = vld [vmem:[%s9810_s14 + $0x20] sm:$0xf] }
  0xd6   : > { %8925 = vmatprep.subr.bf16.mxu0 %v9504_v4  ;;  %8608 = vmatmul.mubr.bf16.gmra.mrb[4].mxu1 %v7288_v24  ;;  %v4686_v6 = vsel %vm9857_vm2, %v10631_v16, %v10633_v51  ;;  %v2013_v30 = vshll.u32 %v7337_v57, 16  ;;  %v9530_v11 = vld [vmem:[%s11556_s3 + $0x520] sm:$0xff]  }
  0xd7   : > { %8616 = vmatpush3.bf16.msra.mxu1 %v9505_v56  ;;  %8627 = vmatprep.mubr.bf16.mxu1 %v9519_v1  ;;  %v4711_v56 = vshll.u32 %v10624_v45, 16  ;;  %v10642_v1 = vrot.slane %v4697_v61, 5  ;;  %v4708_v24 = vor.u32 %v4707_v32, %v4704_v43  ;;  %v2002_v61 = vor.u32 %v2001_v63, %v1998_v39  ;;  %v9525_v43 = vld [vmem:[%s11556_s3 + $0x1d0] sm:$0xff]  }
  0xd8   : > { %8617 = vmatprep.subr.bf16.mxu1 %v9507_v23  ;;  %v7806_v16 = vcombine.low %v4672_v28, %v4686_v6  ;;  %v2010_v6 = vshrl.u32 %v7337_v57, 16 }
  0xd9   : > { %8926 = vmatpush3.bf16.msra.mxu0 %v9504_v4  ;;  %v4730_v4 = vshrl.u32 %v4629_v60, 16  ;;  %v4709_v62 = vrot.slane %v4708_v24, 4  ;;  %v4923_v60 = vrot.slane %v10551_v8, 5  ;;  %v2003_v37 = vrot.slane %v2002_v61, 4  ;;  %v9524_v8 = vld [vmem:[%s11556_s3 + $0x508] sm:$0xff]  }
  0xda   : > { %8927 = vmatprep.subr.bf16.mxu0 %v9506_v0 }
  0xdb   : > { %8618 = vmatpush3.bf16.msra.mxu1 %v9507_v23  ;;  %v10648_v29 = vrot.slane %v4730_v4, 4  ;;  %v4694_v23 = vor.u32 %v4693_v12, %v4690_v14  ;;  %v9521_v12 = vld [vmem:[%s11556_s3 + $0x500] sm:$0xff]  }
  0xdc   : > { %8920 = vmatmul.mubr.bf16.gmra.mrb[4].mxu0 %v9516_v17  ;;  %8619 = vmatprep.subr.bf16.mxu1 %v9509_v20  ;;  %v10661_v17 = vld [vmem:[%s9810_s14 + $0x14] sm:$0x1] }
  0xdd   : > { %8928 = vmatpush3.bf16.msra.mxu0 %v9506_v0  ;;  %8939 = vmatprep.mubr.bf16.mxu0 %v7805_v21  ;;  %v10654_v0 = vld [vmem:[%s10465_s19 + $0x34] sm:$0x1]  ;;  %v1991_v21 = vshll.u32 %v10661_v17, 16  ;;  %v4695_v27 = vrot.slane %v4694_v23, 4  ;;  %v9527_v23 = vld [vmem:[%s11556_s3 + $0x1d8] sm:$0xff]  }
  0xde   : > { %8929 = vmatprep.subr.bf16.mxu0 %v9508_v7 }
  0xdf   : > { %8620 = vmatpush3.bf16.msra.mxu1 %v9509_v20  ;;  %v4735_v20 = vrot.slane %v4733_v3, 5  ;;  %v1993_v19 = vrot.slane %v1991_v21, 5  ;;  %v4700_v32 = vsel %vm9857_vm2, %v4695_v27, %v10642_v1  ;;  %v2012_v27 = vrot.slane %v2010_v6, 4 }
  0xe0   : > { %8621 = vmatprep.subr.bf16.mxu1 %v9511_v18 }
  0xe1   : > { %8930 = vmatpush3.bf16.msra.mxu0 %v9508_v7  ;;  %v10676_v7 = vld [vmem:[%s9810_s14 + $0x1c] sm:$0x1]  ;;  %v4736_v9 = vor.u32 %v4735_v20, %v10648_v29  ;;  %v1994_v47 = vsel %vm9857_vm2, %v1989_v31, %v1993_v19  ;;  %v9536_v29 = vld [vmem:[%s9810_s14 + $0x40] ss:$8 sps:$4 sm:$0xff]  }
  0xe2   : > { %8931 = vmatprep.subr.bf16.mxu0 %v9510_v46  ;;  %v2005_v33 = vshll.u32 %v10676_v7, 16 }
  0xe3   : > { %8622 = vmatpush3.bf16.msra.mxu1 %v9511_v18  ;;  %v9522_v18 = vld [vmem:[%s9810_s14 + $0x20] ss:$8 sps:$4 sm:$0xff]   ;;  %v4737_v3 = vrot.slane %v4736_v9, 4  ;;  %v10753_v9 = vld [vmem:[%s9810_s14 + $0x3c] sm:$0x1] }
  0xe4   : > { %8623 = vmatprep.subr.bf16.mxu1 %v9513_v44  ;;  %v2007_v14 = vrot.slane %v2005_v33, 5  ;;  %v10736_v33 = vld [vmem:[%s9810_s14 + $0x24] sm:$0x1] }
  0xe5   : > { %8932 = vmatpush3.bf16.msra.mxu0 %v9510_v46  ;;  %v4713_v46 = vrot.slane %v4711_v56, 5  ;;  %v4723_v56 = vrot.slane %v4722_v15, 4  ;;  %v9531_v15 = vld [vmem:[%s11556_s3 + $0x1e8] sm:$0xff]  }
  0xe6   : > { %8933 = vmatprep.subr.bf16.mxu0 %v9512_v41  ;;  %v2008_v1 = vsel %vm9857_vm2, %v2003_v37, %v2007_v14  ;;  %v2019_v14 = vshll.u32 %v10736_v33, 16 }
  0xe7   : > { %8624 = vmatpush3.bf16.msra.mxu1 %v9513_v44  ;;  %v4739_v44 = vshll.u32 %v10657_v59, 16  ;;  %v4714_v50 = vsel %vm9857_vm2, %v4709_v62, %v4713_v46  ;;  %v7365_v28 = vcombine.low %v1994_v47, %v2008_v1  ;;  %v2015_v62 = vrot.slane %v2013_v30, 5 }
  0xe8   : > { %8625 = vmatprep.subr.bf16.mxu1 %v9517_v52  ;;  %v7807_v55 = vcombine.low %v4700_v32, %v4714_v50  ;;  %v10758_v50 = vld [vmem:[%s10465_s19 + $0x10] sm:$0xe]  ;;  %v4935_v47 = vrot.slane %v10607_v26, 5  ;;  %v2021_v57 = vrot.slane %v2019_v14, 5 }
  0xe9   : > { %8934 = vmatpush3.bf16.msra.mxu0 %v9512_v41  ;;  %v4725_v41 = vshll.u32 %v10654_v0, 16  ;;  %v4741_v4 = vrot.slane %v4739_v44, 5  ;;  %v10746_v44 = vld [vmem:[%s9810_s14 + $0x34] sm:$0x1] }
  0xea   : > { %8935 = vmatprep.subr.bf16.mxu0 %v9515_v53 }
  0xeb   : > { %8626 = vmatpush3.bf16.msra.mxu1 %v9517_v52  ;;  %v4727_v51 = vrot.slane %v4725_v41, 5  ;;  %v4898_v52 = vld [vmem:[%s10465_s19 + $0x8] sm:$0xe]  ;;  %v4742_v38 = vsel %vm9857_vm2, %v4737_v3, %v4741_v4  ;;  %v7341_v41 = vld [vmem:[%s9810_s14 + $0x30] sm:$0xf]  ;;  %v4931_v3 = vrot.slane %v10597_v36, 5 }
  0xec   : > { %8635 = vmatprep.subr.bf16.mxu1 %v9520_v2  ;;  %v7818_v49 = vrot.slane %v4898_v52, 9  ;;  %v2038_v19 = vshrl.u32 %v7341_v41, 16  ;;  %v2041_v61 = vshll.u32 %v7341_v41, 16  ;;  %v9532_v52 = vld [vmem:[%s11556_s3 + $0x528] sm:$0xff]   ;;  %v9537_v36 = vld [vmem:[%s11556_s3 + $0x1f8] sm:$0xff]  }
  0xed   : > { %8936 = vmatpush3.bf16.msra.mxu0 %v9515_v53  ;;  %v4897_v53 = vld [vmem:[%s10465_s19] sm:$0xe]  ;;  %v4728_v10 = vsel %vm9857_vm2, %v4723_v56, %v4727_v51  ;;  %v9534_v56 = vld [vmem:[%s11556_s3 + $0x1f0] sm:$0xff]  }
  0xee   : > { %8937 = vmatprep.subr.bf16.mxu0 %v9518_v5  ;;  %8628 = vmatmul.mubr.bf16.vlgmr.msra.gmra.mrb[0].mxu1 %v9522_v18  ;;  %v7817_v24 = vrot.slane %v4897_v53, 9  ;;  %v4928_v46 = vsel %vm10031_vm5, %v7818_v49, %v4927_v54  ;;  %v7808_v25 = vcombine.low %v4728_v10, %v4742_v38  ;;  %v10739_v18 = vld [vmem:[%s9810_s14 + $0x2c] sm:$0x1]  ;;  %v2040_v37 = vrot.slane %v2038_v19, 4  ;;  %v10781_v10 = vld [vmem:[%s9810_s14 + $0x44] sm:$0x1] }
  0xef   : > { %8636 = vmatpush3.bf16.msra.mxu1 %v9520_v2  ;;  %8631 = vmatprep.mubr.bf16.mxu1 %v9533_v40  ;;  %v7339_v2 = vld [vmem:[%s9810_s14 + $0x28] sm:$0xf]  ;;  %v2043_v54 = vrot.slane %v2041_v61, 5  ;;  %v2061_v53 = vshll.u32 %v10753_v9, 16 }
  0xf0   : > { %8637 = vmatprep.subr.bf16.mxu1 %v9523_v42  ;;  %v2024_v20 = vshrl.u32 %v7339_v2, 16  ;;  %v2027_v21 = vshll.u32 %v7339_v2, 16  ;;  %v4924_v58 = vsel %vm10031_vm5, %v7817_v24, %v4923_v60  ;;  %v7345_v2 = vld [vmem:[%s9810_s14 + $0x40] sm:$0xf] }
  0xf1   : > { %8938 = vmatpush3.bf16.msra.mxu0 %v9518_v5  ;;  %v9526_v5 = vld [vmem:[%s11556_s3 + $0x510] sm:$0xff]   ;;  %v7841_v39 = vcombine.low %v4924_v58, %v4928_v46  ;;  %v2044_v1 = vor.u32 %v2043_v54, %v2040_v37  ;;  %v2063_v30 = vrot.slane %v2061_v53, 5  ;;  %v2069_v38 = vshll.u32 %v7345_v2, 16  ;;  %v10787_v58 = vld [vmem:[%s9810_s14 + $0x4c] sm:$0x1] }
  0xf2   : > { %8947 = vmatprep.subr.bf16.mxu0 %v9521_v12  ;;  %v2026_v63 = vrot.slane %v2024_v20, 4  ;;  %v2029_v40 = vrot.slane %v2027_v21, 5  ;;  %v9535_v20 = vld [vmem:[%s11556_s3 + $0x530] sm:$0xff]   ;;  %v2089_v19 = vshll.u32 %v10787_v58, 16 }
  0xf3   : > { %8638 = vmatpush3.bf16.msra.mxu1 %v9523_v42  ;;  %v7343_v42 = vld [vmem:[%s9810_s14 + $0x38] sm:$0xf]  ;;  %v2045_v21 = vrot.slane %v2044_v1, 4 }
  0xf4   : > { %8940 = vmatmul.mubr.bf16.vlgmr.msra.gmra.mrb[0].mxu0 %v7806_v16  ;;  %8639 = vmatprep.subr.bf16.mxu1 %v9525_v43  ;;  %v2052_v31 = vshrl.u32 %v7343_v42, 16  ;;  %v2055_v60 = vshll.u32 %v7343_v42, 16  ;;  %v2030_v32 = vor.u32 %v2029_v40, %v2026_v63  ;;  %v10761_v16 = vld [vmem:[%s10465_s19 + $0x18] sm:$0xe]  ;;  %v4943_v63 = vrot.slane %v10624_v45, 5  ;;  %v9539_v45 = vld [vmem:[%s11556_s3 + $0x200] sm:$0xff]  }
  0xf5   : > { %8948 = vmatpush3.bf16.msra.mxu0 %v9521_v12  ;;  %8943 = vmatprep.mubr.bf16.mxu0 %v7807_v55  ;;  %v2033_v12 = vshll.u32 %v10739_v18, 16  ;;  %v7819_v55 = vrot.slane %v10758_v50, 9  ;;  %v7820_v49 = vrot.slane %v10761_v16, 9  ;;  %v2075_v40 = vshll.u32 %v10781_v10, 16  ;;  %v7378_v16 = vld [vmem:[%s9810_s14 + $0x18] sm:$0xe] }
  0xf6   : > { %8949 = vmatprep.subr.bf16.mxu0 %v9524_v8  ;;  %8632 = vmatmul.mubr.bf16.gmra.mrb[4].mxu1 %v9536_v29  ;;  %v2054_v51 = vrot.slane %v2052_v31, 4  ;;  %v2057_v4 = vrot.slane %v2055_v60, 5  ;;  %v2031_v26 = vrot.slane %v2030_v32, 4  ;;  %v7377_v32 = vld [vmem:[%s9810_s14 + $0x10] sm:$0xe] }
  0xf7   : > { %8640 = vmatpush3.bf16.msra.mxu1 %v9525_v43  ;;  %8651 = vmatprep.mubr.bf16.mxu1 %v7365_v28  ;;  %v2016_v43 = vor.u32 %v2015_v62, %v2012_v27  ;;  %v2035_v24 = vrot.slane %v2033_v12, 5  ;;  %v2066_v28 = vshrl.u32 %v7345_v2, 16  ;;  %v2071_v27 = vrot.slane %v2069_v38, 5  ;;  %v4902_v12 = vld [vmem:[%s10465_s19 + $0x28] sm:$0xe] }
  0xf8   : > { %8641 = vmatprep.subr.bf16.mxu1 %v9527_v23  ;;  %v2058_v29 = vor.u32 %v2057_v4, %v2054_v51  ;;  %v4932_v37 = vsel %vm10031_vm5, %v7819_v55, %v4931_v3  ;;  %v4936_v54 = vsel %vm10031_vm5, %v7820_v49, %v4935_v47  ;;  %v7822_v4 = vrot.slane %v4902_v12, 9  ;;  %v4903_v2 = vld [vmem:[%s10465_s19 + $0x30] sm:$0xe] }
  0xf9   : > { %8950 = vmatpush3.bf16.msra.mxu0 %v9524_v8  ;;  %v2047_v8 = vshll.u32 %v10746_v44, 16  ;;  %v2068_v46 = vrot.slane %v2066_v28, 4  ;;  %v2077_v53 = vrot.slane %v2075_v40, 5  ;;  %v2273_v47 = vrot.slane %v10661_v17, 5  ;;  %v9543_v49 = vld [vmem:[%s11556_s3 + $0x210] sm:$0xff]  }
  0xfa   : > { %8951 = vmatprep.subr.bf16.mxu0 %v9526_v5  ;;  %v7386_v55 = vrot.slane %v7378_v16, 9  ;;  %v4944_v17 = vsel %vm10031_vm5, %v7822_v4, %v4943_v63  ;;  %v9547_v63 = vld [vmem:[%s11556_s3 + $0x220] sm:$0xff]   ;;  %v9556_v40 = vld [vmem:[%s10465_s19 + $0x8] ss:$8 sps:$4 sm:$0xff]   ;;  %v2285_v12 = vrot.slane %v10739_v18, 5 }
  0xfb   : > { %8642 = vmatpush3.bf16.msra.mxu1 %v9527_v23  ;;  %v2017_v23 = vrot.slane %v2016_v43, 4  ;;  %v2049_v6 = vrot.slane %v2047_v8, 5  ;;  %v2072_v60 = vor.u32 %v2071_v27, %v2068_v46  ;;  %v9541_v8 = vld [vmem:[%s11556_s3 + $0x208] sm:$0xff]   ;;  %v9544_v27 = vld [vmem:[%s11556_s3 + $0x550] sm:$0xff]  }
  0xfc   : > { %8944 = vmatmul.mubr.bf16.gmra.mrb[4].mxu0 %v7808_v25  ;;  %8643 = vmatprep.subr.bf16.mxu1 %v9529_v22  ;;  %v4901_v25 = vld [vmem:[%s10465_s19 + $0x20] sm:$0xe]  ;;  %v9552_v18 = vld [vmem:[%s11556_s3 + $0x570] sm:$0xff]  }
  0xfd   : > { %8952 = vmatpush3.bf16.msra.mxu0 %v9526_v5  ;;  %8963 = vmatprep.mubr.bf16.mxu0 %v7841_v39  ;;  %v7347_v5 = vld [vmem:[%s9810_s14 + $0x48] sm:$0xf]  ;;  %v4939_v39 = vrot.slane %v10612_v34, 5  ;;  %v2022_v41 = vsel %vm9857_vm2, %v2017_v23, %v2021_v57  ;;  %v9538_v34 = vld [vmem:[%s11556_s3 + $0x538] sm:$0xff]   ;;  %v2050_v61 = vsel %vm9857_vm2, %v2045_v21, %v2049_v6  ;;  %v7821_v31 = vrot.slane %v4901_v25, 9 }
  0xfe   : > { %8953 = vmatprep.subr.bf16.mxu0 %v9528_v13  ;;  %v2083_v62 = vshll.u32 %v7347_v5, 16  ;;  %v2073_v3 = vrot.slane %v2072_v60, 4  ;;  %v7385_v57 = vrot.slane %v7377_v32, 9  ;;  %v4904_v23 = vld [vmem:[%s10465_s19 + $0x38] sm:$0xe]  ;;  %v7823_v6 = vrot.slane %v4903_v2, 9 }
  0xff   : > { %8644 = vmatpush3.bf16.msra.mxu1 %v9529_v22  ;;  %v2059_v22 = vrot.slane %v2058_v29, 4  ;;  %v2277_v29 = vrot.slane %v10676_v7, 5  ;;  %v9542_v21 = vld [vmem:[%s11556_s3 + $0x548] sm:$0xff]   ;;  %v7382_v60 = vld [vmem:[%s9810_s14 + $0x38] sm:$0xe] }
 0x100   : > { %8645 = vmatprep.subr.bf16.mxu1 %v9531_v15  ;;  %v2085_v42 = vrot.slane %v2083_v62, 5  ;;  %v2078_v7 = vsel %vm9857_vm2, %v2073_v3, %v2077_v53  ;;  %v2274_v38 = vsel %vm10031_vm5, %v7385_v57, %v2273_v47  ;;  %v9546_v62 = vld [vmem:[%s11556_s3 + $0x558] sm:$0xff]   ;;  %v7889_v32 = vld [vmem:[%s10465_s19 + $0x8] sm:$0xf]  ;;  %v7390_v16 = vrot.slane %v7382_v60, 9 }
 0x101   : > { %8954 = vmatpush3.bf16.msra.mxu0 %v9528_v13  ;;  %v2080_v13 = vshrl.u32 %v7347_v5, 16  ;;  %v2064_v14 = vsel %vm9857_vm2, %v2059_v22, %v2063_v30  ;;  %v4940_v5 = vsel %vm10031_vm5, %v7821_v31, %v4939_v39  ;;  %v7824_v30 = vrot.slane %v4904_v23, 9  ;;  %v7381_v31 = vld [vmem:[%s9810_s14 + $0x30] sm:$0xe]  ;;  %v7383_v47 = vld [vmem:[%s9810_s14 + $0x40] sm:$0xe] }
 0x102   : > { %8955 = vmatprep.subr.bf16.mxu0 %v9530_v11  ;;  %v7367_v51 = vcombine.low %v2050_v61, %v2064_v14  ;;  %v7843_v22 = vcombine.low %v4940_v5, %v4944_v17  ;;  %v2281_v61 = vrot.slane %v10736_v33, 5  ;;  %v2293_v33 = vrot.slane %v10753_v9, 5  ;;  %v9554_v9 = vld [vmem:[%s11556_s3 + $0x578] sm:$0xff]   ;;  %v10908_v2 = vld [vmem:[%s10465_s19 + $0xc] sm:$0x1]  ;;  %v9557_v17 = vld [vmem:[%s11556_s3 + $0x580] sm:$0xff]  }
 0x103   : > { %8646 = vmatpush3.bf16.msra.mxu1 %v9531_v15  ;;  %v2082_v15 = vrot.slane %v2080_v13, 4  ;;  %v5295_v4 = vshrl.u32 %v7889_v32, 16  ;;  %v5298_v53 = vshll.u32 %v7889_v32, 16  ;;  %v2297_v3 = vrot.slane %v10781_v10, 5  ;;  %v10911_v23 = vld [vmem:[%s10465_s19 + $0x14] sm:$0x1] }
 0x104   : > { %8647 = vmatprep.subr.bf16.mxu1 %v9534_v56  ;;  %v2294_v57 = vsel %vm10031_vm5, %v7390_v16, %v2293_v33 }
 0x105   : > { %8956 = vmatpush3.bf16.msra.mxu0 %v9530_v11  ;;  %v2036_v11 = vsel %vm9857_vm2, %v2031_v26, %v2035_v24  ;;  %v2086_v43 = vor.u32 %v2085_v42, %v2082_v15  ;;  %v7842_v24 = vcombine.low %v4932_v37, %v4936_v54  ;;  %v4951_v26 = vrot.slane %v10657_v59, 5  ;;  %v9545_v59 = vld [vmem:[%s11556_s3 + $0x218] sm:$0xff]   ;;  %v9548_v15 = vld [vmem:[%s11556_s3 + $0x560] sm:$0xff]   ;;  %v7380_v42 = vld [vmem:[%s9810_s14 + $0x28] sm:$0xe] }
 0x106   : > { %8957 = vmatprep.subr.bf16.mxu0 %v9532_v52  ;;  %v7366_v50 = vcombine.low %v2022_v41, %v2036_v11  ;;  %v9549_v41 = vld [vmem:[%s11556_s3 + $0x228] sm:$0xff]   ;;  %v7379_v11 = vld [vmem:[%s9810_s14 + $0x20] sm:$0xe]  ;;  %v7388_v14 = vrot.slane %v7380_v42, 9  ;;  %v7389_v37 = vrot.slane %v7381_v31, 9  ;;  %v2289_v54 = vrot.slane %v10746_v44, 5 }
 0x107   : > { %8648 = vmatpush3.bf16.msra.mxu1 %v9534_v56  ;;  %v9540_v56 = vld [vmem:[%s11556_s3 + $0x540] sm:$0xff]   ;;  %v2087_v1 = vrot.slane %v2086_v43, 4  ;;  %v4952_v25 = vsel %vm10031_vm5, %v7824_v30, %v4951_v26  ;;  %v9553_v43 = vld [vmem:[%s11556_s3 + $0x238] sm:$0xff]   ;;  %v5304_v30 = vshll.u32 %v10908_v2, 16  ;;  %v7897_v31 = vld [vmem:[%s10465_s19 + $0x28] sm:$0xf] }
 0x108   : > { %8649 = vmatprep.subr.bf16.mxu1 %v9537_v36  ;;  %v5351_v33 = vshrl.u32 %v7897_v31, 16 }
 0x109   : > { %8958 = vmatpush3.bf16.msra.mxu0 %v9532_v52  ;;  %v2091_v52 = vrot.slane %v2089_v19, 5  ;;  %v9550_v19 = vld [vmem:[%s11556_s3 + $0x568] sm:$0xff]  }
 0x10a   : > { %8959 = vmatprep.subr.bf16.mxu0 %v9535_v20 }
 0x10b   : > { %8650 = vmatpush3.bf16.msra.mxu1 %v9537_v36  ;;  %v2092_v28 = vsel %vm9857_vm2, %v2087_v1, %v2091_v52  ;;  %v4947_v36 = vrot.slane %v10654_v0, 5  ;;  %v2290_v1 = vsel %vm10031_vm5, %v7389_v37, %v2289_v54  ;;  %v10960_v37 = vld [vmem:[%s10465_s19 + $0x24] sm:$0x1] }
 0x10c   : > { %8659 = vmatprep.subr.bf16.mxu1 %v9539_v45  ;;  %v7368_v46 = vcombine.low %v2078_v7, %v2092_v28  ;;  %v9559_v7 = vld [vmem:[%s11556_s3 + $0x248] sm:$0xff]   ;;  %v7411_v28 = vcombine.low %v2290_v1, %v2294_v57  ;;  %v5346_v1 = vshll.u32 %v10960_v37, 16  ;;  %v9569_v57 = vld [vmem:[%s11556_s3 + $0x270] sm:$0xff]  }
 0x10d   : > { %8960 = vmatpush3.bf16.msra.mxu0 %v9535_v20  ;;  %v2278_v20 = vsel %vm10031_vm5, %v7386_v55, %v2277_v29  ;;  %v4948_v13 = vsel %vm10031_vm5, %v7823_v6, %v4947_v36  ;;  %v7384_v55 = vld [vmem:[%s9810_s14 + $0x48] sm:$0xe]  ;;  %v7391_v36 = vrot.slane %v7383_v47, 9  ;;  %v2301_v6 = vrot.slane %v10787_v58, 5  ;;  %v9561_v58 = vld [vmem:[%s11556_s3 + $0x250] sm:$0xff]  }
 0x10e   : > { %8961 = vmatprep.subr.bf16.mxu0 %v9538_v34  ;;  %8652 = vmatmul.mubr.bf16.vlgmr.msra.gmra.mrb[0].mxu1 %v7366_v50  ;;  %v7409_v0 = vcombine.low %v2274_v38, %v2278_v20  ;;  %v7844_v39 = vcombine.low %v4948_v13, %v4952_v25  ;;  %v7891_v50 = vld [vmem:[%s10465_s19 + $0x10] sm:$0xf]  ;;  %v7392_v26 = vrot.slane %v7384_v55, 9  ;;  %v5318_v38 = vshll.u32 %v10911_v23, 16  ;;  %v9558_v20 = vld [vmem:[%s10465_s19 + $0x18] ss:$8 sps:$4 sm:$0xff]  }
 0x10f   : > { %8660 = vmatpush3.bf16.msra.mxu1 %v9539_v45  ;;  %8655 = vmatprep.mubr.bf16.mxu1 %v7367_v51  ;;  %v7387_v45 = vrot.slane %v7379_v11, 9  ;;  %v2286_v51 = vsel %vm10031_vm5, %v7388_v14, %v2285_v12  ;;  %v5309_v44 = vshrl.u32 %v7891_v50, 16  ;;  %v5312_v52 = vshll.u32 %v7891_v50, 16  ;;  %v9570_v13 = vld [vmem:[%s10465_s19 + $0x28] ss:$8 sps:$4 sm:$0xff]   ;;  %v9565_v11 = vld [vmem:[%s11556_s3 + $0x260] sm:$0xff]  }
 0x110   : > { %8661 = vmatprep.subr.bf16.mxu1 %v9541_v8  ;;  %v5306_v25 = vrot.slane %v5304_v30, 5  ;;  %v7895_v14 = vld [vmem:[%s10465_s19 + $0x20] sm:$0xf]  ;;  %v10955_v12 = vld [vmem:[%s10465_s19 + $0x1c] sm:$0x1] }
 0x111   : > { %8962 = vmatpush3.bf16.msra.mxu0 %v9538_v34  ;;  %v9551_v34 = vld [vmem:[%s11556_s3 + $0x230] sm:$0xff]   ;;  %v5311_v10 = vrot.slane %v5309_v44, 4  ;;  %v5314_v5 = vrot.slane %v5312_v52, 5  ;;  %v5337_v54 = vshrl.u32 %v7895_v14, 16  ;;  %v5340_v16 = vshll.u32 %v7895_v14, 16 }
 0x112   : > { %8971 = vmatprep.subr.bf16.mxu0 %v9540_v56  ;;  %v7899_v50 = vld [vmem:[%s10465_s19 + $0x30] sm:$0xf]  ;;  %v7903_v52 = vld [vmem:[%s10465_s19 + $0x40] sm:$0xf] }
 0x113   : > { %8662 = vmatpush3.bf16.msra.mxu1 %v9541_v8  ;;  %v2282_v8 = vsel %vm10031_vm5, %v7387_v45, %v2281_v61  ;;  %v9564_v45 = vld [vmem:[%s11556_s3 + $0x598] sm:$0xff]   ;;  %v5368_v44 = vshll.u32 %v7899_v50, 16  ;;  %v5339_v47 = vrot.slane %v5337_v54, 4  ;;  %v5342_v55 = vrot.slane %v5340_v16, 5  ;;  %v2627_v30 = vld [vmem:[%s9843_s26] sm:$0xf] }
 0x114   : > { %8964 = vmatmul.mubr.bf16.vlgmr.msra.gmra.mrb[0].mxu0 %v7842_v24  ;;  %8663 = vmatprep.subr.bf16.mxu1 %v9543_v49  ;;  %v7410_v29 = vcombine.low %v2282_v8, %v2286_v51  ;;  %v5297_v24 = vrot.slane %v5295_v4, 4  ;;  %v9572_v61 = vld [vmem:[%s10465_s19 + $0x38] ss:$8 sps:$4 sm:$0xff]   ;;  %v9567_v4 = vld [vmem:[%s11556_s3 + $0x268] sm:$0xff]  }
 0x115   : > { %8972 = vmatpush3.bf16.msra.mxu0 %v9540_v56  ;;  %8967 = vmatprep.mubr.bf16.mxu0 %v7843_v22  ;;  %v9555_v56 = vld [vmem:[%s11556_s3 + $0x240] sm:$0xff]   ;;  %v5315_v22 = vor.u32 %v5314_v5, %v5311_v10  ;;  %v7901_v8 = vld [vmem:[%s10465_s19 + $0x38] sm:$0xf]  ;;  %v10982_v10 = vrot.slane %v5351_v33, 4 }
 0x116   : > { %8973 = vmatprep.subr.bf16.mxu0 %v9542_v21  ;;  %8656 = vmatmul.mubr.bf16.gmra.mrb[4].mxu1 %v7368_v46  ;;  %v9560_v46 = vld [vmem:[%s11556_s3 + $0x588] sm:$0xff]   ;;  %v9566_v51 = vld [vmem:[%s11556_s3 + $0x5a0] sm:$0xff]  }
 0x117   : > { %8664 = vmatpush3.bf16.msra.mxu1 %v9543_v49  ;;  %8675 = vmatprep.mubr.bf16.mxu1 %v7409_v0  ;;  %v5300_v49 = vrot.slane %v5298_v53, 5  ;;  %v2298_v0 = vsel %vm10031_vm5, %v7391_v36, %v2297_v3  ;;  %v5365_v53 = vshrl.u32 %v7899_v50, 16  ;;  %v5332_v3 = vshll.u32 %v10955_v12, 16  ;;  %v10990_v36 = vld [vmem:[%s10465_s19 + $0x34] sm:$0x1] }
 0x118   : > { %8665 = vmatprep.subr.bf16.mxu1 %v9545_v59 }
 0x119   : > { %8974 = vmatpush3.bf16.msra.mxu0 %v9542_v21  ;;  %v5301_v21 = vor.u32 %v5300_v49, %v5297_v24  ;;  %v5382_v24 = vshll.u32 %v7901_v8, 16  ;;  %v9568_v49 = vld [vmem:[%s11556_s3 + $0x5a8] sm:$0xff]  }
 0x11a   : > { %8975 = vmatprep.subr.bf16.mxu0 %v9544_v27 }
 0x11b   : > { %8666 = vmatpush3.bf16.msra.mxu1 %v9545_v59  ;;  %v2302_v59 = vsel %vm10031_vm5, %v7392_v26, %v2301_v6  ;;  %v5367_v26 = vrot.slane %v5365_v53, 4  ;;  %v5370_v6 = vrot.slane %v5368_v44, 5 }
 0x11c   : > { %8968 = vmatmul.mubr.bf16.gmra.mrb[4].mxu0 %v7844_v39  ;;  %8667 = vmatprep.subr.bf16.mxu1 %v9547_v63  ;;  %v5302_v39 = vrot.slane %v5301_v21, 4  ;;  %v2629_v21 = vld [vmem:[%s9843_s26 + $0x8] sm:$0xf] }
 0x11d   : > { %8976 = vmatpush3.bf16.msra.mxu0 %v9544_v27  ;;  %8987 = vmatprep.mubr.bf16.mxu0 %v9556_v40  ;;  %v5320_v27 = vrot.slane %v5318_v38, 5  ;;  %v9575_v40 = vld [vmem:[%s9843_s26] ss:$8 sps:$4 sm:$0xff]   ;;  %v10994_v38 = vld [vmem:[%s10465_s19 + $0x3c] sm:$0x1] }
 0x11e   : > { %8977 = vmatprep.subr.bf16.mxu0 %v9546_v62  ;;  %v5307_v42 = vsel %vm9857_vm2, %v5302_v39, %v5306_v25  ;;  %v2661_v25 = vshll.u32 %v2629_v21, 16  ;;  %v5343_v39 = vor.u32 %v5342_v55, %v5339_v47  ;;  %v5590_v47 = vrot.slane %v10911_v23, 5  ;;  %v9579_v55 = vld [vmem:[%s11556_s3 + $0x288] sm:$0xff]  }
 0x11f   : > { %8668 = vmatpush3.bf16.msra.mxu1 %v9547_v63  ;;  %v5316_v63 = vrot.slane %v5315_v22, 4  ;;  %v2644_v22 = vshrl.u32 %v2627_v30, 16 }
 0x120   : > { %8669 = vmatprep.subr.bf16.mxu1 %v9549_v41  ;;  %v5344_v44 = vrot.slane %v5343_v39, 4  ;;  %v9592_v39 = vld [vmem:[%s9843_s26 + $0x30] ss:$8 sps:$4 sm:$0xff]  }
 0x121   : > { %8978 = vmatpush3.bf16.msra.mxu0 %v9546_v62  ;;  %v7412_v62 = vcombine.low %v2298_v0, %v2302_v59  ;;  %v5384_v59 = vrot.slane %v5382_v24, 5 }
 0x122   : > { %8979 = vmatprep.subr.bf16.mxu0 %v9548_v15 }
 0x123   : > { %8670 = vmatpush3.bf16.msra.mxu1 %v9549_v41  ;;  %v9562_v41 = vld [vmem:[%s11556_s3 + $0x590] sm:$0xff]  }
 0x124   : > { %8671 = vmatprep.subr.bf16.mxu1 %v9551_v34 }
 0x125   : > { %8980 = vmatpush3.bf16.msra.mxu0 %v9548_v15  ;;  %v9563_v15 = vld [vmem:[%s11556_s3 + $0x258] sm:$0xff]  }
 0x126   : > { %8981 = vmatprep.subr.bf16.mxu0 %v9550_v19 }
 0x127   : > { %8672 = vmatpush3.bf16.msra.mxu1 %v9551_v34  ;;  %v7893_v34 = vld [vmem:[%s10465_s19 + $0x18] sm:$0xf] }
 0x128   : > { %8673 = vmatprep.subr.bf16.mxu1 %v9553_v43  ;;  %v5326_v32 = vshll.u32 %v7893_v34, 16 }
 0x129   : > { %8982 = vmatpush3.bf16.msra.mxu0 %v9550_v19  ;;  %v5321_v19 = vsel %vm9857_vm2, %v5316_v63, %v5320_v27  ;;  %v9571_v27 = vld [vmem:[%s11556_s3 + $0x5b0] sm:$0xff]  }
 0x12a   : > { %8983 = vmatprep.subr.bf16.mxu0 %v9552_v18  ;;  %v7921_v60 = vcombine.low %v5307_v42, %v5321_v19 }
 0x12b   : > { %8674 = vmatpush3.bf16.msra.mxu1 %v9553_v43  ;;  %v5323_v43 = vshrl.u32 %v7893_v34, 16  ;;  %v2663_v34 = vrot.slane %v2661_v25, 5  ;;  %v2633_v25 = vld [vmem:[%s9843_s26 + $0x18] sm:$0xf] }
 0x12c   : > { %8683 = vmatprep.subr.bf16.mxu1 %v9555_v56 }
 0x12d   : > { %8984 = vmatpush3.bf16.msra.mxu0 %v9552_v18  ;;  %v5354_v18 = vshll.u32 %v7897_v31, 16  ;;  %v5374_v31 = vshll.u32 %v10990_v36, 16 }
 0x12e   : > { %8985 = vmatprep.subr.bf16.mxu0 %v9554_v9  ;;  %8676 = vmatmul.mubr.bf16.vlgmr.msra.gmra.mrb[0].mxu1 %v7410_v29  ;;  %v5379_v29 = vshrl.u32 %v7901_v8, 16  ;;  %v9574_v8 = vld [vmem:[%s11556_s3 + $0x5b8] sm:$0xff]  }
 0x12f   : > { %8684 = vmatpush3.bf16.msra.mxu1 %v9555_v56  ;;  %8679 = vmatprep.mubr.bf16.mxu1 %v7411_v28  ;;  %v10972_v56 = vrot.slane %v5326_v32, 5  ;;  %v10984_v5 = vrot.slane %v5354_v18, 5  ;;  %v10987_v28 = vld [vmem:[%s10465_s19 + $0x2c] sm:$0x1]  ;;  %v5388_v32 = vshll.u32 %v10994_v38, 16 }
 0x130   : > { %8685 = vmatprep.subr.bf16.mxu1 %v9559_v7  ;;  %v5381_v0 = vrot.slane %v5379_v29, 4  ;;  %v5360_v14 = vshll.u32 %v10987_v28, 16 }
 0x131   : > { %8986 = vmatpush3.bf16.msra.mxu0 %v9554_v9  ;;  %v10970_v9 = vrot.slane %v5323_v43, 4  ;;  %v5371_v43 = vor.u32 %v5370_v6, %v5367_v26 }
 0x132   : > { %8995 = vmatprep.subr.bf16.mxu0 %v9557_v17  ;;  %v5385_v54 = vor.u32 %v5384_v59, %v5381_v0  ;;  %v9581_v0 = vld [vmem:[%s11556_s3 + $0x290] sm:$0xff]  }
 0x133   : > { %8686 = vmatpush3.bf16.msra.mxu1 %v9559_v7  ;;  %v5396_v7 = vshll.u32 %v7903_v52, 16  ;;  %v5372_v24 = vrot.slane %v5371_v43, 4  ;;  %v9583_v43 = vld [vmem:[%s11556_s3 + $0x298] sm:$0xff]  }
 0x134   : > { %8988 = vmatmul.mubr.bf16.vlgmr.msra.gmra.mrb[0].mxu0 %v9558_v20  ;;  %8687 = vmatprep.subr.bf16.mxu1 %v9561_v58  ;;  %v10997_v20 = vld [vmem:[%s10465_s19 + $0x44] sm:$0x1] }
 0x135   : > { %8996 = vmatpush3.bf16.msra.mxu0 %v9557_v17  ;;  %8991 = vmatprep.mubr.bf16.mxu0 %v9570_v13  ;;  %v5393_v17 = vshrl.u32 %v7903_v52, 16  ;;  %v2658_v13 = vshrl.u32 %v2629_v21, 16  ;;  %v5402_v50 = vshll.u32 %v10997_v20, 16 }
 0x136   : > { %8997 = vmatprep.subr.bf16.mxu0 %v9560_v46  ;;  %8680 = vmatmul.mubr.bf16.gmra.mrb[4].mxu1 %v7412_v62  ;;  %v5329_v62 = vor.u32 %v10972_v56, %v10970_v9  ;;  %v9589_v56 = vld [vmem:[%s9843_s26 + $0x20] ss:$8 sps:$4 sm:$0xff]  }
 0x137   : > { %8688 = vmatpush3.bf16.msra.mxu1 %v9561_v58  ;;  %8699 = vmatprep.mubr.bf16.mxu1 %v9575_v40  ;;  %v9573_v58 = vld [vmem:[%s11556_s3 + $0x278] sm:$0xff]   ;;  %v5395_v63 = vrot.slane %v5393_v17, 4  ;;  %v5398_v40 = vrot.slane %v5396_v7, 5  ;;  %v2660_v19 = vrot.slane %v2658_v13, 4  ;;  %v5386_v17 = vrot.slane %v5385_v54, 4 }
 0x138   : > { %8689 = vmatprep.subr.bf16.mxu1 %v9563_v15  ;;  %v5330_v53 = vrot.slane %v5329_v62, 4  ;;  %v9580_v62 = vld [vmem:[%s11556_s3 + $0x5c8] sm:$0xff]  }
 0x139   : > { %8998 = vmatpush3.bf16.msra.mxu0 %v9560_v46  ;;  %v2647_v46 = vshll.u32 %v2627_v30, 16  ;;  %v5399_v16 = vor.u32 %v5398_v40, %v5395_v63  ;;  %v2664_v9 = vor.u32 %v2663_v34, %v2660_v19 }
 0x13a   : > { %8999 = vmatprep.subr.bf16.mxu0 %v9562_v41 }
 0x13b   : > { %8690 = vmatpush3.bf16.msra.mxu1 %v9563_v15  ;;  %v11009_v15 = vld [vmem:[%s9843_s26 + $0x4] sm:$0x1]  ;;  %v2649_v42 = vrot.slane %v2647_v46, 5  ;;  %v2665_v21 = vrot.slane %v2664_v9, 4  ;;  %v7934_v46 = vld [vmem:[%s10465_s19 + $0x10] sm:$0xe] }
 0x13c   : > { %8992 = vmatmul.mubr.bf16.gmra.mrb[4].mxu0 %v9572_v61  ;;  %8691 = vmatprep.subr.bf16.mxu1 %v9565_v11  ;;  %v5348_v61 = vrot.slane %v5346_v1, 5  ;;  %v2653_v33 = vshll.u32 %v11009_v15, 16  ;;  %v5376_v1 = vrot.slane %v5374_v31, 5  ;;  %v2689_v31 = vshll.u32 %v2633_v25, 16 }
 0x13d   : > { %9000 = vmatpush3.bf16.msra.mxu0 %v9562_v41  ;;  %9011 = vmatprep.mubr.bf16.mxu0 %v7921_v60  ;;  %v11012_v41 = vld [vmem:[%s9843_s26 + $0xc] sm:$0x1]  ;;  %v5357_v60 = vor.u32 %v10984_v5, %v10982_v10  ;;  %v5404_v10 = vrot.slane %v5402_v50, 5  ;;  %v9577_v5 = vld [vmem:[%s11556_s3 + $0x5c0] sm:$0xff]  }
 0x13e   : > { %9001 = vmatprep.subr.bf16.mxu0 %v9564_v45  ;;  %v2667_v18 = vshll.u32 %v11012_v41, 16  ;;  %v2655_v7 = vrot.slane %v2653_v33, 5  ;;  %v5349_v6 = vsel %vm9857_vm2, %v5344_v44, %v5348_v61  ;;  %v5377_v13 = vsel %vm9857_vm2, %v5372_v24, %v5376_v1  ;;  %v2635_v33 = vld [vmem:[%s9843_s26 + $0x20] sm:$0xf] }
 0x13f   : > { %8692 = vmatpush3.bf16.msra.mxu1 %v9565_v11  ;;  %v2646_v11 = vrot.slane %v2644_v22, 4  ;;  %v5358_v29 = vrot.slane %v5357_v60, 4  ;;  %v7933_v22 = vld [vmem:[%s10465_s19 + $0x8] sm:$0xe]  ;;  %v9582_v60 = vld [vmem:[%s11556_s3 + $0x5d0] sm:$0xff]   ;;  %v2691_v9 = vrot.slane %v2689_v31, 5 }
 0x140   : > { %8693 = vmatprep.subr.bf16.mxu1 %v9567_v4  ;;  %v2669_v23 = vrot.slane %v2667_v18, 5  ;;  %v7941_v34 = vrot.slane %v7933_v22, 9  ;;  %v2637_v18 = vld [vmem:[%s9843_s26 + $0x28] sm:$0xf]  ;;  %v2703_v1 = vshll.u32 %v2635_v33, 16 }
 0x141   : > { %9002 = vmatpush3.bf16.msra.mxu0 %v9564_v45  ;;  %v5334_v45 = vrot.slane %v5332_v3, 5  ;;  %v2650_v52 = vor.u32 %v2649_v42, %v2646_v11  ;;  %v5362_v3 = vrot.slane %v5360_v14, 5  ;;  %v2686_v14 = vshrl.u32 %v2633_v25, 16 }
 0x142   : > { %9003 = vmatprep.subr.bf16.mxu0 %v9566_v51  ;;  %v2670_v40 = vsel %vm9857_vm2, %v2665_v21, %v2669_v23  ;;  %v5598_v23 = vrot.slane %v10960_v37, 5  ;;  %v2705_v22 = vrot.slane %v2703_v1, 5  ;;  %v9599_v37 = vld [vmem:[%s11556_s3 + $0x2d0] sm:$0xff]  }
 0x143   : > { %8694 = vmatpush3.bf16.msra.mxu1 %v9567_v4  ;;  %v9578_v4 = vld [vmem:[%s9843_s26 + $0x10] ss:$8 sps:$4 sm:$0xff]   ;;  %v5335_v26 = vsel %vm9857_vm2, %v5330_v53, %v5334_v45  ;;  %v2651_v30 = vrot.slane %v2650_v52, 4  ;;  %v5363_v59 = vsel %vm9857_vm2, %v5358_v29, %v5362_v3  ;;  %v7942_v45 = vrot.slane %v7934_v46, 9  ;;  %v11081_v53 = vld [vmem:[%s9843_s26 + $0x1c] sm:$0x1] }
 0x144   : > { %8695 = vmatprep.subr.bf16.mxu1 %v9569_v57  ;;  %v7923_v19 = vcombine.low %v5363_v59, %v5377_v13  ;;  %v2688_v52 = vrot.slane %v2686_v14, 4  ;;  %v2700_v3 = vshrl.u32 %v2635_v33, 16  ;;  %v7936_v14 = vld [vmem:[%s10465_s19 + $0x20] sm:$0xe]  ;;  %v9593_v33 = vld [vmem:[%s11556_s3 + $0x2b8] sm:$0xff]  }
 0x145   : > { %9004 = vmatpush3.bf16.msra.mxu0 %v9566_v51  ;;  %v9576_v51 = vld [vmem:[%s11556_s3 + $0x280] sm:$0xff]   ;;  %v2656_v63 = vsel %vm9857_vm2, %v2651_v30, %v2655_v7  ;;  %v11102_v30 = vld [vmem:[%s9843_s26 + $0x2c] sm:$0x1] }
 0x146   : > { %9005 = vmatprep.subr.bf16.mxu0 %v9568_v49  ;;  %v7465_v61 = vcombine.low %v2656_v63, %v2670_v40  ;;  %v2692_v7 = vor.u32 %v2691_v9, %v2688_v52  ;;  %v2702_v21 = vrot.slane %v2700_v3, 4 }
 0x147   : > { %8696 = vmatpush3.bf16.msra.mxu1 %v9569_v57  ;;  %v5586_v57 = vrot.slane %v10908_v2, 5  ;;  %v5400_v2 = vrot.slane %v5399_v16, 4 }
 0x148   : > { %8697 = vmatprep.subr.bf16.mxu1 %v9573_v58  ;;  %v2706_v31 = vor.u32 %v2705_v22, %v2702_v21  ;;  %v2909_v22 = vld [vmem:[%s9843_s26] sm:$0xe] }
 0x149   : > { %9006 = vmatpush3.bf16.msra.mxu0 %v9568_v49  ;;  %v5390_v49 = vrot.slane %v5388_v32, 5  ;;  %v5405_v50 = vsel %vm9857_vm2, %v5400_v2, %v5404_v10  ;;  %v2695_v10 = vshll.u32 %v11081_v53, 16  ;;  %v9587_v2 = vld [vmem:[%s11556_s3 + $0x2a8] sm:$0xff]  }
 0x14a   : > { %9007 = vmatprep.subr.bf16.mxu0 %v9571_v27  ;;  %v2707_v9 = vrot.slane %v2706_v31, 4  ;;  %v5610_v31 = vrot.slane %v10994_v38, 5 }
 0x14b   : > { %8698 = vmatpush3.bf16.msra.mxu1 %v9573_v58  ;;  %v2631_v58 = vld [vmem:[%s9843_s26 + $0x10] sm:$0xf]  ;;  %v5391_v32 = vsel %vm9857_vm2, %v5386_v17, %v5390_v49  ;;  %v2697_v25 = vrot.slane %v2695_v10, 5 }
 0x14c   : > { %8707 = vmatprep.subr.bf16.mxu1 %v9576_v51  ;;  %v2672_v11 = vshrl.u32 %v2631_v58, 16  ;;  %v2675_v42 = vshll.u32 %v2631_v58, 16  ;;  %v7924_v44 = vcombine.low %v5391_v32, %v5405_v50  ;;  %v2639_v17 = vld [vmem:[%s9843_s26 + $0x30] sm:$0xf]  ;;  %v11126_v32 = vld [vmem:[%s10465_s19 + $0x28] sm:$0xe] }
 0x14d   : > { %9008 = vmatpush3.bf16.msra.mxu0 %v9571_v27  ;;  %v7922_v27 = vcombine.low %v5335_v26, %v5349_v6  ;;  %v11098_v26 = vld [vmem:[%s9843_s26 + $0x24] sm:$0x1]  ;;  %v2641_v6 = vld [vmem:[%s9843_s26 + $0x38] sm:$0xf]  ;;  %v2731_v63 = vshll.u32 %v2639_v17, 16  ;;  %v7945_v10 = vrot.slane %v11126_v32, 9 }
 0x14e   : > { %9009 = vmatprep.subr.bf16.mxu0 %v9574_v8  ;;  %8700 = vmatmul.mubr.bf16.vlgmr.msra.gmra.mrb[0].mxu1 %v9578_v4  ;;  %v2674_v54 = vrot.slane %v2672_v11, 4  ;;  %v2677_v16 = vrot.slane %v2675_v42, 5  ;;  %v11078_v4 = vld [vmem:[%s9843_s26 + $0x14] sm:$0x1]  ;;  %v2742_v40 = vshrl.u32 %v2641_v6, 16  ;;  %v9588_v11 = vld [vmem:[%s11556_s3 + $0x5e8] sm:$0xff]  }
 0x14f   : > { %8708 = vmatpush3.bf16.msra.mxu1 %v9576_v51  ;;  %8703 = vmatprep.mubr.bf16.mxu1 %v9589_v56  ;;  %v5591_v51 = vsel %vm10031_vm5, %v7942_v45, %v5590_v47  ;;  %v9585_v56 = vld [vmem:[%s11556_s3 + $0x2a0] sm:$0xff]   ;;  %v2717_v47 = vshll.u32 %v2637_v18, 16  ;;  %v2681_v49 = vshll.u32 %v11078_v4, 16  ;;  %v2693_v42 = vrot.slane %v2692_v7, 4  ;;  %v11129_v50 = vld [vmem:[%s10465_s19 + $0x30] sm:$0xe] }
 0x150   : > { %8709 = vmatprep.subr.bf16.mxu1 %v9579_v55  ;;  %v2678_v24 = vor.u32 %v2677_v16, %v2674_v54  ;;  %v2745_v45 = vshll.u32 %v2641_v6, 16 }
 0x151   : > { %9010 = vmatpush3.bf16.msra.mxu0 %v9574_v8  ;;  %v5587_v8 = vsel %vm10031_vm5, %v7941_v34, %v5586_v57  ;;  %v2714_v57 = vshrl.u32 %v2637_v18, 16  ;;  %v2719_v58 = vrot.slane %v2717_v47, 5  ;;  %v2683_v13 = vrot.slane %v2681_v49, 5 }
 0x152   : > { %9019 = vmatprep.subr.bf16.mxu0 %v9577_v5  ;;  %v7965_v29 = vcombine.low %v5587_v8, %v5591_v51  ;;  %v11107_v59 = vrot.slane %v2678_v24, 4  ;;  %v2723_v34 = vshll.u32 %v11102_v30, 16  ;;  %v2733_v18 = vrot.slane %v2731_v63, 5  ;;  %v9591_v51 = vld [vmem:[%s11556_s3 + $0x5f0] sm:$0xff]   ;;  %v9595_v24 = vld [vmem:[%s11556_s3 + $0x2c0] sm:$0xff]  }
 0x153   : > { %8710 = vmatpush3.bf16.msra.mxu1 %v9579_v55  ;;  %v9584_v55 = vld [vmem:[%s11556_s3 + $0x5d8] sm:$0xff]   ;;  %v2716_v46 = vrot.slane %v2714_v57, 4  ;;  %v2744_v8 = vrot.slane %v2742_v40, 4  ;;  %v7944_v47 = vrot.slane %v7936_v14, 9  ;;  %v9596_v63 = vld [vmem:[%s11556_s3 + $0x600] sm:$0xff]  }
 0x154   : > { %9012 = vmatmul.mubr.bf16.vlgmr.msra.gmra.mrb[0].mxu0 %v7922_v27  ;;  %8711 = vmatprep.subr.bf16.mxu1 %v9581_v0  ;;  %v2728_v27 = vshrl.u32 %v2639_v17, 16  ;;  %v2725_v1 = vrot.slane %v2723_v34, 5  ;;  %v2684_v49 = vsel %vm9857_vm2, %v11107_v59, %v2683_v13  ;;  %v7946_v17 = vrot.slane %v11129_v50, 9 }
 0x155   : > { %9020 = vmatpush3.bf16.msra.mxu0 %v9577_v5  ;;  %9015 = vmatprep.mubr.bf16.mxu0 %v7923_v19  ;;  %v5594_v5 = vrot.slane %v10955_v12, 5  ;;  %v2709_v19 = vshll.u32 %v11098_v26, 16  ;;  %v5599_v12 = vsel %vm10031_vm5, %v7944_v47, %v5598_v23  ;;  %v2939_v34 = vrot.slane %v11012_v41, 5  ;;  %v9604_v47 = vld [vmem:[%s11556_s3 + $0x620] sm:$0xff]  }
 0x156   : > { %9021 = vmatprep.subr.bf16.mxu0 %v9580_v62  ;;  %8704 = vmatmul.mubr.bf16.gmra.mrb[4].mxu1 %v9592_v39  ;;  %v11113_v39 = vld [vmem:[%s9843_s26 + $0x34] sm:$0x1]  ;;  %v2730_v54 = vrot.slane %v2728_v27, 4 }
 0x157   : > { %8712 = vmatpush3.bf16.msra.mxu1 %v9581_v0  ;;  %8723 = vmatprep.mubr.bf16.mxu1 %v7465_v61  ;;  %v9586_v0 = vld [vmem:[%s11556_s3 + $0x5e0] sm:$0xff]   ;;  %v7935_v61 = vld [vmem:[%s10465_s19 + $0x18] sm:$0xe]  ;;  %v2737_v16 = vshll.u32 %v11113_v39, 16 }
 0x158   : > { %8713 = vmatprep.subr.bf16.mxu1 %v9583_v43  ;;  %v7943_v57 = vrot.slane %v7935_v61, 9 }
 0x159   : > { %9022 = vmatpush3.bf16.msra.mxu0 %v9580_v62  ;;  %v9590_v62 = vld [vmem:[%s11556_s3 + $0x2b0] sm:$0xff]   ;;  %v2739_v7 = vrot.slane %v2737_v16, 5 }
 0x15a   : > { %9023 = vmatprep.subr.bf16.mxu0 %v9582_v60  ;;  %v5595_v13 = vsel %vm10031_vm5, %v7943_v57, %v5594_v5  ;;  %v9605_v57 = vld [vmem:[%s11556_s3 + $0x2e8] sm:$0xff]  }
 0x15b   : > { %8714 = vmatpush3.bf16.msra.mxu1 %v9583_v43  ;;  %v11123_v43 = vld [vmem:[%s9843_s26 + $0x3c] sm:$0x1] }
 0x15c   : > { %9016 = vmatmul.mubr.bf16.gmra.mrb[4].mxu0 %v7924_v44  ;;  %8715 = vmatprep.subr.bf16.mxu1 %v9585_v56  ;;  %v2747_v44 = vrot.slane %v2745_v45, 5  ;;  %v2751_v52 = vshll.u32 %v11123_v43, 16  ;;  %v7966_v45 = vcombine.low %v5595_v13, %v5599_v12  ;;  %v8015_v13 = vld [vmem:[%s10465_s19 + $0x18] sm:$0xf] }
 0x15d   : > { %9024 = vmatpush3.bf16.msra.mxu0 %v9582_v60  ;;  %9035 = vmatprep.mubr.bf16.mxu0 %v7965_v29  ;;  %v2720_v60 = vor.u32 %v2719_v58, %v2716_v46  ;;  %v5606_v29 = vrot.slane %v10990_v36, 5  ;;  %v2698_v36 = vsel %vm9857_vm2, %v2693_v42, %v2697_v25  ;;  %v9597_v25 = vld [vmem:[%s11556_s3 + $0x2c8] sm:$0xff]   ;;  %v7477_v42 = vrot.slane %v2909_v22, 9 }
 0x15e   : > { %9025 = vmatprep.subr.bf16.mxu0 %v9584_v55  ;;  %v2748_v6 = vor.u32 %v2747_v44, %v2744_v8  ;;  %v2753_v21 = vrot.slane %v2751_v52, 5  ;;  %v7466_v59 = vcombine.low %v2684_v49, %v2698_v36  ;;  %v9600_v52 = vld [vmem:[%s11556_s3 + $0x610] sm:$0xff]   ;;  %v2914_v49 = vld [vmem:[%s9843_s26 + $0x28] sm:$0xe]  ;;  %v5975_v12 = vshll.u32 %v8015_v13, 16 }
 0x15f   : > { %8716 = vmatpush3.bf16.msra.mxu1 %v9585_v56  ;;  %v2711_v56 = vrot.slane %v2709_v19, 5  ;;  %v2721_v3 = vrot.slane %v2720_v60, 4  ;;  %v5607_v61 = vsel %vm10031_vm5, %v7946_v17, %v5606_v29  ;;  %v5614_v60 = vrot.slane %v10997_v20, 5  ;;  %v9601_v20 = vld [vmem:[%s11556_s3 + $0x2d8] sm:$0xff]   ;;  %v9607_v17 = vld [vmem:[%s11556_s3 + $0x2f0] sm:$0xff]  }
 0x160   : > { %8717 = vmatprep.subr.bf16.mxu1 %v9587_v2  ;;  %v2749_v5 = vrot.slane %v2748_v6, 4  ;;  %v2912_v29 = vld [vmem:[%s9843_s26 + $0x18] sm:$0xe]  ;;  %v8013_v6 = vld [vmem:[%s10465_s19 + $0x10] sm:$0xf] }
 0x161   : > { %9026 = vmatpush3.bf16.msra.mxu0 %v9584_v55  ;;  %v5602_v55 = vrot.slane %v10987_v28, 5  ;;  %v9594_v28 = vld [vmem:[%s11556_s3 + $0x5f8] sm:$0xff]   ;;  %v2712_v46 = vsel %vm9857_vm2, %v2707_v9, %v2711_v56  ;;  %v2726_v58 = vsel %vm9857_vm2, %v2721_v3, %v2725_v1  ;;  %v9603_v3 = vld [vmem:[%s11556_s3 + $0x2e0] sm:$0xff]   ;;  %v7480_v36 = vrot.slane %v2912_v29, 9 }
 0x162   : > { %9027 = vmatprep.subr.bf16.mxu0 %v9586_v0  ;;  %v7467_v40 = vcombine.low %v2712_v46, %v2726_v58  ;;  %v2754_v41 = vsel %vm9857_vm2, %v2749_v5, %v2753_v21  ;;  %v9602_v9 = vld [vmem:[%s11556_s3 + $0x618] sm:$0xff]   ;;  %v2951_v46 = vrot.slane %v11098_v26, 5  ;;  %v7482_v58 = vrot.slane %v2914_v49, 9  ;;  %v9611_v26 = vld [vmem:[%s11556_s3 + $0x300] sm:$0xff]  }
 0x163   : > { %8718 = vmatpush3.bf16.msra.mxu1 %v9587_v2  ;;  %v2734_v2 = vor.u32 %v2733_v18, %v2730_v54  ;;  %v5603_v23 = vsel %vm10031_vm5, %v7945_v10, %v5602_v55  ;;  %v9612_v1 = vld [vmem:[%s10465_s19 + $0x10] ss:$8 sps:$4 sm:$0xff]   ;;  %v9606_v10 = vld [vmem:[%s11556_s3 + $0x628] sm:$0xff]   ;;  %v9621_v29 = vld [vmem:[%s11556_s3 + $0x320] sm:$0xff]  }
 0x164   : > { %8719 = vmatprep.subr.bf16.mxu1 %v9590_v62  ;;  %v7967_v18 = vcombine.low %v5603_v23, %v5607_v61  ;;  %v2911_v55 = vld [vmem:[%s9843_s26 + $0x10] sm:$0xe]  ;;  %v9609_v21 = vld [vmem:[%s11556_s3 + $0x2f8] sm:$0xff]   ;;  %v11262_v23 = vld [vmem:[%s10465_s19 + $0x14] sm:$0x1] }
 0x165   : > { %9028 = vmatpush3.bf16.msra.mxu0 %v9586_v0  ;;  %v2910_v0 = vld [vmem:[%s9843_s26 + $0x8] sm:$0xe]  ;;  %v2735_v27 = vrot.slane %v2734_v2, 4  ;;  %v7479_v2 = vrot.slane %v2911_v55, 9  ;;  %v8017_v55 = vld [vmem:[%s10465_s19 + $0x20] sm:$0xf] }
 0x166   : > { %9029 = vmatprep.subr.bf16.mxu0 %v9588_v11  ;;  %v7478_v19 = vrot.slane %v2910_v0, 9  ;;  %v2955_v0 = vrot.slane %v11102_v30, 5 }
 0x167   : > { %8720 = vmatpush3.bf16.msra.mxu1 %v9590_v62  ;;  %v2935_v62 = vrot.slane %v11009_v15, 5  ;;  %v7940_v15 = vld [vmem:[%s10465_s19 + $0x40] sm:$0xe]  ;;  %v2740_v14 = vsel %vm9857_vm2, %v2735_v27, %v2739_v7  ;;  %v2947_v7 = vrot.slane %v11081_v53, 5  ;;  %v5961_v27 = vshll.u32 %v8013_v6, 16  ;;  %v9608_v53 = vld [vmem:[%s11556_s3 + $0x630] sm:$0xff]  }
 0x168   : > { %8721 = vmatprep.subr.bf16.mxu1 %v9593_v33  ;;  %v7948_v50 = vrot.slane %v7940_v15, 9  ;;  %v2940_v16 = vsel %vm10031_vm5, %v7478_v19, %v2939_v34  ;;  %v7468_v8 = vcombine.low %v2740_v14, %v2754_v41  ;;  %v2963_v19 = vrot.slane %v11123_v43, 5  ;;  %v11265_v43 = vld [vmem:[%s10465_s19 + $0x1c] sm:$0x1] }
 0x169   : > { %9030 = vmatpush3.bf16.msra.mxu0 %v9588_v11  ;;  %v7939_v11 = vld [vmem:[%s10465_s19 + $0x38] sm:$0xe]  ;;  %v2936_v54 = vsel %vm10031_vm5, %v7477_v42, %v2935_v62  ;;  %v2948_v62 = vsel %vm10031_vm5, %v7480_v36, %v2947_v7  ;;  %v2956_v15 = vsel %vm10031_vm5, %v7482_v58, %v2955_v0  ;;  %v11311_v36 = vld [vmem:[%s10465_s19 + $0x2c] sm:$0x1]  ;;  %v5986_v7 = vshrl.u32 %v8017_v55, 16 }
 0x16a   : > { %9031 = vmatprep.subr.bf16.mxu0 %v9591_v51  ;;  %v7947_v32 = vrot.slane %v7939_v11, 9  ;;  %v7501_v38 = vcombine.low %v2936_v54, %v2940_v16  ;;  %v5615_v44 = vsel %vm10031_vm5, %v7948_v50, %v5614_v60  ;;  %v2959_v11 = vrot.slane %v11113_v39, 5  ;;  %v9613_v60 = vld [vmem:[%s11556_s3 + $0x640] sm:$0xff]   ;;  %v8021_v58 = vld [vmem:[%s10465_s19 + $0x30] sm:$0xf] }
 0x16b   : > { %8722 = vmatpush3.bf16.msra.mxu1 %v9593_v33  ;;  %v9598_v33 = vld [vmem:[%s11556_s3 + $0x608] sm:$0xff]   ;;  %v5977_v39 = vrot.slane %v5975_v12, 5  ;;  %v5967_v16 = vshll.u32 %v11262_v23, 16  ;;  %v8023_v0 = vld [vmem:[%s10465_s19 + $0x38] sm:$0xf]  ;;  %v6014_v12 = vshrl.u32 %v8021_v58, 16 }
 0x16c   : > { %8731 = vmatprep.subr.bf16.mxu1 %v9595_v24 }
 0x16d   : > { %9032 = vmatpush3.bf16.msra.mxu0 %v9591_v51  ;;  %v5611_v51 = vsel %vm10031_vm5, %v7947_v32, %v5610_v31  ;;  %v9615_v31 = vld [vmem:[%s11556_s3 + $0x308] sm:$0xff]  }
 0x16e   : > { %9033 = vmatprep.subr.bf16.mxu0 %v9594_v28  ;;  %8724 = vmatmul.mubr.bf16.vlgmr.msra.gmra.mrb[0].mxu1 %v7466_v59  ;;  %v7968_v56 = vcombine.low %v5611_v51, %v5615_v44  ;;  %v2915_v59 = vld [vmem:[%s9843_s26 + $0x30] sm:$0xe] }
 0x16f   : > { %8732 = vmatpush3.bf16.msra.mxu1 %v9595_v24  ;;  %8727 = vmatprep.mubr.bf16.mxu1 %v7467_v40  ;;  %v2913_v24 = vld [vmem:[%s9843_s26 + $0x20] sm:$0xe]  ;;  %v9610_v40 = vld [vmem:[%s11556_s3 + $0x638] sm:$0xff]   ;;  %v7483_v5 = vrot.slane %v2915_v59, 9 }
 0x170   : > { %8733 = vmatprep.subr.bf16.mxu1 %v9597_v25  ;;  %v7481_v22 = vrot.slane %v2913_v24, 9  ;;  %v9626_v44 = vld [vmem:[%s10465_s19 + $0x30] ss:$8 sps:$4 sm:$0xff]   ;;  %v9628_v24 = vld [vmem:[%s10465_s19 + $0x40] ss:$8 sps:$4 sm:$0xff]  }
 0x171   : > { %9034 = vmatpush3.bf16.msra.mxu0 %v9594_v28  ;;  %v2943_v28 = vrot.slane %v11078_v4, 5  ;;  %v2916_v4 = vld [vmem:[%s9843_s26 + $0x38] sm:$0xe]  ;;  %v2960_v32 = vsel %vm10031_vm5, %v7483_v5, %v2959_v11  ;;  %v9622_v59 = vld [vmem:[%s11556_s3 + $0x660] sm:$0xff]   ;;  %v6028_v5 = vshrl.u32 %v8023_v0, 16  ;;  %v6031_v11 = vshll.u32 %v8023_v0, 16 }
 0x172   : > { %9043 = vmatprep.subr.bf16.mxu0 %v9596_v63  ;;  %v7484_v42 = vrot.slane %v2916_v4, 9  ;;  %v2952_v34 = vsel %vm10031_vm5, %v7481_v22, %v2951_v46  ;;  %v5988_v4 = vrot.slane %v5986_v7, 4 }
 0x173   : > { %8734 = vmatpush3.bf16.msra.mxu1 %v9597_v25  ;;  %v5958_v25 = vshrl.u32 %v8013_v6, 16  ;;  %v2944_v30 = vsel %vm10031_vm5, %v7479_v2, %v2943_v28  ;;  %v7503_v41 = vcombine.low %v2952_v34, %v2956_v15  ;;  %v9620_v2 = vld [vmem:[%s11556_s3 + $0x658] sm:$0xff]   ;;  %v11308_v28 = vld [vmem:[%s10465_s19 + $0x24] sm:$0x1]  ;;  %v5989_v6 = vshll.u32 %v8017_v55, 16 }
 0x174   : > { %9036 = vmatmul.mubr.bf16.vlgmr.msra.gmra.mrb[0].mxu0 %v7966_v45  ;;  %8735 = vmatprep.subr.bf16.mxu1 %v9599_v37  ;;  %v7502_v61 = vcombine.low %v2944_v30, %v2948_v62  ;;  %v2964_v50 = vsel %vm10031_vm5, %v7484_v42, %v2963_v19  ;;  %v8101_v62 = vld [vmem:[%s9843_s26 + $0x8] sm:$0xf]  ;;  %v9625_v42 = vld [vmem:[%s11556_s3 + $0x330] sm:$0xff]   ;;  %v8025_v19 = vld [vmem:[%s10465_s19 + $0x40] sm:$0xf] }
 0x175   : > { %9044 = vmatpush3.bf16.msra.mxu0 %v9596_v63  ;;  %9039 = vmatprep.mubr.bf16.mxu0 %v7967_v18  ;;  %v5972_v63 = vshrl.u32 %v8015_v13, 16  ;;  %v5960_v45 = vrot.slane %v5958_v25, 4  ;;  %v5981_v18 = vshll.u32 %v11265_v43, 16  ;;  %v7504_v51 = vcombine.low %v2960_v32, %v2964_v50  ;;  %v9623_v13 = vld [vmem:[%s11556_s3 + $0x328] sm:$0xff]   ;;  %v11338_v32 = vld [vmem:[%s10465_s19 + $0x34] sm:$0x1] }
 0x176   : > { %9045 = vmatprep.subr.bf16.mxu0 %v9598_v33  ;;  %8728 = vmatmul.mubr.bf16.gmra.mrb[4].mxu1 %v7468_v8  ;;  %v9614_v8 = vld [vmem:[%s10465_s19 + $0x20] ss:$8 sps:$4 sm:$0xff]   ;;  %v5991_v25 = vrot.slane %v5989_v6, 5  ;;  %v6495_v15 = vshrl.u32 %v8101_v62, 16  ;;  %v6016_v50 = vrot.slane %v6014_v12, 4 }
 0x177   : > { %8736 = vmatpush3.bf16.msra.mxu1 %v9599_v37  ;;  %8747 = vmatprep.mubr.bf16.mxu1 %v7501_v38  ;;  %v5963_v37 = vrot.slane %v5961_v27, 5  ;;  %v5974_v14 = vrot.slane %v5972_v63, 4  ;;  %v9617_v38 = vld [vmem:[%s11556_s3 + $0x310] sm:$0xff]   ;;  %v5995_v27 = vshll.u32 %v11308_v28, 16  ;;  %v8027_v34 = vld [vmem:[%s10465_s19 + $0x48] sm:$0xf] }
 0x178   : > { %8737 = vmatprep.subr.bf16.mxu1 %v9601_v20  ;;  %v8103_v63 = vld [vmem:[%s9843_s26 + $0x10] sm:$0xf]  ;;  %v8102_v55 = vld [vmem:[%s9843_s26 + $0xc] sm:$0x1] }
 0x179   : > { %9046 = vmatpush3.bf16.msra.mxu0 %v9598_v33  ;;  %v5964_v54 = vor.u32 %v5963_v37, %v5960_v45  ;;  %v5978_v33 = vor.u32 %v5977_v39, %v5974_v14  ;;  %v6498_v45 = vshll.u32 %v8101_v62, 16  ;;  %v6509_v37 = vshrl.u32 %v8103_v63, 16  ;;  %v9624_v14 = vld [vmem:[%s11556_s3 + $0x668] sm:$0xff]  }
 0x17a   : > { %9047 = vmatprep.subr.bf16.mxu0 %v9600_v52  ;;  %v5992_v39 = vor.u32 %v5991_v25, %v5988_v4  ;;  %v9630_v25 = vld [vmem:[%s11556_s3 + $0x678] sm:$0xff]  }
 0x17b   : > { %8738 = vmatpush3.bf16.msra.mxu1 %v9601_v20  ;;  %v9616_v20 = vld [vmem:[%s11556_s3 + $0x648] sm:$0xff]  }
 0x17c   : > { %9040 = vmatmul.mubr.bf16.gmra.mrb[4].mxu0 %v7968_v56  ;;  %8739 = vmatprep.subr.bf16.mxu1 %v9603_v3  ;;  %v5979_v56 = vrot.slane %v5978_v33, 4  ;;  %v6033_v33 = vrot.slane %v6031_v11, 5 }
 0x17d   : > { %9048 = vmatpush3.bf16.msra.mxu0 %v9600_v52  ;;  %9059 = vmatprep.mubr.bf16.mxu0 %v9612_v1  ;;  %v5965_v52 = vrot.slane %v5964_v54, 4  ;;  %v9631_v1 = vld [vmem:[%s9843_s26 + $0x8] ss:$8 sps:$4 sm:$0xff]  }
 0x17e   : > { %9049 = vmatprep.subr.bf16.mxu0 %v9602_v9 }
 0x17f   : > { %8740 = vmatpush3.bf16.msra.mxu1 %v9603_v3  ;;  %v5983_v3 = vrot.slane %v5981_v18, 5  ;;  %v11341_v18 = vld [vmem:[%s10465_s19 + $0x3c] sm:$0x1] }
 0x180   : > { %8741 = vmatprep.subr.bf16.mxu1 %v9605_v57 }
 0x181   : > { %9050 = vmatpush3.bf16.msra.mxu0 %v9602_v9  ;;  %v5969_v9 = vrot.slane %v5967_v16, 5  ;;  %v6030_v16 = vrot.slane %v6028_v5, 4 }
 0x182   : > { %9051 = vmatprep.subr.bf16.mxu0 %v9604_v47 }
 0x183   : > { %8742 = vmatpush3.bf16.msra.mxu1 %v9605_v57  ;;  %v9619_v57 = vld [vmem:[%s11556_s3 + $0x318] sm:$0xff]   ;;  %v5970_v49 = vsel %vm9857_vm2, %v5965_v52, %v5969_v9  ;;  %v6497_v9 = vrot.slane %v6495_v15, 4 }
 0x184   : > { %8743 = vmatprep.subr.bf16.mxu1 %v9607_v17  ;;  %v9629_v52 = vld [vmem:[%s11556_s3 + $0x338] sm:$0xff]  }
 0x185   : > { %9052 = vmatpush3.bf16.msra.mxu0 %v9604_v47  ;;  %v9618_v47 = vld [vmem:[%s11556_s3 + $0x650] sm:$0xff]  }
 0x186   : > { %9053 = vmatprep.subr.bf16.mxu0 %v9606_v10 }
 0x187   : > { %8744 = vmatpush3.bf16.msra.mxu1 %v9607_v17  ;;  %v8019_v17 = vld [vmem:[%s10465_s19 + $0x28] sm:$0xf] }
 0x188   : > { %8745 = vmatprep.subr.bf16.mxu1 %v9609_v21  ;;  %v6000_v22 = vshrl.u32 %v8019_v17, 16  ;;  %v6003_v46 = vshll.u32 %v8019_v17, 16  ;;  %v6037_v17 = vshll.u32 %v11341_v18, 16 }
 0x189   : > { %9054 = vmatpush3.bf16.msra.mxu0 %v9606_v10  ;;  %v5984_v10 = vsel %vm9857_vm2, %v5979_v56, %v5983_v3  ;;  %v6500_v56 = vrot.slane %v6498_v45, 5  ;;  %v6511_v3 = vrot.slane %v6509_v37, 4 }
 0x18a   : > { %9055 = vmatprep.subr.bf16.mxu0 %v9608_v53  ;;  %v6005_v30 = vrot.slane %v6003_v46, 5  ;;  %v11357_v46 = vld [vmem:[%s10465_s19 + $0x44] sm:$0x1]  ;;  %v6039_v12 = vrot.slane %v6037_v17, 5 }
 0x18b   : > { %8746 = vmatpush3.bf16.msra.mxu1 %v9609_v21  ;;  %v8045_v21 = vcombine.low %v5970_v49, %v5984_v10  ;;  %v6023_v49 = vshll.u32 %v11338_v32, 16  ;;  %v6034_v10 = vor.u32 %v6033_v33, %v6030_v16  ;;  %v6501_v0 = vor.u32 %v6500_v56, %v6497_v9 }
 0x18c   : > { %8755 = vmatprep.subr.bf16.mxu1 %v9611_v26  ;;  %v6051_v11 = vshll.u32 %v11357_v46, 16  ;;  %v6249_v33 = vrot.slane %v11262_v23, 5  ;;  %v9635_v23 = vld [vmem:[%s11556_s3 + $0x688] sm:$0xff]  }
 0x18d   : > { %9056 = vmatpush3.bf16.msra.mxu0 %v9608_v53  ;;  %v6009_v53 = vshll.u32 %v11311_v36, 16  ;;  %v6025_v62 = vrot.slane %v6023_v49, 5  ;;  %v6502_v15 = vrot.slane %v6501_v0, 4  ;;  %v9639_v49 = vld [vmem:[%s11556_s3 + $0x690] sm:$0xff]  }
 0x18e   : > { %9057 = vmatprep.subr.bf16.mxu0 %v9610_v40  ;;  %8748 = vmatmul.mubr.bf16.vlgmr.msra.gmra.mrb[0].mxu1 %v7502_v61  ;;  %v6512_v61 = vshll.u32 %v8103_v63, 16  ;;  %v6035_v63 = vrot.slane %v6034_v10, 4 }
 0x18f   : > { %8756 = vmatpush3.bf16.msra.mxu1 %v9611_v26  ;;  %8751 = vmatprep.mubr.bf16.mxu1 %v7503_v41  ;;  %v6002_v26 = vrot.slane %v6000_v22, 4  ;;  %v11333_v41 = vrot.slane %v5995_v27, 5 }
 0x190   : > { %8757 = vmatprep.subr.bf16.mxu1 %v9615_v31 }
 0x191   : > { %9058 = vmatpush3.bf16.msra.mxu0 %v9610_v40  ;;  %v6017_v40 = vshll.u32 %v8021_v58, 16  ;;  %v11360_v58 = vld [vmem:[%s10465_s19 + $0x4c] sm:$0x1] }
 0x192   : > { %9067 = vmatprep.subr.bf16.mxu0 %v9613_v60 }
 0x193   : > { %8758 = vmatpush3.bf16.msra.mxu1 %v9615_v31  ;;  %v6006_v31 = vor.u32 %v6005_v30, %v6002_v26  ;;  %v6019_v54 = vrot.slane %v6017_v40, 5  ;;  %v9632_v26 = vld [vmem:[%s9843_s26 + $0x18] ss:$8 sps:$4 sm:$0xff]   ;;  %v9637_v40 = vld [vmem:[%s9843_s26 + $0x28] ss:$8 sps:$4 sm:$0xff]  }
 0x194   : > { %9060 = vmatmul.mubr.bf16.vlgmr.msra.gmra.mrb[0].mxu0 %v9614_v8  ;;  %8759 = vmatprep.subr.bf16.mxu1 %v9617_v38  ;;  %v6042_v8 = vshrl.u32 %v8025_v19, 16 }
 0x195   : > { %9068 = vmatpush3.bf16.msra.mxu0 %v9613_v60  ;;  %9063 = vmatprep.mubr.bf16.mxu0 %v9626_v44  ;;  %v11335_v60 = vrot.slane %v6009_v53, 5  ;;  %v9627_v44 = vld [vmem:[%s11556_s3 + $0x670] sm:$0xff]  }
 0x196   : > { %9069 = vmatprep.subr.bf16.mxu0 %v9616_v20  ;;  %8752 = vmatmul.mubr.bf16.gmra.mrb[4].mxu1 %v7504_v51  ;;  %v6059_v51 = vshll.u32 %v8027_v34, 16  ;;  %v6044_v7 = vrot.slane %v6042_v8, 4  ;;  %v9640_v8 = vld [vmem:[%s11557_s4 + $0x10] sm:$0xff]  }
 0x197   : > { %8760 = vmatpush3.bf16.msra.mxu1 %v9617_v38  ;;  %8771 = vmatprep.mubr.bf16.mxu1 %v9631_v1  ;;  %v6045_v38 = vshll.u32 %v8025_v19, 16  ;;  %v6514_v1 = vrot.slane %v6512_v61, 5  ;;  %v6065_v19 = vshll.u32 %v11360_v58, 16 }
 0x198   : > { %8761 = vmatprep.subr.bf16.mxu1 %v9619_v57  ;;  %v6061_v22 = vrot.slane %v6059_v51, 5 }
 0x199   : > { %9070 = vmatpush3.bf16.msra.mxu0 %v9616_v20  ;;  %v6056_v20 = vshrl.u32 %v8027_v34, 16  ;;  %v6047_v6 = vrot.slane %v6045_v38, 5  ;;  %v9636_v34 = vld [vmem:[%s11557_s4 + $0x8] sm:$0xff]   ;;  %v6067_v16 = vrot.slane %v6065_v19, 5  ;;  %v8113_v19 = vld [vmem:[%s9843_s26 + $0x38] sm:$0xf] }
 0x19a   : > { %9071 = vmatprep.subr.bf16.mxu0 %v9618_v47 }
 0x19b   : > { %8762 = vmatpush3.bf16.msra.mxu1 %v9619_v57  ;;  %v5993_v57 = vrot.slane %v5992_v39, 4  ;;  %v6048_v5 = vor.u32 %v6047_v6, %v6044_v7  ;;  %v8111_v7 = vld [vmem:[%s9843_s26 + $0x30] sm:$0xf] }
 0x19c   : > { %9064 = vmatmul.mubr.bf16.gmra.mrb[4].mxu0 %v9628_v24  ;;  %8763 = vmatprep.subr.bf16.mxu1 %v9621_v29  ;;  %v6020_v24 = vor.u32 %v6019_v54, %v6016_v50  ;;  %v6053_v54 = vrot.slane %v6051_v11, 5  ;;  %v8106_v11 = vld [vmem:[%s9843_s26 + $0x1c] sm:$0x1] }
 0x19d   : > { %9072 = vmatpush3.bf16.msra.mxu0 %v9618_v47  ;;  %9083 = vmatprep.mubr.bf16.mxu0 %v8045_v21  ;;  %v6007_v47 = vrot.slane %v6006_v31, 4  ;;  %v6058_v21 = vrot.slane %v6056_v20, 4  ;;  %v5998_v27 = vsel %vm9857_vm2, %v5993_v57, %v11333_v41  ;;  %v6040_v41 = vsel %vm9857_vm2, %v6035_v63, %v6039_v12  ;;  %v8057_v31 = vld [vmem:[%s10465_s19 + $0x10] sm:$0xe] }
 0x19e   : > { %9073 = vmatprep.subr.bf16.mxu0 %v9620_v2  ;;  %v6021_v30 = vrot.slane %v6020_v24, 4  ;;  %v6049_v38 = vrot.slane %v6048_v5, 4  ;;  %v8065_v9 = vrot.slane %v8057_v31, 9 }
 0x19f   : > { %8764 = vmatpush3.bf16.msra.mxu1 %v9621_v29  ;;  %v8104_v29 = vld [vmem:[%s9843_s26 + $0x14] sm:$0x1]  ;;  %v6012_v53 = vsel %vm9857_vm2, %v6007_v47, %v11335_v60  ;;  %v8058_v60 = vld [vmem:[%s10465_s19 + $0x18] sm:$0xe] }
 0x1a0   : > { %8765 = vmatprep.subr.bf16.mxu1 %v9623_v13  ;;  %v6518_v4 = vshll.u32 %v8104_v29, 16  ;;  %v6026_v39 = vsel %vm9857_vm2, %v6021_v30, %v6025_v62  ;;  %v8046_v50 = vcombine.low %v5998_v27, %v6012_v53  ;;  %v8066_v56 = vrot.slane %v8058_v60, 9  ;;  %v8105_v47 = vld [vmem:[%s9843_s26 + $0x18] sm:$0xf]  ;;  %v9646_v62 = vld [vmem:[%s11557_s4 + $0x28] sm:$0xff]  }
 0x1a1   : > { %9074 = vmatpush3.bf16.msra.mxu0 %v9620_v2  ;;  %v9634_v2 = vld [vmem:[%s11557_s4] sm:$0xff]   ;;  %v9642_v29 = vld [vmem:[%s11557_s4 + $0x18] sm:$0xff]   ;;  %v6054_v24 = vsel %vm9857_vm2, %v6049_v38, %v6053_v54  ;;  %v6250_v10 = vsel %vm10031_vm5, %v8065_v9, %v6249_v33  ;;  %v6523_v6 = vshrl.u32 %v8105_v47, 16  ;;  %v6565_v27 = vshrl.u32 %v8111_v7, 16  ;;  %v9645_v9 = vld [vmem:[%s11556_s3 + $0x6a8] sm:$0xff]  }
 0x1a2   : > { %9075 = vmatprep.subr.bf16.mxu0 %v9622_v59  ;;  %v6520_v61 = vrot.slane %v6518_v4, 5  ;;  %v6568_v53 = vshll.u32 %v8111_v7, 16  ;;  %v6532_v60 = vshll.u32 %v8106_v11, 16  ;;  %v6582_v33 = vshll.u32 %v8113_v19, 16 }
 0x1a3   : > { %8766 = vmatpush3.bf16.msra.mxu1 %v9623_v13  ;;  %v6515_v13 = vor.u32 %v6514_v1, %v6511_v3  ;;  %v6253_v3 = vrot.slane %v11265_v43, 5  ;;  %v9638_v1 = vld [vmem:[%s9843_s26 + $0x38] ss:$8 sps:$4 sm:$0xff]   ;;  %v6525_v63 = vrot.slane %v6523_v6, 4 }
 0x1a4   : > { %8767 = vmatprep.subr.bf16.mxu1 %v9625_v42 }
 0x1a5   : > { %9076 = vmatpush3.bf16.msra.mxu0 %v9622_v59  ;;  %v6504_v59 = vshll.u32 %v8102_v55, 16  ;;  %v6516_v37 = vrot.slane %v6515_v13, 4  ;;  %v8107_v55 = vld [vmem:[%s9843_s26 + $0x20] sm:$0xf]  ;;  %v6254_v17 = vsel %vm10031_vm5, %v8066_v56, %v6253_v3  ;;  %v8060_v3 = vld [vmem:[%s10465_s19 + $0x28] sm:$0xe] }
 0x1a6   : > { %9077 = vmatprep.subr.bf16.mxu0 %v9624_v14  ;;  %v6540_v0 = vshll.u32 %v8107_v55, 16  ;;  %v9644_v13 = vld [vmem:[%s11557_s4 + $0x20] sm:$0xff]   ;;  %v8089_v30 = vcombine.low %v6250_v10, %v6254_v17  ;;  %v6584_v17 = vrot.slane %v6582_v33, 5 }
 0x1a7   : > { %8768 = vmatpush3.bf16.msra.mxu1 %v9625_v42  ;;  %v6062_v42 = vor.u32 %v6061_v22, %v6058_v21  ;;  %v6506_v45 = vrot.slane %v6504_v59, 5  ;;  %v6526_v21 = vshll.u32 %v8105_v47, 16  ;;  %v6537_v22 = vshrl.u32 %v8107_v55, 16  ;;  %v8059_v56 = vld [vmem:[%s10465_s19 + $0x20] sm:$0xe] }
 0x1a8   : > { %8769 = vmatprep.subr.bf16.mxu1 %v9629_v52  ;;  %v6542_v5 = vrot.slane %v6540_v0, 5  ;;  %v6534_v55 = vrot.slane %v6532_v60, 5  ;;  %v8116_v0 = vld [vmem:[%s9843_s26 + $0x44] sm:$0x1]  ;;  %v8063_v60 = vld [vmem:[%s10465_s19 + $0x40] sm:$0xe] }
 0x1a9   : > { %9078 = vmatpush3.bf16.msra.mxu0 %v9624_v14  ;;  %v9633_v14 = vld [vmem:[%s11556_s3 + $0x680] sm:$0xff]   ;;  %v6063_v20 = vrot.slane %v6062_v42, 4  ;;  %v6507_v51 = vsel %vm9857_vm2, %v6502_v15, %v6506_v45  ;;  %v6528_v12 = vrot.slane %v6526_v21, 5  ;;  %v6567_v45 = vrot.slane %v6565_v27, 4 }
 0x1aa   : > { %9079 = vmatprep.subr.bf16.mxu0 %v9627_v44  ;;  %v8108_v42 = vld [vmem:[%s9843_s26 + $0x24] sm:$0x1]  ;;  %v6265_v27 = vrot.slane %v11338_v32, 5 }
 0x1ab   : > { %8770 = vmatpush3.bf16.msra.mxu1 %v9629_v52  ;;  %v8047_v52 = vcombine.low %v6026_v39, %v6040_v41  ;;  %v6068_v43 = vsel %vm9857_vm2, %v6063_v20, %v6067_v16  ;;  %v8110_v39 = vld [vmem:[%s9843_s26 + $0x2c] sm:$0x1]  ;;  %v8112_v41 = vld [vmem:[%s9843_s26 + $0x34] sm:$0x1]  ;;  %v6529_v31 = vor.u32 %v6528_v12, %v6525_v63  ;;  %v6546_v54 = vshll.u32 %v8108_v42, 16 }
 0x1ac   : > { %9115 = vmatprep.subr.bf16.mxu1 %v9634_v2  ;;  %v8048_v59 = vcombine.low %v6054_v24, %v6068_v43  ;;  %v6579_v16 = vshrl.u32 %v8113_v19, 16  ;;  %v9648_v20 = vld [vmem:[%s11557_s4 + $0x30] sm:$0xff]   ;;  %v9649_v19 = vld [vmem:[%s11556_s3 + $0x6b8] sm:$0xff]  }
 0x1ad   : > { %9080 = vmatpush3.bf16.msra.mxu0 %v9627_v44  ;;  %v6521_v44 = vsel %vm9857_vm2, %v6516_v37, %v6520_v61  ;;  %v6570_v37 = vrot.slane %v6568_v53, 5  ;;  %v8115_v61 = vld [vmem:[%s9843_s26 + $0x40] sm:$0xf]  ;;  %v6530_v47 = vrot.slane %v6529_v31, 4  ;;  %v6548_v24 = vrot.slane %v6546_v54, 5 }
 0x1ae   : > { %9081 = vmatprep.subr.bf16.mxu0 %v9630_v25  ;;  %8772 = vmatmul.mubr.bf16.vlgmr.msra.gmra.mrb[0].mxu1 %v9632_v26  ;;  %v8117_v57 = vcombine.low %v6507_v51, %v6521_v44  ;;  %v9641_v26 = vld [vmem:[%s11556_s3 + $0x698] sm:$0xff]   ;;  %v6596_v38 = vshll.u32 %v8115_v61, 16  ;;  %v6560_v44 = vshll.u32 %v8110_v39, 16  ;;  %v8061_v43 = vld [vmem:[%s10465_s19 + $0x30] sm:$0xe]  ;;  %v6581_v10 = vrot.slane %v6579_v16, 4 }
 0x1af   : > { %9116 = vmatpush3.bf16.msra.mxu1 %v9634_v2  ;;  %8775 = vmatprep.mubr.bf16.mxu1 %v9637_v40  ;;  %v8109_v2 = vld [vmem:[%s9843_s26 + $0x28] sm:$0xf]  ;;  %v6539_v40 = vrot.slane %v6537_v22, 4  ;;  %v8068_v53 = vrot.slane %v8060_v3, 9 }
 0x1b0   : > { %9117 = vmatprep.subr.bf16.mxu1 %v9636_v34  ;;  %v6551_v4 = vshrl.u32 %v8109_v2, 16  ;;  %v6598_v7 = vrot.slane %v6596_v38, 5  ;;  %v6562_v6 = vrot.slane %v6560_v44, 5  ;;  %v6585_v12 = vor.u32 %v6584_v17, %v6581_v10 }
 0x1b1   : > { %9082 = vmatpush3.bf16.msra.mxu0 %v9630_v25  ;;  %v6554_v25 = vshll.u32 %v8109_v2, 16  ;;  %v8071_v38 = vrot.slane %v8063_v60, 9  ;;  %v6277_v44 = vrot.slane %v11360_v58, 5 }
 0x1b2   : > { %9091 = vmatprep.subr.bf16.mxu0 %v9633_v14 }
 0x1b3   : > { %9118 = vmatpush3.bf16.msra.mxu1 %v9636_v34  ;;  %v6553_v34 = vrot.slane %v6551_v4, 4  ;;  %v6556_v15 = vrot.slane %v6554_v25, 5  ;;  %v6261_v4 = vrot.slane %v11311_v36, 5  ;;  %v8062_v25 = vld [vmem:[%s10465_s19 + $0x38] sm:$0xe]  ;;  %v6269_v36 = vrot.slane %v11341_v18, 5 }
 0x1b4   : > { %9084 = vmatmul.mubr.bf16.vlgmr.msra.gmra.mrb[0].mxu0 %v8046_v50  ;;  %9119 = vmatprep.subr.bf16.mxu1 %v9640_v8  ;;  %v6543_v50 = vor.u32 %v6542_v5, %v6539_v40  ;;  %v6602_v5 = vshll.u32 %v8116_v0, 16  ;;  %v8070_v11 = vrot.slane %v8062_v25, 9 }
 0x1b5   : > { %9092 = vmatpush3.bf16.msra.mxu0 %v9633_v14  ;;  %9087 = vmatprep.mubr.bf16.mxu0 %v8047_v52  ;;  %v9643_v14 = vld [vmem:[%s11556_s3 + $0x6a0] sm:$0xff]   ;;  %v6557_v51 = vor.u32 %v6556_v15, %v6553_v34  ;;  %v6574_v52 = vshll.u32 %v8112_v41, 16  ;;  %v6262_v39 = vsel %vm10031_vm5, %v8068_v53, %v6261_v4 }
 0x1b6   : > { %9093 = vmatprep.subr.bf16.mxu0 %v9635_v23  ;;  %8776 = vmatmul.mubr.bf16.gmra.mrb[4].mxu1 %v9638_v1  ;;  %v6257_v1 = vrot.slane %v11308_v28, 5  ;;  %v6604_v18 = vrot.slane %v6602_v5, 5  ;;  %v6270_v31 = vsel %vm10031_vm5, %v8070_v11, %v6269_v36 }
 0x1b7   : > { %9120 = vmatpush3.bf16.msra.mxu1 %v9640_v8  ;;  %9131 = vmatprep.mubr.bf16.mxu1 %v8117_v57  ;;  %v6593_v8 = vshrl.u32 %v8115_v61, 16  ;;  %v9650_v57 = vld [vmem:[%s11557_s4 + $0x38] sm:$0xff]   ;;  %v6558_v28 = vrot.slane %v6557_v51, 4  ;;  %v6576_v22 = vrot.slane %v6574_v52, 5 }
 0x1b8   : > { %9121 = vmatprep.subr.bf16.mxu1 %v9642_v29 }
 0x1b9   : > { %9094 = vmatpush3.bf16.msra.mxu0 %v9635_v23  ;;  %v6571_v23 = vor.u32 %v6570_v37, %v6567_v45  ;;  %v6595_v2 = vrot.slane %v6593_v8, 4  ;;  %v6563_v32 = vsel %vm9857_vm2, %v6558_v28, %v6562_v6  ;;  %v6586_v37 = vrot.slane %v6585_v12, 4 }
 0x1ba   : > { %9095 = vmatprep.subr.bf16.mxu0 %v9639_v49 }
 0x1bb   : > { %9122 = vmatpush3.bf16.msra.mxu1 %v9642_v29  ;;  %v6544_v29 = vrot.slane %v6543_v50, 4  ;;  %v6572_v21 = vrot.slane %v6571_v23, 4  ;;  %v6599_v40 = vor.u32 %v6598_v7, %v6595_v2  ;;  %v8064_v50 = vld [vmem:[%s10465_s19 + $0x48] sm:$0xe]  ;;  %s7087_s19 = sshll.u32 %s11584_s27, 3 }
 0x1bc   : > { %9088 = vmatmul.mubr.bf16.gmra.mrb[4].mxu0 %v8048_v59  ;;  %9123 = vmatprep.subr.bf16.mxu1 %v9644_v13  ;;  %v9647_v59 = vld [vmem:[%s11556_s3 + $0x6b0] sm:$0xff]   ;;  %v8072_v51 = vrot.slane %v8064_v50, 9  ;;  %s459_s24 = sadd.s32 %s7088_s22, %s7087_s19  ;;  %s478_s22 = scalar_lea.vmem %s11560_s7, %s7094_s23 }
 0x1bd   : > { %9096 = vmatpush3.bf16.msra.mxu0 %v9639_v49  ;;  %9107 = vmatprep.mubr.bf16.mxu0 %v8089_v30  ;;  %v8114_v49 = vld [vmem:[%s9843_s26 + $0x3c] sm:$0x1]  ;;  %v8069_v30 = vrot.slane %v8061_v43, 9  ;;  %v6549_v63 = vsel %vm9857_vm2, %v6544_v29, %v6548_v24  ;;  %v6577_v42 = vsel %vm9857_vm2, %v6572_v21, %v6576_v22  ;;  %v6600_v61 = vrot.slane %v6599_v40, 4  ;;  %s7089_s13 = sshll.u32 %s459_s24, 3 }
 0x1be   : > { %9097 = vmatprep.subr.bf16.mxu0 %v9641_v26  ;;  %v8119_v45 = vcombine.low %v6563_v32, %v6577_v42  ;;  %v6278_v35 = vsel %vm10031_vm5, %v8072_v51, %v6277_v44  ;;  %s11504_s25 = scalar_lea.vmem %s11559_s6, %s7089_s13  ;;  %s11513_s17 = scalar_lea.vmem %s11558_s5, %s7089_s13 }
 0x1bf   : > { %9124 = vmatpush3.bf16.msra.mxu1 %v9644_v13  ;;  %v8067_v13 = vrot.slane %v8059_v56, 9  ;;  %v6266_v41 = vsel %vm10031_vm5, %v8069_v30, %v6265_v27  ;;  %v6605_v8 = vsel %vm9857_vm2, %v6600_v61, %v6604_v18 }
 0x1c0   : > { %9125 = vmatprep.subr.bf16.mxu1 %v9646_v62  ;;  %v8091_v16 = vcombine.low %v6266_v41, %v6270_v31 }
 0x1c1   : > { %9098 = vmatpush3.bf16.msra.mxu0 %v9641_v26  ;;  %v6535_v26 = vsel %vm9857_vm2, %v6530_v47, %v6534_v55 }
 0x1c2   : > { %9099 = vmatprep.subr.bf16.mxu0 %v9643_v14  ;;  %v8118_v34 = vcombine.low %v6535_v26, %v6549_v63 }
 0x1c3   : > { %9126 = vmatpush3.bf16.msra.mxu1 %v9646_v62  ;;  %v6588_v62 = vshll.u32 %v8114_v49, 16 }
 0x1c4   : > { %9127 = vmatprep.subr.bf16.mxu1 %v9648_v20 }
 0x1c5   : > { %9100 = vmatpush3.bf16.msra.mxu0 %v9643_v14  ;;  %v6590_v15 = vrot.slane %v6588_v62, 5  ;;  %v6258_v14 = vsel %vm10031_vm5, %v8067_v13, %v6257_v1 }
 0x1c6   : > { %9101 = vmatprep.subr.bf16.mxu0 %v9645_v9  ;;  %v8090_v54 = vcombine.low %v6258_v14, %v6262_v39 }
 0x1c7   : > { %9128 = vmatpush3.bf16.msra.mxu1 %v9648_v20  ;;  %v6591_v33 = vsel %vm9857_vm2, %v6586_v37, %v6590_v15  ;;  %v6273_v20 = vrot.slane %v11357_v46, 5 }
 0x1c8   : > { %9129 = vmatprep.subr.bf16.mxu1 %v9650_v57  ;;  %v8120_v23 = vcombine.low %v6591_v33, %v6605_v8 }
 0x1c9   : > { %9102 = vmatpush3.bf16.msra.mxu0 %v9645_v9  ;;  %v6274_v52 = vsel %vm10031_vm5, %v8071_v38, %v6273_v20 }
 0x1ca   : > { %9103 = vmatprep.subr.bf16.mxu0 %v9647_v59  ;;  %v8092_v9 = vcombine.low %v6274_v52, %v6278_v35 }
 0x1cb   : > { %9130 = vmatpush3.bf16.msra.mxu1 %v9650_v57 }
 0x1cd   : > { %9104 = vmatpush3.bf16.msra.mxu0 %v9647_v59 }
 0x1ce   : > { %9105 = vmatprep.subr.bf16.mxu0 %v9649_v19  ;;  %9132 = vmatmul.mubr.bf16.vlgmr.msra.gmra.mrb[8].mxu1 %v8118_v34 }
 0x1cf   : > { %9135 = vmatprep.mubr.bf16.mxu1 %v8119_v45 }
 0x1d1   : > { %9106 = vmatpush3.bf16.msra.mxu0 %v9649_v19 }
 0x1d4   : > { %9108 = vmatmul.mubr.bf16.vlgmr.msra.gmra.mrb[0].mxu0 %v8090_v54 }
 0x1d5   : > { %9111 = vmatprep.mubr.bf16.mxu0 %v8091_v16 }
 0x1d6   : > { %9136 = vmatmul.mubr.bf16.gmra.mrb[12].mxu1 %v8120_v23 }
 0x1dc   : > { %9112 = vmatmul.mubr.bf16.gmra.mrb[4].mxu0 %v8092_v9 }
 0x281   : > { %v8773_v56 = vpop.f32.mrb[0].mxu1 }
 0x282   : > { %v3251_v46 = vpop.f32.mrb[1].mxu1 }
 0x283   : > { %v8774_v3 = vpop.f32.mrb[2].mxu1 }
 0x284   : > { %v3254_v1 = vpop.f32.mrb[3].mxu1 }
 0x289   : > { %v8777_v58 = vpop.f32.mrb[4].mxu1 }
 0x28a   : > { %v11489_v57 = vpop.f32.mrb[5].mxu1 }
 0x28b   : > { %v11491_v47 = vpop.f32.mrb[6].mxu1 }
 0x28c   : > { %v11493_v55 = vpop.f32.mrb[7].mxu1 }
 0x2a1   : > { %v9133_v48 = vpop.f32.mrb[8].mxu1 }
 0x2a2   : > { %6753 = vst [vmem:[%s11504_s25 + $0x10] sm:$0xff] %v9133_v48  ;;  %v6720_v29 = vpop.f32.mrb[9].mxu1  ;;  %v6774_v28 = vmul.f32 %v9133_v48, %v9133_v48 }
 0x2a3   : > { %6751 = vst [vmem:[%s11504_s25] sm:$0xff] %v6720_v29  ;;  %v6772_v24 = vmul.f32 %v6720_v29, %v6720_v29  ;;  %v9134_v43 = vpop.f32.mrb[10].mxu1 }
 0x2a4   : > { %6754 = vst [vmem:[%s11504_s25 + $0x18] sm:$0xff] %v9134_v43  ;;  %v6723_v49 = vpop.f32.mrb[11].mxu1  ;;  %v6775_v4 = vmul.f32 %v9134_v43, %v9134_v43 }
 0x2a5   : > { %6752 = vst [vmem:[%s11504_s25 + $0x8] sm:$0xff] %v6723_v49  ;;  %v6759_v10 = vadd.f32 %v6723_v49, %v6720_v29  ;;  %v6773_v17 = vmul.f32 %v6723_v49, %v6723_v49 }
 0x2a7   : > { %v9109_v2 = vpop.f32.mrb[0].mxu0  ;;  %v6760_v21 = vadd.f32 %v9133_v48, %v6759_v10  ;;  %v6780_v22 = vadd.f32 %v6773_v17, %v6772_v24 }
 0x2a8   : > { %v9139_v7 = vadd.f32 %v9109_v2, %v8773_v56  ;;  %v6394_v6 = vpop.f32.mrb[1].mxu0 }
 0x2a9   : > { %v9140_v0 = vadd.f32 %v6394_v6, %v3251_v46  ;;  %v9110_v59 = vpop.f32.mrb[2].mxu0  ;;  %v6781_v27 = vadd.f32 %v6780_v22, %v6774_v28  ;;  %v9137_v53 = vpop.f32.mrb[12].mxu1  ;;  %v6761_v26 = vadd.f32 %v9134_v43, %v6760_v21 }
 0x2aa   : > { %6435 = vst [vmem:[%s11513_s17 + $0x10] sm:$0xff] %v9139_v7  ;;  %v9141_v13 = vadd.f32 %v9110_v59, %v8774_v3  ;;  %v6397_v25 = vpop.f32.mrb[3].mxu0  ;;  %6757 = vst [vmem:[%s11504_s25 + $0x30] sm:$0xff] %v9137_v53  ;;  %v6736_v62 = vpop.f32.mrb[13].mxu1  ;;  %v6456_v45 = vmul.f32 %v9139_v7, %v9139_v7  ;;  %v6778_v39 = vmul.f32 %v9137_v53, %v9137_v53 }
 0x2ab   : > { %6433 = vst [vmem:[%s11513_s17] sm:$0xff] %v9140_v0  ;;  %v9142_v30 = vadd.f32 %v6397_v25, %v3254_v1  ;;  %6755 = vst [vmem:[%s11504_s25 + $0x20] sm:$0xff] %v6736_v62  ;;  %v6762_v63 = vadd.f32 %v6761_v26, %v6736_v62  ;;  %v6776_v12 = vmul.f32 %v6736_v62, %v6736_v62  ;;  %v9138_v5 = vpop.f32.mrb[14].mxu1 }
 0x2ac   : > { %6436 = vst [vmem:[%s11513_s17 + $0x18] sm:$0xff] %v9141_v13  ;;  %v6782_v40 = vadd.f32 %v6781_v27, %v6775_v4  ;;  %v6454_v11 = vmul.f32 %v9140_v0, %v9140_v0  ;;  %6758 = vst [vmem:[%s11504_s25 + $0x38] sm:$0xff] %v9138_v5  ;;  %v6739_v42 = vpop.f32.mrb[15].mxu1  ;;  %v6457_v50 = vmul.f32 %v9141_v13, %v9141_v13 }
 0x2ad   : > { %6434 = vst [vmem:[%s11513_s17 + $0x8] sm:$0xff] %v9142_v30  ;;  %v6441_v36 = vadd.f32 %v9142_v30, %v9140_v0  ;;  %v6455_v32 = vmul.f32 %v9142_v30, %v9142_v30  ;;  %6756 = vst [vmem:[%s11504_s25 + $0x28] sm:$0xff] %v6739_v42  ;;  %v6763_v34 = vadd.f32 %v6762_v63, %v6739_v42 }
 0x2ae   : > { %v6783_v19 = vadd.f32 %v6782_v40, %v6776_v12  ;;  %v6777_v15 = vmul.f32 %v6739_v42, %v6739_v42  ;;  %v6779_v20 = vmul.f32 %v9138_v5, %v9138_v5 }
 0x2af   : > { %v6442_v37 = vadd.f32 %v9139_v7, %v6441_v36  ;;  %v6462_v61 = vadd.f32 %v6455_v32, %v6454_v11  ;;  %v9113_v18 = vpop.f32.mrb[4].mxu0  ;;  %v6764_v31 = vadd.f32 %v9137_v53, %v6763_v34 }
 0x2b0   : > { %v9143_v14 = vadd.f32 %v9113_v18, %v8777_v58  ;;  %v6410_v41 = vpop.f32.mrb[5].mxu0  ;;  %v6784_v60 = vadd.f32 %v6783_v19, %v6777_v15 }
 0x2b1   : > { %v6463_v54 = vadd.f32 %v6462_v61, %v6456_v45  ;;  %v9144_v16 = vadd.f32 %v6410_v41, %v11489_v57  ;;  %v6443_v33 = vadd.f32 %v9141_v13, %v6442_v37  ;;  %v9114_v8 = vpop.f32.mrb[6].mxu0  ;;  %v6765_v44 = vadd.f32 %v9138_v5, %v6764_v31 }
 0x2b2   : > { %6439 = vst [vmem:[%s11513_s17 + $0x30] sm:$0xff] %v9143_v14  ;;  %v9145_v38 = vadd.f32 %v9114_v8, %v11491_v47  ;;  %v6413_v51 = vpop.f32.mrb[7].mxu0  ;;  %v6785_v23 = vadd.f32 %v6784_v60, %v6778_v39  ;;  %v6460_v29 = vmul.f32 %v9143_v14, %v9143_v14 }
 0x2b3   : > { %6437 = vst [vmem:[%s11513_s17 + $0x20] sm:$0xff] %v9144_v16  ;;  %v6444_v52 = vadd.f32 %v9144_v16, %v6443_v33  ;;  %v6458_v35 = vmul.f32 %v9144_v16, %v9144_v16  ;;  %v6464_v9 = vadd.f32 %v6463_v54, %v6457_v50  ;;  %v9146_v56 = vadd.f32 %v6413_v51, %v11493_v55 }
 0x2b4   : > { %6440 = vst [vmem:[%s11513_s17 + $0x38] sm:$0xff] %v9145_v38  ;;  %v6766_v46 = vrot.slane %v6765_v44, 4  ;;  %v6786_v3 = vadd.f32 %v6785_v23, %v6779_v20  ;;  %v6461_v17 = vmul.f32 %v9145_v38, %v9145_v38 }
 0x2b5   : > { %v6465_v1 = vadd.f32 %v6464_v9, %v6458_v35  ;;  %6438 = vst [vmem:[%s11513_s17 + $0x28] sm:$0xff] %v9146_v56  ;;  %v6445_v58 = vadd.f32 %v9146_v56, %v6444_v52  ;;  %v6459_v57 = vmul.f32 %v9146_v56, %v9146_v56 }
 0x2b6   : > { %v6767_v47 = vadd.f32 %v6766_v46, %v6765_v44  ;;  %v6787_v48 = vrot.slane %v6786_v3, 4 }
 0x2b7   : > { %v6446_v24 = vadd.f32 %v9143_v14, %v6445_v58  ;;  %v6466_v43 = vadd.f32 %v6465_v1, %v6459_v57 }
 0x2b8   : > { %v6768_v49 = vrot.slane %v6767_v47, 2  ;;  %v6788_v10 = vadd.f32 %v6787_v48, %v6786_v3 }
 0x2b9   : > { %v6447_v2 = vadd.f32 %v9145_v38, %v6446_v24  ;;  %v6467_v7 = vadd.f32 %v6466_v43, %v6460_v29 }
 0x2ba   : > { %v6769_v55 = vadd.f32 %v6768_v49, %v6767_v47  ;;  %v6789_v28 = vrot.slane %v6788_v10, 2 }
 0x2bb   : > { %v6448_v6 = vrot.slane %v6447_v2, 4  ;;  %v6468_v21 = vadd.f32 %v6467_v7, %v6461_v17 }
 0x2bc   : > { %v6770_v22 = vrot.slane %v6769_v55, 1  ;;  %v6790_v0 = vadd.f32 %v6789_v28, %v6788_v10 }
 0x2bd   : > { %v6449_v59 = vadd.f32 %v6448_v6, %v6447_v2  ;;  %v6469_v13 = vrot.slane %v6468_v21, 4 }
 0x2be   : > { %v6791_v4 = vrot.slane %v6790_v0, 1  ;;  %v6771_v53 = vadd.f32 %v6770_v22, %v6769_v55 }
 0x2bf   : > { %v6450_v25 = vrot.slane %v6449_v59, 2  ;;  %v6470_v27 = vadd.f32 %v6469_v13, %v6468_v21 }
 0x2c0   : > { %v6792_v26 = vadd.f32 %v6791_v4, %v6790_v0 }
 0x2c1   : > { %v6451_v30 = vadd.f32 %v6450_v25, %v6449_v59  ;;  %v6471_v62 = vrot.slane %v6470_v27, 2 }
 0x2c2   : > { %v6793_v63 = vsel %vm6475_vm6, %v6771_v53, %v6792_v26 }
 0x2c3   : > { %v6452_v12 = vrot.slane %v6451_v30, 1  ;;  %v6472_v40 = vadd.f32 %v6471_v62, %v6470_v27  ;;  %6794 = vst [vmem:[%s486_s21] sm:$0x3] %v6793_v63 }
 0x2c5   : > { %v6473_v5 = vrot.slane %v6472_v40, 1  ;;  %v6453_v11 = vadd.f32 %v6452_v12, %v6451_v30 }
 0x2c7   : > { %v6474_v36 = vadd.f32 %v6473_v5, %v6472_v40 }
 0x2c9   : > { %v6476_v32 = vsel %vm6475_vm6, %v6453_v11, %v6474_v36 }
 0x2ca   : > { %6477 = vst [vmem:[%s478_s22] sm:$0x3] %v6476_v32 }
 0x2cb PF: > { %s19_s9 = sadd.s32 1, %s9689_s9   ;;  %s11567_s27 = smov %s9681_s29 }
 0x2cc   : > { %p16_p10 = scmp.ge.s32.totalorder %s19_s9, 18   ;;  %s11568_s28 = smov %s9685_s30 }
 0x2cd   : > { %s11569_s29 = smov %s11572_s10  ;;  %s11570_s30 = smov %s11576_s11 }
 0x2ce   :  { %18 = sbr.rel (!%p16_p10) target bundleno = 3 (0x3), region = 144 }

// kernel: resblock3d_forward.6
= control target key start
LH: loop header
LB: loop body
LE: loop exit
PB: predicated region body
PF: predicated region fallthrough
CT: control target
= control target key end

     0   :  { %s9120_s18 = smov 0   ;;  %s9122_s19 = smov 0   ;;  %s10840_s0 = inlined_call_operand.vmem [shape: bf16[2,10,10,10,128], index: 0, kind: input, shape index: {}, may-alias: {0,1,2}]   ;;  %s10841_s1 = inlined_call_operand.vmem [shape: bf16[2,10,10,10,128], index: 1, kind: input, shape index: {}, may-alias: {0,1,2}]   ;;  %s10842_s2 = inlined_call_operand.vmem [shape: bf16[2,10,10,10,128], index: 2, kind: input, shape index: {}, may-alias: {0,1,2}]   ;;  %s10843_s3 = inlined_call_operand.vmem [shape: bf16[27,128,128], index: 3, kind: input, shape index: {}]   ;;  %s10844_s4 = inlined_call_operand.vmem [shape: f32[2,8,8,8,128], index: 4, kind: output, shape index: {0}]   ;;  %s10845_s5 = inlined_call_operand.vmem [shape: f32[2,8,2,128], index: 5, kind: output, shape index: {1}]  }
   0x1   :  { %s9124_s20 = smov 0   ;;  %s9126_s21 = smov 0  }
   0x2   :  { %s9128_s22 = smov 0  }
   0x3 LB: > { %s25_s23 = sadd.s32 1, %s9080_s20  ;;  %s28_s24 = sadd.s32 1, %s9084_s21  ;;  %s9088_s22 = sphi %s9128_s22, %s16_s22   ;;  %s9084_s21 = sphi %s9126_s21, %s10854_s21   ;;  %s9080_s20 = sphi %s9124_s20, %s10853_s20   ;;  %s9076_s19 = sphi %s9122_s19, %s10852_s19   ;;  %s9072_s18 = sphi %s9120_s18, %s10851_s18  }
   0x4   : > { %p26_p0 = scmp.ge.s32.totalorder %s25_s23, 8  ;;  %p6543_p1 = scmp.ge.s32.totalorder %s9088_s22, 1 }
   0x5   : > { %p252_p2 = scmp.lt.s32.totalorder %s9088_s22, 17 }
   0x6   : > { %s10856_s23 = smov (%p26_p0, %s25_s23), 0  ;;  %s10858_s24 = smov (!%p26_p0, %s28_s24), %s9084_s21 }
   0x7   : > { %p253_p3 = pnand %p6543_p1, %p252_p2  ;;  %p30_p4 = scmp.ge.s32.totalorder %s10858_s24, 2 }
   0x8   : > { %v8798_v0 = vld [vmem:[%s10843_s3 + $0x40] sm:$0xff] (!%p253_p3)   ;;  %p316_p5 = scmp.lt.s32.totalorder (!%p253_p3), %s9076_s19, 1  ;;  %p318_p6 = scmp.lt.s32.totalorder (!%p253_p3), %s9072_s18, 9  ;;  %v8800_v2 = vld [vmem:[%s10843_s3 + $0x48] sm:$0xff] (!%p253_p3)   ;;  %v8802_v4 = vld [vmem:[%s10843_s3 + $0x50] sm:$0xff] (!%p253_p3)   ;;  %vm819_vm3 = vcmask (!%p253_p3), 1042432  }
   0x9   : > { %s10860_s24 = smov (%p30_p4, %s10858_s24), 0  ;;  %256 = sbr.rel (%p253_p3) target bundleno = 715 (0x2cb), region = 36 }
   0xa   : > { %v8799_v1 = vld [vmem:[%s10843_s3 + $0x340] sm:$0xff] (!%p253_p3)   ;;  %7882 = vmatprep.subr.bf16.mxu1 (!%p253_p3), %v8798_v0  ;;  %v8801_v3 = vld [vmem:[%s10843_s3 + $0x348] sm:$0xff] (!%p253_p3)   ;;  %v8803_v5 = vld [vmem:[%s10843_s3 + $0x350] sm:$0xff] (!%p253_p3)   ;;  %s325_s15 = sadd.s32 (!%p253_p3), 1, %s9072_s18  ;;  %vm397_vm0 = vsmask.f32 (!%p253_p3), 3328 }
   0xb   : > { %8194 = vmatprep.subr.bf16.mxu0 (!%p253_p3), %v8799_v1  ;;  %7883 = vmatpush3.bf16.msra.mxu1 (!%p253_p3), %v8798_v0  ;;  %p328_p7 = scmp.lt.s32.totalorder (!%p253_p3), %s325_s15, 9  ;;  %v8804_v6 = vld [vmem:[%s10843_s3 + $0x58] sm:$0xff] (!%p253_p3)   ;;  %v8806_v8 = vld [vmem:[%s10843_s3 + $0x60] sm:$0xff] (!%p253_p3)   ;;  %v8808_v10 = vld [vmem:[%s10843_s3 + $0x68] sm:$0xff] (!%p253_p3)   ;;  %vm398_vm1 = vsmask.f32 (!%p253_p3), 7440 }
   0xc   : > { %8195 = vmatpush3.bf16.msra.mxu0 (!%p253_p3), %v8799_v1  ;;  %7884 = vmatprep.subr.bf16.mxu1 (!%p253_p3), %v8800_v2  ;;  %v8805_v7 = vld [vmem:[%s10843_s3 + $0x358] sm:$0xff] (!%p253_p3)   ;;  %v8807_v9 = vld [vmem:[%s10843_s3 + $0x360] sm:$0xff] (!%p253_p3)   ;;  %v8809_v13 = vld [vmem:[%s10843_s3 + $0x368] sm:$0xff] (!%p253_p3)   ;;  %vm820_vm4 = vcmask (!%p253_p3), 1046532   ;;  %p349_p9 = scmp.lt.s32.totalorder (!%p253_p3), %s9072_s18, 7  ;;  %vm6352_vm6 = vcmask (!%p253_p3), 1040384  }
   0xd   : > { %8196 = vmatprep.subr.bf16.mxu0 (!%p253_p3), %v8801_v3  ;;  %v8810_v16 = vld [vmem:[%s10843_s3 + $0x70] sm:$0xff] (!%p253_p3)   ;;  %v8812_v34 = vld [vmem:[%s10843_s3 + $0x78] sm:$0xff] (!%p253_p3)   ;;  %vm9241_vm2 = vmor (!%p253_p3), %vm397_vm0, %vm398_vm1 }
   0xe   : > { %v8811_v20 = vld [vmem:[%s10843_s3 + $0x370] sm:$0xff] (!%p253_p3)   ;;  %v8813_v45 = vld [vmem:[%s10843_s3 + $0x378] sm:$0xff] (!%p253_p3)   ;;  %v8814_v60 = vld [vmem:[%s10843_s3] sm:$0xff] (!%p253_p3)  }
   0xf   : > { %7885 = vmatpush3.bf16.msra.mxu1 (!%p253_p3), %v8800_v2  ;;  %v9272_v62 = vld [vmem:[%s10843_s3 + $0x380] sm:$0xff] (!%p253_p3)   ;;  %vm9415_vm5 = vmor (!%p253_p3), %vm819_vm3, %vm820_vm4 }
  0x10   : > { %s10862_s19 = smov (!%p316_p5, %s9076_s19), 1  ;;  %8197 = vmatpush3.bf16.msra.mxu0 %v8801_v3  ;;  %7886 = vmatprep.subr.bf16.mxu1 %v8802_v4  ;;  %s10864_s15 = smov (!%p328_p7, %s325_s15), 9  ;;  %v9046_v35 = vld [vmem:[%s10843_s3 + $0x6a0] sm:$0xff]  }
  0x11   : > { %s319_s8 = scalar_select %p318_p6, %s9072_s18, 9  ;;  %8198 = vmatprep.subr.bf16.mxu0 %v8803_v5 }
  0x12   : > { %s9172_s11 = smul.u32 200, %s10862_s19 }
  0x13   : > { %s8754_s14 = smul.u32 20, %s319_s8  ;;  %7887 = vmatpush3.bf16.msra.mxu1 %v8802_v4  ;;  %s336_s8 = sadd.s32 2, %s9072_s18 }
  0x14   : > { %8199 = vmatpush3.bf16.msra.mxu0 %v8803_v5  ;;  %7888 = vmatprep.subr.bf16.mxu1 %v8804_v6  ;;  %s8756_s6 = smul.u32 20, %s10864_s15  ;;  %p9637_p8 = scmp.lt.s32.totalorder %s336_s8, 9 }
  0x15   : > { %s322_s16 = sadd.s32 %s9172_s11, %s8754_s14  ;;  %8200 = vmatprep.subr.bf16.mxu0 %v8805_v7  ;;  %s10868_s18 = smov (!%p349_p9, %s9072_s18), 7 }
  0x16   : > { %s6544_s28 = sshll.u32 %s322_s16, 2  ;;  %s332_s13 = sadd.s32 %s8756_s6, %s9172_s11 }
  0x17   : > { %s9194_s12 = scalar_lea.vmem %s10840_s0, %s6544_s28  ;;  %7889 = vmatpush3.bf16.msra.mxu1 %v8804_v6  ;;  %s6545_s16 = sshll.u32 %s332_s13, 2 }
  0x18   : > { %8201 = vmatpush3.bf16.msra.mxu0 %v8805_v7  ;;  %7890 = vmatprep.subr.bf16.mxu1 %v8806_v8  ;;  %v9201_v11 = vld [vmem:[%s9194_s12] sm:$0xf]  ;;  %v9204_v12 = vld [vmem:[%s9194_s12 + $0x8] sm:$0xf]  ;;  %v9210_v14 = vld [vmem:[%s9194_s12 + $0x4] sm:$0x1]  ;;  %s9227_s7 = scalar_lea.vmem %s10841_s1, %s6545_s16 }
  0x19   : > { %8202 = vmatprep.subr.bf16.mxu0 %v8807_v9  ;;  %v9213_v15 = vld [vmem:[%s9194_s12 + $0xc] sm:$0x1]  ;;  %v401_v17 = vshrl.u32 %v9201_v11, 16  ;;  %v404_v18 = vshll.u32 %v9201_v11, 16  ;;  %v410_v19 = vshll.u32 %v9210_v14, 16  ;;  %v415_v21 = vshrl.u32 %v9204_v12, 16 }
  0x1a   : > { %v418_v22 = vshll.u32 %v9204_v12, 16  ;;  %v424_v23 = vshll.u32 %v9213_v15, 16  ;;  %v7004_v31 = vld [vmem:[%s9227_s7 + $0x8] sm:$0xf]  ;;  %v9234_v32 = vld [vmem:[%s9227_s7 + $0xc] sm:$0x1] }
  0x1b   : > { %7891 = vmatpush3.bf16.msra.mxu1 %v8806_v8  ;;  %v403_v24 = vrot.slane %v401_v17, 4  ;;  %v406_v25 = vrot.slane %v404_v18, 5  ;;  %v412_v26 = vrot.slane %v410_v19, 5  ;;  %v417_v27 = vrot.slane %v415_v21, 4  ;;  %v7006_v33 = vld [vmem:[%s9227_s7 + $0x10] sm:$0xf] }
  0x1c   : > { %8203 = vmatpush3.bf16.msra.mxu0 %v8807_v9  ;;  %7892 = vmatprep.subr.bf16.mxu1 %v8808_v10  ;;  %v420_v28 = vrot.slane %v418_v22, 5  ;;  %v426_v29 = vrot.slane %v424_v23, 5  ;;  %v9246_v37 = vld [vmem:[%s9227_s7 + $0x14] sm:$0x1]  ;;  %v3184_v38 = vshrl.u32 %v7004_v31, 16  ;;  %v3187_v39 = vshll.u32 %v7004_v31, 16 }
  0x1d   : > { %8204 = vmatprep.subr.bf16.mxu0 %v8809_v13  ;;  %v407_v30 = vor.u32 %v406_v25, %v403_v24  ;;  %v3193_v40 = vshll.u32 %v9234_v32, 16  ;;  %v3198_v42 = vshrl.u32 %v7006_v33, 16  ;;  %v3201_v43 = vshll.u32 %v7006_v33, 16  ;;  %v9256_v52 = vld [vmem:[%s9194_s12 + $0x10] sm:$0xf]  ;;  %s10866_s8 = smov (!%p9637_p8, %s336_s8), 9 }
  0x1e   : > { %v421_v36 = vor.u32 %v420_v28, %v417_v27  ;;  %v3207_v44 = vshll.u32 %v9246_v37, 16  ;;  %v3186_v47 = vrot.slane %v3184_v38, 4  ;;  %v3189_v48 = vrot.slane %v3187_v39, 5  ;;  %v9261_v57 = vld [vmem:[%s9194_s12 + $0x18] sm:$0xf]  ;;  %s8757_s28 = smul.u32 20, %s10866_s8 }
  0x1f   : > { %7893 = vmatpush3.bf16.msra.mxu1 %v8808_v10  ;;  %v408_v41 = vrot.slane %v407_v30, 4  ;;  %v3200_v50 = vrot.slane %v3198_v42, 4  ;;  %v3203_v51 = vrot.slane %v3201_v43, 5  ;;  %v3195_v55 = vrot.slane %v3193_v40, 5  ;;  %v9264_v58 = vld [vmem:[%s9194_s12 + $0x14] sm:$0x1] }
  0x20   : > { %8205 = vmatpush3.bf16.msra.mxu0 %v8809_v13  ;;  %7894 = vmatprep.subr.bf16.mxu1 %v8810_v16  ;;  %v422_v46 = vrot.slane %v421_v36, 4  ;;  %v3190_v54 = vor.u32 %v3189_v48, %v3186_v47  ;;  %v3209_v56 = vrot.slane %v3207_v44, 5  ;;  %v9275_v63 = vld [vmem:[%s9194_s12 + $0x1c] sm:$0x1]  ;;  %v429_v0 = vshrl.u32 %v9256_v52, 16  ;;  %v8816_v44 = vld [vmem:[%s10843_s3 + $0x8] sm:$0xff]   ;;  %s9801_s10 = sadd.s32 %s8757_s28, %s9172_s11 }
  0x21   : > { %8206 = vmatprep.subr.bf16.mxu0 %v8811_v20  ;;  %v413_v49 = vsel %vm9241_vm2, %v408_v41, %v412_v26  ;;  %v3204_v61 = vor.u32 %v3203_v51, %v3200_v50  ;;  %v432_v1 = vshll.u32 %v9256_v52, 16  ;;  %v438_v3 = vshll.u32 %v9264_v58, 16  ;;  %v7008_v6 = vld [vmem:[%s9227_s7 + $0x18] sm:$0xf]  ;;  %v9285_v13 = vld [vmem:[%s9227_s7 + $0x1c] sm:$0x1] }
  0x22   : > { %v427_v53 = vsel %vm9241_vm2, %v422_v46, %v426_v29  ;;  %v3191_v2 = vrot.slane %v3190_v54, 4  ;;  %v443_v4 = vshrl.u32 %v9261_v57, 16  ;;  %v446_v5 = vshll.u32 %v9261_v57, 16  ;;  %v9293_v23 = vld [vmem:[%s9227_s7 + $0x24] sm:$0x1]  ;;  %s6546_s14 = sshll.u32 %s9801_s10, 2 }
  0x23   : > { %7895 = vmatpush3.bf16.msra.mxu1 %v8810_v16  ;;  %v6568_v59 = vcombine.low %v413_v49, %v427_v53  ;;  %v3205_v7 = vrot.slane %v3204_v61, 4  ;;  %v431_v8 = vrot.slane %v429_v0, 4  ;;  %v434_v9 = vrot.slane %v432_v1, 5  ;;  %v8818_v53 = vld [vmem:[%s10843_s3 + $0x10] sm:$0xff]   ;;  %v9315_v61 = vld [vmem:[%s9194_s12 + $0x20] sm:$0xf]  ;;  %s9849_s29 = scalar_lea.vmem %s10842_s2, %s6546_s14 }
  0x24   : > { %8207 = vmatpush3.bf16.msra.mxu0 %v8811_v20  ;;  %7896 = vmatprep.subr.bf16.mxu1 %v8812_v34  ;;  %v452_v10 = vshll.u32 %v9275_v63, 16  ;;  %v3196_v16 = vsel %vm9241_vm2, %v3191_v2, %v3195_v55  ;;  %v440_v17 = vrot.slane %v438_v3, 5  ;;  %v445_v18 = vrot.slane %v443_v4, 4  ;;  %v7010_v20 = vld [vmem:[%s9227_s7 + $0x20] sm:$0xf]  ;;  %v8817_v3 = vld [vmem:[%s10843_s3 + $0x388] sm:$0xff]  }
  0x25   : > { %8208 = vmatprep.subr.bf16.mxu0 %v8813_v45  ;;  %7898 = vmatprep.mubr.bf16.mxu1 %v6568_v59  ;;  %v448_v19 = vrot.slane %v446_v5, 5  ;;  %v3210_v21 = vsel %vm9241_vm2, %v3205_v7, %v3209_v56  ;;  %v435_v22 = vor.u32 %v434_v9, %v431_v8  ;;  %v3212_v27 = vshrl.u32 %v7008_v6, 16  ;;  %v9318_v0 = vld [vmem:[%s9194_s12 + $0x28] sm:$0xf]  ;;  %v9321_v1 = vld [vmem:[%s9194_s12 + $0x24] sm:$0x1] }
  0x26   : > { %v7036_v24 = vcombine.low %v3196_v16, %v3210_v21  ;;  %v454_v26 = vrot.slane %v452_v10, 5  ;;  %v3215_v29 = vshll.u32 %v7008_v6, 16  ;;  %v3221_v30 = vshll.u32 %v9285_v13, 16  ;;  %v8820_v7 = vld [vmem:[%s10843_s3 + $0x18] sm:$0xff]   ;;  %s6548_s6 = sshll.u32 %s10862_s19, 6  ;;  %s6550_s13 = sshll.u32 %s10862_s19, 3 }
  0x27   : > { %7897 = vmatpush3.bf16.msra.mxu1 %v8812_v34  ;;  %v449_v25 = vor.u32 %v448_v19, %v445_v18  ;;  %v436_v28 = vrot.slane %v435_v22, 4  ;;  %v3226_v31 = vshrl.u32 %v7010_v20, 16  ;;  %v3214_v34 = vrot.slane %v3212_v27, 4  ;;  %v8819_v18 = vld [vmem:[%s10843_s3 + $0x390] sm:$0xff]  }
  0x28   : > { %8209 = vmatpush3.bf16.msra.mxu0 %v8813_v45  ;;  %7906 = vmatprep.subr.bf16.mxu1 %v8814_v60  ;;  %v3229_v36 = vshll.u32 %v7010_v20, 16  ;;  %v3235_v38 = vshll.u32 %v9293_v23, 16  ;;  %v3217_v40 = vrot.slane %v3215_v29, 5  ;;  %v3223_v47 = vrot.slane %v3221_v30, 5  ;;  %v7014_v29 = vld [vmem:[%s9227_s7 + $0x30] sm:$0xf] }
  0x29   : > { %8218 = vmatprep.subr.bf16.mxu0 %v9272_v62  ;;  %8210 = vmatprep.mubr.bf16.mxu0 %v7036_v24  ;;  %v450_v33 = vrot.slane %v449_v25, 4  ;;  %v441_v39 = vsel %vm9241_vm2, %v436_v28, %v440_v17  ;;  %v3228_v41 = vrot.slane %v3226_v31, 4  ;;  %v3475_v50 = vrot.slane %v9234_v32, 5  ;;  %v9346_v28 = vld [vmem:[%s9227_s7 + $0x2c] sm:$0x1]  ;;  %v8822_v31 = vld [vmem:[%s10843_s3 + $0x20] sm:$0xff]  }
  0x2a   : > { %v3231_v43 = vrot.slane %v3229_v36, 5  ;;  %v3218_v46 = vor.u32 %v3217_v40, %v3214_v34  ;;  %v3237_v48 = vrot.slane %v3235_v38, 5  ;;  %v3479_v54 = vrot.slane %v9246_v37, 5  ;;  %v9350_v30 = vld [vmem:[%s9227_s7 + $0x34] sm:$0x1]  ;;  %v8821_v38 = vld [vmem:[%s10843_s3 + $0x398] sm:$0xff]  }
  0x2b   : > { %v455_v42 = vsel %vm9241_vm2, %v450_v33, %v454_v26  ;;  %v457_v4 = vshrl.u32 %v9315_v61, 16  ;;  %v460_v5 = vshll.u32 %v9315_v61, 16  ;;  %v466_v6 = vshll.u32 %v9321_v1, 16  ;;  %v7012_v26 = vld [vmem:[%s9227_s7 + $0x28] sm:$0xf]  ;;  %v8829_v37 = vld [vmem:[%s10843_s3 + $0x3b8] sm:$0xff]  }
  0x2c   : > { %v6569_v45 = vcombine.low %v441_v39, %v455_v42  ;;  %v3232_v49 = vor.u32 %v3231_v43, %v3228_v41  ;;  %v3219_v51 = vrot.slane %v3218_v46, 4  ;;  %v471_v8 = vshrl.u32 %v9318_v0, 16 }
  0x2d   : > { %v474_v9 = vshll.u32 %v9318_v0, 16  ;;  %v3483_v16 = vrot.slane %v9285_v13, 5  ;;  %v3487_v17 = vrot.slane %v9293_v23, 5  ;;  %v459_v19 = vrot.slane %v457_v4, 4  ;;  %v9377_v4 = vld [vmem:[%s9194_s12 + $0x3c] sm:$0x1] }
  0x2e   : > { %7899 = vmatmul.mubr.bf16.vlgmr.msra.gmra.mrb[0].mxu1 %v6569_v45  ;;  %v3233_v55 = vrot.slane %v3232_v49, 4  ;;  %v3224_v56 = vsel %vm9241_vm2, %v3219_v51, %v3223_v47  ;;  %v462_v20 = vrot.slane %v460_v5, 5  ;;  %v468_v21 = vrot.slane %v466_v6, 5  ;;  %v9361_v47 = vld [vmem:[%s9194_s12 + $0x30] sm:$0xf]  ;;  %v8832_v13 = vld [vmem:[%s10843_s3 + $0x3c0] sm:$0xff]  }
  0x2f   : > { %7907 = vmatpush3.bf16.msra.mxu1 %v8814_v60  ;;  %v9327_v60 = vld [vmem:[%s9194_s12 + $0x2c] sm:$0x1]  ;;  %v473_v22 = vrot.slane %v471_v8, 4  ;;  %v476_v24 = vrot.slane %v474_v9, 5  ;;  %v3243_v34 = vshll.u32 %v7012_v26, 16  ;;  %v3249_v36 = vshll.u32 %v9346_v28, 16 }
  0x30   : > { %7908 = vmatprep.subr.bf16.mxu1 %v8816_v44  ;;  %v3238_v59 = vsel %vm9241_vm2, %v3233_v55, %v3237_v48  ;;  %v480_v10 = vshll.u32 %v9327_v60, 16  ;;  %v463_v27 = vor.u32 %v462_v20, %v459_v19  ;;  %v3254_v40 = vshrl.u32 %v7014_v29, 16  ;;  %v8824_v48 = vld [vmem:[%s10843_s3 + $0x28] sm:$0xff]   ;;  %v8823_v8 = vld [vmem:[%s10843_s3 + $0x3a0] sm:$0xff]   ;;  %v7016_v20 = vld [vmem:[%s9227_s7 + $0x38] sm:$0xf] }
  0x31   : > { %v7037_v2 = vcombine.low %v3224_v56, %v3238_v59  ;;  %v477_v33 = vor.u32 %v476_v24, %v473_v22  ;;  %v3257_v41 = vshll.u32 %v7014_v29, 16  ;;  %v3263_v42 = vshll.u32 %v9350_v30, 16  ;;  %v9369_v56 = vld [vmem:[%s9194_s12 + $0x38] sm:$0xf] }
  0x32   : > { %v482_v25 = vrot.slane %v480_v10, 5  ;;  %v464_v39 = vrot.slane %v463_v27, 4  ;;  %v3245_v45 = vrot.slane %v3243_v34, 5  ;;  %v3251_v46 = vrot.slane %v3249_v36, 5  ;;  %v7018_v27 = vld [vmem:[%s9227_s7 + $0x40] sm:$0xf] }
  0x33   : > { %7909 = vmatpush3.bf16.msra.mxu1 %v8816_v44  ;;  %8211 = vmatmul.mubr.bf16.vlgmr.msra.gmra.mrb[0].mxu0 %v7037_v2  ;;  %v478_v43 = vrot.slane %v477_v33, 4  ;;  %v3256_v51 = vrot.slane %v3254_v40, 4  ;;  %v3265_v55 = vrot.slane %v3263_v42, 5  ;;  %v485_v5 = vshrl.u32 %v9361_v47, 16  ;;  %v9394_v36 = vld [vmem:[%s9227_s7 + $0x44] sm:$0x1] }
  0x34   : > { %7910 = vmatprep.subr.bf16.mxu1 %v8818_v53  ;;  %8219 = vmatpush3.bf16.msra.mxu0 %v9272_v62  ;;  %v3240_v62 = vshrl.u32 %v7012_v26, 16  ;;  %v469_v49 = vsel %vm9241_vm2, %v464_v39, %v468_v21  ;;  %v488_v6 = vshll.u32 %v9361_v47, 16  ;;  %v499_v19 = vshrl.u32 %v9369_v56, 16  ;;  %v9388_v21 = vld [vmem:[%s9227_s7 + $0x3c] sm:$0x1]  ;;  %v8825_v42 = vld [vmem:[%s10843_s3 + $0x3a8] sm:$0xff]  }
  0x35   : > { %8220 = vmatprep.subr.bf16.mxu0 %v8817_v3  ;;  %v483_v59 = vsel %vm9241_vm2, %v478_v43, %v482_v25  ;;  %v487_v24 = vrot.slane %v485_v5, 4  ;;  %v502_v26 = vshll.u32 %v9369_v56, 16  ;;  %v508_v34 = vshll.u32 %v9377_v4, 16  ;;  %v8826_v43 = vld [vmem:[%s10843_s3 + $0x30] sm:$0xff]  }
  0x36   : > { %v3242_v44 = vrot.slane %v3240_v62, 4  ;;  %v6570_v9 = vcombine.low %v469_v49, %v483_v59  ;;  %v490_v25 = vrot.slane %v488_v6, 5  ;;  %v501_v62 = vrot.slane %v499_v19, 4 }
  0x37   : > { %7911 = vmatpush3.bf16.msra.mxu1 %v8818_v53  ;;  %v3259_v53 = vrot.slane %v3257_v41, 5  ;;  %v504_v40 = vrot.slane %v502_v26, 5  ;;  %v3268_v41 = vshrl.u32 %v7016_v20, 16  ;;  %v3277_v49 = vshll.u32 %v9388_v21, 16 }
  0x38   : > { %7912 = vmatprep.subr.bf16.mxu1 %v8820_v7  ;;  %8221 = vmatpush3.bf16.msra.mxu0 %v8817_v3  ;;  %v3246_v2 = vor.u32 %v3245_v45, %v3242_v44  ;;  %v9374_v3 = vld [vmem:[%s9194_s12 + $0x34] sm:$0x1]  ;;  %v510_v45 = vrot.slane %v508_v34, 5  ;;  %v3282_v6 = vshrl.u32 %v7018_v27, 16  ;;  %v3491_v23 = vrot.slane %v9346_v28, 5 }
  0x39   : > { %8222 = vmatprep.subr.bf16.mxu0 %v8819_v18  ;;  %v494_v10 = vshll.u32 %v9374_v3, 16  ;;  %7902 = vmatprep.mubr.bf16.mxu1 %v6570_v9  ;;  %v3270_v59 = vrot.slane %v3268_v41, 4  ;;  %v3279_v5 = vrot.slane %v3277_v49, 5  ;;  %v3285_v9 = vshll.u32 %v7018_v27, 16  ;;  %v8827_v27 = vld [vmem:[%s10843_s3 + $0x3b0] sm:$0xff]  }
  0x3a   : > { %v3247_v22 = vrot.slane %v3246_v2, 4  ;;  %v7050_v41 = vld [vmem:[%s9227_s7 + $0x18] sm:$0xe]  ;;  %v3499_v28 = vrot.slane %v9388_v21, 5  ;;  %v832_v21 = vrot.slane %v9264_v58, 5 }
  0x3b   : > { %7913 = vmatpush3.bf16.msra.mxu1 %v8820_v7  ;;  %v3260_v7 = vor.u32 %v3259_v53, %v3256_v51  ;;  %v496_v33 = vrot.slane %v494_v10, 5  ;;  %v505_v53 = vor.u32 %v504_v40, %v501_v62  ;;  %v3291_v10 = vshll.u32 %v9394_v36, 16 }
  0x3c   : > { %7914 = vmatprep.subr.bf16.mxu1 %v8822_v31  ;;  %8223 = vmatpush3.bf16.msra.mxu0 %v8819_v18  ;;  %v3252_v39 = vsel %vm9241_vm2, %v3247_v22, %v3251_v46  ;;  %v491_v18 = vor.u32 %v490_v25, %v487_v24  ;;  %v3287_v22 = vrot.slane %v3285_v9, 5  ;;  %v8828_v24 = vld [vmem:[%s10843_s3 + $0x38] sm:$0xff]   ;;  %v7049_v25 = vld [vmem:[%s9227_s7 + $0x10] sm:$0xe] }
  0x3d   : > { %8224 = vmatprep.subr.bf16.mxu0 %v8821_v38  ;;  %v3261_v29 = vrot.slane %v3260_v7, 4  ;;  %v506_v7 = vrot.slane %v505_v53, 4  ;;  %v7057_v62 = vrot.slane %v7049_v25, 9  ;;  %v3293_v40 = vrot.slane %v3291_v10, 5  ;;  %v7054_v9 = vld [vmem:[%s9227_s7 + $0x38] sm:$0xe] }
  0x3e   : > { %v492_v51 = vrot.slane %v491_v18, 4  ;;  %v8837_v25 = vld [vmem:[%s10843_s3 + $0x3d0] sm:$0xff]  }
  0x3f   : > { %7915 = vmatpush3.bf16.msra.mxu1 %v8822_v31  ;;  %v3266_v44 = vsel %vm9241_vm2, %v3261_v29, %v3265_v55  ;;  %v3271_v31 = vshll.u32 %v7016_v20, 16  ;;  %v3284_v20 = vrot.slane %v3282_v6, 4  ;;  %v511_v29 = vsel %vm9241_vm2, %v506_v7, %v510_v45 }
  0x40   : > { %7916 = vmatprep.subr.bf16.mxu1 %v8824_v48  ;;  %8225 = vmatpush3.bf16.msra.mxu0 %v8821_v38  ;;  %v7038_v46 = vcombine.low %v3252_v39, %v3266_v44  ;;  %v497_v55 = vsel %vm9241_vm2, %v492_v51, %v496_v33  ;;  %v7048_v38 = vld [vmem:[%s9227_s7 + $0x8] sm:$0xe]  ;;  %v6580_v33 = vcombine.low %v9201_v11, %v9204_v12  ;;  %v7051_v44 = vld [vmem:[%s9227_s7 + $0x20] sm:$0xe]  ;;  %v7058_v12 = vrot.slane %v7050_v41, 9 }
  0x41   : > { %8226 = vmatprep.subr.bf16.mxu0 %v8823_v8  ;;  %v3273_v2 = vrot.slane %v3271_v31, 5  ;;  %v7056_v26 = vrot.slane %v7048_v38, 9  ;;  %v6571_v34 = vcombine.low %v497_v55, %v511_v29  ;;  %v3288_v18 = vor.u32 %v3287_v22, %v3284_v20  ;;  %v7055_v55 = vld [vmem:[%s9227_s7 + $0x40] sm:$0xe] }
  0x42   : > { %8214 = vmatprep.mubr.bf16.mxu0 %v7038_v46  ;;  %v3480_v11 = vsel %vm9415_vm5, %v7057_v62, %v3479_v54  ;;  %v7059_v49 = vrot.slane %v7051_v44, 9  ;;  %v6581_v54 = vcombine.low %v9256_v52, %v9261_v57  ;;  %v3484_v51 = vsel %vm9415_vm5, %v7058_v12, %v3483_v16  ;;  %v8834_v52 = vld [vmem:[%s10843_s3 + $0x88] sm:$0xff]   ;;  %v795_v22 = vld [vmem:[%s9194_s12] sm:$0xe]  ;;  %v8839_v62 = vld [vmem:[%s10843_s3 + $0x3d8] sm:$0xff]  }
  0x43   : > { %7917 = vmatpush3.bf16.msra.mxu1 %v8824_v48  ;;  %v3274_v19 = vor.u32 %v3273_v2, %v3270_v59  ;;  %v3476_v45 = vsel %vm9415_vm5, %v7056_v26, %v3475_v50  ;;  %v824_v57 = vrot.slane %v9210_v14, 5  ;;  %v8835_v14 = vld [vmem:[%s10843_s3 + $0x3c8] sm:$0xff]   ;;  %v7053_v59 = vld [vmem:[%s9227_s7 + $0x30] sm:$0xe]  ;;  %v3503_v6 = vrot.slane %v9394_v36, 5  ;;  %v8840_v29 = vld [vmem:[%s10843_s3 + $0xa0] sm:$0xff]  }
  0x44   : > { %7918 = vmatprep.subr.bf16.mxu1 %v8826_v43  ;;  %8227 = vmatpush3.bf16.msra.mxu0 %v8823_v8  ;;  %v8831_v8 = vld [vmem:[%s10843_s3 + $0x80] sm:$0xff]   ;;  %v7080_v50 = vcombine.low %v3476_v45, %v3480_v11  ;;  %v3488_v53 = vsel %vm9415_vm5, %v7059_v49, %v3487_v17  ;;  %v7052_v17 = vld [vmem:[%s9227_s7 + $0x28] sm:$0xe]  ;;  %v7062_v38 = vrot.slane %v7054_v9, 9  ;;  %v828_v20 = vrot.slane %v9213_v15, 5  ;;  %v8845_v49 = vld [vmem:[%s10843_s3 + $0xb0] sm:$0xff]  }
  0x45   : > { %8228 = vmatprep.subr.bf16.mxu0 %v8825_v42  ;;  %v3275_v39 = vrot.slane %v3274_v19, 4  ;;  %7903 = vmatmul.mubr.bf16.gmra.mrb[4].mxu1 %v6571_v34  ;;  %v7081_v16 = vcombine.low %v3484_v51, %v3488_v53  ;;  %v7060_v2 = vrot.slane %v7052_v17, 9  ;;  %v7063_v19 = vrot.slane %v7055_v55, 9  ;;  %v796_v15 = vld [vmem:[%s9194_s12 + $0x8] sm:$0xe] }
  0x46   : > { %7922 = vmatprep.mubr.bf16.mxu1 %v6580_v33  ;;  %v6592_v58 = vrot.slane %v795_v22, 9  ;;  %v6593_v26 = vrot.slane %v796_v15, 9  ;;  %v7130_v9 = vld [vmem:[%s9227_s7 + $0x18] sm:$0xf]  ;;  %v9571_v55 = vld [vmem:[%s9227_s7 + $0x1c] sm:$0x1] }
  0x47   : > { %7919 = vmatpush3.bf16.msra.mxu1 %v8826_v43  ;;  %v3280_v31 = vsel %vm9241_vm2, %v3275_v39, %v3279_v5  ;;  %v3289_v43 = vrot.slane %v3288_v18, 4  ;;  %v7061_v5 = vrot.slane %v7053_v59, 9  ;;  %v3492_v7 = vsel %vm9415_vm5, %v7060_v2, %v3491_v23  ;;  %v797_v18 = vld [vmem:[%s9194_s12 + $0x10] sm:$0xe]  ;;  %v8852_v59 = vld [vmem:[%s10843_s3 + $0x400] sm:$0xff]  }
  0x48   : > { %7920 = vmatprep.subr.bf16.mxu1 %v8828_v24  ;;  %8229 = vmatpush3.bf16.msra.mxu0 %v8825_v42  ;;  %v6582_v42 = vcombine.low %v9315_v61, %v9318_v0  ;;  %v8836_v61 = vld [vmem:[%s10843_s3 + $0x90] sm:$0xff]   ;;  %v3495_v0 = vrot.slane %v9350_v30, 5  ;;  %v6583_v30 = vcombine.low %v9361_v47, %v9369_v56  ;;  %v8838_v47 = vld [vmem:[%s10843_s3 + $0x98] sm:$0xff]   ;;  %v3500_v56 = vsel %vm9415_vm5, %v7062_v38, %v3499_v28 }
  0x49   : > { %8230 = vmatprep.subr.bf16.mxu0 %v8827_v27  ;;  %v3294_v32 = vsel %vm9241_vm2, %v3289_v43, %v3293_v40  ;;  %v825_v33 = vsel %vm9415_vm5, %v6592_v58, %v824_v57  ;;  %v829_v39 = vsel %vm9415_vm5, %v6593_v26, %v828_v20  ;;  %v6594_v41 = vrot.slane %v797_v18, 9  ;;  %v8841_v43 = vld [vmem:[%s10843_s3 + $0x3e0] sm:$0xff]   ;;  %v801_v57 = vld [vmem:[%s9194_s12 + $0x30] sm:$0xe] }
  0x4a   : > { %v7039_v46 = vcombine.low %v3280_v31, %v3294_v32  ;;  %v3496_v10 = vsel %vm9415_vm5, %v7061_v5, %v3495_v0  ;;  %v6616_v40 = vcombine.low %v825_v33, %v829_v39  ;;  %v8842_v31 = vld [vmem:[%s10843_s3 + $0xa8] sm:$0xff]   ;;  %v848_v0 = vrot.slane %v9374_v3, 5  ;;  %v7128_v28 = vld [vmem:[%s9227_s7 + $0x10] sm:$0xf]  ;;  %v8858_v39 = vld [vmem:[%s10843_s3 + $0xd8] sm:$0xff]  }
  0x4b   : > { %7921 = vmatpush3.bf16.msra.mxu1 %v8828_v24  ;;  %v7082_v36 = vcombine.low %v3492_v7, %v3496_v10  ;;  %v3504_v24 = vsel %vm9415_vm5, %v7063_v19, %v3503_v6  ;;  %v833_v45 = vsel %vm9415_vm5, %v6594_v41, %v832_v21  ;;  %v8843_v32 = vld [vmem:[%s10843_s3 + $0x3e8] sm:$0xff]   ;;  %v3847_v7 = vshrl.u32 %v7128_v28, 16  ;;  %v8856_v22 = vld [vmem:[%s10843_s3 + $0xd0] sm:$0xff]  }
  0x4c   : > { %7930 = vmatprep.subr.bf16.mxu1 %v8831_v8  ;;  %8215 = vmatmul.mubr.bf16.gmra.mrb[4].mxu0 %v7039_v46  ;;  %v7083_v34 = vcombine.low %v3500_v56, %v3504_v24  ;;  %v8848_v46 = vld [vmem:[%s10843_s3 + $0xb8] sm:$0xff]   ;;  %v8854_v5 = vld [vmem:[%s10843_s3 + $0xc8] sm:$0xff]   ;;  %v3850_v10 = vshll.u32 %v7128_v28, 16  ;;  %v3861_v19 = vshrl.u32 %v7130_v9, 16  ;;  %v3864_v20 = vshll.u32 %v7130_v9, 16 }
  0x4d   : > { %8231 = vmatpush3.bf16.msra.mxu0 %v8827_v27  ;;  %8234 = vmatprep.mubr.bf16.mxu0 %v7080_v50  ;;  %v836_v27 = vrot.slane %v9275_v63, 5  ;;  %v798_v63 = vld [vmem:[%s9194_s12 + $0x18] sm:$0xe]  ;;  %v840_v50 = vrot.slane %v9321_v1, 5  ;;  %v8853_v3 = vld [vmem:[%s9227_s7 + $0x20] ss:$8 sps:$4 sm:$0xff]  }
  0x4e   : > { %8232 = vmatprep.subr.bf16.mxu0 %v8829_v37  ;;  %7923 = vmatmul.mubr.bf16.vlgmr.msra.gmra.mrb[0].mxu1 %v6581_v54  ;;  %v6595_v44 = vrot.slane %v798_v63, 9  ;;  %v800_v54 = vld [vmem:[%s9194_s12 + $0x28] sm:$0xe]  ;;  %v8849_v1 = vld [vmem:[%s10843_s3 + $0x3f8] sm:$0xff]   ;;  %v3870_v21 = vshll.u32 %v9571_v55, 16  ;;  %v3852_v56 = vrot.slane %v3850_v10, 5 }
  0x4f   : > { %7931 = vmatpush3.bf16.msra.mxu1 %v8831_v8  ;;  %7926 = vmatprep.mubr.bf16.mxu1 %v6582_v42  ;;  %v8851_v8 = vld [vmem:[%s9227_s7 + $0x10] ss:$8 sps:$4 sm:$0xff]   ;;  %v844_v42 = vrot.slane %v9327_v60, 5  ;;  %v6597_v53 = vrot.slane %v800_v54, 9  ;;  %v8850_v60 = vld [vmem:[%s10843_s3 + $0xc0] sm:$0xff]   ;;  %v3863_v15 = vrot.slane %v3861_v19, 4 }
  0x50   : > { %7932 = vmatprep.subr.bf16.mxu1 %v8834_v52  ;;  %v837_v11 = vsel %vm9415_vm5, %v6595_v44, %v836_v27  ;;  %v8865_v24 = vld [vmem:[%s9227_s7 + $0x30] ss:$8 sps:$4 sm:$0xff]   ;;  %v3866_v58 = vrot.slane %v3864_v20, 5  ;;  %v7134_v63 = vld [vmem:[%s9227_s7 + $0x28] sm:$0xf] }
  0x51   : > { %8233 = vmatpush3.bf16.msra.mxu0 %v8829_v37  ;;  %v6617_v12 = vcombine.low %v833_v45, %v837_v11  ;;  %v799_v37 = vld [vmem:[%s9194_s12 + $0x20] sm:$0xe]  ;;  %v845_v23 = vsel %vm9415_vm5, %v6597_v53, %v844_v42  ;;  %v8870_v33 = vld [vmem:[%s9194_s12 + $0x8] ss:$8 sps:$4 sm:$0xff]   ;;  %v9606_v42 = vld [vmem:[%s9227_s7 + $0x2c] sm:$0x1] }
  0x52   : > { %8242 = vmatprep.subr.bf16.mxu0 %v8832_v13  ;;  %v6596_v51 = vrot.slane %v799_v37, 9  ;;  %v8860_v45 = vld [vmem:[%s10843_s3 + $0xe0] sm:$0xff]   ;;  %v8868_v10 = vld [vmem:[%s10843_s3 + $0xf8] sm:$0xff]  }
  0x53   : > { %7933 = vmatpush3.bf16.msra.mxu1 %v8834_v52  ;;  %v8846_v52 = vld [vmem:[%s10843_s3 + $0x3f0] sm:$0xff]   ;;  %v8867_v11 = vld [vmem:[%s9227_s7 + $0x40] ss:$8 sps:$4 sm:$0xff]  }
  0x54   : > { %8235 = vmatmul.mubr.bf16.vlgmr.msra.gmra.mrb[0].mxu0 %v7081_v16  ;;  %7934 = vmatprep.subr.bf16.mxu1 %v8836_v61  ;;  %v852_v16 = vrot.slane %v9377_v4, 5  ;;  %v9563_v4 = vld [vmem:[%s9227_s7 + $0x14] sm:$0x1] }
  0x55   : > { %8243 = vmatpush3.bf16.msra.mxu0 %v8832_v13  ;;  %8238 = vmatprep.mubr.bf16.mxu0 %v7082_v36  ;;  %v802_v13 = vld [vmem:[%s9194_s12 + $0x38] sm:$0xe]  ;;  %v3856_v38 = vshll.u32 %v9563_v4, 16  ;;  %v8855_v36 = vld [vmem:[%s10843_s3 + $0x408] sm:$0xff]  }
  0x56   : > { %8244 = vmatprep.subr.bf16.mxu0 %v8835_v14  ;;  %7927 = vmatmul.mubr.bf16.gmra.mrb[4].mxu1 %v6583_v30  ;;  %v6599_v17 = vrot.slane %v802_v13, 9 }
  0x57   : > { %7935 = vmatpush3.bf16.msra.mxu1 %v8836_v61  ;;  %7946 = vmatprep.mubr.bf16.mxu1 %v6616_v40  ;;  %v841_v61 = vsel %vm9415_vm5, %v6596_v51, %v840_v50  ;;  %v3858_v27 = vrot.slane %v3856_v38, 5  ;;  %v8857_v40 = vld [vmem:[%s10843_s3 + $0x410] sm:$0xff]   ;;  %v3892_v50 = vshll.u32 %v7134_v63, 16 }
  0x58   : > { %7936 = vmatprep.subr.bf16.mxu1 %v8838_v47  ;;  %v6618_v2 = vcombine.low %v841_v61, %v845_v23  ;;  %v853_v30 = vsel %vm9415_vm5, %v6599_v17, %v852_v16  ;;  %v8863_v61 = vld [vmem:[%s10843_s3 + $0x428] sm:$0xff]  }
  0x59   : > { %8245 = vmatpush3.bf16.msra.mxu0 %v8835_v14  ;;  %v6598_v14 = vrot.slane %v801_v57, 9  ;;  %v3894_v53 = vrot.slane %v3892_v50, 5  ;;  %v8861_v57 = vld [vmem:[%s10843_s3 + $0x420] sm:$0xff]  }
  0x5a   : > { %8246 = vmatprep.subr.bf16.mxu0 %v8837_v25 }
  0x5b   : > { %7937 = vmatpush3.bf16.msra.mxu1 %v8838_v47  ;;  %v849_v6 = vsel %vm9415_vm5, %v6598_v14, %v848_v0  ;;  %v3849_v47 = vrot.slane %v3847_v7, 4  ;;  %v8864_v0 = vld [vmem:[%s10843_s3 + $0xf0] sm:$0xff]  }
  0x5c   : > { %8239 = vmatmul.mubr.bf16.gmra.mrb[4].mxu0 %v7083_v34  ;;  %7938 = vmatprep.subr.bf16.mxu1 %v8840_v29  ;;  %v3872_v34 = vrot.slane %v3870_v21, 5  ;;  %v8866_v7 = vld [vmem:[%s10843_s3 + $0x430] sm:$0xff]  }
  0x5d   : > { %8247 = vmatpush3.bf16.msra.mxu0 %v8837_v25  ;;  %8258 = vmatprep.mubr.bf16.mxu0 %v8851_v8  ;;  %v6619_v25 = vcombine.low %v849_v6, %v853_v30  ;;  %v3853_v26 = vor.u32 %v3852_v56, %v3849_v47  ;;  %v4138_v56 = vrot.slane %v9563_v4, 5 }
  0x5e   : > { %8248 = vmatprep.subr.bf16.mxu0 %v8839_v62 }
  0x5f   : > { %7939 = vmatpush3.bf16.msra.mxu1 %v8840_v29  ;;  %v7132_v29 = vld [vmem:[%s9227_s7 + $0x20] sm:$0xf]  ;;  %v3854_v18 = vrot.slane %v3853_v26, 4 }
  0x60   : > { %7940 = vmatprep.subr.bf16.mxu1 %v8842_v31  ;;  %v3875_v44 = vshrl.u32 %v7132_v29, 16  ;;  %v3878_v8 = vshll.u32 %v7132_v29, 16  ;;  %v9662_v29 = vld [vmem:[%s9227_s7 + $0x44] sm:$0x1] }
  0x61   : > { %8249 = vmatpush3.bf16.msra.mxu0 %v8839_v62  ;;  %v3867_v62 = vor.u32 %v3866_v58, %v3863_v15  ;;  %v8869_v15 = vld [vmem:[%s10843_s3 + $0x438] sm:$0xff]  }
  0x62   : > { %8250 = vmatprep.subr.bf16.mxu0 %v8841_v43  ;;  %v3877_v37 = vrot.slane %v3875_v44, 4  ;;  %v3880_v54 = vrot.slane %v3878_v8, 5  ;;  %v8884_v44 = vld [vmem:[%s9194_s12 + $0x28] ss:$8 sps:$4 sm:$0xff]  }
  0x63   : > { %7941 = vmatpush3.bf16.msra.mxu1 %v8842_v31  ;;  %v3868_v41 = vrot.slane %v3867_v62, 4  ;;  %v8859_v31 = vld [vmem:[%s10843_s3 + $0x418] sm:$0xff]   ;;  %v8871_v62 = vld [vmem:[%s10843_s3 + $0x100] sm:$0xff]  }
  0x64   : > { %7942 = vmatprep.subr.bf16.mxu1 %v8845_v49  ;;  %v3881_v13 = vor.u32 %v3880_v54, %v3877_v37  ;;  %v8872_v37 = vld [vmem:[%s10843_s3 + $0x440] sm:$0xff]  }
  0x65   : > { %8251 = vmatpush3.bf16.msra.mxu0 %v8841_v43  ;;  %v3873_v43 = vsel %vm9241_vm2, %v3868_v41, %v3872_v34  ;;  %v8873_v34 = vld [vmem:[%s9194_s12 + $0x18] ss:$8 sps:$4 sm:$0xff]   ;;  %v3940_v41 = vshll.u32 %v9662_v29, 16 }
  0x66   : > { %8252 = vmatprep.subr.bf16.mxu0 %v8843_v32  ;;  %v9625_v14 = vrot.slane %v3881_v13, 4  ;;  %v6664_v13 = vld [vmem:[%s9194_s12 + $0x8] sm:$0xf] }
  0x67   : > { %7943 = vmatpush3.bf16.msra.mxu1 %v8845_v49  ;;  %v9603_v49 = vld [vmem:[%s9227_s7 + $0x24] sm:$0x1]  ;;  %v9680_v54 = vrot.slane %v3940_v41, 5  ;;  %v6670_v41 = vld [vmem:[%s9194_s12 + $0x20] sm:$0xf] }
  0x68   : > { %7944 = vmatprep.subr.bf16.mxu1 %v8848_v46 }
  0x69   : > { %8253 = vmatpush3.bf16.msra.mxu0 %v8843_v32  ;;  %v3889_v32 = vshrl.u32 %v7134_v63, 16 }
  0x6a   : > { %8254 = vmatprep.subr.bf16.mxu0 %v8846_v52 }
  0x6b   : > { %7945 = vmatpush3.bf16.msra.mxu1 %v8848_v46  ;;  %v3891_v51 = vrot.slane %v3889_v32, 4 }
  0x6c   : > { %7954 = vmatprep.subr.bf16.mxu1 %v8850_v60 }
  0x6d   : > { %8255 = vmatpush3.bf16.msra.mxu0 %v8846_v52  ;;  %v8862_v52 = vld [vmem:[%s10843_s3 + $0xe8] sm:$0xff]   ;;  %v3895_v23 = vor.u32 %v3894_v53, %v3891_v51 }
  0x6e   : > { %8256 = vmatprep.subr.bf16.mxu0 %v8849_v1  ;;  %7947 = vmatmul.mubr.bf16.vlgmr.msra.gmra.mrb[0].mxu1 %v6617_v12  ;;  %v3859_v12 = vsel %vm9241_vm2, %v3854_v18, %v3858_v27  ;;  %v7140_v27 = vld [vmem:[%s9227_s7 + $0x40] sm:$0xf]  ;;  %v9670_v18 = vld [vmem:[%s9227_s7 + $0x4c] sm:$0x1] }
  0x6f   : > { %7955 = vmatpush3.bf16.msra.mxu1 %v8850_v60  ;;  %7950 = vmatprep.mubr.bf16.mxu1 %v6618_v2  ;;  %v7160_v46 = vcombine.low %v3859_v12, %v3873_v43  ;;  %v3898_v60 = vshll.u32 %v9606_v42, 16  ;;  %v9629_v2 = vld [vmem:[%s9227_s7 + $0x34] sm:$0x1]  ;;  %v3896_v28 = vrot.slane %v3895_v23, 4  ;;  %v3931_v63 = vshrl.u32 %v7140_v27, 16 }
  0x70   : > { %7956 = vmatprep.subr.bf16.mxu1 %v8854_v5  ;;  %v3912_v21 = vshll.u32 %v9629_v2, 16 }
  0x71   : > { %8257 = vmatpush3.bf16.msra.mxu0 %v8849_v1  ;;  %v3884_v1 = vshll.u32 %v9603_v49, 16  ;;  %v3900_v17 = vrot.slane %v3898_v60, 5  ;;  %v3933_v50 = vrot.slane %v3931_v63, 4  ;;  %v9685_v60 = vld [vmem:[%s9194_s12 + $0xc] sm:$0x1] }
  0x72   : > { %8266 = vmatprep.subr.bf16.mxu0 %v8852_v59 }
  0x73   : > { %7957 = vmatpush3.bf16.msra.mxu1 %v8854_v5  ;;  %v9623_v16 = vrot.slane %v3884_v1, 5  ;;  %v7138_v5 = vld [vmem:[%s9227_s7 + $0x38] sm:$0xf] }
  0x74   : > { %8259 = vmatmul.mubr.bf16.vlgmr.msra.gmra.mrb[0].mxu0 %v8853_v3  ;;  %7958 = vmatprep.subr.bf16.mxu1 %v8856_v22  ;;  %v9633_v3 = vld [vmem:[%s9227_s7 + $0x3c] sm:$0x1]  ;;  %v3917_v9 = vshrl.u32 %v7138_v5, 16  ;;  %v3920_v38 = vshll.u32 %v7138_v5, 16 }
  0x75   : > { %8267 = vmatpush3.bf16.msra.mxu0 %v8852_v59  ;;  %8262 = vmatprep.mubr.bf16.mxu0 %v8865_v24  ;;  %v7136_v59 = vld [vmem:[%s9227_s7 + $0x30] sm:$0xf]  ;;  %v3926_v47 = vshll.u32 %v9633_v3, 16  ;;  %v4142_v24 = vrot.slane %v9571_v55, 5  ;;  %v3887_v58 = vsel %vm9241_vm2, %v9625_v14, %v9623_v16  ;;  %v9691_v16 = vld [vmem:[%s9194_s12 + $0x14] sm:$0x1] }
  0x76   : > { %8268 = vmatprep.subr.bf16.mxu0 %v8855_v36  ;;  %7951 = vmatmul.mubr.bf16.gmra.mrb[4].mxu1 %v6619_v25  ;;  %v3903_v6 = vshrl.u32 %v7136_v59, 16  ;;  %v3906_v30 = vshll.u32 %v7136_v59, 16  ;;  %v3901_v25 = vsel %vm9241_vm2, %v3896_v28, %v3900_v17  ;;  %v1196_v14 = vshrl.u32 %v6664_v13, 16  ;;  %v8876_v59 = vld [vmem:[%s10843_s3 + $0x110] sm:$0xff]  }
  0x77   : > { %7959 = vmatpush3.bf16.msra.mxu1 %v8856_v22  ;;  %7970 = vmatprep.mubr.bf16.mxu1 %v8870_v33  ;;  %v3922_v22 = vrot.slane %v3920_v38, 5  ;;  %v7142_v33 = vld [vmem:[%s9227_s7 + $0x48] sm:$0xf]  ;;  %v3928_v32 = vrot.slane %v3926_v47, 5  ;;  %v7161_v1 = vcombine.low %v3887_v58, %v3901_v25  ;;  %v1199_v17 = vshll.u32 %v6664_v13, 16 }
  0x78   : > { %7960 = vmatprep.subr.bf16.mxu1 %v8858_v39  ;;  %v3905_v19 = vrot.slane %v3903_v6, 4  ;;  %v3908_v20 = vrot.slane %v3906_v30, 5  ;;  %v3948_v12 = vshll.u32 %v7142_v33, 16  ;;  %v1205_v28 = vshll.u32 %v9685_v60, 16  ;;  %v7172_v58 = vld [vmem:[%s9227_s7 + $0x10] sm:$0xe] }
  0x79   : > { %8269 = vmatpush3.bf16.msra.mxu0 %v8855_v36  ;;  %v3919_v36 = vrot.slane %v3917_v9, 4  ;;  %v8875_v9 = vld [vmem:[%s10843_s3 + $0x448] sm:$0xff]   ;;  %v1201_v38 = vrot.slane %v1199_v17, 5  ;;  %v9744_v13 = vld [vmem:[%s9194_s12 + $0x24] sm:$0x1]  ;;  %v4146_v17 = vrot.slane %v9603_v49, 5 }
  0x7a   : > { %8270 = vmatprep.subr.bf16.mxu0 %v8857_v40  ;;  %v3909_v26 = vor.u32 %v3908_v20, %v3905_v19  ;;  %v3950_v53 = vrot.slane %v3948_v12, 5  ;;  %v1219_v19 = vshll.u32 %v9691_v16, 16  ;;  %v8887_v20 = vld [vmem:[%s9194_s12 + $0x38] ss:$8 sps:$4 sm:$0xff]  }
  0x7b   : > { %7961 = vmatpush3.bf16.msra.mxu1 %v8858_v39  ;;  %v3923_v39 = vor.u32 %v3922_v22, %v3919_v36 }
  0x7c   : > { %8263 = vmatmul.mubr.bf16.gmra.mrb[4].mxu0 %v8867_v11  ;;  %7962 = vmatprep.subr.bf16.mxu1 %v8860_v45  ;;  %v3910_v8 = vrot.slane %v3909_v26, 4  ;;  %v3945_v11 = vshrl.u32 %v7142_v33, 16  ;;  %v7173_v33 = vld [vmem:[%s9227_s7 + $0x18] sm:$0xe] }
  0x7d   : > { %8271 = vmatpush3.bf16.msra.mxu0 %v8857_v40  ;;  %8282 = vmatprep.mubr.bf16.mxu0 %v7160_v46  ;;  %v3934_v40 = vshll.u32 %v7140_v27, 16  ;;  %v3924_v43 = vrot.slane %v3923_v39, 4  ;;  %v1207_v27 = vrot.slane %v1205_v28, 5  ;;  %v1221_v39 = vrot.slane %v1219_v19, 5  ;;  %v8881_v28 = vld [vmem:[%s10843_s3 + $0x460] sm:$0xff]  }
  0x7e   : > { %8272 = vmatprep.subr.bf16.mxu0 %v8859_v31  ;;  %v3947_v51 = vrot.slane %v3945_v11, 4  ;;  %v7181_v63 = vrot.slane %v7173_v33, 9  ;;  %v4150_v19 = vrot.slane %v9606_v42, 5  ;;  %v9778_v33 = vld [vmem:[%s9194_s12 + $0x34] sm:$0x1] }
  0x7f   : > { %7963 = vmatpush3.bf16.msra.mxu1 %v8860_v45  ;;  %v3914_v45 = vrot.slane %v3912_v21, 5  ;;  %v3936_v46 = vrot.slane %v3934_v40, 5  ;;  %v3929_v5 = vsel %vm9241_vm2, %v3924_v43, %v3928_v32  ;;  %v6668_v40 = vld [vmem:[%s9194_s12 + $0x18] sm:$0xf]  ;;  %v8877_v43 = vld [vmem:[%s10843_s3 + $0x450] sm:$0xff]  }
  0x80   : > { %7964 = vmatprep.subr.bf16.mxu1 %v8862_v52  ;;  %v3951_v23 = vor.u32 %v3950_v53, %v3947_v51  ;;  %v4143_v4 = vsel %vm9415_vm5, %v7181_v63, %v4142_v24 }
  0x81   : > { %8273 = vmatpush3.bf16.msra.mxu0 %v8859_v31  ;;  %v8874_v31 = vld [vmem:[%s10843_s3 + $0x108] sm:$0xff]  }
  0x82   : > { %8274 = vmatprep.subr.bf16.mxu0 %v8861_v57  ;;  %v3952_v36 = vrot.slane %v3951_v23, 4 }
  0x83   : > { %7965 = vmatpush3.bf16.msra.mxu1 %v8862_v52  ;;  %v3954_v52 = vshll.u32 %v9670_v18, 16 }
  0x84   : > { %7966 = vmatprep.subr.bf16.mxu1 %v8864_v0 }
  0x85   : > { %8275 = vmatpush3.bf16.msra.mxu0 %v8861_v57  ;;  %v3937_v57 = vor.u32 %v3936_v46, %v3933_v50  ;;  %v9726_v46 = vld [vmem:[%s9194_s12 + $0x1c] sm:$0x1] }
  0x86   : > { %8276 = vmatprep.subr.bf16.mxu0 %v8863_v61  ;;  %v1233_v23 = vshll.u32 %v9726_v46, 16 }
  0x87   : > { %7967 = vmatpush3.bf16.msra.mxu1 %v8864_v0  ;;  %v6666_v0 = vld [vmem:[%s9194_s12 + $0x10] sm:$0xf]  ;;  %v3938_v21 = vrot.slane %v3937_v57, 4 }
  0x88   : > { %7968 = vmatprep.subr.bf16.mxu1 %v8868_v10  ;;  %v1210_v6 = vshrl.u32 %v6666_v0, 16  ;;  %v1213_v30 = vshll.u32 %v6666_v0, 16  ;;  %v8879_v0 = vld [vmem:[%s10843_s3 + $0x458] sm:$0xff]  }
  0x89   : > { %8277 = vmatpush3.bf16.msra.mxu0 %v8863_v61  ;;  %v3915_v61 = vsel %vm9241_vm2, %v3910_v8, %v3914_v45  ;;  %v8878_v8 = vld [vmem:[%s10843_s3 + $0x118] sm:$0xff]   ;;  %v3943_v45 = vsel %vm9241_vm2, %v3938_v21, %v9680_v54  ;;  %v1238_v54 = vshrl.u32 %v6670_v41, 16 }
  0x8a   : > { %8278 = vmatprep.subr.bf16.mxu0 %v8866_v7  ;;  %v1212_v22 = vrot.slane %v1210_v6, 4  ;;  %v1215_v47 = vrot.slane %v1213_v30, 5  ;;  %v7162_v25 = vcombine.low %v3915_v61, %v3929_v5  ;;  %v1247_v5 = vshll.u32 %v9744_v13, 16  ;;  %v7174_v30 = vld [vmem:[%s9227_s7 + $0x20] sm:$0xe] }
  0x8b   : > { %7969 = vmatpush3.bf16.msra.mxu1 %v8868_v10  ;;  %v1198_v10 = vrot.slane %v1196_v14, 4  ;;  %v1240_v61 = vrot.slane %v1238_v54, 4 }
  0x8c   : > { %7978 = vmatprep.subr.bf16.mxu1 %v8871_v62 }
  0x8d   : > { %8279 = vmatpush3.bf16.msra.mxu0 %v8866_v7  ;;  %v3956_v7 = vrot.slane %v3954_v52, 5  ;;  %v1202_v26 = vor.u32 %v1201_v38, %v1198_v10  ;;  %v1241_v52 = vshll.u32 %v6670_v41, 16  ;;  %v1235_v10 = vrot.slane %v1233_v23, 5  ;;  %v8885_v38 = vld [vmem:[%s10843_s3 + $0x130] sm:$0xff]  }
  0x8e   : > { %8280 = vmatprep.subr.bf16.mxu0 %v8869_v15  ;;  %7971 = vmatmul.mubr.bf16.vlgmr.msra.gmra.mrb[0].mxu1 %v8873_v34  ;;  %v1216_v34 = vor.u32 %v1215_v47, %v1212_v22  ;;  %v7182_v22 = vrot.slane %v7174_v30, 9  ;;  %v7178_v30 = vld [vmem:[%s9227_s7 + $0x40] sm:$0xe] }
  0x8f   : > { %7979 = vmatpush3.bf16.msra.mxu1 %v8871_v62  ;;  %7974 = vmatprep.mubr.bf16.mxu1 %v8884_v44  ;;  %v7180_v62 = vrot.slane %v7172_v58, 9  ;;  %v1224_v44 = vshrl.u32 %v6668_v40, 16  ;;  %v3957_v11 = vsel %vm9241_vm2, %v3952_v36, %v3956_v7  ;;  %v1243_v24 = vrot.slane %v1241_v52, 5  ;;  %v6672_v58 = vld [vmem:[%s9194_s12 + $0x28] sm:$0xf] }
  0x90   : > { %7980 = vmatprep.subr.bf16.mxu1 %v8874_v31  ;;  %v1217_v12 = vrot.slane %v1216_v34, 4  ;;  %v1249_v36 = vrot.slane %v1247_v5, 5  ;;  %v1255_v34 = vshll.u32 %v6672_v58, 16  ;;  %v7177_v52 = vld [vmem:[%s9227_s7 + $0x38] sm:$0xe] }
  0x91   : > { %8281 = vmatpush3.bf16.msra.mxu0 %v8869_v15  ;;  %v1203_v15 = vrot.slane %v1202_v26, 4  ;;  %v4139_v50 = vsel %vm9415_vm5, %v7180_v62, %v4138_v56  ;;  %v8880_v56 = vld [vmem:[%s10843_s3 + $0x120] sm:$0xff]   ;;  %v1244_v6 = vor.u32 %v1243_v24, %v1240_v61  ;;  %v1252_v62 = vshrl.u32 %v6672_v58, 16  ;;  %v9810_v61 = vld [vmem:[%s9194_s12 + $0x3c] sm:$0x1] }
  0x92   : > { %8290 = vmatprep.subr.bf16.mxu0 %v8872_v37  ;;  %v1222_v51 = vsel %vm9241_vm2, %v1217_v12, %v1221_v39  ;;  %v7204_v14 = vcombine.low %v4139_v50, %v4143_v4  ;;  %v8888_v12 = vld [vmem:[%s10843_s3 + $0x138] sm:$0xff]   ;;  %v8890_v4 = vld [vmem:[%s10843_s3 + $0x140] sm:$0xff]   ;;  %v1289_v49 = vshll.u32 %v9810_v61, 16 }
  0x93   : > { %7981 = vmatpush3.bf16.msra.mxu1 %v8874_v31  ;;  %v1227_v31 = vshll.u32 %v6668_v40, 16  ;;  %v1208_v32 = vsel %vm9241_vm2, %v1203_v15, %v1207_v27  ;;  %v1245_v21 = vrot.slane %v1244_v6, 4  ;;  %v6674_v27 = vld [vmem:[%s9194_s12 + $0x30] sm:$0xf]  ;;  %v1275_v15 = vshll.u32 %v9778_v33, 16 }
  0x94   : > { %8283 = vmatmul.mubr.bf16.vlgmr.msra.gmra.mrb[0].mxu0 %v7161_v1  ;;  %7982 = vmatprep.subr.bf16.mxu1 %v8876_v59  ;;  %v7163_v1 = vcombine.low %v3943_v45, %v3957_v11  ;;  %v6696_v57 = vcombine.low %v1208_v32, %v1222_v51  ;;  %v1266_v63 = vshrl.u32 %v6674_v27, 16  ;;  %v1269_v40 = vshll.u32 %v6674_v27, 16  ;;  %v8886_v11 = vld [vmem:[%s10843_s3 + $0x470] sm:$0xff]  }
  0x95   : > { %8291 = vmatpush3.bf16.msra.mxu0 %v8872_v37  ;;  %8286 = vmatprep.mubr.bf16.mxu0 %v7162_v25  ;;  %v1226_v37 = vrot.slane %v1224_v44, 4  ;;  %v1229_v53 = vrot.slane %v1227_v31, 5  ;;  %v9772_v25 = vld [vmem:[%s9194_s12 + $0x2c] sm:$0x1]  ;;  %v1250_v41 = vsel %vm9241_vm2, %v1245_v21, %v1249_v36  ;;  %v1254_v44 = vrot.slane %v1252_v62, 4  ;;  %v8891_v36 = vld [vmem:[%s10843_s3 + $0x480] sm:$0xff]  }
  0x96   : > { %8292 = vmatprep.subr.bf16.mxu0 %v8875_v9  ;;  %7975 = vmatmul.mubr.bf16.gmra.mrb[4].mxu1 %v8887_v20  ;;  %v8883_v20 = vld [vmem:[%s10843_s3 + $0x468] sm:$0xff]   ;;  %v1261_v39 = vshll.u32 %v9772_v25, 16  ;;  %v4154_v45 = vrot.slane %v9629_v2, 5  ;;  %v1268_v31 = vrot.slane %v1266_v63, 4  ;;  %v4158_v32 = vrot.slane %v9633_v3, 5 }
  0x97   : > { %7983 = vmatpush3.bf16.msra.mxu1 %v8876_v59  ;;  %v1230_v55 = vor.u32 %v1229_v53, %v1226_v37  ;;  %7994 = vmatprep.mubr.bf16.mxu1 %v6696_v57  ;;  %v8882_v59 = vld [vmem:[%s10843_s3 + $0x128] sm:$0xff]   ;;  %v4162_v2 = vrot.slane %v9662_v29, 5  ;;  %v1277_v54 = vrot.slane %v1275_v15, 5  ;;  %v7176_v51 = vld [vmem:[%s9227_s7 + $0x30] sm:$0xe] }
  0x98   : > { %7984 = vmatprep.subr.bf16.mxu1 %v8878_v8  ;;  %v1263_v37 = vrot.slane %v1261_v39, 5  ;;  %v7179_v62 = vld [vmem:[%s9227_s7 + $0x48] sm:$0xe] }
  0x99   : > { %8293 = vmatpush3.bf16.msra.mxu0 %v8875_v9  ;;  %v9760_v9 = vld [vmem:[%s9227_s7 + $0x28] sm:$0xe]  ;;  %v1231_v7 = vrot.slane %v1230_v55, 4  ;;  %v6678_v55 = vld [vmem:[%s9194_s12 + $0x40] sm:$0xf] }
  0x9a   : > { %8294 = vmatprep.subr.bf16.mxu0 %v8877_v43  ;;  %v7183_v47 = vrot.slane %v9760_v9, 9  ;;  %v1294_v6 = vshrl.u32 %v6678_v55, 16  ;;  %v1297_v21 = vshll.u32 %v6678_v55, 16  ;;  %v8897_v55 = vld [vmem:[%s10843_s3 + $0x498] sm:$0xff]  }
  0x9b   : > { %7985 = vmatpush3.bf16.msra.mxu1 %v8878_v8  ;;  %v1236_v26 = vsel %vm9241_vm2, %v1231_v7, %v1235_v10  ;;  %v1257_v8 = vrot.slane %v1255_v34, 5  ;;  %v4166_v7 = vrot.slane %v9670_v18, 5  ;;  %v1291_v18 = vrot.slane %v1289_v49, 5  ;;  %v8902_v49 = vld [vmem:[%s10843_s3 + $0x170] sm:$0xff]  }
  0x9c   : > { %8287 = vmatmul.mubr.bf16.gmra.mrb[4].mxu0 %v7163_v1  ;;  %7986 = vmatprep.subr.bf16.mxu1 %v8880_v56  ;;  %v6697_v3 = vcombine.low %v1236_v26, %v1250_v41  ;;  %v9807_v1 = vsel %vm9415_vm5, %v7182_v22, %v4146_v17  ;;  %v8889_v17 = vld [vmem:[%s10843_s3 + $0x478] sm:$0xff]   ;;  %v8892_v22 = vld [vmem:[%s10843_s3 + $0x148] sm:$0xff]   ;;  %v1296_v26 = vrot.slane %v1294_v6, 4  ;;  %v4151_v34 = vsel %vm9415_vm5, %v7183_v47, %v4150_v19 }
  0x9d   : > { %8295 = vmatpush3.bf16.msra.mxu0 %v8877_v43  ;;  %8306 = vmatprep.mubr.bf16.mxu0 %v7204_v14  ;;  %v1271_v43 = vrot.slane %v1269_v40, 5  ;;  %v1258_v50 = vor.u32 %v1257_v8, %v1254_v44  ;;  %v9814_v14 = vld [vmem:[%s9194_s12 + $0x44] sm:$0x1]  ;;  %v1299_v63 = vrot.slane %v1297_v21, 5  ;;  %v7186_v40 = vrot.slane %v7178_v30, 9  ;;  %v8901_v6 = vld [vmem:[%s10843_s3 + $0x4a8] sm:$0xff]  }
  0x9e   : > { %8296 = vmatprep.subr.bf16.mxu0 %v8879_v0  ;;  %v1303_v27 = vshll.u32 %v9814_v14, 16  ;;  %v6708_v44 = vld [vmem:[%s9194_s12 + $0x8] sm:$0xe]  ;;  %v6709_v8 = vld [vmem:[%s9194_s12 + $0x10] sm:$0xe]  ;;  %v1507_v21 = vrot.slane %v9778_v33, 5 }
  0x9f   : > { %7987 = vmatpush3.bf16.msra.mxu1 %v8880_v56  ;;  %v1272_v53 = vor.u32 %v1271_v43, %v1268_v31  ;;  %v6676_v56 = vld [vmem:[%s9194_s12 + $0x38] sm:$0xf]  ;;  %v1259_v57 = vrot.slane %v1258_v50, 4  ;;  %v1300_v19 = vor.u32 %v1299_v63, %v1296_v26  ;;  %v6716_v47 = vrot.slane %v6708_v44, 9  ;;  %v4492_v63 = vld [vmem:[%s9849_s29] sm:$0xf] }
  0xa0   : > { %7988 = vmatprep.subr.bf16.mxu1 %v8882_v59  ;;  %v1280_v23 = vshrl.u32 %v6676_v56, 16  ;;  %v1305_v41 = vrot.slane %v1303_v27, 5  ;;  %v1491_v31 = vrot.slane %v9691_v16, 5  ;;  %v7187_v50 = vrot.slane %v7179_v62, 9  ;;  %v6714_v62 = vld [vmem:[%s9194_s12 + $0x38] sm:$0xe] }
  0xa1   : > { %8297 = vmatpush3.bf16.msra.mxu0 %v8879_v0  ;;  %v1273_v24 = vrot.slane %v1272_v53, 4  ;;  %v7184_v0 = vrot.slane %v7176_v51, 9  ;;  %v1264_v5 = vsel %vm9241_vm2, %v1259_v57, %v1263_v37  ;;  %v8896_v53 = vld [vmem:[%s10843_s3 + $0x158] sm:$0xff]   ;;  %v8895_v57 = vld [vmem:[%s10843_s3 + $0x490] sm:$0xff]   ;;  %v4512_v44 = vshll.u32 %v4492_v63, 16 }
  0xa2   : > { %8298 = vmatprep.subr.bf16.mxu0 %v8881_v28 }
  0xa3   : > { %7989 = vmatpush3.bf16.msra.mxu1 %v8882_v59  ;;  %v1283_v59 = vshll.u32 %v6676_v56, 16  ;;  %v1278_v10 = vsel %vm9241_vm2, %v1273_v24, %v1277_v54  ;;  %v4155_v15 = vsel %vm9415_vm5, %v7184_v0, %v4154_v45  ;;  %v7205_v45 = vcombine.low %v9807_v1, %v4151_v34  ;;  %v8893_v54 = vld [vmem:[%s10843_s3 + $0x488] sm:$0xff]   ;;  %v8899_v0 = vld [vmem:[%s10843_s3 + $0x4a0] sm:$0xff]  }
  0xa4   : > { %7990 = vmatprep.subr.bf16.mxu1 %v8885_v38  ;;  %v6698_v58 = vcombine.low %v1264_v5, %v1278_v10  ;;  %v4167_v1 = vsel %vm9415_vm5, %v7187_v50, %v4166_v7  ;;  %v8900_v24 = vld [vmem:[%s10843_s3 + $0x168] sm:$0xff]   ;;  %v1495_v7 = vrot.slane %v9726_v46, 5  ;;  %v8903_v46 = vld [vmem:[%s10843_s3 + $0x4b0] sm:$0xff]   ;;  %v1511_v34 = vrot.slane %v9810_v61, 5 }
  0xa5   : > { %8299 = vmatpush3.bf16.msra.mxu0 %v8881_v28  ;;  %v1282_v28 = vrot.slane %v1280_v23, 4  ;;  %v8907_v23 = vld [vmem:[%s9849_s29] ss:$8 sps:$4 sm:$0xff]   ;;  %v4514_v61 = vrot.slane %v4512_v44, 5  ;;  %v8920_v44 = vld [vmem:[%s10843_s3 + $0x1b0] sm:$0xff]  }
  0xa6   : > { %8300 = vmatprep.subr.bf16.mxu0 %v8883_v20  ;;  %v6712_v5 = vld [vmem:[%s9194_s12 + $0x28] sm:$0xe] }
  0xa7   : > { %7991 = vmatpush3.bf16.msra.mxu1 %v8885_v38  ;;  %v7185_v38 = vrot.slane %v7177_v52, 9 }
  0xa8   : > { %7992 = vmatprep.subr.bf16.mxu1 %v8888_v12 }
  0xa9   : > { %8301 = vmatpush3.bf16.msra.mxu0 %v8883_v20  ;;  %v1285_v20 = vrot.slane %v1283_v59, 5  ;;  %v4159_v42 = vsel %vm9415_vm5, %v7185_v38, %v4158_v32  ;;  %v1301_v32 = vrot.slane %v1300_v19, 4  ;;  %v6710_v59 = vld [vmem:[%s9194_s12 + $0x18] sm:$0xe]  ;;  %v1499_v38 = vrot.slane %v9744_v13, 5  ;;  %v8906_v13 = vld [vmem:[%s10843_s3 + $0x180] sm:$0xff]  }
  0xaa   : > { %8302 = vmatprep.subr.bf16.mxu0 %v8886_v11  ;;  %v7206_v16 = vcombine.low %v4155_v15, %v4159_v42  ;;  %v6718_v30 = vrot.slane %v6710_v59, 9  ;;  %v4494_v15 = vld [vmem:[%s9849_s29 + $0x8] sm:$0xf]  ;;  %v4496_v59 = vld [vmem:[%s9849_s29 + $0x10] sm:$0xf] }
  0xab   : > { %7993 = vmatpush3.bf16.msra.mxu1 %v8888_v12  ;;  %v1286_v39 = vor.u32 %v1285_v20, %v1282_v28  ;;  %v6717_v12 = vrot.slane %v6709_v8, 9  ;;  %v6713_v28 = vld [vmem:[%s9194_s12 + $0x30] sm:$0xe]  ;;  %v1503_v20 = vrot.slane %v9772_v25, 5  ;;  %v9935_v8 = vld [vmem:[%s9849_s29 + $0x4] sm:$0x1] }
  0xac   : > { %8002 = vmatprep.subr.bf16.mxu1 %v8890_v4  ;;  %v1496_v25 = vsel %vm9415_vm5, %v6718_v30, %v1495_v7  ;;  %v4526_v42 = vshll.u32 %v4494_v15, 16  ;;  %v4540_v30 = vshll.u32 %v4496_v59, 16  ;;  %v8915_v7 = vld [vmem:[%s10843_s3 + $0x4d8] sm:$0xff]  }
  0xad   : > { %8303 = vmatpush3.bf16.msra.mxu0 %v8886_v11  ;;  %v1487_v11 = vrot.slane %v9685_v60, 5  ;;  %v1287_v9 = vrot.slane %v1286_v39, 4  ;;  %v8894_v60 = vld [vmem:[%s10843_s3 + $0x150] sm:$0xff]   ;;  %v1492_v51 = vsel %vm9415_vm5, %v6717_v12, %v1491_v31  ;;  %v1515_v39 = vrot.slane %v9814_v14, 5 }
  0xae   : > { %8304 = vmatprep.subr.bf16.mxu0 %v8889_v17  ;;  %7995 = vmatmul.mubr.bf16.vlgmr.msra.gmra.mrb[0].mxu1 %v6697_v3  ;;  %v4163_v3 = vsel %vm9415_vm5, %v7186_v40, %v4162_v2  ;;  %v8898_v2 = vld [vmem:[%s10843_s3 + $0x160] sm:$0xff]   ;;  %v6722_v14 = vrot.slane %v6714_v62, 9  ;;  %v4502_v62 = vld [vmem:[%s9849_s29 + $0x28] sm:$0xf] }
  0xaf   : > { %8003 = vmatpush3.bf16.msra.mxu1 %v8890_v4  ;;  %7998 = vmatprep.mubr.bf16.mxu1 %v6698_v58  ;;  %v1292_v43 = vsel %vm9241_vm2, %v1287_v9, %v1291_v18  ;;  %v1488_v37 = vsel %vm9415_vm5, %v6716_v47, %v1487_v11  ;;  %v1306_v4 = vsel %vm9241_vm2, %v1301_v32, %v1305_v41  ;;  %v8904_v58 = vld [vmem:[%s10843_s3 + $0x178] sm:$0xff]   ;;  %v6715_v40 = vld [vmem:[%s9194_s12 + $0x40] sm:$0xe]  ;;  %v4509_v41 = vshrl.u32 %v4492_v63, 16  ;;  %v9938_v47 = vld [vmem:[%s9849_s29 + $0xc] sm:$0x1] }
  0xb0   : > { %8004 = vmatprep.subr.bf16.mxu1 %v8892_v22  ;;  %v6699_v52 = vcombine.low %v1292_v43, %v1306_v4  ;;  %v6740_v56 = vcombine.low %v1488_v37, %v1492_v51  ;;  %v7207_v29 = vcombine.low %v4163_v3, %v4167_v1  ;;  %v8905_v18 = vld [vmem:[%s10843_s3 + $0x4b8] sm:$0xff]   ;;  %v4523_v11 = vshrl.u32 %v4494_v15, 16  ;;  %v8910_v43 = vld [vmem:[%s10843_s3 + $0x188] sm:$0xff]   ;;  %v8908_v32 = vld [vmem:[%s10843_s3 + $0x4c0] sm:$0xff]  }
  0xb1   : > { %8305 = vmatpush3.bf16.msra.mxu0 %v8889_v17  ;;  %v6711_v17 = vld [vmem:[%s9194_s12 + $0x20] sm:$0xe]  ;;  %v6723_v12 = vrot.slane %v6715_v40, 9  ;;  %v4518_v37 = vshll.u32 %v9935_v8, 16  ;;  %v8909_v51 = vld [vmem:[%s9849_s29 + $0x10] ss:$8 sps:$4 sm:$0xff]  }
  0xb2   : > { %8314 = vmatprep.subr.bf16.mxu0 %v8891_v36  ;;  %v6719_v10 = vrot.slane %v6711_v17, 9  ;;  %v4525_v31 = vrot.slane %v4523_v11, 4  ;;  %v8911_v4 = vld [vmem:[%s10843_s3 + $0x4c8] sm:$0xff]   ;;  %v8926_v1 = vld [vmem:[%s9194_s12 + $0x10] ss:$8 sps:$4 sm:$0xff]   ;;  %v4579_v40 = vshrl.u32 %v4502_v62, 16 }
  0xb3   : > { %8005 = vmatpush3.bf16.msra.mxu1 %v8892_v22  ;;  %v6721_v22 = vrot.slane %v6713_v28, 9  ;;  %v8921_v3 = vld [vmem:[%s9849_s29 + $0x20] ss:$8 sps:$4 sm:$0xff]   ;;  %v8923_v17 = vld [vmem:[%s9849_s29 + $0x30] ss:$8 sps:$4 sm:$0xff]   ;;  %v4582_v15 = vshll.u32 %v4502_v62, 16 }
  0xb4   : > { %8307 = vmatmul.mubr.bf16.vlgmr.msra.gmra.mrb[0].mxu0 %v7205_v45  ;;  %8006 = vmatprep.subr.bf16.mxu1 %v8894_v60  ;;  %v1500_v33 = vsel %vm9415_vm5, %v6719_v10, %v1499_v38  ;;  %v4511_v45 = vrot.slane %v4509_v41, 4  ;;  %v8919_v41 = vld [vmem:[%s10843_s3 + $0x4e8] sm:$0xff]  }
  0xb5   : > { %8315 = vmatpush3.bf16.msra.mxu0 %v8891_v36  ;;  %8310 = vmatprep.mubr.bf16.mxu0 %v7206_v16  ;;  %v6720_v36 = vrot.slane %v6712_v5, 9  ;;  %v1508_v27 = vsel %vm9415_vm5, %v6721_v22, %v1507_v21  ;;  %v6741_v9 = vcombine.low %v1496_v25, %v1500_v33  ;;  %v4532_v16 = vshll.u32 %v9938_v47, 16  ;;  %v4500_v33 = vld [vmem:[%s9849_s29 + $0x20] sm:$0xf] }
  0xb6   : > { %8316 = vmatprep.subr.bf16.mxu0 %v8893_v54  ;;  %7999 = vmatmul.mubr.bf16.gmra.mrb[4].mxu1 %v6699_v52  ;;  %v4515_v50 = vor.u32 %v4514_v61, %v4511_v45  ;;  %v1516_v52 = vsel %vm9415_vm5, %v6723_v12, %v1515_v39  ;;  %v4565_v39 = vshrl.u32 %v4500_v33, 16  ;;  %v4568_v63 = vshll.u32 %v4500_v33, 16  ;;  %v10008_v45 = vld [vmem:[%s9849_s29 + $0x2c] sm:$0x1] }
  0xb7   : > { %8007 = vmatpush3.bf16.msra.mxu1 %v8894_v60  ;;  %8018 = vmatprep.mubr.bf16.mxu1 %v6740_v56  ;;  %v1504_v26 = vsel %vm9415_vm5, %v6720_v36, %v1503_v20  ;;  %v4528_v60 = vrot.slane %v4526_v42, 5  ;;  %v8912_v56 = vld [vmem:[%s10843_s3 + $0x190] sm:$0xff]   ;;  %v8916_v20 = vld [vmem:[%s10843_s3 + $0x1a0] sm:$0xff]  }
  0xb8   : > { %8008 = vmatprep.subr.bf16.mxu1 %v8896_v53  ;;  %v6742_v19 = vcombine.low %v1504_v26, %v1508_v27  ;;  %v9981_v36 = vld [vmem:[%s9849_s29 + $0x14] sm:$0x1]  ;;  %v9991_v26 = vld [vmem:[%s9849_s29 + $0x1c] sm:$0x1]  ;;  %v4570_v12 = vrot.slane %v4568_v63, 5 }
  0xb9   : > { %8317 = vmatpush3.bf16.msra.mxu0 %v8893_v54  ;;  %v4529_v54 = vor.u32 %v4528_v60, %v4525_v31  ;;  %v4546_v27 = vshll.u32 %v9981_v36, 16  ;;  %v4504_v31 = vld [vmem:[%s9849_s29 + $0x30] sm:$0xf]  ;;  %v4506_v60 = vld [vmem:[%s9849_s29 + $0x38] sm:$0xf] }
  0xba   : > { %8318 = vmatprep.subr.bf16.mxu0 %v8895_v57 }
  0xbb   : > { %8009 = vmatpush3.bf16.msra.mxu1 %v8896_v53  ;;  %v1512_v53 = vsel %vm9415_vm5, %v6722_v14, %v1511_v34  ;;  %v9996_v34 = vld [vmem:[%s9849_s29 + $0x24] sm:$0x1]  ;;  %v4567_v14 = vrot.slane %v4565_v39, 4 }
  0xbc   : > { %8311 = vmatmul.mubr.bf16.gmra.mrb[4].mxu0 %v7207_v29  ;;  %8010 = vmatprep.subr.bf16.mxu1 %v8898_v2  ;;  %v4530_v29 = vrot.slane %v4529_v54, 4  ;;  %v4574_v61 = vshll.u32 %v9996_v34, 16 }
  0xbd   : > { %8319 = vmatpush3.bf16.msra.mxu0 %v8895_v57  ;;  %8330 = vmatprep.mubr.bf16.mxu0 %v8907_v23  ;;  %v4516_v57 = vrot.slane %v4515_v50, 4  ;;  %v8914_v23 = vld [vmem:[%s10843_s3 + $0x198] sm:$0xff]   ;;  %v4593_v50 = vshrl.u32 %v4504_v31, 16 }
  0xbe   : > { %8320 = vmatprep.subr.bf16.mxu0 %v8897_v55 }
  0xbf   : > { %8011 = vmatpush3.bf16.msra.mxu1 %v8898_v2  ;;  %v4534_v2 = vrot.slane %v4532_v16, 5 }
  0xc0   : > { %8012 = vmatprep.subr.bf16.mxu1 %v8900_v24 }
  0xc1   : > { %8321 = vmatpush3.bf16.msra.mxu0 %v8897_v55  ;;  %v4520_v55 = vrot.slane %v4518_v37, 5  ;;  %v4535_v28 = vsel %vm9241_vm2, %v4530_v29, %v4534_v2  ;;  %v4596_v37 = vshll.u32 %v4504_v31, 16  ;;  %v8927_v2 = vld [vmem:[%s10843_s3 + $0x1c0] sm:$0xff]  }
  0xc2   : > { %8322 = vmatprep.subr.bf16.mxu0 %v8899_v0 }
  0xc3   : > { %8013 = vmatpush3.bf16.msra.mxu1 %v8900_v24  ;;  %v6743_v24 = vcombine.low %v1512_v53, %v1516_v52  ;;  %v4521_v5 = vsel %vm9241_vm2, %v4516_v57, %v4520_v55  ;;  %v8922_v53 = vld [vmem:[%s10843_s3 + $0x4f0] sm:$0xff]   ;;  %v8924_v52 = vld [vmem:[%s10843_s3 + $0x1b8] sm:$0xff]   ;;  %v10028_v57 = vrot.slane %v4593_v50, 4  ;;  %v10030_v55 = vrot.slane %v4596_v37, 5 }
  0xc4   : > { %8014 = vmatprep.subr.bf16.mxu1 %v8902_v49  ;;  %v7260_v21 = vcombine.low %v4521_v5, %v4535_v28  ;;  %v8925_v5 = vld [vmem:[%s10843_s3 + $0x4f8] sm:$0xff]  }
  0xc5   : > { %8323 = vmatpush3.bf16.msra.mxu0 %v8899_v0  ;;  %v8913_v0 = vld [vmem:[%s10843_s3 + $0x4d0] sm:$0xff]  }
  0xc6   : > { %8324 = vmatprep.subr.bf16.mxu0 %v8901_v6 }
  0xc7   : > { %8015 = vmatpush3.bf16.msra.mxu1 %v8902_v49  ;;  %v4498_v49 = vld [vmem:[%s9849_s29 + $0x18] sm:$0xf] }
  0xc8   : > { %8016 = vmatprep.subr.bf16.mxu1 %v8904_v58  ;;  %v4551_v10 = vshrl.u32 %v4498_v49, 16  ;;  %v4554_v38 = vshll.u32 %v4498_v49, 16  ;;  %v6788_v49 = vld [vmem:[%s9194_s12 + $0x10] sm:$0xf] }
  0xc9   : > { %8325 = vmatpush3.bf16.msra.mxu0 %v8901_v6  ;;  %v4537_v6 = vshrl.u32 %v4496_v59, 16  ;;  %v10041_v59 = vld [vmem:[%s9849_s29 + $0x3c] sm:$0x1] }
  0xca   : > { %8326 = vmatprep.subr.bf16.mxu0 %v8903_v46  ;;  %v4556_v25 = vrot.slane %v4554_v38, 5  ;;  %v1862_v38 = vshll.u32 %v6788_v49, 16 }
  0xcb   : > { %8017 = vmatpush3.bf16.msra.mxu1 %v8904_v58  ;;  %v4539_v22 = vrot.slane %v4537_v6, 4  ;;  %v4542_v58 = vrot.slane %v4540_v30, 5  ;;  %v6790_v30 = vld [vmem:[%s9194_s12 + $0x18] sm:$0xf] }
  0xcc   : > { %8026 = vmatprep.subr.bf16.mxu1 %v8906_v13 }
  0xcd   : > { %8327 = vmatpush3.bf16.msra.mxu0 %v8903_v46  ;;  %v8917_v46 = vld [vmem:[%s10843_s3 + $0x4e0] sm:$0xff]   ;;  %v4543_v11 = vor.u32 %v4542_v58, %v4539_v22  ;;  %v1873_v22 = vshrl.u32 %v6790_v30, 16  ;;  %v1876_v58 = vshll.u32 %v6790_v30, 16 }
  0xce   : > { %8328 = vmatprep.subr.bf16.mxu0 %v8905_v18  ;;  %8019 = vmatmul.mubr.bf16.vlgmr.msra.gmra.mrb[0].mxu1 %v6741_v9  ;;  %v4560_v9 = vshll.u32 %v9991_v26, 16 }
  0xcf   : > { %8027 = vmatpush3.bf16.msra.mxu1 %v8906_v13  ;;  %8022 = vmatprep.mubr.bf16.mxu1 %v6742_v19  ;;  %v4553_v13 = vrot.slane %v4551_v10, 4  ;;  %v10005_v19 = vrot.slane %v4546_v27, 5  ;;  %v10013_v54 = vrot.slane %v4543_v11, 4  ;;  %v1859_v10 = vshrl.u32 %v6788_v49, 16 }
  0xd0   : > { %8028 = vmatprep.subr.bf16.mxu1 %v8910_v43  ;;  %v1875_v39 = vrot.slane %v1873_v22, 4  ;;  %v1878_v63 = vrot.slane %v1876_v58, 5  ;;  %v8936_v22 = vld [vmem:[%s10843_s3 + $0x1e0] sm:$0xff]  }
  0xd1   : > { %8329 = vmatpush3.bf16.msra.mxu0 %v8905_v18  ;;  %v8918_v18 = vld [vmem:[%s10843_s3 + $0x1a8] sm:$0xff]   ;;  %v4557_v42 = vor.u32 %v4556_v25, %v4553_v13  ;;  %v4549_v28 = vsel %vm9241_vm2, %v10013_v54, %v10005_v19  ;;  %v1861_v13 = vrot.slane %v1859_v10, 4  ;;  %v1864_v25 = vrot.slane %v1862_v38, 5 }
  0xd2   : > { %8338 = vmatprep.subr.bf16.mxu0 %v8908_v32  ;;  %v4804_v54 = vrot.slane %v9938_v47, 5 }
  0xd3   : > { %8029 = vmatpush3.bf16.msra.mxu1 %v8910_v43  ;;  %v4581_v43 = vrot.slane %v4579_v40, 4  ;;  %v10015_v16 = vrot.slane %v4557_v42, 4  ;;  %v8940_v40 = vld [vmem:[%s9194_s12 + $0x30] ss:$8 sps:$4 sm:$0xff]   ;;  %v1865_v11 = vor.u32 %v1864_v25, %v1861_v13  ;;  %v8930_v42 = vld [vmem:[%s10843_s3 + $0x1c8] sm:$0xff]  }
  0xd4   : > { %8331 = vmatmul.mubr.bf16.vlgmr.msra.gmra.mrb[0].mxu0 %v8909_v51  ;;  %8030 = vmatprep.subr.bf16.mxu1 %v8912_v56  ;;  %v10017_v51 = vrot.slane %v4560_v9, 5  ;;  %v8935_v13 = vld [vmem:[%s10843_s3 + $0x518] sm:$0xff]  }
  0xd5   : > { %8339 = vmatpush3.bf16.msra.mxu0 %v8908_v32  ;;  %8334 = vmatprep.mubr.bf16.mxu0 %v8921_v3  ;;  %v4584_v32 = vrot.slane %v4582_v15, 5  ;;  %v4610_v3 = vshll.u32 %v4506_v60, 16  ;;  %v4599_v15 = vor.u32 %v10030_v55, %v10028_v57  ;;  %v1866_v31 = vrot.slane %v1865_v11, 4  ;;  %v6792_v57 = vld [vmem:[%s9194_s12 + $0x20] sm:$0xf] }
  0xd6   : > { %8340 = vmatprep.subr.bf16.mxu0 %v8911_v4  ;;  %8023 = vmatmul.mubr.bf16.gmra.mrb[4].mxu1 %v6743_v24  ;;  %v4563_v6 = vsel %vm9241_vm2, %v10015_v16, %v10017_v51  ;;  %v1890_v30 = vshll.u32 %v6792_v57, 16  ;;  %v8937_v11 = vld [vmem:[%s10843_s3 + $0x520] sm:$0xff]  }
  0xd7   : > { %8031 = vmatpush3.bf16.msra.mxu1 %v8912_v56  ;;  %8042 = vmatprep.mubr.bf16.mxu1 %v8926_v1  ;;  %v4588_v56 = vshll.u32 %v10008_v45, 16  ;;  %v10026_v1 = vrot.slane %v4574_v61, 5  ;;  %v4585_v24 = vor.u32 %v4584_v32, %v4581_v43  ;;  %v1879_v61 = vor.u32 %v1878_v63, %v1875_v39  ;;  %v8932_v43 = vld [vmem:[%s10843_s3 + $0x1d0] sm:$0xff]  }
  0xd8   : > { %8032 = vmatprep.subr.bf16.mxu1 %v8914_v23  ;;  %v7261_v16 = vcombine.low %v4549_v28, %v4563_v6  ;;  %v1887_v6 = vshrl.u32 %v6792_v57, 16 }
  0xd9   : > { %8341 = vmatpush3.bf16.msra.mxu0 %v8911_v4  ;;  %v4607_v4 = vshrl.u32 %v4506_v60, 16  ;;  %v4586_v62 = vrot.slane %v4585_v24, 4  ;;  %v4800_v60 = vrot.slane %v9935_v8, 5  ;;  %v1880_v37 = vrot.slane %v1879_v61, 4  ;;  %v8931_v8 = vld [vmem:[%s10843_s3 + $0x508] sm:$0xff]  }
  0xda   : > { %8342 = vmatprep.subr.bf16.mxu0 %v8913_v0 }
  0xdb   : > { %8033 = vmatpush3.bf16.msra.mxu1 %v8914_v23  ;;  %v10032_v29 = vrot.slane %v4607_v4, 4  ;;  %v4571_v23 = vor.u32 %v4570_v12, %v4567_v14  ;;  %v8928_v12 = vld [vmem:[%s10843_s3 + $0x500] sm:$0xff]  }
  0xdc   : > { %8335 = vmatmul.mubr.bf16.gmra.mrb[4].mxu0 %v8923_v17  ;;  %8034 = vmatprep.subr.bf16.mxu1 %v8916_v20  ;;  %v10045_v17 = vld [vmem:[%s9194_s12 + $0x14] sm:$0x1] }
  0xdd   : > { %8343 = vmatpush3.bf16.msra.mxu0 %v8913_v0  ;;  %8354 = vmatprep.mubr.bf16.mxu0 %v7260_v21  ;;  %v10038_v0 = vld [vmem:[%s9849_s29 + $0x34] sm:$0x1]  ;;  %v1868_v21 = vshll.u32 %v10045_v17, 16  ;;  %v4572_v27 = vrot.slane %v4571_v23, 4  ;;  %v8934_v23 = vld [vmem:[%s10843_s3 + $0x1d8] sm:$0xff]  }
  0xde   : > { %8344 = vmatprep.subr.bf16.mxu0 %v8915_v7 }
  0xdf   : > { %8035 = vmatpush3.bf16.msra.mxu1 %v8916_v20  ;;  %v4612_v20 = vrot.slane %v4610_v3, 5  ;;  %v1870_v19 = vrot.slane %v1868_v21, 5  ;;  %v4577_v32 = vsel %vm9241_vm2, %v4572_v27, %v10026_v1  ;;  %v1889_v27 = vrot.slane %v1887_v6, 4 }
  0xe0   : > { %8036 = vmatprep.subr.bf16.mxu1 %v8918_v18 }
  0xe1   : > { %8345 = vmatpush3.bf16.msra.mxu0 %v8915_v7  ;;  %v10060_v7 = vld [vmem:[%s9194_s12 + $0x1c] sm:$0x1]  ;;  %v4613_v9 = vor.u32 %v4612_v20, %v10032_v29  ;;  %v1871_v47 = vsel %vm9241_vm2, %v1866_v31, %v1870_v19  ;;  %v8943_v29 = vld [vmem:[%s9194_s12 + $0x40] ss:$8 sps:$4 sm:$0xff]  }
  0xe2   : > { %8346 = vmatprep.subr.bf16.mxu0 %v8917_v46  ;;  %v1882_v33 = vshll.u32 %v10060_v7, 16 }
  0xe3   : > { %8037 = vmatpush3.bf16.msra.mxu1 %v8918_v18  ;;  %v8929_v18 = vld [vmem:[%s9194_s12 + $0x20] ss:$8 sps:$4 sm:$0xff]   ;;  %v4614_v3 = vrot.slane %v4613_v9, 4  ;;  %v10137_v9 = vld [vmem:[%s9194_s12 + $0x3c] sm:$0x1] }
  0xe4   : > { %8038 = vmatprep.subr.bf16.mxu1 %v8920_v44  ;;  %v1884_v14 = vrot.slane %v1882_v33, 5  ;;  %v10120_v33 = vld [vmem:[%s9194_s12 + $0x24] sm:$0x1] }
  0xe5   : > { %8347 = vmatpush3.bf16.msra.mxu0 %v8917_v46  ;;  %v4590_v46 = vrot.slane %v4588_v56, 5  ;;  %v4600_v56 = vrot.slane %v4599_v15, 4  ;;  %v8938_v15 = vld [vmem:[%s10843_s3 + $0x1e8] sm:$0xff]  }
  0xe6   : > { %8348 = vmatprep.subr.bf16.mxu0 %v8919_v41  ;;  %v1885_v1 = vsel %vm9241_vm2, %v1880_v37, %v1884_v14  ;;  %v1896_v14 = vshll.u32 %v10120_v33, 16 }
  0xe7   : > { %8039 = vmatpush3.bf16.msra.mxu1 %v8920_v44  ;;  %v4616_v44 = vshll.u32 %v10041_v59, 16  ;;  %v4591_v50 = vsel %vm9241_vm2, %v4586_v62, %v4590_v46  ;;  %v6820_v28 = vcombine.low %v1871_v47, %v1885_v1  ;;  %v1892_v62 = vrot.slane %v1890_v30, 5 }
  0xe8   : > { %8040 = vmatprep.subr.bf16.mxu1 %v8924_v52  ;;  %v7262_v55 = vcombine.low %v4577_v32, %v4591_v50  ;;  %v10142_v50 = vld [vmem:[%s9849_s29 + $0x10] sm:$0xe]  ;;  %v4812_v47 = vrot.slane %v9991_v26, 5  ;;  %v1898_v57 = vrot.slane %v1896_v14, 5 }
  0xe9   : > { %8349 = vmatpush3.bf16.msra.mxu0 %v8919_v41  ;;  %v4602_v41 = vshll.u32 %v10038_v0, 16  ;;  %v4618_v4 = vrot.slane %v4616_v44, 5  ;;  %v10130_v44 = vld [vmem:[%s9194_s12 + $0x34] sm:$0x1] }
  0xea   : > { %8350 = vmatprep.subr.bf16.mxu0 %v8922_v53 }
  0xeb   : > { %8041 = vmatpush3.bf16.msra.mxu1 %v8924_v52  ;;  %v4604_v51 = vrot.slane %v4602_v41, 5  ;;  %v4775_v52 = vld [vmem:[%s9849_s29 + $0x8] sm:$0xe]  ;;  %v4619_v38 = vsel %vm9241_vm2, %v4614_v3, %v4618_v4  ;;  %v6796_v41 = vld [vmem:[%s9194_s12 + $0x30] sm:$0xf]  ;;  %v4808_v3 = vrot.slane %v9981_v36, 5 }
  0xec   : > { %8050 = vmatprep.subr.bf16.mxu1 %v8927_v2  ;;  %v7273_v49 = vrot.slane %v4775_v52, 9  ;;  %v1915_v19 = vshrl.u32 %v6796_v41, 16  ;;  %v1918_v61 = vshll.u32 %v6796_v41, 16  ;;  %v8939_v52 = vld [vmem:[%s10843_s3 + $0x528] sm:$0xff]   ;;  %v8944_v36 = vld [vmem:[%s10843_s3 + $0x1f8] sm:$0xff]  }
  0xed   : > { %8351 = vmatpush3.bf16.msra.mxu0 %v8922_v53  ;;  %v4774_v53 = vld [vmem:[%s9849_s29] sm:$0xe]  ;;  %v4605_v10 = vsel %vm9241_vm2, %v4600_v56, %v4604_v51  ;;  %v8941_v56 = vld [vmem:[%s10843_s3 + $0x1f0] sm:$0xff]  }
  0xee   : > { %8352 = vmatprep.subr.bf16.mxu0 %v8925_v5  ;;  %8043 = vmatmul.mubr.bf16.vlgmr.msra.gmra.mrb[0].mxu1 %v8929_v18  ;;  %v7272_v24 = vrot.slane %v4774_v53, 9  ;;  %v4805_v46 = vsel %vm9415_vm5, %v7273_v49, %v4804_v54  ;;  %v7263_v25 = vcombine.low %v4605_v10, %v4619_v38  ;;  %v10123_v18 = vld [vmem:[%s9194_s12 + $0x2c] sm:$0x1]  ;;  %v1917_v37 = vrot.slane %v1915_v19, 4  ;;  %v10165_v10 = vld [vmem:[%s9194_s12 + $0x44] sm:$0x1] }
  0xef   : > { %8051 = vmatpush3.bf16.msra.mxu1 %v8927_v2  ;;  %8046 = vmatprep.mubr.bf16.mxu1 %v8940_v40  ;;  %v6794_v2 = vld [vmem:[%s9194_s12 + $0x28] sm:$0xf]  ;;  %v1920_v54 = vrot.slane %v1918_v61, 5  ;;  %v1938_v53 = vshll.u32 %v10137_v9, 16 }
  0xf0   : > { %8052 = vmatprep.subr.bf16.mxu1 %v8930_v42  ;;  %v1901_v20 = vshrl.u32 %v6794_v2, 16  ;;  %v1904_v21 = vshll.u32 %v6794_v2, 16  ;;  %v4801_v58 = vsel %vm9415_vm5, %v7272_v24, %v4800_v60  ;;  %v6800_v2 = vld [vmem:[%s9194_s12 + $0x40] sm:$0xf] }
  0xf1   : > { %8353 = vmatpush3.bf16.msra.mxu0 %v8925_v5  ;;  %v8933_v5 = vld [vmem:[%s10843_s3 + $0x510] sm:$0xff]   ;;  %v7296_v39 = vcombine.low %v4801_v58, %v4805_v46  ;;  %v1921_v1 = vor.u32 %v1920_v54, %v1917_v37  ;;  %v1940_v30 = vrot.slane %v1938_v53, 5  ;;  %v1946_v38 = vshll.u32 %v6800_v2, 16  ;;  %v10171_v58 = vld [vmem:[%s9194_s12 + $0x4c] sm:$0x1] }
  0xf2   : > { %8362 = vmatprep.subr.bf16.mxu0 %v8928_v12  ;;  %v1903_v63 = vrot.slane %v1901_v20, 4  ;;  %v1906_v40 = vrot.slane %v1904_v21, 5  ;;  %v8942_v20 = vld [vmem:[%s10843_s3 + $0x530] sm:$0xff]   ;;  %v1966_v19 = vshll.u32 %v10171_v58, 16 }
  0xf3   : > { %8053 = vmatpush3.bf16.msra.mxu1 %v8930_v42  ;;  %v6798_v42 = vld [vmem:[%s9194_s12 + $0x38] sm:$0xf]  ;;  %v1922_v21 = vrot.slane %v1921_v1, 4 }
  0xf4   : > { %8355 = vmatmul.mubr.bf16.vlgmr.msra.gmra.mrb[0].mxu0 %v7261_v16  ;;  %8054 = vmatprep.subr.bf16.mxu1 %v8932_v43  ;;  %v1929_v31 = vshrl.u32 %v6798_v42, 16  ;;  %v1932_v60 = vshll.u32 %v6798_v42, 16  ;;  %v1907_v32 = vor.u32 %v1906_v40, %v1903_v63  ;;  %v10145_v16 = vld [vmem:[%s9849_s29 + $0x18] sm:$0xe]  ;;  %v4820_v63 = vrot.slane %v10008_v45, 5  ;;  %v8946_v45 = vld [vmem:[%s10843_s3 + $0x200] sm:$0xff]  }
  0xf5   : > { %8363 = vmatpush3.bf16.msra.mxu0 %v8928_v12  ;;  %8358 = vmatprep.mubr.bf16.mxu0 %v7262_v55  ;;  %v1910_v12 = vshll.u32 %v10123_v18, 16  ;;  %v7274_v55 = vrot.slane %v10142_v50, 9  ;;  %v7275_v49 = vrot.slane %v10145_v16, 9  ;;  %v1952_v40 = vshll.u32 %v10165_v10, 16  ;;  %v6833_v16 = vld [vmem:[%s9194_s12 + $0x18] sm:$0xe] }
  0xf6   : > { %8364 = vmatprep.subr.bf16.mxu0 %v8931_v8  ;;  %8047 = vmatmul.mubr.bf16.gmra.mrb[4].mxu1 %v8943_v29  ;;  %v1931_v51 = vrot.slane %v1929_v31, 4  ;;  %v1934_v4 = vrot.slane %v1932_v60, 5  ;;  %v1908_v26 = vrot.slane %v1907_v32, 4  ;;  %v6832_v32 = vld [vmem:[%s9194_s12 + $0x10] sm:$0xe] }
  0xf7   : > { %8055 = vmatpush3.bf16.msra.mxu1 %v8932_v43  ;;  %8066 = vmatprep.mubr.bf16.mxu1 %v6820_v28  ;;  %v1893_v43 = vor.u32 %v1892_v62, %v1889_v27  ;;  %v1912_v24 = vrot.slane %v1910_v12, 5  ;;  %v1943_v28 = vshrl.u32 %v6800_v2, 16  ;;  %v1948_v27 = vrot.slane %v1946_v38, 5  ;;  %v4779_v12 = vld [vmem:[%s9849_s29 + $0x28] sm:$0xe] }
  0xf8   : > { %8056 = vmatprep.subr.bf16.mxu1 %v8934_v23  ;;  %v1935_v29 = vor.u32 %v1934_v4, %v1931_v51  ;;  %v4809_v37 = vsel %vm9415_vm5, %v7274_v55, %v4808_v3  ;;  %v4813_v54 = vsel %vm9415_vm5, %v7275_v49, %v4812_v47  ;;  %v7277_v4 = vrot.slane %v4779_v12, 9  ;;  %v4780_v2 = vld [vmem:[%s9849_s29 + $0x30] sm:$0xe] }
  0xf9   : > { %8365 = vmatpush3.bf16.msra.mxu0 %v8931_v8  ;;  %v1924_v8 = vshll.u32 %v10130_v44, 16  ;;  %v1945_v46 = vrot.slane %v1943_v28, 4  ;;  %v1954_v53 = vrot.slane %v1952_v40, 5  ;;  %v2150_v47 = vrot.slane %v10045_v17, 5  ;;  %v8950_v49 = vld [vmem:[%s10843_s3 + $0x210] sm:$0xff]  }
  0xfa   : > { %8366 = vmatprep.subr.bf16.mxu0 %v8933_v5  ;;  %v6841_v55 = vrot.slane %v6833_v16, 9  ;;  %v4821_v17 = vsel %vm9415_vm5, %v7277_v4, %v4820_v63  ;;  %v8954_v63 = vld [vmem:[%s10843_s3 + $0x220] sm:$0xff]   ;;  %v8963_v40 = vld [vmem:[%s9849_s29 + $0x8] ss:$8 sps:$4 sm:$0xff]   ;;  %v2162_v12 = vrot.slane %v10123_v18, 5 }
  0xfb   : > { %8057 = vmatpush3.bf16.msra.mxu1 %v8934_v23  ;;  %v1894_v23 = vrot.slane %v1893_v43, 4  ;;  %v1926_v6 = vrot.slane %v1924_v8, 5  ;;  %v1949_v60 = vor.u32 %v1948_v27, %v1945_v46  ;;  %v8948_v8 = vld [vmem:[%s10843_s3 + $0x208] sm:$0xff]   ;;  %v8951_v27 = vld [vmem:[%s10843_s3 + $0x550] sm:$0xff]  }
  0xfc   : > { %8359 = vmatmul.mubr.bf16.gmra.mrb[4].mxu0 %v7263_v25  ;;  %8058 = vmatprep.subr.bf16.mxu1 %v8936_v22  ;;  %v4778_v25 = vld [vmem:[%s9849_s29 + $0x20] sm:$0xe]  ;;  %v8959_v18 = vld [vmem:[%s10843_s3 + $0x570] sm:$0xff]  }
  0xfd   : > { %8367 = vmatpush3.bf16.msra.mxu0 %v8933_v5  ;;  %8378 = vmatprep.mubr.bf16.mxu0 %v7296_v39  ;;  %v6802_v5 = vld [vmem:[%s9194_s12 + $0x48] sm:$0xf]  ;;  %v4816_v39 = vrot.slane %v9996_v34, 5  ;;  %v1899_v41 = vsel %vm9241_vm2, %v1894_v23, %v1898_v57  ;;  %v8945_v34 = vld [vmem:[%s10843_s3 + $0x538] sm:$0xff]   ;;  %v1927_v61 = vsel %vm9241_vm2, %v1922_v21, %v1926_v6  ;;  %v7276_v31 = vrot.slane %v4778_v25, 9 }
  0xfe   : > { %8368 = vmatprep.subr.bf16.mxu0 %v8935_v13  ;;  %v1960_v62 = vshll.u32 %v6802_v5, 16  ;;  %v1950_v3 = vrot.slane %v1949_v60, 4  ;;  %v6840_v57 = vrot.slane %v6832_v32, 9  ;;  %v4781_v23 = vld [vmem:[%s9849_s29 + $0x38] sm:$0xe]  ;;  %v7278_v6 = vrot.slane %v4780_v2, 9 }
  0xff   : > { %8059 = vmatpush3.bf16.msra.mxu1 %v8936_v22  ;;  %v1936_v22 = vrot.slane %v1935_v29, 4  ;;  %v2154_v29 = vrot.slane %v10060_v7, 5  ;;  %v8949_v21 = vld [vmem:[%s10843_s3 + $0x548] sm:$0xff]   ;;  %v6837_v60 = vld [vmem:[%s9194_s12 + $0x38] sm:$0xe] }
 0x100   : > { %8060 = vmatprep.subr.bf16.mxu1 %v8938_v15  ;;  %v1962_v42 = vrot.slane %v1960_v62, 5  ;;  %v1955_v7 = vsel %vm9241_vm2, %v1950_v3, %v1954_v53  ;;  %v2151_v38 = vsel %vm9415_vm5, %v6840_v57, %v2150_v47  ;;  %v8953_v62 = vld [vmem:[%s10843_s3 + $0x558] sm:$0xff]   ;;  %v7344_v32 = vld [vmem:[%s9849_s29 + $0x8] sm:$0xf]  ;;  %v6845_v16 = vrot.slane %v6837_v60, 9 }
 0x101   : > { %8369 = vmatpush3.bf16.msra.mxu0 %v8935_v13  ;;  %v1957_v13 = vshrl.u32 %v6802_v5, 16  ;;  %v1941_v14 = vsel %vm9241_vm2, %v1936_v22, %v1940_v30  ;;  %v4817_v5 = vsel %vm9415_vm5, %v7276_v31, %v4816_v39  ;;  %v7279_v30 = vrot.slane %v4781_v23, 9  ;;  %v6836_v31 = vld [vmem:[%s9194_s12 + $0x30] sm:$0xe]  ;;  %v6838_v47 = vld [vmem:[%s9194_s12 + $0x40] sm:$0xe] }
 0x102   : > { %8370 = vmatprep.subr.bf16.mxu0 %v8937_v11  ;;  %v6822_v51 = vcombine.low %v1927_v61, %v1941_v14  ;;  %v7298_v22 = vcombine.low %v4817_v5, %v4821_v17  ;;  %v2158_v61 = vrot.slane %v10120_v33, 5  ;;  %v2170_v33 = vrot.slane %v10137_v9, 5  ;;  %v8961_v9 = vld [vmem:[%s10843_s3 + $0x578] sm:$0xff]   ;;  %v10292_v2 = vld [vmem:[%s9849_s29 + $0xc] sm:$0x1]  ;;  %v8964_v17 = vld [vmem:[%s10843_s3 + $0x580] sm:$0xff]  }
 0x103   : > { %8061 = vmatpush3.bf16.msra.mxu1 %v8938_v15  ;;  %v1959_v15 = vrot.slane %v1957_v13, 4  ;;  %v5172_v4 = vshrl.u32 %v7344_v32, 16  ;;  %v5175_v53 = vshll.u32 %v7344_v32, 16  ;;  %v2174_v3 = vrot.slane %v10165_v10, 5  ;;  %v10295_v23 = vld [vmem:[%s9849_s29 + $0x14] sm:$0x1] }
 0x104   : > { %8062 = vmatprep.subr.bf16.mxu1 %v8941_v56  ;;  %v2171_v57 = vsel %vm9415_vm5, %v6845_v16, %v2170_v33 }
 0x105   : > { %8371 = vmatpush3.bf16.msra.mxu0 %v8937_v11  ;;  %v1913_v11 = vsel %vm9241_vm2, %v1908_v26, %v1912_v24  ;;  %v1963_v43 = vor.u32 %v1962_v42, %v1959_v15  ;;  %v7297_v24 = vcombine.low %v4809_v37, %v4813_v54  ;;  %v4828_v26 = vrot.slane %v10041_v59, 5  ;;  %v8952_v59 = vld [vmem:[%s10843_s3 + $0x218] sm:$0xff]   ;;  %v8955_v15 = vld [vmem:[%s10843_s3 + $0x560] sm:$0xff]   ;;  %v6835_v42 = vld [vmem:[%s9194_s12 + $0x28] sm:$0xe] }
 0x106   : > { %8372 = vmatprep.subr.bf16.mxu0 %v8939_v52  ;;  %v6821_v50 = vcombine.low %v1899_v41, %v1913_v11  ;;  %v8956_v41 = vld [vmem:[%s10843_s3 + $0x228] sm:$0xff]   ;;  %v6834_v11 = vld [vmem:[%s9194_s12 + $0x20] sm:$0xe]  ;;  %v6843_v14 = vrot.slane %v6835_v42, 9  ;;  %v6844_v37 = vrot.slane %v6836_v31, 9  ;;  %v2166_v54 = vrot.slane %v10130_v44, 5 }
 0x107   : > { %8063 = vmatpush3.bf16.msra.mxu1 %v8941_v56  ;;  %v8947_v56 = vld [vmem:[%s10843_s3 + $0x540] sm:$0xff]   ;;  %v1964_v1 = vrot.slane %v1963_v43, 4  ;;  %v4829_v25 = vsel %vm9415_vm5, %v7279_v30, %v4828_v26  ;;  %v8960_v43 = vld [vmem:[%s10843_s3 + $0x238] sm:$0xff]   ;;  %v5181_v30 = vshll.u32 %v10292_v2, 16  ;;  %v7352_v31 = vld [vmem:[%s9849_s29 + $0x28] sm:$0xf] }
 0x108   : > { %8064 = vmatprep.subr.bf16.mxu1 %v8944_v36  ;;  %v5228_v33 = vshrl.u32 %v7352_v31, 16 }
 0x109   : > { %8373 = vmatpush3.bf16.msra.mxu0 %v8939_v52  ;;  %v1968_v52 = vrot.slane %v1966_v19, 5  ;;  %v8957_v19 = vld [vmem:[%s10843_s3 + $0x568] sm:$0xff]  }
 0x10a   : > { %8374 = vmatprep.subr.bf16.mxu0 %v8942_v20 }
 0x10b   : > { %8065 = vmatpush3.bf16.msra.mxu1 %v8944_v36  ;;  %v1969_v28 = vsel %vm9241_vm2, %v1964_v1, %v1968_v52  ;;  %v4824_v36 = vrot.slane %v10038_v0, 5  ;;  %v2167_v1 = vsel %vm9415_vm5, %v6844_v37, %v2166_v54  ;;  %v10344_v37 = vld [vmem:[%s9849_s29 + $0x24] sm:$0x1] }
 0x10c   : > { %8074 = vmatprep.subr.bf16.mxu1 %v8946_v45  ;;  %v6823_v46 = vcombine.low %v1955_v7, %v1969_v28  ;;  %v8966_v7 = vld [vmem:[%s10843_s3 + $0x248] sm:$0xff]   ;;  %v6866_v28 = vcombine.low %v2167_v1, %v2171_v57  ;;  %v5223_v1 = vshll.u32 %v10344_v37, 16  ;;  %v8976_v57 = vld [vmem:[%s10843_s3 + $0x270] sm:$0xff]  }
 0x10d   : > { %8375 = vmatpush3.bf16.msra.mxu0 %v8942_v20  ;;  %v2155_v20 = vsel %vm9415_vm5, %v6841_v55, %v2154_v29  ;;  %v4825_v13 = vsel %vm9415_vm5, %v7278_v6, %v4824_v36  ;;  %v6839_v55 = vld [vmem:[%s9194_s12 + $0x48] sm:$0xe]  ;;  %v6846_v36 = vrot.slane %v6838_v47, 9  ;;  %v2178_v6 = vrot.slane %v10171_v58, 5  ;;  %v8968_v58 = vld [vmem:[%s10843_s3 + $0x250] sm:$0xff]   ;;  %s361_s12 = sadd.s32 %s6550_s13, %s10868_s18 }
 0x10e   : > { %8376 = vmatprep.subr.bf16.mxu0 %v8945_v34  ;;  %8067 = vmatmul.mubr.bf16.vlgmr.msra.gmra.mrb[0].mxu1 %v6821_v50  ;;  %v6864_v0 = vcombine.low %v2151_v38, %v2155_v20  ;;  %v7299_v39 = vcombine.low %v4825_v13, %v4829_v25  ;;  %v7346_v50 = vld [vmem:[%s9849_s29 + $0x10] sm:$0xf]  ;;  %v6847_v26 = vrot.slane %v6839_v55, 9  ;;  %v5195_v38 = vshll.u32 %v10295_v23, 16  ;;  %v8965_v20 = vld [vmem:[%s9849_s29 + $0x18] ss:$8 sps:$4 sm:$0xff]  }
 0x10f   : > { %8075 = vmatpush3.bf16.msra.mxu1 %v8946_v45  ;;  %8070 = vmatprep.mubr.bf16.mxu1 %v6822_v51  ;;  %v6842_v45 = vrot.slane %v6834_v11, 9  ;;  %v2163_v51 = vsel %vm9415_vm5, %v6843_v14, %v2162_v12  ;;  %v5186_v44 = vshrl.u32 %v7346_v50, 16  ;;  %v5189_v52 = vshll.u32 %v7346_v50, 16  ;;  %v8977_v13 = vld [vmem:[%s9849_s29 + $0x28] ss:$8 sps:$4 sm:$0xff]   ;;  %v8972_v11 = vld [vmem:[%s10843_s3 + $0x260] sm:$0xff]  }
 0x110   : > { %8076 = vmatprep.subr.bf16.mxu1 %v8948_v8  ;;  %v5183_v25 = vrot.slane %v5181_v30, 5  ;;  %v7350_v14 = vld [vmem:[%s9849_s29 + $0x20] sm:$0xf]  ;;  %v10339_v12 = vld [vmem:[%s9849_s29 + $0x1c] sm:$0x1]  ;;  %s6551_s14 = sshll.u32 %s361_s12, 1 }
 0x111   : > { %8377 = vmatpush3.bf16.msra.mxu0 %v8945_v34  ;;  %v8958_v34 = vld [vmem:[%s10843_s3 + $0x230] sm:$0xff]   ;;  %v5188_v10 = vrot.slane %v5186_v44, 4  ;;  %v5191_v5 = vrot.slane %v5189_v52, 5  ;;  %v5214_v54 = vshrl.u32 %v7350_v14, 16  ;;  %v5217_v16 = vshll.u32 %v7350_v14, 16  ;;  %s363_s17 = scalar_lea.vmem %s10845_s5, %s6551_s14 }
 0x112   : > { %8386 = vmatprep.subr.bf16.mxu0 %v8947_v56  ;;  %v7354_v50 = vld [vmem:[%s9849_s29 + $0x30] sm:$0xf]  ;;  %v7358_v52 = vld [vmem:[%s9849_s29 + $0x40] sm:$0xf] }
 0x113   : > { %8077 = vmatpush3.bf16.msra.mxu1 %v8948_v8  ;;  %v2159_v8 = vsel %vm9415_vm5, %v6842_v45, %v2158_v61  ;;  %v8971_v45 = vld [vmem:[%s10843_s3 + $0x598] sm:$0xff]   ;;  %v5245_v44 = vshll.u32 %v7354_v50, 16  ;;  %v5216_v47 = vrot.slane %v5214_v54, 4  ;;  %v5219_v55 = vrot.slane %v5217_v16, 5  ;;  %v2504_v30 = vld [vmem:[%s9227_s7] sm:$0xf] }
 0x114   : > { %8379 = vmatmul.mubr.bf16.vlgmr.msra.gmra.mrb[0].mxu0 %v7297_v24  ;;  %8078 = vmatprep.subr.bf16.mxu1 %v8950_v49  ;;  %v6865_v29 = vcombine.low %v2159_v8, %v2163_v51  ;;  %v5174_v24 = vrot.slane %v5172_v4, 4  ;;  %v8979_v61 = vld [vmem:[%s9849_s29 + $0x38] ss:$8 sps:$4 sm:$0xff]   ;;  %v8974_v4 = vld [vmem:[%s10843_s3 + $0x268] sm:$0xff]  }
 0x115   : > { %8387 = vmatpush3.bf16.msra.mxu0 %v8947_v56  ;;  %8382 = vmatprep.mubr.bf16.mxu0 %v7298_v22  ;;  %v8962_v56 = vld [vmem:[%s10843_s3 + $0x240] sm:$0xff]   ;;  %v5192_v22 = vor.u32 %v5191_v5, %v5188_v10  ;;  %v7356_v8 = vld [vmem:[%s9849_s29 + $0x38] sm:$0xf]  ;;  %v10366_v10 = vrot.slane %v5228_v33, 4 }
 0x116   : > { %8388 = vmatprep.subr.bf16.mxu0 %v8949_v21  ;;  %8071 = vmatmul.mubr.bf16.gmra.mrb[4].mxu1 %v6823_v46  ;;  %v8967_v46 = vld [vmem:[%s10843_s3 + $0x588] sm:$0xff]   ;;  %v8973_v51 = vld [vmem:[%s10843_s3 + $0x5a0] sm:$0xff]  }
 0x117   : > { %8079 = vmatpush3.bf16.msra.mxu1 %v8950_v49  ;;  %8090 = vmatprep.mubr.bf16.mxu1 %v6864_v0  ;;  %v5177_v49 = vrot.slane %v5175_v53, 5  ;;  %v2175_v0 = vsel %vm9415_vm5, %v6846_v36, %v2174_v3  ;;  %v5242_v53 = vshrl.u32 %v7354_v50, 16  ;;  %v5209_v3 = vshll.u32 %v10339_v12, 16  ;;  %v10374_v36 = vld [vmem:[%s9849_s29 + $0x34] sm:$0x1] }
 0x118   : > { %8080 = vmatprep.subr.bf16.mxu1 %v8952_v59 }
 0x119   : > { %8389 = vmatpush3.bf16.msra.mxu0 %v8949_v21  ;;  %v5178_v21 = vor.u32 %v5177_v49, %v5174_v24  ;;  %v5259_v24 = vshll.u32 %v7356_v8, 16  ;;  %v8975_v49 = vld [vmem:[%s10843_s3 + $0x5a8] sm:$0xff]  }
 0x11a   : > { %8390 = vmatprep.subr.bf16.mxu0 %v8951_v27 }
 0x11b   : > { %8081 = vmatpush3.bf16.msra.mxu1 %v8952_v59  ;;  %v2179_v59 = vsel %vm9415_vm5, %v6847_v26, %v2178_v6  ;;  %v5244_v26 = vrot.slane %v5242_v53, 4  ;;  %v5247_v6 = vrot.slane %v5245_v44, 5 }
 0x11c   : > { %8383 = vmatmul.mubr.bf16.gmra.mrb[4].mxu0 %v7299_v39  ;;  %8082 = vmatprep.subr.bf16.mxu1 %v8954_v63  ;;  %v5179_v39 = vrot.slane %v5178_v21, 4  ;;  %v2506_v21 = vld [vmem:[%s9227_s7 + $0x8] sm:$0xf] }
 0x11d   : > { %8391 = vmatpush3.bf16.msra.mxu0 %v8951_v27  ;;  %8402 = vmatprep.mubr.bf16.mxu0 %v8963_v40  ;;  %v5197_v27 = vrot.slane %v5195_v38, 5  ;;  %v8982_v40 = vld [vmem:[%s9227_s7] ss:$8 sps:$4 sm:$0xff]   ;;  %v10378_v38 = vld [vmem:[%s9849_s29 + $0x3c] sm:$0x1] }
 0x11e   : > { %8392 = vmatprep.subr.bf16.mxu0 %v8953_v62  ;;  %v5184_v42 = vsel %vm9241_vm2, %v5179_v39, %v5183_v25  ;;  %v2538_v25 = vshll.u32 %v2506_v21, 16  ;;  %v5220_v39 = vor.u32 %v5219_v55, %v5216_v47  ;;  %v5467_v47 = vrot.slane %v10295_v23, 5  ;;  %v8986_v55 = vld [vmem:[%s10843_s3 + $0x288] sm:$0xff]  }
 0x11f   : > { %8083 = vmatpush3.bf16.msra.mxu1 %v8954_v63  ;;  %v5193_v63 = vrot.slane %v5192_v22, 4  ;;  %v2521_v22 = vshrl.u32 %v2504_v30, 16 }
 0x120   : > { %8084 = vmatprep.subr.bf16.mxu1 %v8956_v41  ;;  %v5221_v44 = vrot.slane %v5220_v39, 4  ;;  %v8999_v39 = vld [vmem:[%s9227_s7 + $0x30] ss:$8 sps:$4 sm:$0xff]  }
 0x121   : > { %8393 = vmatpush3.bf16.msra.mxu0 %v8953_v62  ;;  %v6867_v62 = vcombine.low %v2175_v0, %v2179_v59  ;;  %v5261_v59 = vrot.slane %v5259_v24, 5 }
 0x122   : > { %8394 = vmatprep.subr.bf16.mxu0 %v8955_v15 }
 0x123   : > { %8085 = vmatpush3.bf16.msra.mxu1 %v8956_v41  ;;  %v8969_v41 = vld [vmem:[%s10843_s3 + $0x590] sm:$0xff]  }
 0x124   : > { %8086 = vmatprep.subr.bf16.mxu1 %v8958_v34 }
 0x125   : > { %8395 = vmatpush3.bf16.msra.mxu0 %v8955_v15  ;;  %v8970_v15 = vld [vmem:[%s10843_s3 + $0x258] sm:$0xff]  }
 0x126   : > { %8396 = vmatprep.subr.bf16.mxu0 %v8957_v19 }
 0x127   : > { %8087 = vmatpush3.bf16.msra.mxu1 %v8958_v34  ;;  %v7348_v34 = vld [vmem:[%s9849_s29 + $0x18] sm:$0xf] }
 0x128   : > { %8088 = vmatprep.subr.bf16.mxu1 %v8960_v43  ;;  %v5203_v32 = vshll.u32 %v7348_v34, 16 }
 0x129   : > { %8397 = vmatpush3.bf16.msra.mxu0 %v8957_v19  ;;  %v5198_v19 = vsel %vm9241_vm2, %v5193_v63, %v5197_v27  ;;  %v8978_v27 = vld [vmem:[%s10843_s3 + $0x5b0] sm:$0xff]  }
 0x12a   : > { %8398 = vmatprep.subr.bf16.mxu0 %v8959_v18  ;;  %v7376_v60 = vcombine.low %v5184_v42, %v5198_v19 }
 0x12b   : > { %8089 = vmatpush3.bf16.msra.mxu1 %v8960_v43  ;;  %v5200_v43 = vshrl.u32 %v7348_v34, 16  ;;  %v2540_v34 = vrot.slane %v2538_v25, 5  ;;  %v2510_v25 = vld [vmem:[%s9227_s7 + $0x18] sm:$0xf] }
 0x12c   : > { %8098 = vmatprep.subr.bf16.mxu1 %v8962_v56 }
 0x12d   : > { %8399 = vmatpush3.bf16.msra.mxu0 %v8959_v18  ;;  %v5231_v18 = vshll.u32 %v7352_v31, 16  ;;  %v5251_v31 = vshll.u32 %v10374_v36, 16 }
 0x12e   : > { %8400 = vmatprep.subr.bf16.mxu0 %v8961_v9  ;;  %8091 = vmatmul.mubr.bf16.vlgmr.msra.gmra.mrb[0].mxu1 %v6865_v29  ;;  %v5256_v29 = vshrl.u32 %v7356_v8, 16  ;;  %v8981_v8 = vld [vmem:[%s10843_s3 + $0x5b8] sm:$0xff]  }
 0x12f   : > { %8099 = vmatpush3.bf16.msra.mxu1 %v8962_v56  ;;  %8094 = vmatprep.mubr.bf16.mxu1 %v6866_v28  ;;  %v10356_v56 = vrot.slane %v5203_v32, 5  ;;  %v10368_v5 = vrot.slane %v5231_v18, 5  ;;  %v10371_v28 = vld [vmem:[%s9849_s29 + $0x2c] sm:$0x1]  ;;  %v5265_v32 = vshll.u32 %v10378_v38, 16 }
 0x130   : > { %8100 = vmatprep.subr.bf16.mxu1 %v8966_v7  ;;  %v5258_v0 = vrot.slane %v5256_v29, 4  ;;  %v5237_v14 = vshll.u32 %v10371_v28, 16 }
 0x131   : > { %8401 = vmatpush3.bf16.msra.mxu0 %v8961_v9  ;;  %v10354_v9 = vrot.slane %v5200_v43, 4  ;;  %v5248_v43 = vor.u32 %v5247_v6, %v5244_v26 }
 0x132   : > { %8410 = vmatprep.subr.bf16.mxu0 %v8964_v17  ;;  %v5262_v54 = vor.u32 %v5261_v59, %v5258_v0  ;;  %v8988_v0 = vld [vmem:[%s10843_s3 + $0x290] sm:$0xff]  }
 0x133   : > { %8101 = vmatpush3.bf16.msra.mxu1 %v8966_v7  ;;  %v5273_v7 = vshll.u32 %v7358_v52, 16  ;;  %v5249_v24 = vrot.slane %v5248_v43, 4  ;;  %v8990_v43 = vld [vmem:[%s10843_s3 + $0x298] sm:$0xff]  }
 0x134   : > { %8403 = vmatmul.mubr.bf16.vlgmr.msra.gmra.mrb[0].mxu0 %v8965_v20  ;;  %8102 = vmatprep.subr.bf16.mxu1 %v8968_v58  ;;  %v10381_v20 = vld [vmem:[%s9849_s29 + $0x44] sm:$0x1] }
 0x135   : > { %8411 = vmatpush3.bf16.msra.mxu0 %v8964_v17  ;;  %8406 = vmatprep.mubr.bf16.mxu0 %v8977_v13  ;;  %v5270_v17 = vshrl.u32 %v7358_v52, 16  ;;  %v2535_v13 = vshrl.u32 %v2506_v21, 16  ;;  %v5279_v50 = vshll.u32 %v10381_v20, 16 }
 0x136   : > { %8412 = vmatprep.subr.bf16.mxu0 %v8967_v46  ;;  %8095 = vmatmul.mubr.bf16.gmra.mrb[4].mxu1 %v6867_v62  ;;  %v5206_v62 = vor.u32 %v10356_v56, %v10354_v9  ;;  %v8996_v56 = vld [vmem:[%s9227_s7 + $0x20] ss:$8 sps:$4 sm:$0xff]  }
 0x137   : > { %8103 = vmatpush3.bf16.msra.mxu1 %v8968_v58  ;;  %8114 = vmatprep.mubr.bf16.mxu1 %v8982_v40  ;;  %v8980_v58 = vld [vmem:[%s10843_s3 + $0x278] sm:$0xff]   ;;  %v5272_v63 = vrot.slane %v5270_v17, 4  ;;  %v5275_v40 = vrot.slane %v5273_v7, 5  ;;  %v2537_v19 = vrot.slane %v2535_v13, 4  ;;  %v5263_v17 = vrot.slane %v5262_v54, 4 }
 0x138   : > { %8104 = vmatprep.subr.bf16.mxu1 %v8970_v15  ;;  %v5207_v53 = vrot.slane %v5206_v62, 4  ;;  %v8987_v62 = vld [vmem:[%s10843_s3 + $0x5c8] sm:$0xff]  }
 0x139   : > { %8413 = vmatpush3.bf16.msra.mxu0 %v8967_v46  ;;  %v2524_v46 = vshll.u32 %v2504_v30, 16  ;;  %v5276_v16 = vor.u32 %v5275_v40, %v5272_v63  ;;  %v2541_v9 = vor.u32 %v2540_v34, %v2537_v19 }
 0x13a   : > { %8414 = vmatprep.subr.bf16.mxu0 %v8969_v41 }
 0x13b   : > { %8105 = vmatpush3.bf16.msra.mxu1 %v8970_v15  ;;  %v10393_v15 = vld [vmem:[%s9227_s7 + $0x4] sm:$0x1]  ;;  %v2526_v42 = vrot.slane %v2524_v46, 5  ;;  %v2542_v21 = vrot.slane %v2541_v9, 4  ;;  %v7389_v46 = vld [vmem:[%s9849_s29 + $0x10] sm:$0xe] }
 0x13c   : > { %8407 = vmatmul.mubr.bf16.gmra.mrb[4].mxu0 %v8979_v61  ;;  %8106 = vmatprep.subr.bf16.mxu1 %v8972_v11  ;;  %v5225_v61 = vrot.slane %v5223_v1, 5  ;;  %v2530_v33 = vshll.u32 %v10393_v15, 16  ;;  %v5253_v1 = vrot.slane %v5251_v31, 5  ;;  %v2566_v31 = vshll.u32 %v2510_v25, 16 }
 0x13d   : > { %8415 = vmatpush3.bf16.msra.mxu0 %v8969_v41  ;;  %8426 = vmatprep.mubr.bf16.mxu0 %v7376_v60  ;;  %v10396_v41 = vld [vmem:[%s9227_s7 + $0xc] sm:$0x1]  ;;  %v5234_v60 = vor.u32 %v10368_v5, %v10366_v10  ;;  %v5281_v10 = vrot.slane %v5279_v50, 5  ;;  %v8984_v5 = vld [vmem:[%s10843_s3 + $0x5c0] sm:$0xff]  }
 0x13e   : > { %8416 = vmatprep.subr.bf16.mxu0 %v8971_v45  ;;  %v2544_v18 = vshll.u32 %v10396_v41, 16  ;;  %v2532_v7 = vrot.slane %v2530_v33, 5  ;;  %v5226_v6 = vsel %vm9241_vm2, %v5221_v44, %v5225_v61  ;;  %v5254_v13 = vsel %vm9241_vm2, %v5249_v24, %v5253_v1  ;;  %v2512_v33 = vld [vmem:[%s9227_s7 + $0x20] sm:$0xf] }
 0x13f   : > { %8107 = vmatpush3.bf16.msra.mxu1 %v8972_v11  ;;  %v2523_v11 = vrot.slane %v2521_v22, 4  ;;  %v5235_v29 = vrot.slane %v5234_v60, 4  ;;  %v7388_v22 = vld [vmem:[%s9849_s29 + $0x8] sm:$0xe]  ;;  %v8989_v60 = vld [vmem:[%s10843_s3 + $0x5d0] sm:$0xff]   ;;  %v2568_v9 = vrot.slane %v2566_v31, 5 }
 0x140   : > { %8108 = vmatprep.subr.bf16.mxu1 %v8974_v4  ;;  %v2546_v23 = vrot.slane %v2544_v18, 5  ;;  %v7396_v34 = vrot.slane %v7388_v22, 9  ;;  %v2514_v18 = vld [vmem:[%s9227_s7 + $0x28] sm:$0xf]  ;;  %v2580_v1 = vshll.u32 %v2512_v33, 16 }
 0x141   : > { %8417 = vmatpush3.bf16.msra.mxu0 %v8971_v45  ;;  %v5211_v45 = vrot.slane %v5209_v3, 5  ;;  %v2527_v52 = vor.u32 %v2526_v42, %v2523_v11  ;;  %v5239_v3 = vrot.slane %v5237_v14, 5  ;;  %v2563_v14 = vshrl.u32 %v2510_v25, 16 }
 0x142   : > { %8418 = vmatprep.subr.bf16.mxu0 %v8973_v51  ;;  %v2547_v40 = vsel %vm9241_vm2, %v2542_v21, %v2546_v23  ;;  %v5475_v23 = vrot.slane %v10344_v37, 5  ;;  %v2582_v22 = vrot.slane %v2580_v1, 5  ;;  %v9006_v37 = vld [vmem:[%s10843_s3 + $0x2d0] sm:$0xff]  }
 0x143   : > { %8109 = vmatpush3.bf16.msra.mxu1 %v8974_v4  ;;  %v8985_v4 = vld [vmem:[%s9227_s7 + $0x10] ss:$8 sps:$4 sm:$0xff]   ;;  %v5212_v26 = vsel %vm9241_vm2, %v5207_v53, %v5211_v45  ;;  %v2528_v30 = vrot.slane %v2527_v52, 4  ;;  %v5240_v59 = vsel %vm9241_vm2, %v5235_v29, %v5239_v3  ;;  %v7397_v45 = vrot.slane %v7389_v46, 9  ;;  %v10465_v53 = vld [vmem:[%s9227_s7 + $0x1c] sm:$0x1] }
 0x144   : > { %8110 = vmatprep.subr.bf16.mxu1 %v8976_v57  ;;  %v7378_v19 = vcombine.low %v5240_v59, %v5254_v13  ;;  %v2565_v52 = vrot.slane %v2563_v14, 4  ;;  %v2577_v3 = vshrl.u32 %v2512_v33, 16  ;;  %v7391_v14 = vld [vmem:[%s9849_s29 + $0x20] sm:$0xe]  ;;  %v9000_v33 = vld [vmem:[%s10843_s3 + $0x2b8] sm:$0xff]  }
 0x145   : > { %8419 = vmatpush3.bf16.msra.mxu0 %v8973_v51  ;;  %v8983_v51 = vld [vmem:[%s10843_s3 + $0x280] sm:$0xff]   ;;  %v2533_v63 = vsel %vm9241_vm2, %v2528_v30, %v2532_v7  ;;  %v10486_v30 = vld [vmem:[%s9227_s7 + $0x2c] sm:$0x1] }
 0x146   : > { %8420 = vmatprep.subr.bf16.mxu0 %v8975_v49  ;;  %v6920_v61 = vcombine.low %v2533_v63, %v2547_v40  ;;  %v2569_v7 = vor.u32 %v2568_v9, %v2565_v52  ;;  %v2579_v21 = vrot.slane %v2577_v3, 4 }
 0x147   : > { %8111 = vmatpush3.bf16.msra.mxu1 %v8976_v57  ;;  %v5463_v57 = vrot.slane %v10292_v2, 5  ;;  %v5277_v2 = vrot.slane %v5276_v16, 4 }
 0x148   : > { %8112 = vmatprep.subr.bf16.mxu1 %v8980_v58  ;;  %v2583_v31 = vor.u32 %v2582_v22, %v2579_v21  ;;  %v2786_v22 = vld [vmem:[%s9227_s7] sm:$0xe] }
 0x149   : > { %8421 = vmatpush3.bf16.msra.mxu0 %v8975_v49  ;;  %v5267_v49 = vrot.slane %v5265_v32, 5  ;;  %v5282_v50 = vsel %vm9241_vm2, %v5277_v2, %v5281_v10  ;;  %v2572_v10 = vshll.u32 %v10465_v53, 16  ;;  %v8994_v2 = vld [vmem:[%s10843_s3 + $0x2a8] sm:$0xff]  }
 0x14a   : > { %8422 = vmatprep.subr.bf16.mxu0 %v8978_v27  ;;  %v2584_v9 = vrot.slane %v2583_v31, 4  ;;  %v5487_v31 = vrot.slane %v10378_v38, 5 }
 0x14b   : > { %8113 = vmatpush3.bf16.msra.mxu1 %v8980_v58  ;;  %v2508_v58 = vld [vmem:[%s9227_s7 + $0x10] sm:$0xf]  ;;  %v5268_v32 = vsel %vm9241_vm2, %v5263_v17, %v5267_v49  ;;  %v2574_v25 = vrot.slane %v2572_v10, 5 }
 0x14c   : > { %8122 = vmatprep.subr.bf16.mxu1 %v8983_v51  ;;  %v2549_v11 = vshrl.u32 %v2508_v58, 16  ;;  %v2552_v42 = vshll.u32 %v2508_v58, 16  ;;  %v7379_v44 = vcombine.low %v5268_v32, %v5282_v50  ;;  %v2516_v17 = vld [vmem:[%s9227_s7 + $0x30] sm:$0xf]  ;;  %v10510_v32 = vld [vmem:[%s9849_s29 + $0x28] sm:$0xe] }
 0x14d   : > { %8423 = vmatpush3.bf16.msra.mxu0 %v8978_v27  ;;  %v7377_v27 = vcombine.low %v5212_v26, %v5226_v6  ;;  %v10482_v26 = vld [vmem:[%s9227_s7 + $0x24] sm:$0x1]  ;;  %v2518_v6 = vld [vmem:[%s9227_s7 + $0x38] sm:$0xf]  ;;  %v2608_v63 = vshll.u32 %v2516_v17, 16  ;;  %v7400_v10 = vrot.slane %v10510_v32, 9 }
 0x14e   : > { %8424 = vmatprep.subr.bf16.mxu0 %v8981_v8  ;;  %8115 = vmatmul.mubr.bf16.vlgmr.msra.gmra.mrb[0].mxu1 %v8985_v4  ;;  %v2551_v54 = vrot.slane %v2549_v11, 4  ;;  %v2554_v16 = vrot.slane %v2552_v42, 5  ;;  %v10462_v4 = vld [vmem:[%s9227_s7 + $0x14] sm:$0x1]  ;;  %v2619_v40 = vshrl.u32 %v2518_v6, 16  ;;  %v8995_v11 = vld [vmem:[%s10843_s3 + $0x5e8] sm:$0xff]  }
 0x14f   : > { %8123 = vmatpush3.bf16.msra.mxu1 %v8983_v51  ;;  %8118 = vmatprep.mubr.bf16.mxu1 %v8996_v56  ;;  %v5468_v51 = vsel %vm9415_vm5, %v7397_v45, %v5467_v47  ;;  %v8992_v56 = vld [vmem:[%s10843_s3 + $0x2a0] sm:$0xff]   ;;  %v2594_v47 = vshll.u32 %v2514_v18, 16  ;;  %v2558_v49 = vshll.u32 %v10462_v4, 16  ;;  %v2570_v42 = vrot.slane %v2569_v7, 4  ;;  %v10513_v50 = vld [vmem:[%s9849_s29 + $0x30] sm:$0xe] }
 0x150   : > { %8124 = vmatprep.subr.bf16.mxu1 %v8986_v55  ;;  %v2555_v24 = vor.u32 %v2554_v16, %v2551_v54  ;;  %v2622_v45 = vshll.u32 %v2518_v6, 16 }
 0x151   : > { %8425 = vmatpush3.bf16.msra.mxu0 %v8981_v8  ;;  %v5464_v8 = vsel %vm9415_vm5, %v7396_v34, %v5463_v57  ;;  %v2591_v57 = vshrl.u32 %v2514_v18, 16  ;;  %v2596_v58 = vrot.slane %v2594_v47, 5  ;;  %v2560_v13 = vrot.slane %v2558_v49, 5 }
 0x152   : > { %8434 = vmatprep.subr.bf16.mxu0 %v8984_v5  ;;  %v7420_v29 = vcombine.low %v5464_v8, %v5468_v51  ;;  %v10491_v59 = vrot.slane %v2555_v24, 4  ;;  %v2600_v34 = vshll.u32 %v10486_v30, 16  ;;  %v2610_v18 = vrot.slane %v2608_v63, 5  ;;  %v8998_v51 = vld [vmem:[%s10843_s3 + $0x5f0] sm:$0xff]   ;;  %v9002_v24 = vld [vmem:[%s10843_s3 + $0x2c0] sm:$0xff]  }
 0x153   : > { %8125 = vmatpush3.bf16.msra.mxu1 %v8986_v55  ;;  %v8991_v55 = vld [vmem:[%s10843_s3 + $0x5d8] sm:$0xff]   ;;  %v2593_v46 = vrot.slane %v2591_v57, 4  ;;  %v2621_v8 = vrot.slane %v2619_v40, 4  ;;  %v7399_v47 = vrot.slane %v7391_v14, 9  ;;  %v9003_v63 = vld [vmem:[%s10843_s3 + $0x600] sm:$0xff]  }
 0x154   : > { %8427 = vmatmul.mubr.bf16.vlgmr.msra.gmra.mrb[0].mxu0 %v7377_v27  ;;  %8126 = vmatprep.subr.bf16.mxu1 %v8988_v0  ;;  %v2605_v27 = vshrl.u32 %v2516_v17, 16  ;;  %v2602_v1 = vrot.slane %v2600_v34, 5  ;;  %v2561_v49 = vsel %vm9241_vm2, %v10491_v59, %v2560_v13  ;;  %v7401_v17 = vrot.slane %v10513_v50, 9 }
 0x155   : > { %8435 = vmatpush3.bf16.msra.mxu0 %v8984_v5  ;;  %8430 = vmatprep.mubr.bf16.mxu0 %v7378_v19  ;;  %v5471_v5 = vrot.slane %v10339_v12, 5  ;;  %v2586_v19 = vshll.u32 %v10482_v26, 16  ;;  %v5476_v12 = vsel %vm9415_vm5, %v7399_v47, %v5475_v23  ;;  %v2816_v34 = vrot.slane %v10396_v41, 5  ;;  %v9012_v47 = vld [vmem:[%s10843_s3 + $0x2e8] sm:$0xff]  }
 0x156   : > { %8436 = vmatprep.subr.bf16.mxu0 %v8987_v62  ;;  %8119 = vmatmul.mubr.bf16.gmra.mrb[4].mxu1 %v8999_v39  ;;  %v10497_v39 = vld [vmem:[%s9227_s7 + $0x34] sm:$0x1]  ;;  %v2607_v54 = vrot.slane %v2605_v27, 4 }
 0x157   : > { %8127 = vmatpush3.bf16.msra.mxu1 %v8988_v0  ;;  %8138 = vmatprep.mubr.bf16.mxu1 %v6920_v61  ;;  %v8993_v0 = vld [vmem:[%s10843_s3 + $0x5e0] sm:$0xff]   ;;  %v7390_v61 = vld [vmem:[%s9849_s29 + $0x18] sm:$0xe]  ;;  %v2614_v16 = vshll.u32 %v10497_v39, 16 }
 0x158   : > { %8128 = vmatprep.subr.bf16.mxu1 %v8990_v43  ;;  %v7398_v57 = vrot.slane %v7390_v61, 9 }
 0x159   : > { %8437 = vmatpush3.bf16.msra.mxu0 %v8987_v62  ;;  %v8997_v62 = vld [vmem:[%s10843_s3 + $0x2b0] sm:$0xff]   ;;  %v2616_v7 = vrot.slane %v2614_v16, 5 }
 0x15a   : > { %8438 = vmatprep.subr.bf16.mxu0 %v8989_v60  ;;  %v5472_v13 = vsel %vm9415_vm5, %v7398_v57, %v5471_v5  ;;  %v9011_v57 = vld [vmem:[%s10843_s3 + $0x620] sm:$0xff]  }
 0x15b   : > { %8129 = vmatpush3.bf16.msra.mxu1 %v8990_v43  ;;  %v10507_v43 = vld [vmem:[%s9227_s7 + $0x3c] sm:$0x1] }
 0x15c   : > { %8431 = vmatmul.mubr.bf16.gmra.mrb[4].mxu0 %v7379_v44  ;;  %8130 = vmatprep.subr.bf16.mxu1 %v8992_v56  ;;  %v2624_v44 = vrot.slane %v2622_v45, 5  ;;  %v2628_v52 = vshll.u32 %v10507_v43, 16  ;;  %v7421_v45 = vcombine.low %v5472_v13, %v5476_v12 }
 0x15d   : > { %8439 = vmatpush3.bf16.msra.mxu0 %v8989_v60  ;;  %8450 = vmatprep.mubr.bf16.mxu0 %v7420_v29  ;;  %v2597_v60 = vor.u32 %v2596_v58, %v2593_v46  ;;  %v5483_v29 = vrot.slane %v10374_v36, 5  ;;  %v2575_v36 = vsel %vm9241_vm2, %v2570_v42, %v2574_v25  ;;  %v9004_v25 = vld [vmem:[%s10843_s3 + $0x2c8] sm:$0xff]   ;;  %v6932_v42 = vrot.slane %v2786_v22, 9 }
 0x15e   : > { %8440 = vmatprep.subr.bf16.mxu0 %v8991_v55  ;;  %v2625_v6 = vor.u32 %v2624_v44, %v2621_v8  ;;  %v2630_v21 = vrot.slane %v2628_v52, 5  ;;  %v6921_v59 = vcombine.low %v2561_v49, %v2575_v36  ;;  %v9007_v52 = vld [vmem:[%s10843_s3 + $0x610] sm:$0xff]   ;;  %v2790_v36 = vld [vmem:[%s9227_s7 + $0x20] sm:$0xe]  ;;  %v2832_v22 = vrot.slane %v10486_v30, 5 }
 0x15f   : > { %8131 = vmatpush3.bf16.msra.mxu1 %v8992_v56  ;;  %v2588_v56 = vrot.slane %v2586_v19, 5  ;;  %v2598_v3 = vrot.slane %v2597_v60, 4  ;;  %v5484_v61 = vsel %vm9415_vm5, %v7401_v17, %v5483_v29  ;;  %v5491_v60 = vrot.slane %v10381_v20, 5  ;;  %v9008_v20 = vld [vmem:[%s10843_s3 + $0x2d8] sm:$0xff]   ;;  %v9014_v49 = vld [vmem:[%s10843_s3 + $0x2f0] sm:$0xff]  }
 0x160   : > { %8132 = vmatprep.subr.bf16.mxu1 %v8994_v2  ;;  %v2626_v5 = vrot.slane %v2625_v6, 4  ;;  %v2789_v29 = vld [vmem:[%s9227_s7 + $0x18] sm:$0xe]  ;;  %v2820_v17 = vrot.slane %v10462_v4, 5  ;;  %v6936_v4 = vrot.slane %v2790_v36, 9 }
 0x161   : > { %8441 = vmatpush3.bf16.msra.mxu0 %v8991_v55  ;;  %v5479_v55 = vrot.slane %v10371_v28, 5  ;;  %v9001_v28 = vld [vmem:[%s10843_s3 + $0x5f8] sm:$0xff]   ;;  %v2589_v46 = vsel %vm9241_vm2, %v2584_v9, %v2588_v56  ;;  %v2603_v58 = vsel %vm9241_vm2, %v2598_v3, %v2602_v1  ;;  %v9010_v3 = vld [vmem:[%s10843_s3 + $0x2e0] sm:$0xff]  }
 0x162   : > { %8442 = vmatprep.subr.bf16.mxu0 %v8993_v0  ;;  %v6922_v40 = vcombine.low %v2589_v46, %v2603_v58  ;;  %v2631_v41 = vsel %vm9241_vm2, %v2626_v5, %v2630_v21  ;;  %v9009_v9 = vld [vmem:[%s10843_s3 + $0x618] sm:$0xff]   ;;  %v2828_v21 = vrot.slane %v10482_v26, 5  ;;  %v7468_v46 = vld [vmem:[%s9849_s29 + $0x10] sm:$0xf] }
 0x163   : > { %8133 = vmatpush3.bf16.msra.mxu1 %v8994_v2  ;;  %v2611_v2 = vor.u32 %v2610_v18, %v2607_v54  ;;  %v5480_v23 = vsel %vm9415_vm5, %v7400_v10, %v5479_v55  ;;  %v9019_v1 = vld [vmem:[%s9849_s29 + $0x10] ss:$8 sps:$4 sm:$0xff]   ;;  %v5835_v30 = vshrl.u32 %v7468_v46, 16  ;;  %v5838_v13 = vshll.u32 %v7468_v46, 16 }
 0x164   : > { %8134 = vmatprep.subr.bf16.mxu1 %v8997_v62  ;;  %v7422_v18 = vcombine.low %v5480_v23, %v5484_v61  ;;  %v2788_v55 = vld [vmem:[%s9227_s7 + $0x10] sm:$0xe]  ;;  %v9016_v6 = vld [vmem:[%s10843_s3 + $0x2f8] sm:$0xff]  }
 0x165   : > { %8443 = vmatpush3.bf16.msra.mxu0 %v8993_v0  ;;  %v2787_v0 = vld [vmem:[%s9227_s7 + $0x8] sm:$0xe]  ;;  %v2612_v27 = vrot.slane %v2611_v2, 4  ;;  %v6934_v10 = vrot.slane %v2788_v55, 9  ;;  %v6935_v2 = vrot.slane %v2789_v29, 9 }
 0x166   : > { %8444 = vmatprep.subr.bf16.mxu0 %v8995_v11  ;;  %v6933_v19 = vrot.slane %v2787_v0, 9  ;;  %v7470_v58 = vld [vmem:[%s9849_s29 + $0x18] sm:$0xf]  ;;  %v7472_v55 = vld [vmem:[%s9849_s29 + $0x20] sm:$0xf] }
 0x167   : > { %8135 = vmatpush3.bf16.msra.mxu1 %v8997_v62  ;;  %v2812_v62 = vrot.slane %v10393_v15, 5  ;;  %v7395_v15 = vld [vmem:[%s9849_s29 + $0x40] sm:$0xe]  ;;  %v2617_v14 = vsel %vm9241_vm2, %v2612_v27, %v2616_v7  ;;  %v2791_v7 = vld [vmem:[%s9227_s7 + $0x28] sm:$0xe]  ;;  %v5852_v27 = vshll.u32 %v7470_v58, 16 }
 0x168   : > { %8136 = vmatprep.subr.bf16.mxu1 %v9000_v33  ;;  %v7403_v50 = vrot.slane %v7395_v15, 9  ;;  %v2817_v16 = vsel %vm9415_vm5, %v6933_v19, %v2816_v34  ;;  %v6923_v8 = vcombine.low %v2617_v14, %v2631_v41  ;;  %v6937_v0 = vrot.slane %v2791_v7, 9  ;;  %v2793_v5 = vld [vmem:[%s9227_s7 + $0x38] sm:$0xe]  ;;  %v10645_v34 = vld [vmem:[%s9849_s29 + $0x14] sm:$0x1] }
 0x169   : > { %8445 = vmatpush3.bf16.msra.mxu0 %v8995_v11  ;;  %v7394_v11 = vld [vmem:[%s9849_s29 + $0x38] sm:$0xe]  ;;  %v2813_v54 = vsel %vm9415_vm5, %v6932_v42, %v2812_v62  ;;  %v9018_v62 = vld [vmem:[%s10843_s3 + $0x300] sm:$0xff]   ;;  %v2836_v19 = vrot.slane %v10497_v39, 5  ;;  %v10648_v15 = vld [vmem:[%s9849_s29 + $0x1c] sm:$0x1] }
 0x16a   : > { %8446 = vmatprep.subr.bf16.mxu0 %v8998_v51  ;;  %v7402_v32 = vrot.slane %v7394_v11, 9  ;;  %v6956_v38 = vcombine.low %v2813_v54, %v2817_v16  ;;  %v5492_v44 = vsel %vm9415_vm5, %v7403_v50, %v5491_v60  ;;  %v2833_v12 = vsel %vm9415_vm5, %v6937_v0, %v2832_v22  ;;  %v9017_v11 = vld [vmem:[%s10843_s3 + $0x638] sm:$0xff]   ;;  %v9022_v39 = vld [vmem:[%s10843_s3 + $0x308] sm:$0xff]  }
 0x16b   : > { %8137 = vmatpush3.bf16.msra.mxu1 %v9000_v33  ;;  %v9005_v33 = vld [vmem:[%s10843_s3 + $0x608] sm:$0xff]   ;;  %v5854_v61 = vrot.slane %v5852_v27, 5  ;;  %v2840_v60 = vrot.slane %v10507_v43, 5  ;;  %v5844_v50 = vshll.u32 %v10645_v34, 16  ;;  %v5858_v54 = vshll.u32 %v10648_v15, 16  ;;  %v9024_v43 = vld [vmem:[%s10843_s3 + $0x310] sm:$0xff]  }
 0x16c   : > { %8146 = vmatprep.subr.bf16.mxu1 %v9002_v24  ;;  %v9021_v16 = vld [vmem:[%s9849_s29 + $0x20] ss:$8 sps:$4 sm:$0xff]   ;;  %v5863_v36 = vshrl.u32 %v7472_v55, 16  ;;  %v9027_v7 = vld [vmem:[%s10843_s3 + $0x658] sm:$0xff]  }
 0x16d   : > { %8447 = vmatpush3.bf16.msra.mxu0 %v8998_v51  ;;  %v5488_v51 = vsel %vm9415_vm5, %v7402_v32, %v5487_v31  ;;  %v6939_v31 = vrot.slane %v2793_v5, 9  ;;  %v9020_v32 = vld [vmem:[%s10843_s3 + $0x640] sm:$0xff]  }
 0x16e   : > { %8448 = vmatprep.subr.bf16.mxu0 %v9001_v28  ;;  %8139 = vmatmul.mubr.bf16.vlgmr.msra.gmra.mrb[0].mxu1 %v6921_v59  ;;  %v7423_v56 = vcombine.low %v5488_v51, %v5492_v44  ;;  %v2821_v59 = vsel %vm9415_vm5, %v6934_v10, %v2820_v17  ;;  %v5846_v44 = vrot.slane %v5844_v50, 5  ;;  %v9034_v10 = vld [vmem:[%s9849_s29 + $0x40] ss:$8 sps:$4 sm:$0xff]   ;;  %v7476_v17 = vld [vmem:[%s9849_s29 + $0x30] sm:$0xf] }
 0x16f   : > { %8147 = vmatpush3.bf16.msra.mxu1 %v9002_v24  ;;  %8142 = vmatprep.mubr.bf16.mxu1 %v6922_v40  ;;  %v9013_v24 = vld [vmem:[%s10843_s3 + $0x628] sm:$0xff]   ;;  %v2792_v40 = vld [vmem:[%s9227_s7 + $0x30] sm:$0xe]  ;;  %v2841_v51 = vsel %vm9415_vm5, %v6939_v31, %v2840_v60 }
 0x170   : > { %8148 = vmatprep.subr.bf16.mxu1 %v9004_v25  ;;  %v6938_v41 = vrot.slane %v2792_v40, 9 }
 0x171   : > { %8449 = vmatpush3.bf16.msra.mxu0 %v9001_v28  ;;  %v2824_v28 = vrot.slane %v10465_v53, 5  ;;  %v9015_v53 = vld [vmem:[%s10843_s3 + $0x630] sm:$0xff]  }
 0x172   : > { %8458 = vmatprep.subr.bf16.mxu0 %v9003_v63 }
 0x173   : > { %8149 = vmatpush3.bf16.msra.mxu1 %v9004_v25  ;;  %v2825_v26 = vsel %vm9415_vm5, %v6935_v2, %v2824_v28  ;;  %v5849_v25 = vshrl.u32 %v7470_v58, 16  ;;  %v7478_v2 = vld [vmem:[%s9849_s29 + $0x38] sm:$0xf]  ;;  %v9028_v28 = vld [vmem:[%s10843_s3 + $0x320] sm:$0xff]   ;;  %v5891_v58 = vshrl.u32 %v7476_v17, 16 }
 0x174   : > { %8451 = vmatmul.mubr.bf16.vlgmr.msra.gmra.mrb[0].mxu0 %v7421_v45  ;;  %8150 = vmatprep.subr.bf16.mxu1 %v9006_v37  ;;  %v6957_v42 = vcombine.low %v2821_v59, %v2825_v26  ;;  %v5837_v45 = vrot.slane %v5835_v30, 4  ;;  %v5905_v0 = vshrl.u32 %v7478_v2, 16  ;;  %v9029_v59 = vld [vmem:[%s10843_s3 + $0x660] sm:$0xff]   ;;  %v9030_v26 = vld [vmem:[%s10843_s3 + $0x328] sm:$0xff]  }
 0x175   : > { %8459 = vmatpush3.bf16.msra.mxu0 %v9003_v63  ;;  %8454 = vmatprep.mubr.bf16.mxu0 %v7422_v18  ;;  %v2829_v63 = vsel %vm9415_vm5, %v6936_v4, %v2828_v21  ;;  %v5851_v23 = vrot.slane %v5849_v25, 4  ;;  %v5866_v21 = vshll.u32 %v7472_v55, 16  ;;  %v5894_v4 = vshll.u32 %v7476_v17, 16  ;;  %v10700_v30 = vld [vmem:[%s9849_s29 + $0x24] sm:$0x1]  ;;  %v9037_v17 = vld [vmem:[%s10843_s3 + $0x678] sm:$0xff]  }
 0x176   : > { %8460 = vmatprep.subr.bf16.mxu0 %v9005_v33  ;;  %8143 = vmatmul.mubr.bf16.gmra.mrb[4].mxu1 %v6923_v8  ;;  %v6958_v14 = vcombine.low %v2829_v63, %v2833_v12  ;;  %v9023_v8 = vld [vmem:[%s10843_s3 + $0x648] sm:$0xff]   ;;  %v5893_v12 = vrot.slane %v5891_v58, 4  ;;  %v5907_v5 = vrot.slane %v5905_v0, 4 }
 0x177   : > { %8151 = vmatpush3.bf16.msra.mxu1 %v9006_v37  ;;  %8162 = vmatprep.mubr.bf16.mxu1 %v6956_v38  ;;  %v5840_v37 = vrot.slane %v5838_v13, 5  ;;  %v5855_v18 = vor.u32 %v5854_v61, %v5851_v23  ;;  %v9032_v38 = vld [vmem:[%s9849_s29 + $0x30] ss:$8 sps:$4 sm:$0xff]   ;;  %v5865_v13 = vrot.slane %v5863_v36, 4  ;;  %v5868_v25 = vrot.slane %v5866_v21, 5  ;;  %v9031_v61 = vld [vmem:[%s10843_s3 + $0x668] sm:$0xff]  }
 0x178   : > { %8152 = vmatprep.subr.bf16.mxu1 %v9008_v20  ;;  %v10703_v63 = vld [vmem:[%s9849_s29 + $0x2c] sm:$0x1]  ;;  %v5896_v40 = vrot.slane %v5894_v4, 5  ;;  %v7482_v23 = vld [vmem:[%s9849_s29 + $0x48] sm:$0xf] }
 0x179   : > { %8461 = vmatpush3.bf16.msra.mxu0 %v9005_v33  ;;  %v5841_v33 = vor.u32 %v5840_v37, %v5837_v45  ;;  %v9033_v45 = vld [vmem:[%s10843_s3 + $0x330] sm:$0xff]   ;;  %v7480_v37 = vld [vmem:[%s9849_s29 + $0x40] sm:$0xf]  ;;  %v5886_v60 = vshll.u32 %v10703_v63, 16 }
 0x17a   : > { %8462 = vmatprep.subr.bf16.mxu0 %v9007_v52  ;;  %v9039_v36 = vld [vmem:[%s9227_s7 + $0x18] ss:$8 sps:$4 sm:$0xff]  }
 0x17b   : > { %8153 = vmatpush3.bf16.msra.mxu1 %v9008_v20  ;;  %v2837_v20 = vsel %vm9415_vm5, %v6938_v41, %v2836_v19  ;;  %v10709_v19 = vld [vmem:[%s9849_s29 + $0x3c] sm:$0x1]  ;;  %v5872_v41 = vshll.u32 %v10700_v30, 16 }
 0x17c   : > { %8455 = vmatmul.mubr.bf16.gmra.mrb[4].mxu0 %v7423_v56  ;;  %8154 = vmatprep.subr.bf16.mxu1 %v9010_v3  ;;  %v5842_v56 = vrot.slane %v5841_v33, 4  ;;  %v5933_v33 = vshrl.u32 %v7482_v23, 16 }
 0x17d   : > { %8463 = vmatpush3.bf16.msra.mxu0 %v9007_v52  ;;  %8474 = vmatprep.mubr.bf16.mxu0 %v9019_v1  ;;  %v5860_v52 = vrot.slane %v5858_v54, 5  ;;  %v9038_v1 = vld [vmem:[%s9227_s7 + $0x8] ss:$8 sps:$4 sm:$0xff]   ;;  %v5914_v54 = vshll.u32 %v10709_v19, 16 }
 0x17e   : > { %8464 = vmatprep.subr.bf16.mxu0 %v9009_v9  ;;  %v5847_v29 = vsel %vm9241_vm2, %v5842_v56, %v5846_v44 }
 0x17f   : > { %8155 = vmatpush3.bf16.msra.mxu1 %v9010_v3  ;;  %v5856_v3 = vrot.slane %v5855_v18, 4  ;;  %v5936_v18 = vshll.u32 %v7482_v23, 16 }
 0x180   : > { %8156 = vmatprep.subr.bf16.mxu1 %v9012_v47 }
 0x181   : > { %8465 = vmatpush3.bf16.msra.mxu0 %v9009_v9  ;;  %v6959_v9 = vcombine.low %v2837_v20, %v2841_v51  ;;  %v5874_v51 = vrot.slane %v5872_v41, 5 }
 0x182   : > { %8466 = vmatprep.subr.bf16.mxu0 %v9011_v57 }
 0x183   : > { %8157 = vmatpush3.bf16.msra.mxu1 %v9012_v47  ;;  %v9025_v47 = vld [vmem:[%s10843_s3 + $0x650] sm:$0xff]  }
 0x184   : > { %8158 = vmatprep.subr.bf16.mxu1 %v9014_v49 }
 0x185   : > { %8467 = vmatpush3.bf16.msra.mxu0 %v9011_v57  ;;  %v9026_v57 = vld [vmem:[%s10843_s3 + $0x318] sm:$0xff]  }
 0x186   : > { %8468 = vmatprep.subr.bf16.mxu0 %v9013_v24 }
 0x187   : > { %8159 = vmatpush3.bf16.msra.mxu1 %v9014_v49  ;;  %v7474_v49 = vld [vmem:[%s9849_s29 + $0x28] sm:$0xf] }
 0x188   : > { %8160 = vmatprep.subr.bf16.mxu1 %v9016_v6  ;;  %v5877_v22 = vshrl.u32 %v7474_v49, 16  ;;  %v5880_v46 = vshll.u32 %v7474_v49, 16  ;;  %v5938_v49 = vrot.slane %v5936_v18, 5  ;;  %v9047_v18 = vld [vmem:[%s10843_s3 + $0x6a8] sm:$0xff]  }
 0x189   : > { %8469 = vmatpush3.bf16.msra.mxu0 %v9013_v24  ;;  %v5861_v24 = vsel %vm9241_vm2, %v5856_v3, %v5860_v52  ;;  %v5888_v52 = vrot.slane %v5886_v60, 5 }
 0x18a   : > { %8470 = vmatprep.subr.bf16.mxu0 %v9015_v53  ;;  %v5879_v27 = vrot.slane %v5877_v22, 4 }
 0x18b   : > { %8161 = vmatpush3.bf16.msra.mxu1 %v9016_v6  ;;  %v7500_v6 = vcombine.low %v5847_v29, %v5861_v24  ;;  %v5935_v24 = vrot.slane %v5933_v33, 4 }
 0x18c   : > { %8170 = vmatprep.subr.bf16.mxu1 %v9018_v62 }
 0x18d   : > { %8471 = vmatpush3.bf16.msra.mxu0 %v9015_v53  ;;  %v5908_v53 = vshll.u32 %v7478_v2, 16  ;;  %v7516_v2 = vld [vmem:[%s9849_s29 + $0x30] sm:$0xe] }
 0x18e   : > { %8472 = vmatprep.subr.bf16.mxu0 %v9017_v11  ;;  %8163 = vmatmul.mubr.bf16.vlgmr.msra.gmra.mrb[0].mxu1 %v6957_v42  ;;  %v10706_v42 = vld [vmem:[%s9849_s29 + $0x34] sm:$0x1] }
 0x18f   : > { %8171 = vmatpush3.bf16.msra.mxu1 %v9018_v62  ;;  %8166 = vmatprep.mubr.bf16.mxu1 %v6958_v14  ;;  %v5882_v62 = vrot.slane %v5880_v46, 5  ;;  %v5869_v14 = vor.u32 %v5868_v25, %v5865_v13  ;;  %v9042_v46 = vld [vmem:[%s9227_s7 + $0x28] ss:$8 sps:$4 sm:$0xff]   ;;  %v6142_v13 = vrot.slane %v10706_v42, 5 }
 0x190   : > { %8172 = vmatprep.subr.bf16.mxu1 %v9022_v39 }
 0x191   : > { %8473 = vmatpush3.bf16.msra.mxu0 %v9017_v11  ;;  %v5910_v11 = vrot.slane %v5908_v53, 5  ;;  %v5883_v31 = vor.u32 %v5882_v62, %v5879_v27  ;;  %v5870_v20 = vrot.slane %v5869_v14, 4  ;;  %v5939_v53 = vor.u32 %v5938_v49, %v5935_v24  ;;  %v9043_v14 = vld [vmem:[%s9227_s7 + $0x38] ss:$8 sps:$4 sm:$0xff]  }
 0x192   : > { %8482 = vmatprep.subr.bf16.mxu0 %v9020_v32  ;;  %v6146_v27 = vrot.slane %v10709_v19, 5  ;;  %v6138_v49 = vrot.slane %v10703_v63, 5 }
 0x193   : > { %8173 = vmatpush3.bf16.msra.mxu1 %v9022_v39  ;;  %v5897_v39 = vor.u32 %v5896_v40, %v5893_v12  ;;  %v5911_v50 = vor.u32 %v5910_v11, %v5907_v5  ;;  %v5884_v44 = vrot.slane %v5883_v31, 4  ;;  %v7512_v11 = vld [vmem:[%s9849_s29 + $0x10] sm:$0xe]  ;;  %v5940_v23 = vrot.slane %v5939_v53, 4 }
 0x194   : > { %8475 = vmatmul.mubr.bf16.vlgmr.msra.gmra.mrb[0].mxu0 %v9021_v16  ;;  %8174 = vmatprep.subr.bf16.mxu1 %v9024_v43  ;;  %v5919_v16 = vshrl.u32 %v7480_v37, 16  ;;  %v7520_v41 = vrot.slane %v7512_v11, 9  ;;  %v6126_v31 = vrot.slane %v10645_v34, 5 }
 0x195   : > { %8483 = vmatpush3.bf16.msra.mxu0 %v9020_v32  ;;  %8478 = vmatprep.mubr.bf16.mxu0 %v9032_v38  ;;  %v5900_v32 = vshll.u32 %v10706_v42, 16  ;;  %v9035_v38 = vld [vmem:[%s10843_s3 + $0x670] sm:$0xff]   ;;  %v5912_v3 = vrot.slane %v5911_v50, 4 }
 0x196   : > { %8484 = vmatprep.subr.bf16.mxu0 %v9023_v8  ;;  %8167 = vmatmul.mubr.bf16.gmra.mrb[4].mxu1 %v6959_v9  ;;  %v5898_v9 = vrot.slane %v5897_v39, 4  ;;  %v5921_v55 = vrot.slane %v5919_v16, 4  ;;  %v6130_v39 = vrot.slane %v10648_v15, 5  ;;  %v9045_v16 = vld [vmem:[%s10843_s3 + $0x698] sm:$0xff]   ;;  %v6127_v34 = vsel %vm9415_vm5, %v7520_v41, %v6126_v31 }
 0x197   : > { %8175 = vmatpush3.bf16.msra.mxu1 %v9024_v43  ;;  %8186 = vmatprep.mubr.bf16.mxu1 %v9038_v1  ;;  %v5922_v43 = vshll.u32 %v7480_v37, 16  ;;  %v5902_v56 = vrot.slane %v5900_v32, 5  ;;  %v5916_v1 = vrot.slane %v5914_v54, 5 }
 0x198   : > { %8176 = vmatprep.subr.bf16.mxu1 %v9026_v57 }
 0x199   : > { %8485 = vmatpush3.bf16.msra.mxu0 %v9023_v8  ;;  %v9036_v8 = vld [vmem:[%s10843_s3 + $0x338] sm:$0xff]   ;;  %v5924_v29 = vrot.slane %v5922_v43, 5  ;;  %v5903_v58 = vsel %vm9241_vm2, %v5898_v9, %v5902_v56  ;;  %v5917_v4 = vsel %vm9241_vm2, %v5912_v3, %v5916_v1  ;;  %v7514_v3 = vld [vmem:[%s9849_s29 + $0x20] sm:$0xe]  ;;  %v7515_v1 = vld [vmem:[%s9849_s29 + $0x28] sm:$0xe] }
 0x19a   : > { %8486 = vmatprep.subr.bf16.mxu0 %v9025_v47  ;;  %v7502_v12 = vcombine.low %v5903_v58, %v5917_v4  ;;  %v9049_v56 = vld [vmem:[%s10843_s3 + $0x6b8] sm:$0xff]   ;;  %v7523_v24 = vrot.slane %v7515_v1, 9 }
 0x19b   : > { %8177 = vmatpush3.bf16.msra.mxu1 %v9026_v57  ;;  %v10730_v57 = vld [vmem:[%s9849_s29 + $0x44] sm:$0x1]  ;;  %v5925_v0 = vor.u32 %v5924_v29, %v5921_v55  ;;  %v6134_v29 = vrot.slane %v10700_v30, 5 }
 0x19c   : > { %8479 = vmatmul.mubr.bf16.gmra.mrb[4].mxu0 %v9034_v10  ;;  %8178 = vmatprep.subr.bf16.mxu1 %v9028_v28  ;;  %v9040_v10 = vld [vmem:[%s10843_s3 + $0x680] sm:$0xff]   ;;  %v5928_v21 = vshll.u32 %v10730_v57, 16 }
 0x19d   : > { %8487 = vmatpush3.bf16.msra.mxu0 %v9025_v47  ;;  %8498 = vmatprep.mubr.bf16.mxu0 %v7500_v6  ;;  %v10733_v47 = vld [vmem:[%s9849_s29 + $0x4c] sm:$0x1]  ;;  %v5889_v6 = vsel %vm9241_vm2, %v5884_v44, %v5888_v52  ;;  %v5926_v37 = vrot.slane %v5925_v0, 4 }
 0x19e   : > { %8488 = vmatprep.subr.bf16.mxu0 %v9027_v7  ;;  %v5942_v22 = vshll.u32 %v10733_v47, 16  ;;  %v5930_v40 = vrot.slane %v5928_v21, 5  ;;  %v6154_v44 = vrot.slane %v10733_v47, 5  ;;  %v7522_v47 = vrot.slane %v7514_v3, 9 }
 0x19f   : > { %8179 = vmatpush3.bf16.msra.mxu1 %v9028_v28  ;;  %v7517_v28 = vld [vmem:[%s9849_s29 + $0x38] sm:$0xe] }
 0x1a0   : > { %8180 = vmatprep.subr.bf16.mxu1 %v9030_v26  ;;  %v7525_v25 = vrot.slane %v7517_v28, 9  ;;  %v5944_v5 = vrot.slane %v5942_v22, 5  ;;  %v5931_v50 = vsel %vm9241_vm2, %v5926_v37, %v5930_v40 }
 0x1a1   : > { %8489 = vmatpush3.bf16.msra.mxu0 %v9027_v7  ;;  %v5875_v7 = vsel %vm9241_vm2, %v5870_v20, %v5874_v51  ;;  %v7519_v20 = vld [vmem:[%s9849_s29 + $0x48] sm:$0xe]  ;;  %v6150_v51 = vrot.slane %v10730_v57, 5 }
 0x1a2   : > { %8490 = vmatprep.subr.bf16.mxu0 %v9029_v59  ;;  %v7501_v62 = vcombine.low %v5875_v7, %v5889_v6  ;;  %v6147_v19 = vsel %vm9415_vm5, %v7525_v25, %v6146_v27  ;;  %v5945_v54 = vsel %vm9241_vm2, %v5940_v23, %v5944_v5  ;;  %v7527_v9 = vrot.slane %v7519_v20, 9 }
 0x1a3   : > { %8181 = vmatpush3.bf16.msra.mxu1 %v9030_v26  ;;  %v7524_v26 = vrot.slane %v7516_v2, 9  ;;  %v7503_v43 = vcombine.low %v5931_v50, %v5945_v54  ;;  %v6139_v2 = vsel %vm9415_vm5, %v7523_v24, %v6138_v49 }
 0x1a4   : > { %8182 = vmatprep.subr.bf16.mxu1 %v9033_v45  ;;  %v6155_v57 = vsel %vm9415_vm5, %v7527_v9, %v6154_v44 }
 0x1a5   : > { %8491 = vmatpush3.bf16.msra.mxu0 %v9029_v59  ;;  %v9041_v59 = vld [vmem:[%s10843_s3 + $0x688] sm:$0xff]   ;;  %v6143_v42 = vsel %vm9415_vm5, %v7524_v26, %v6142_v13 }
 0x1a6   : > { %8492 = vmatprep.subr.bf16.mxu0 %v9031_v61  ;;  %v7546_v32 = vcombine.low %v6143_v42, %v6147_v19 }
 0x1a7   : > { %8183 = vmatpush3.bf16.msra.mxu1 %v9033_v45  ;;  %v7513_v45 = vld [vmem:[%s9849_s29 + $0x18] sm:$0xe] }
 0x1a8   : > { %8184 = vmatprep.subr.bf16.mxu1 %v9036_v8  ;;  %v7521_v60 = vrot.slane %v7513_v45, 9 }
 0x1a9   : > { %8493 = vmatpush3.bf16.msra.mxu0 %v9031_v61  ;;  %v9044_v61 = vld [vmem:[%s10843_s3 + $0x690] sm:$0xff]  }
 0x1aa   : > { %8494 = vmatprep.subr.bf16.mxu0 %v9035_v38  ;;  %v6131_v15 = vsel %vm9415_vm5, %v7521_v60, %v6130_v39 }
 0x1ab   : > { %8185 = vmatpush3.bf16.msra.mxu1 %v9036_v8  ;;  %v7544_v33 = vcombine.low %v6127_v34, %v6131_v15  ;;  %v9048_v8 = vld [vmem:[%s10843_s3 + $0x6b0] sm:$0xff]  }
 0x1ac   : > { %8530 = vmatprep.subr.bf16.mxu1 %v9040_v10 }
 0x1ad   : > { %8495 = vmatpush3.bf16.msra.mxu0 %v9035_v38  ;;  %v7518_v38 = vld [vmem:[%s9849_s29 + $0x40] sm:$0xe]  ;;  %s6547_s29 = sshll.u32 %s10868_s18, 3 }
 0x1ae   : > { %8496 = vmatprep.subr.bf16.mxu0 %v9037_v17  ;;  %8187 = vmatmul.mubr.bf16.vlgmr.msra.gmra.mrb[0].mxu1 %v9039_v36  ;;  %v7526_v52 = vrot.slane %v7518_v38, 9  ;;  %s353_s8 = sadd.s32 %s6548_s6, %s6547_s29 }
 0x1af   : > { %8538 = vmatpush3.bf16.msra.mxu1 %v9040_v10  ;;  %8190 = vmatprep.mubr.bf16.mxu1 %v9042_v46  ;;  %s6549_s15 = sshll.u32 %s353_s8, 3 }
 0x1b0   : > { %8531 = vmatprep.subr.bf16.mxu1 %v9041_v59  ;;  %v6151_v55 = vsel %vm9415_vm5, %v7526_v52, %v6150_v51  ;;  %s355_s11 = scalar_lea.vmem %s10844_s4, %s6549_s15 }
 0x1b1   : > { %8497 = vmatpush3.bf16.msra.mxu0 %v9037_v17  ;;  %v6135_v17 = vsel %vm9415_vm5, %v7522_v47, %v6134_v29 }
 0x1b2   : > { %8506 = vmatprep.subr.bf16.mxu0 %v9040_v10  ;;  %v7545_v28 = vcombine.low %v6135_v17, %v6139_v2 }
 0x1b3   : > { %8539 = vmatpush3.bf16.msra.mxu1 %v9041_v59 }
 0x1b4   : > { %8499 = vmatmul.mubr.bf16.vlgmr.msra.gmra.mrb[0].mxu0 %v7501_v62  ;;  %8532 = vmatprep.subr.bf16.mxu1 %v9044_v61 }
 0x1b5   : > { %8507 = vmatpush3.bf16.msra.mxu0 %v9040_v10  ;;  %8502 = vmatprep.mubr.bf16.mxu0 %v7502_v12  ;;  %v7547_v10 = vcombine.low %v6151_v55, %v6155_v57 }
 0x1b6   : > { %8508 = vmatprep.subr.bf16.mxu0 %v9041_v59  ;;  %8191 = vmatmul.mubr.bf16.gmra.mrb[4].mxu1 %v9043_v14 }
 0x1b7   : > { %8540 = vmatpush3.bf16.msra.mxu1 %v9044_v61  ;;  %8526 = vmatprep.mubr.bf16.mxu1 %v7546_v32 }
 0x1b8   : > { %8533 = vmatprep.subr.bf16.mxu1 %v9045_v16 }
 0x1b9   : > { %8509 = vmatpush3.bf16.msra.mxu0 %v9041_v59 }
 0x1ba   : > { %8510 = vmatprep.subr.bf16.mxu0 %v9044_v61 }
 0x1bb   : > { %8541 = vmatpush3.bf16.msra.mxu1 %v9045_v16 }
 0x1bc   : > { %8503 = vmatmul.mubr.bf16.gmra.mrb[4].mxu0 %v7503_v43  ;;  %8534 = vmatprep.subr.bf16.mxu1 %v9046_v35 }
 0x1bd   : > { %8511 = vmatpush3.bf16.msra.mxu0 %v9044_v61  ;;  %8522 = vmatprep.mubr.bf16.mxu0 %v7544_v33 }
 0x1be   : > { %8512 = vmatprep.subr.bf16.mxu0 %v9045_v16 }
 0x1bf   : > { %8542 = vmatpush3.bf16.msra.mxu1 %v9046_v35 }
 0x1c0   : > { %8535 = vmatprep.subr.bf16.mxu1 %v9047_v18 }
 0x1c1   : > { %8513 = vmatpush3.bf16.msra.mxu0 %v9045_v16 }
 0x1c2   : > { %8514 = vmatprep.subr.bf16.mxu0 %v9046_v35 }
 0x1c3   : > { %8543 = vmatpush3.bf16.msra.mxu1 %v9047_v18 }
 0x1c4   : > { %8536 = vmatprep.subr.bf16.mxu1 %v9048_v8 }
 0x1c5   : > { %8515 = vmatpush3.bf16.msra.mxu0 %v9046_v35 }
 0x1c6   : > { %8516 = vmatprep.subr.bf16.mxu0 %v9047_v18 }
 0x1c7   : > { %8544 = vmatpush3.bf16.msra.mxu1 %v9048_v8 }
 0x1c8   : > { %8537 = vmatprep.subr.bf16.mxu1 %v9049_v56 }
 0x1c9   : > { %8517 = vmatpush3.bf16.msra.mxu0 %v9047_v18 }
 0x1ca   : > { %8518 = vmatprep.subr.bf16.mxu0 %v9048_v8 }
 0x1cb   : > { %8545 = vmatpush3.bf16.msra.mxu1 %v9049_v56 }
 0x1cd   : > { %8519 = vmatpush3.bf16.msra.mxu0 %v9048_v8 }
 0x1ce   : > { %8520 = vmatprep.subr.bf16.mxu0 %v9049_v56  ;;  %8527 = vmatmul.mubr.bf16.vlgmr.msra.gmra.mrb[8].mxu1 %v7547_v10 }
 0x1d1   : > { %8521 = vmatpush3.bf16.msra.mxu0 %v9049_v56 }
 0x1d4   : > { %8523 = vmatmul.mubr.bf16.vlgmr.msra.gmra.mrb[0].mxu0 %v7545_v28 }
 0x281   : > { %v8188_v30 = vpop.f32.mrb[0].mxu1 }
 0x282   : > { %v3128_v36 = vpop.f32.mrb[1].mxu1 }
 0x283   : > { %v8189_v63 = vpop.f32.mrb[2].mxu1 }
 0x284   : > { %v3131_v7 = vpop.f32.mrb[3].mxu1 }
 0x289   : > { %v8192_v6 = vpop.f32.mrb[4].mxu1 }
 0x28a   : > { %v3144_v21 = vpop.f32.mrb[5].mxu1 }
 0x28b   : > { %v8193_v22 = vpop.f32.mrb[6].mxu1 }
 0x28c   : > { %v3147_v46 = vpop.f32.mrb[7].mxu1 }
 0x28f   : > { %v8504_v58 = vpop.f32.mrb[4].mxu0 }
 0x290   : > { %v8550_v4 = vadd.f32 %v8504_v58, %v8192_v6  ;;  %v6077_v48 = vpop.f32.mrb[5].mxu0 }
 0x291   : > { %v8552_v0 = vadd.f32 %v6077_v48, %v3144_v21  ;;  %v8505_v53 = vpop.f32.mrb[6].mxu0 }
 0x292   : > { %v8554_v59 = vadd.f32 %v8505_v53, %v8193_v22  ;;  %v6080_v26 = vpop.f32.mrb[7].mxu0 }
 0x293   : > { %v8556_v13 = vadd.f32 %v6080_v26, %v3147_v46 }
 0x2a1   : > { %v8528_v25 = vpop.f32.mrb[8].mxu1 }
 0x2a2   : > { %v8551_v27 = vadd.f32 %v8550_v4, %v8528_v25  ;;  %v6287_v62 = vpop.f32.mrb[9].mxu1 }
 0x2a3   : > { %v8553_v12 = vadd.f32 %v8552_v0, %v6287_v62  ;;  %v8529_v40 = vpop.f32.mrb[10].mxu1 }
 0x2a4   : > { %6316 = vst [vmem:[%s355_s11 + $0x30] sm:$0xff] %v8551_v27  ;;  %v8555_v5 = vadd.f32 %v8554_v59, %v8529_v40  ;;  %v6290_v11 = vpop.f32.mrb[11].mxu1  ;;  %v6337_v51 = vmul.f32 %v8551_v27, %v8551_v27 }
 0x2a5   : > { %6314 = vst [vmem:[%s355_s11 + $0x20] sm:$0xff] %v8553_v12  ;;  %v8557_v45 = vadd.f32 %v8556_v13, %v6290_v11  ;;  %v6335_v35 = vmul.f32 %v8553_v12, %v8553_v12 }
 0x2a6   : > { %6317 = vst [vmem:[%s355_s11 + $0x38] sm:$0xff] %v8555_v5  ;;  %v6338_v9 = vmul.f32 %v8555_v5, %v8555_v5 }
 0x2a7   : > { %v8524_v37 = vpop.f32.mrb[0].mxu0  ;;  %6315 = vst [vmem:[%s355_s11 + $0x28] sm:$0xff] %v8557_v45  ;;  %v6336_v38 = vmul.f32 %v8557_v45, %v8557_v45 }
 0x2a8   : > { %v8546_v23 = vadd.f32 %v8524_v37, %v8188_v30  ;;  %v6271_v42 = vpop.f32.mrb[1].mxu0 }
 0x2a9   : > { %v8547_v19 = vadd.f32 %v6271_v42, %v3128_v36  ;;  %v8525_v61 = vpop.f32.mrb[2].mxu0 }
 0x2aa   : > { %6312 = vst [vmem:[%s355_s11 + $0x10] sm:$0xff] %v8546_v23  ;;  %v8548_v14 = vadd.f32 %v8525_v61, %v8189_v63  ;;  %v6274_v41 = vpop.f32.mrb[3].mxu0  ;;  %v6333_v50 = vmul.f32 %v8546_v23, %v8546_v23 }
 0x2ab   : > { %6310 = vst [vmem:[%s355_s11] sm:$0xff] %v8547_v19  ;;  %v8549_v31 = vadd.f32 %v6274_v41, %v3131_v7  ;;  %v6331_v60 = vmul.f32 %v8547_v19, %v8547_v19 }
 0x2ac   : > { %6313 = vst [vmem:[%s355_s11 + $0x18] sm:$0xff] %v8548_v14  ;;  %v6334_v34 = vmul.f32 %v8548_v14, %v8548_v14 }
 0x2ad   : > { %6311 = vst [vmem:[%s355_s11 + $0x8] sm:$0xff] %v8549_v31  ;;  %v6318_v39 = vadd.f32 %v8549_v31, %v8547_v19  ;;  %v6332_v32 = vmul.f32 %v8549_v31, %v8549_v31 }
 0x2af   : > { %v6319_v54 = vadd.f32 %v8546_v23, %v6318_v39  ;;  %v6339_v16 = vadd.f32 %v6332_v32, %v6331_v60 }
 0x2b1   : > { %v6340_v15 = vadd.f32 %v6339_v16, %v6333_v50  ;;  %v6320_v43 = vadd.f32 %v8548_v14, %v6319_v54 }
 0x2b3   : > { %v6321_v33 = vadd.f32 %v8553_v12, %v6320_v43  ;;  %v6341_v18 = vadd.f32 %v6340_v15, %v6334_v34 }
 0x2b5   : > { %v6322_v8 = vadd.f32 %v8557_v45, %v6321_v33  ;;  %v6342_v20 = vadd.f32 %v6341_v18, %v6335_v35 }
 0x2b7   : > { %v6323_v44 = vadd.f32 %v8551_v27, %v6322_v8  ;;  %v6343_v52 = vadd.f32 %v6342_v20, %v6336_v38 }
 0x2b9   : > { %v6324_v56 = vadd.f32 %v8555_v5, %v6323_v44  ;;  %v6344_v3 = vadd.f32 %v6343_v52, %v6337_v51 }
 0x2bb   : > { %v6325_v1 = vrot.slane %v6324_v56, 4  ;;  %v6345_v55 = vadd.f32 %v6344_v3, %v6338_v9 }
 0x2bd   : > { %v6326_v57 = vadd.f32 %v6325_v1, %v6324_v56  ;;  %v6346_v47 = vrot.slane %v6345_v55, 4 }
 0x2bf   : > { %v6327_v29 = vrot.slane %v6326_v57, 2  ;;  %v6347_v24 = vadd.f32 %v6346_v47, %v6345_v55 }
 0x2c1   : > { %v6328_v49 = vadd.f32 %v6327_v29, %v6326_v57  ;;  %v6348_v10 = vrot.slane %v6347_v24, 2 }
 0x2c3   : > { %v6329_v17 = vrot.slane %v6328_v49, 1  ;;  %v6349_v2 = vadd.f32 %v6348_v10, %v6347_v24 }
 0x2c5   : > { %v6350_v28 = vrot.slane %v6349_v2, 1  ;;  %v6330_v30 = vadd.f32 %v6329_v17, %v6328_v49 }
 0x2c7   : > { %v6351_v36 = vadd.f32 %v6350_v28, %v6349_v2 }
 0x2c9   : > { %v6353_v63 = vsel %vm6352_vm6, %v6330_v30, %v6351_v36 }
 0x2ca   : > { %6354 = vst [vmem:[%s363_s17] sm:$0x3] %v6353_v63 }
 0x2cb PF: > { %s16_s22 = sadd.s32 1, %s9088_s22   ;;  %s10851_s18 = smov %s9080_s20 }
 0x2cc   : > { %p13_p10 = scmp.ge.s32.totalorder %s16_s22, 18   ;;  %s10852_s19 = smov %s9084_s21 }
 0x2cd   : > { %s10853_s20 = smov %s10856_s23  ;;  %s10854_s21 = smov %s10860_s24 }
 0x2ce   :  { %15 = sbr.rel (!%p13_p10) target bundleno = 3 (0x3), region = 116 }

</bundles_post_ra>
